<compile_context>
chip_gen: v5e
topology: v5e:2x2
jax: 0.10.0
libtpu: 0.0.40
codegen_flags: <defaults>
</compile_context>

<pallas_src>
from functools import partial

import jax
import jax.numpy as jnp
from jax import lax
from jax.experimental import pallas as pl
from jax.experimental.pallas import tpu as pltpu


# ------------------------------------------------------------------ helpers -

def _conv_taps(kh, kw, stride):
    """Static tap list (dh, g, dw) shared by the weight packer and the kernel.

    stride 1: dh/dw are kernel offsets, g == 0 (no regrouping).
    stride 2: the padded input is viewed as (B, Hp/2, 2, Wp/2, 2*Cin); tap
      (dh, g, dw) covers kernel row 2*dh+g and kernel cols {2*dw, 2*dw+1}
      (those two columns travel together in the 2*Cin channel block).
    """
    if stride == 1:
        return [(r, 0, c) for r in range(kh) for c in range(kw)]
    assert stride == 2 and kh % 2 == 0 and kw % 2 == 0
    return [(ah, rh, aw) for ah in range(kh // 2) for rh in range(2)
            for aw in range(kw // 2)]


def _pick_toh(batch, oh, ow, target_rows=1024, sublane=16):
    """Largest divisor `toh` of `oh` with batch*toh*ow <= target_rows GEMM rows
    (toh*ow kept sublane-aligned when the output is actually row-tiled)."""
    best = oh
    for t in range(oh, 0, -1):
        if oh % t:
            continue
        if t != oh and (t * ow) % sublane:
            continue
        best = t
        if batch * t * ow <= target_rows:
            return t
    return best


def _vmem_limit():
    # TODO(synk): at real channel counts derive this from the actual tile sizes
    # and N-tile the weight block so it fits v7x's 64 MiB VMEM per TensorCore.
    try:
        cap = pltpu.get_tpu_info().vmem_capacity_bytes
    except Exception:
        cap = 128 * 1024 * 1024
    return min(32 * 1024 * 1024, cap // 2)


# ------------------------------------------------------------------ kernel --

def _conv_kernel(x_ref, w_ref, b_ref, o_ref, *, taps, toh, ow, negative_slope):
    """Implicit-GEMM conv for one output-row tile, whole batch per grid step.

    x_ref: (B, H2, G, W2, CG) bf16 -- full padded (stride-regrouped) input
    w_ref: (ntaps, CG, OC)    bf16 -- per-tap weight blocks (true channels)
    b_ref: (1, OC)            f32
    o_ref: (B, toh*OW, OC)         -- sublane-dense output slab
    """
    B = x_ref.shape[0]
    CG = x_ref.shape[-1]
    OC = o_ref.shape[-1]
    oh0 = pl.program_id(0) * toh
    m = B * toh * ow                                     # GEMM rows (batch folded)

    acc = None
    for i, (dh, g, dw) in enumerate(taps):               # static, unrolled
        slab = x_ref[:, pl.ds(oh0 + dh, toh), g, pl.ds(dw, ow), :]  # (B,toh,ow,CG)
        # The (B,toh,ow)->m collapse is a small relayout (m*CG bf16, a few KiB
        # at true channel counts); the dot accumulates in f32 on the MXU.
        part = jnp.dot(slab.reshape(m, CG), w_ref[i],
                       preferred_element_type=jnp.float32)
        acc = part if acc is None else acc + part
    acc = acc + b_ref[...]
    if negative_slope is not None:
        acc = jnp.maximum(acc, negative_slope * acc)      # LeakyReLU, 0<slope<1
    o_ref[...] = acc.reshape(B, toh * ow, OC).astype(o_ref.dtype)


# ------------------------------------------------------------------ wrapper -

def conv_block_pallas(x, w_taps, b, *, kh, kw, stride, pad,
                      negative_slope=None, out_dtype=jnp.bfloat16,
                      target_rows=1024):
    """NHWC conv (+bias, +optional LeakyReLU) as an implicit-GEMM Pallas kernel.

    x:      (B, H, W, Cin) activations.
    w_taps: (ntaps, CG, OC) bf16 tap-major packed weights (prepare_* below).
    b:      (1, OC) f32.
    Returns (B, OH, OW, OC) in out_dtype.
    """
    B, H, W, Cin = x.shape
    ntaps, CG, OC = w_taps.shape

    # Reflection padding stays wrapper-side glue (negligible at this size).
    # TODO(synk): fold the pad into the kernel for 128-256 px resolutions.
    if pad > 0:
        x = jnp.pad(x, ((0, 0), (pad, pad), (pad, pad), (0, 0)), mode="reflect")
    Hp, Wp = H + 2 * pad, W + 2 * pad
    OH = (Hp - kh) // stride + 1
    OW = (Wp - kw) // stride + 1
    taps = _conv_taps(kh, kw, stride)
    assert len(taps) == ntaps

    if stride == 1:
        G = 1
        assert CG == Cin
        xv = x.reshape(B, Hp, 1, Wp, Cin)                       # trivial view
    elif stride == 2:
        assert Hp % 2 == 0 and Wp % 2 == 0
        G = 2
        assert CG == 2 * Cin
        xv = x.reshape(B, Hp // 2, 2, Wp // 2, 2 * Cin)         # contiguous taps
    else:
        raise NotImplementedError("only stride 1 and 2 are needed here")
    xv = xv.astype(jnp.bfloat16)                                # MXU-native lhs
    H2, W2 = xv.shape[1], xv.shape[3]

    sublane = 8 if jnp.dtype(out_dtype).itemsize >= 4 else 16
    toh = _pick_toh(B, OH, OW, target_rows, sublane)
    grid = (OH // toh,)

    kern = partial(_conv_kernel, taps=tuple(taps), toh=toh, ow=OW,
                   negative_slope=negative_slope)
    out_bytes = B * OH * OW * OC * jnp.dtype(out_dtype).itemsize
    cost = pl.CostEstimate(
        flops=2 * B * OH * OW * ntaps * CG * OC,
        transcendentals=0,
        bytes_accessed=int(xv.size) * 2 + int(w_taps.size) * 2
                       + int(b.size) * 4 + out_bytes)

    out = pl.pallas_call(
        kern,
        out_shape=jax.ShapeDtypeStruct((B, OH * OW, OC), out_dtype),
        grid=grid,
        in_specs=[
            # Constant index maps: padded image / weights / bias are DMA'd once
            # and stay resident in VMEM across row tiles.
            pl.BlockSpec((B, H2, G, W2, CG), lambda t: (0, 0, 0, 0, 0)),
            pl.BlockSpec((ntaps, CG, OC), lambda t: (0, 0, 0)),
            pl.BlockSpec((1, OC), lambda t: (0, 0)),
        ],
        out_specs=pl.BlockSpec((B, toh * OW, OC), lambda t: (0, t, 0)),
        compiler_params=pltpu.CompilerParams(
            dimension_semantics=("parallel",),
            vmem_limit_bytes=_vmem_limit()),
        cost_estimate=cost,
    )(xv, w_taps, b)
    return out.reshape(B, OH, OW, OC)                          # free reshape


# ----------------------------------------------------- parameter preparation -

def _pack_conv_weights(w, stride):
    """(OC, IC, KH, KW) torch-layout weights -> (ntaps, CG, OC) bf16 tap blocks
    in the exact order _conv_taps / _conv_kernel consume them."""
    OC, IC, KH, KW = w.shape
    w_t = jnp.transpose(w, (2, 3, 1, 0))                        # (KH, KW, IC, OC)
    blocks = []
    for (dh, g, dw) in _conv_taps(KH, KW, stride):
        if stride == 1:
            blocks.append(w_t[dh, dw])                                      # (IC, OC)
        else:
            r = 2 * dh + g
            blocks.append(jnp.concatenate([w_t[r, 2 * dw],
                                           w_t[r, 2 * dw + 1]], axis=0))    # (2IC, OC)
    return jnp.stack(blocks, axis=0).astype(jnp.bfloat16)


def prepare_discriminator_params(params):
    """One-time repacking of torch-layout params for the Pallas kernels
    (hoisted out of the jitted forward per the perf review)."""
    packed = {"main": []}
    for layer in params["main"]:
        packed["main"].append({
            "w_taps": _pack_conv_weights(layer["w"], stride=2),
            "b": layer["b"].reshape(1, -1).astype(jnp.float32),
        })
    packed["conv1"] = {
        "w_taps": _pack_conv_weights(params["conv1"]["w"], stride=1),
        "b": params["conv1"]["b"].reshape(1, -1).astype(jnp.float32),
    }
    packed["conv2"] = {
        "w": params["conv2"]["w"].astype(jnp.float32),
        "b": params["conv2"]["b"].astype(jnp.float32),
    }
    return packed


def init_discriminator_params(key, image_size, conv_dim, c_dim, repeat_num):
    params = {"main": []}
    in_c, out_c = 3, conv_dim
    for _ in range(repeat_num):
        key, kw_, kb_ = jax.random.split(key, 3)
        params["main"].append({
            "w": 0.05 * jax.random.normal(kw_, (out_c, in_c, 4, 4), jnp.float32),
            "b": 0.05 * jax.random.normal(kb_, (out_c,), jnp.float32),
        })
        in_c, out_c = out_c, out_c * 2
    curr_dim = in_c
    ksz = image_size // (2 ** repeat_num)
    key, k1w, k1b, k2w, k2b = jax.random.split(key, 5)
    params["conv1"] = {
        "w": 0.05 * jax.random.normal(k1w, (1, curr_dim, 3, 3), jnp.float32),
        "b": 0.05 * jax.random.normal(k1b, (1,), jnp.float32),
    }
    params["conv2"] = {
        "w": 0.05 * jax.random.normal(k2w, (c_dim, curr_dim, ksz, ksz), jnp.float32),
        "b": 0.05 * jax.random.normal(k2b, (c_dim,), jnp.float32),
    }
    return params


# ---------------------------------------------------------- forward passes --

def discriminator_forward(packed, x):
    # NCHW -> NHWC exactly once; activations stay NHWC bf16 end-to-end
    # (bf16 MXU operands; f32 accumulation / bias / activation inside kernels).
    h = jnp.transpose(x, (0, 2, 3, 1)).astype(jnp.bfloat16)
    for layer in packed["main"]:
        h = conv_block_pallas(h, layer["w_taps"], layer["b"], kh=4, kw=4,
                              stride=2, pad=1, negative_slope=0.01,
                              out_dtype=jnp.bfloat16)

    # conv1: 3x3 / s1 / mirror pad / no activation -> PatchGAN src map.
    src = conv_block_pallas(h, packed["conv1"]["w_taps"], packed["conv1"]["b"],
                            kh=3, kw=3, stride=1, pad=1, negative_slope=None,
                            out_dtype=jnp.float32)
    out_src = jnp.transpose(src, (0, 3, 1, 2))                  # (B, 1, OH, OW)

    # conv2: kernel == full spatial extent -> a (B, k*k*C) x (k*k*C, c_dim)
    # GEMM; far too small for a custom call, keep it as plain jnp.
    w2, b2 = packed["conv2"]["w"], packed["conv2"]["b"]
    out_cls = jnp.einsum("bhwc,ochw->bo", h.astype(jnp.float32), w2) + b2[None, :]
    return out_src, out_cls


# ------------------------------------------------------------ reference -----

def _conv_ref(x, w, b, stride, pad, pad_mode):
    if pad > 0:
        x = jnp.pad(x, ((0, 0), (0, 0), (pad, pad), (pad, pad)), mode=pad_mode)
    y = lax.conv_general_dilated(x, w, (stride, stride), "VALID",
                                 dimension_numbers=("NCHW", "OIHW", "NCHW"))
    return y + b.reshape(1, -1, 1, 1)


def discriminator_forward_ref(params, x):
    h = x
    for layer in params["main"]:
        h = _conv_ref(h, layer["w"], layer["b"], 2, 1, "reflect")
        h = jnp.where(h >= 0.0, h, 0.01 * h)
    out_src = _conv_ref(h, params["conv1"]["w"], params["conv1"]["b"], 1, 1, "reflect")
    out_cls = _conv_ref(h, params["conv2"]["w"], params["conv2"]["b"], 1, 0, None)
    return out_src, out_cls.reshape(out_cls.shape[0], out_cls.shape[1])


# ------------------------------------------------------------------- main ---

if __name__ == "__main__":
    # Small config consistent with the module: image_size=32, repeat_num=3.
    image_size, conv_dim, c_dim, repeat_num = 32, 8, 5, 3
    batch = 2

    key = jax.random.PRNGKey(0)
    key, kx = jax.random.split(key)
    x = jax.random.normal(kx, (batch, 3, image_size, image_size), jnp.float32)
    params = init_discriminator_params(key, image_size, conv_dim, c_dim, repeat_num)

    packed = prepare_discriminator_params(params)        # one-time, outside jit
    fwd = jax.jit(discriminator_forward)
    out_src, out_cls = fwd(packed, x)
    jax.block_until_ready((out_src, out_cls))

    # Correctness vs. a plain-JAX f32 reference (kernel uses the bf16 MXU
    # path and bf16 inter-layer activations -> bf16-level tolerances).
    ref_src, ref_cls = jax.jit(discriminator_forward_ref)(params, x)
    s = image_size // 2 ** repeat_num
    assert out_src.shape == (batch, 1, s, s), out_src.shape
    assert out_cls.shape == (batch, c_dim), out_cls.shape
    err_src = float(jnp.max(jnp.abs(out_src - ref_src)))
    err_cls = float(jnp.max(jnp.abs(out_cls - ref_cls)))
    assert jnp.allclose(out_src, ref_src, rtol=4e-2, atol=5e-3), err_src
    assert jnp.allclose(out_cls, ref_cls, rtol=4e-2, atol=5e-3), err_cls

    print("KERNEL_OK")
</pallas_src>

<mosaic_0001>
module attributes {stable_mosaic.version = 11 : i64} {
  func.func @_conv_kernel(%arg0: i32, %arg1: memref<2x17x2x17x6xbf16, #tpu.memory_space<vmem>>, %arg2: memref<8x6x8xbf16, #tpu.memory_space<vmem>>, %arg3: memref<1x8xf32, #tpu.memory_space<vmem>>, %arg4: memref<2x256x8xbf16, #tpu.memory_space<vmem>>) attributes {dimension_semantics = [#tpu.dimension_semantics<parallel>], iteration_bounds = array<i64: 1>, scalar_prefetch = 0 : i64, scratch_operands = 0 : i64, tpu.core_type = #tpu.core_type<tc>, window_params = [{pipeline_mode = #tpu.pipeline_mode<synchronous>, transform_indices = @transform_0, window_bounds = array<i64: 2, 17, 2, 17, 6>}, {pipeline_mode = #tpu.pipeline_mode<synchronous>, transform_indices = @transform_1, window_bounds = array<i64: 8, 6, 8>}, {pipeline_mode = #tpu.pipeline_mode<synchronous>, transform_indices = @transform_2, window_bounds = array<i64: 1, 8>}, {transform_indices = @transform_3, window_bounds = array<i64: 2, 256, 8>}]} {
    %c16_i32 = arith.constant 16 : i32
    %0 = arith.muli %arg0, %c16_i32 : i32
    %c0_i32 = arith.constant 0 : i32
    %1 = arith.addi %0, %c0_i32 : i32
    %c0 = arith.constant 0 : index
    %2 = arith.index_cast %1 : i32 to index
    %c0_0 = arith.constant 0 : index
    %c0_1 = arith.constant 0 : index
    %c0_2 = arith.constant 0 : index
    %3 = vector.load %arg1[%c0, %2, %c0_0, %c0_1, %c0_2] : memref<2x17x2x17x6xbf16, #tpu.memory_space<vmem>>, vector<2x16x1x16x6xbf16>
    %4 = vector.shape_cast %3 : vector<2x16x1x16x6xbf16> to vector<2x16x16x6xbf16>
    %5 = vector.shape_cast %4 : vector<2x16x16x6xbf16> to vector<512x6xbf16>
    %c0_3 = arith.constant 0 : index
    %c0_4 = arith.constant 0 : index
    %c0_5 = arith.constant 0 : index
    %6 = vector.load %arg2[%c0_3, %c0_4, %c0_5] : memref<8x6x8xbf16, #tpu.memory_space<vmem>>, vector<1x6x8xbf16>
    %7 = vector.shape_cast %6 : vector<1x6x8xbf16> to vector<6x8xbf16>
    %cst = arith.constant dense<0.000000e+00> : vector<512x8xf32>
    %8 = tpu.matmul %5, %7, %cst {dimension_numbers = #tpu.dot_dimension_numbers<[1], [0], [0], [1], [0, 0, 1, 1], [], []>} : vector<512x6xbf16>, vector<6x8xbf16>, vector<512x8xf32> -> vector<512x8xf32>
    %c0_i32_6 = arith.constant 0 : i32
    %9 = arith.addi %0, %c0_i32_6 : i32
    %c0_7 = arith.constant 0 : index
    %10 = arith.index_cast %9 : i32 to index
    %c0_8 = arith.constant 0 : index
    %c1 = arith.constant 1 : index
    %c0_9 = arith.constant 0 : index
    %11 = vector.load %arg1[%c0_7, %10, %c0_8, %c1, %c0_9] : memref<2x17x2x17x6xbf16, #tpu.memory_space<vmem>>, vector<2x16x1x16x6xbf16>
    %12 = vector.shape_cast %11 : vector<2x16x1x16x6xbf16> to vector<2x16x16x6xbf16>
    %13 = vector.shape_cast %12 : vector<2x16x16x6xbf16> to vector<512x6xbf16>
    %c1_10 = arith.constant 1 : index
    %c0_11 = arith.constant 0 : index
    %c0_12 = arith.constant 0 : index
    %14 = vector.load %arg2[%c1_10, %c0_11, %c0_12] : memref<8x6x8xbf16, #tpu.memory_space<vmem>>, vector<1x6x8xbf16>
    %15 = vector.shape_cast %14 : vector<1x6x8xbf16> to vector<6x8xbf16>
    %cst_13 = arith.constant dense<0.000000e+00> : vector<512x8xf32>
    %16 = tpu.matmul %13, %15, %cst_13 {dimension_numbers = #tpu.dot_dimension_numbers<[1], [0], [0], [1], [0, 0, 1, 1], [], []>} : vector<512x6xbf16>, vector<6x8xbf16>, vector<512x8xf32> -> vector<512x8xf32>
    %17 = arith.addf %8, %16 : vector<512x8xf32>
    %c0_i32_14 = arith.constant 0 : i32
    %18 = arith.addi %0, %c0_i32_14 : i32
    %c0_15 = arith.constant 0 : index
    %19 = arith.index_cast %18 : i32 to index
    %c1_16 = arith.constant 1 : index
    %c0_17 = arith.constant 0 : index
    %c0_18 = arith.constant 0 : index
    %20 = vector.load %arg1[%c0_15, %19, %c1_16, %c0_17, %c0_18] : memref<2x17x2x17x6xbf16, #tpu.memory_space<vmem>>, vector<2x16x1x16x6xbf16>
    %21 = vector.shape_cast %20 : vector<2x16x1x16x6xbf16> to vector<2x16x16x6xbf16>
    %22 = vector.shape_cast %21 : vector<2x16x16x6xbf16> to vector<512x6xbf16>
    %c2 = arith.constant 2 : index
    %c0_19 = arith.constant 0 : index
    %c0_20 = arith.constant 0 : index
    %23 = vector.load %arg2[%c2, %c0_19, %c0_20] : memref<8x6x8xbf16, #tpu.memory_space<vmem>>, vector<1x6x8xbf16>
    %24 = vector.shape_cast %23 : vector<1x6x8xbf16> to vector<6x8xbf16>
    %cst_21 = arith.constant dense<0.000000e+00> : vector<512x8xf32>
    %25 = tpu.matmul %22, %24, %cst_21 {dimension_numbers = #tpu.dot_dimension_numbers<[1], [0], [0], [1], [0, 0, 1, 1], [], []>} : vector<512x6xbf16>, vector<6x8xbf16>, vector<512x8xf32> -> vector<512x8xf32>
    %26 = arith.addf %17, %25 : vector<512x8xf32>
    %c0_i32_22 = arith.constant 0 : i32
    %27 = arith.addi %0, %c0_i32_22 : i32
    %c0_23 = arith.constant 0 : index
    %28 = arith.index_cast %27 : i32 to index
    %c1_24 = arith.constant 1 : index
    %c1_25 = arith.constant 1 : index
    %c0_26 = arith.constant 0 : index
    %29 = vector.load %arg1[%c0_23, %28, %c1_24, %c1_25, %c0_26] : memref<2x17x2x17x6xbf16, #tpu.memory_space<vmem>>, vector<2x16x1x16x6xbf16>
    %30 = vector.shape_cast %29 : vector<2x16x1x16x6xbf16> to vector<2x16x16x6xbf16>
    %31 = vector.shape_cast %30 : vector<2x16x16x6xbf16> to vector<512x6xbf16>
    %c3 = arith.constant 3 : index
    %c0_27 = arith.constant 0 : index
    %c0_28 = arith.constant 0 : index
    %32 = vector.load %arg2[%c3, %c0_27, %c0_28] : memref<8x6x8xbf16, #tpu.memory_space<vmem>>, vector<1x6x8xbf16>
    %33 = vector.shape_cast %32 : vector<1x6x8xbf16> to vector<6x8xbf16>
    %cst_29 = arith.constant dense<0.000000e+00> : vector<512x8xf32>
    %34 = tpu.matmul %31, %33, %cst_29 {dimension_numbers = #tpu.dot_dimension_numbers<[1], [0], [0], [1], [0, 0, 1, 1], [], []>} : vector<512x6xbf16>, vector<6x8xbf16>, vector<512x8xf32> -> vector<512x8xf32>
    %35 = arith.addf %26, %34 : vector<512x8xf32>
    %c1_i32 = arith.constant 1 : i32
    %36 = arith.addi %0, %c1_i32 : i32
    %c0_30 = arith.constant 0 : index
    %37 = arith.index_cast %36 : i32 to index
    %c0_31 = arith.constant 0 : index
    %c0_32 = arith.constant 0 : index
    %c0_33 = arith.constant 0 : index
    %38 = vector.load %arg1[%c0_30, %37, %c0_31, %c0_32, %c0_33] : memref<2x17x2x17x6xbf16, #tpu.memory_space<vmem>>, vector<2x16x1x16x6xbf16>
    %39 = vector.shape_cast %38 : vector<2x16x1x16x6xbf16> to vector<2x16x16x6xbf16>
    %40 = vector.shape_cast %39 : vector<2x16x16x6xbf16> to vector<512x6xbf16>
    %c4 = arith.constant 4 : index
    %c0_34 = arith.constant 0 : index
    %c0_35 = arith.constant 0 : index
    %41 = vector.load %arg2[%c4, %c0_34, %c0_35] : memref<8x6x8xbf16, #tpu.memory_space<vmem>>, vector<1x6x8xbf16>
    %42 = vector.shape_cast %41 : vector<1x6x8xbf16> to vector<6x8xbf16>
    %cst_36 = arith.constant dense<0.000000e+00> : vector<512x8xf32>
    %43 = tpu.matmul %40, %42, %cst_36 {dimension_numbers = #tpu.dot_dimension_numbers<[1], [0], [0], [1], [0, 0, 1, 1], [], []>} : vector<512x6xbf16>, vector<6x8xbf16>, vector<512x8xf32> -> vector<512x8xf32>
    %44 = arith.addf %35, %43 : vector<512x8xf32>
    %c1_i32_37 = arith.constant 1 : i32
    %45 = arith.addi %0, %c1_i32_37 : i32
    %c0_38 = arith.constant 0 : index
    %46 = arith.index_cast %45 : i32 to index
    %c0_39 = arith.constant 0 : index
    %c1_40 = arith.constant 1 : index
    %c0_41 = arith.constant 0 : index
    %47 = vector.load %arg1[%c0_38, %46, %c0_39, %c1_40, %c0_41] : memref<2x17x2x17x6xbf16, #tpu.memory_space<vmem>>, vector<2x16x1x16x6xbf16>
    %48 = vector.shape_cast %47 : vector<2x16x1x16x6xbf16> to vector<2x16x16x6xbf16>
    %49 = vector.shape_cast %48 : vector<2x16x16x6xbf16> to vector<512x6xbf16>
    %c5 = arith.constant 5 : index
    %c0_42 = arith.constant 0 : index
    %c0_43 = arith.constant 0 : index
    %50 = vector.load %arg2[%c5, %c0_42, %c0_43] : memref<8x6x8xbf16, #tpu.memory_space<vmem>>, vector<1x6x8xbf16>
    %51 = vector.shape_cast %50 : vector<1x6x8xbf16> to vector<6x8xbf16>
    %cst_44 = arith.constant dense<0.000000e+00> : vector<512x8xf32>
    %52 = tpu.matmul %49, %51, %cst_44 {dimension_numbers = #tpu.dot_dimension_numbers<[1], [0], [0], [1], [0, 0, 1, 1], [], []>} : vector<512x6xbf16>, vector<6x8xbf16>, vector<512x8xf32> -> vector<512x8xf32>
    %53 = arith.addf %44, %52 : vector<512x8xf32>
    %c1_i32_45 = arith.constant 1 : i32
    %54 = arith.addi %0, %c1_i32_45 : i32
    %c0_46 = arith.constant 0 : index
    %55 = arith.index_cast %54 : i32 to index
    %c1_47 = arith.constant 1 : index
    %c0_48 = arith.constant 0 : index
    %c0_49 = arith.constant 0 : index
    %56 = vector.load %arg1[%c0_46, %55, %c1_47, %c0_48, %c0_49] : memref<2x17x2x17x6xbf16, #tpu.memory_space<vmem>>, vector<2x16x1x16x6xbf16>
    %57 = vector.shape_cast %56 : vector<2x16x1x16x6xbf16> to vector<2x16x16x6xbf16>
    %58 = vector.shape_cast %57 : vector<2x16x16x6xbf16> to vector<512x6xbf16>
    %c6 = arith.constant 6 : index
    %c0_50 = arith.constant 0 : index
    %c0_51 = arith.constant 0 : index
    %59 = vector.load %arg2[%c6, %c0_50, %c0_51] : memref<8x6x8xbf16, #tpu.memory_space<vmem>>, vector<1x6x8xbf16>
    %60 = vector.shape_cast %59 : vector<1x6x8xbf16> to vector<6x8xbf16>
    %cst_52 = arith.constant dense<0.000000e+00> : vector<512x8xf32>
    %61 = tpu.matmul %58, %60, %cst_52 {dimension_numbers = #tpu.dot_dimension_numbers<[1], [0], [0], [1], [0, 0, 1, 1], [], []>} : vector<512x6xbf16>, vector<6x8xbf16>, vector<512x8xf32> -> vector<512x8xf32>
    %62 = arith.addf %53, %61 : vector<512x8xf32>
    %c1_i32_53 = arith.constant 1 : i32
    %63 = arith.addi %0, %c1_i32_53 : i32
    %c0_54 = arith.constant 0 : index
    %64 = arith.index_cast %63 : i32 to index
    %c1_55 = arith.constant 1 : index
    %c1_56 = arith.constant 1 : index
    %c0_57 = arith.constant 0 : index
    %65 = vector.load %arg1[%c0_54, %64, %c1_55, %c1_56, %c0_57] : memref<2x17x2x17x6xbf16, #tpu.memory_space<vmem>>, vector<2x16x1x16x6xbf16>
    %66 = vector.shape_cast %65 : vector<2x16x1x16x6xbf16> to vector<2x16x16x6xbf16>
    %67 = vector.shape_cast %66 : vector<2x16x16x6xbf16> to vector<512x6xbf16>
    %c7 = arith.constant 7 : index
    %c0_58 = arith.constant 0 : index
    %c0_59 = arith.constant 0 : index
    %68 = vector.load %arg2[%c7, %c0_58, %c0_59] : memref<8x6x8xbf16, #tpu.memory_space<vmem>>, vector<1x6x8xbf16>
    %69 = vector.shape_cast %68 : vector<1x6x8xbf16> to vector<6x8xbf16>
    %cst_60 = arith.constant dense<0.000000e+00> : vector<512x8xf32>
    %70 = tpu.matmul %67, %69, %cst_60 {dimension_numbers = #tpu.dot_dimension_numbers<[1], [0], [0], [1], [0, 0, 1, 1], [], []>} : vector<512x6xbf16>, vector<6x8xbf16>, vector<512x8xf32> -> vector<512x8xf32>
    %71 = arith.addf %62, %70 : vector<512x8xf32>
    %c0_61 = arith.constant 0 : index
    %c0_62 = arith.constant 0 : index
    %72 = vector.load %arg3[%c0_61, %c0_62] : memref<1x8xf32, #tpu.memory_space<vmem>>, vector<1x8xf32>
    %73 = vector.broadcast %72 : vector<1x8xf32> to vector<512x8xf32>
    %74 = arith.addf %71, %73 : vector<512x8xf32>
    %cst_63 = arith.constant 0.00999999977 : f32
    %75 = vector.broadcast %cst_63 : f32 to vector<512x8xf32>
    %76 = arith.mulf %75, %74 : vector<512x8xf32>
    %77 = arith.maximumf %74, %76 : vector<512x8xf32>
    %78 = vector.shape_cast %77 : vector<512x8xf32> to vector<2x256x8xf32>
    %79 = arith.truncf %78 : vector<2x256x8xf32> to vector<2x256x8xbf16>
    %c0_64 = arith.constant 0 : index
    %c0_65 = arith.constant 0 : index
    %c0_66 = arith.constant 0 : index
    %80 = vector.load %arg4[%c0_64, %c0_65, %c0_66] : memref<2x256x8xbf16, #tpu.memory_space<vmem>>, vector<2x256x8xbf16>
    tpu.vector_store %arg4[%c0_64, %c0_65, %c0_66], %79 {strides = array<i32>} : memref<2x256x8xbf16, #tpu.memory_space<vmem>>, vector<2x256x8xbf16>,
    return
  }
  func.func @transform_0(%arg0: i32) -> (i32, i32, i32, i32, i32) {
    %c0_i32 = arith.constant 0 : i32
    %c0_i32_0 = arith.constant 0 : i32
    %c0_i32_1 = arith.constant 0 : i32
    %c0_i32_2 = arith.constant 0 : i32
    %c0_i32_3 = arith.constant 0 : i32
    %c0_i32_4 = arith.constant 0 : i32
    return %c0_i32, %c0_i32_0, %c0_i32_1, %c0_i32_2, %c0_i32_3 : i32, i32, i32, i32, i32
  }
  func.func @transform_1(%arg0: i32) -> (i32, i32, i32) {
    %c0_i32 = arith.constant 0 : i32
    %c0_i32_0 = arith.constant 0 : i32
    %c0_i32_1 = arith.constant 0 : i32
    %c0_i32_2 = arith.constant 0 : i32
    return %c0_i32, %c0_i32_0, %c0_i32_1 : i32, i32, i32
  }
  func.func @transform_2(%arg0: i32) -> (i32, i32) {
    %c0_i32 = arith.constant 0 : i32
    %c0_i32_0 = arith.constant 0 : i32
    %c0_i32_1 = arith.constant 0 : i32
    return %c0_i32, %c0_i32_0 : i32, i32
  }
  func.func @transform_3(%arg0: i32) -> (i32, i32, i32) {
    %c0_i32 = arith.constant 0 : i32
    %c0_i32_0 = arith.constant 0 : i32
    %c0_i32_1 = arith.constant 0 : i32
    return %c0_i32, %arg0, %c0_i32_0 : i32, i32, i32
  }
}

module attributes {stable_mosaic.version = 11 : i64} {
  func.func @_conv_kernel(%arg0: i32, %arg1: memref<2x9x2x9x16xbf16, #tpu.memory_space<vmem>>, %arg2: memref<8x16x16xbf16, #tpu.memory_space<vmem>>, %arg3: memref<1x16xf32, #tpu.memory_space<vmem>>, %arg4: memref<2x64x16xbf16, #tpu.memory_space<vmem>>) attributes {dimension_semantics = [#tpu.dimension_semantics<parallel>], iteration_bounds = array<i64: 1>, scalar_prefetch = 0 : i64, scratch_operands = 0 : i64, tpu.core_type = #tpu.core_type<tc>, window_params = [{pipeline_mode = #tpu.pipeline_mode<synchronous>, transform_indices = @transform_0, window_bounds = array<i64: 2, 9, 2, 9, 16>}, {pipeline_mode = #tpu.pipeline_mode<synchronous>, transform_indices = @transform_1, window_bounds = array<i64: 8, 16, 16>}, {pipeline_mode = #tpu.pipeline_mode<synchronous>, transform_indices = @transform_2, window_bounds = array<i64: 1, 16>}, {transform_indices = @transform_3, window_bounds = array<i64: 2, 64, 16>}]} {
    %c8_i32 = arith.constant 8 : i32
    %0 = arith.muli %arg0, %c8_i32 : i32
    %c0_i32 = arith.constant 0 : i32
    %1 = arith.addi %0, %c0_i32 : i32
    %c0 = arith.constant 0 : index
    %2 = arith.index_cast %1 : i32 to index
    %c0_0 = arith.constant 0 : index
    %c0_1 = arith.constant 0 : index
    %c0_2 = arith.constant 0 : index
    %3 = vector.load %arg1[%c0, %2, %c0_0, %c0_1, %c0_2] : memref<2x9x2x9x16xbf16, #tpu.memory_space<vmem>>, vector<2x8x1x8x16xbf16>
    %4 = vector.shape_cast %3 : vector<2x8x1x8x16xbf16> to vector<2x8x8x16xbf16>
    %5 = vector.shape_cast %4 : vector<2x8x8x16xbf16> to vector<128x16xbf16>
    %c0_3 = arith.constant 0 : index
    %c0_4 = arith.constant 0 : index
    %c0_5 = arith.constant 0 : index
    %6 = vector.load %arg2[%c0_3, %c0_4, %c0_5] : memref<8x16x16xbf16, #tpu.memory_space<vmem>>, vector<1x16x16xbf16>
    %7 = vector.shape_cast %6 : vector<1x16x16xbf16> to vector<16x16xbf16>
    %cst = arith.constant dense<0.000000e+00> : vector<128x16xf32>
    %8 = tpu.matmul %5, %7, %cst {dimension_numbers = #tpu.dot_dimension_numbers<[1], [0], [0], [1], [0, 0, 1, 1], [], []>} : vector<128x16xbf16>, vector<16x16xbf16>, vector<128x16xf32> -> vector<128x16xf32>
    %c0_i32_6 = arith.constant 0 : i32
    %9 = arith.addi %0, %c0_i32_6 : i32
    %c0_7 = arith.constant 0 : index
    %10 = arith.index_cast %9 : i32 to index
    %c0_8 = arith.constant 0 : index
    %c1 = arith.constant 1 : index
    %c0_9 = arith.constant 0 : index
    %11 = vector.load %arg1[%c0_7, %10, %c0_8, %c1, %c0_9] : memref<2x9x2x9x16xbf16, #tpu.memory_space<vmem>>, vector<2x8x1x8x16xbf16>
    %12 = vector.shape_cast %11 : vector<2x8x1x8x16xbf16> to vector<2x8x8x16xbf16>
    %13 = vector.shape_cast %12 : vector<2x8x8x16xbf16> to vector<128x16xbf16>
    %c1_10 = arith.constant 1 : index
    %c0_11 = arith.constant 0 : index
    %c0_12 = arith.constant 0 : index
    %14 = vector.load %arg2[%c1_10, %c0_11, %c0_12] : memref<8x16x16xbf16, #tpu.memory_space<vmem>>, vector<1x16x16xbf16>
    %15 = vector.shape_cast %14 : vector<1x16x16xbf16> to vector<16x16xbf16>
    %cst_13 = arith.constant dense<0.000000e+00> : vector<128x16xf32>
    %16 = tpu.matmul %13, %15, %cst_13 {dimension_numbers = #tpu.dot_dimension_numbers<[1], [0], [0], [1], [0, 0, 1, 1], [], []>} : vector<128x16xbf16>, vector<16x16xbf16>, vector<128x16xf32> -> vector<128x16xf32>
    %17 = arith.addf %8, %16 : vector<128x16xf32>
    %c0_i32_14 = arith.constant 0 : i32
    %18 = arith.addi %0, %c0_i32_14 : i32
    %c0_15 = arith.constant 0 : index
    %19 = arith.index_cast %18 : i32 to index
    %c1_16 = arith.constant 1 : index
    %c0_17 = arith.constant 0 : index
    %c0_18 = arith.constant 0 : index
    %20 = vector.load %arg1[%c0_15, %19, %c1_16, %c0_17, %c0_18] : memref<2x9x2x9x16xbf16, #tpu.memory_space<vmem>>, vector<2x8x1x8x16xbf16>
    %21 = vector.shape_cast %20 : vector<2x8x1x8x16xbf16> to vector<2x8x8x16xbf16>
    %22 = vector.shape_cast %21 : vector<2x8x8x16xbf16> to vector<128x16xbf16>
    %c2 = arith.constant 2 : index
    %c0_19 = arith.constant 0 : index
    %c0_20 = arith.constant 0 : index
    %23 = vector.load %arg2[%c2, %c0_19, %c0_20] : memref<8x16x16xbf16, #tpu.memory_space<vmem>>, vector<1x16x16xbf16>
    %24 = vector.shape_cast %23 : vector<1x16x16xbf16> to vector<16x16xbf16>
    %cst_21 = arith.constant dense<0.000000e+00> : vector<128x16xf32>
    %25 = tpu.matmul %22, %24, %cst_21 {dimension_numbers = #tpu.dot_dimension_numbers<[1], [0], [0], [1], [0, 0, 1, 1], [], []>} : vector<128x16xbf16>, vector<16x16xbf16>, vector<128x16xf32> -> vector<128x16xf32>
    %26 = arith.addf %17, %25 : vector<128x16xf32>
    %c0_i32_22 = arith.constant 0 : i32
    %27 = arith.addi %0, %c0_i32_22 : i32
    %c0_23 = arith.constant 0 : index
    %28 = arith.index_cast %27 : i32 to index
    %c1_24 = arith.constant 1 : index
    %c1_25 = arith.constant 1 : index
    %c0_26 = arith.constant 0 : index
    %29 = vector.load %arg1[%c0_23, %28, %c1_24, %c1_25, %c0_26] : memref<2x9x2x9x16xbf16, #tpu.memory_space<vmem>>, vector<2x8x1x8x16xbf16>
    %30 = vector.shape_cast %29 : vector<2x8x1x8x16xbf16> to vector<2x8x8x16xbf16>
    %31 = vector.shape_cast %30 : vector<2x8x8x16xbf16> to vector<128x16xbf16>
    %c3 = arith.constant 3 : index
    %c0_27 = arith.constant 0 : index
    %c0_28 = arith.constant 0 : index
    %32 = vector.load %arg2[%c3, %c0_27, %c0_28] : memref<8x16x16xbf16, #tpu.memory_space<vmem>>, vector<1x16x16xbf16>
    %33 = vector.shape_cast %32 : vector<1x16x16xbf16> to vector<16x16xbf16>
    %cst_29 = arith.constant dense<0.000000e+00> : vector<128x16xf32>
    %34 = tpu.matmul %31, %33, %cst_29 {dimension_numbers = #tpu.dot_dimension_numbers<[1], [0], [0], [1], [0, 0, 1, 1], [], []>} : vector<128x16xbf16>, vector<16x16xbf16>, vector<128x16xf32> -> vector<128x16xf32>
    %35 = arith.addf %26, %34 : vector<128x16xf32>
    %c1_i32 = arith.constant 1 : i32
    %36 = arith.addi %0, %c1_i32 : i32
    %c0_30 = arith.constant 0 : index
    %37 = arith.index_cast %36 : i32 to index
    %c0_31 = arith.constant 0 : index
    %c0_32 = arith.constant 0 : index
    %c0_33 = arith.constant 0 : index
    %38 = vector.load %arg1[%c0_30, %37, %c0_31, %c0_32, %c0_33] : memref<2x9x2x9x16xbf16, #tpu.memory_space<vmem>>, vector<2x8x1x8x16xbf16>
    %39 = vector.shape_cast %38 : vector<2x8x1x8x16xbf16> to vector<2x8x8x16xbf16>
    %40 = vector.shape_cast %39 : vector<2x8x8x16xbf16> to vector<128x16xbf16>
    %c4 = arith.constant 4 : index
    %c0_34 = arith.constant 0 : index
    %c0_35 = arith.constant 0 : index
    %41 = vector.load %arg2[%c4, %c0_34, %c0_35] : memref<8x16x16xbf16, #tpu.memory_space<vmem>>, vector<1x16x16xbf16>
    %42 = vector.shape_cast %41 : vector<1x16x16xbf16> to vector<16x16xbf16>
    %cst_36 = arith.constant dense<0.000000e+00> : vector<128x16xf32>
    %43 = tpu.matmul %40, %42, %cst_36 {dimension_numbers = #tpu.dot_dimension_numbers<[1], [0], [0], [1], [0, 0, 1, 1], [], []>} : vector<128x16xbf16>, vector<16x16xbf16>, vector<128x16xf32> -> vector<128x16xf32>
    %44 = arith.addf %35, %43 : vector<128x16xf32>
    %c1_i32_37 = arith.constant 1 : i32
    %45 = arith.addi %0, %c1_i32_37 : i32
    %c0_38 = arith.constant 0 : index
    %46 = arith.index_cast %45 : i32 to index
    %c0_39 = arith.constant 0 : index
    %c1_40 = arith.constant 1 : index
    %c0_41 = arith.constant 0 : index
    %47 = vector.load %arg1[%c0_38, %46, %c0_39, %c1_40, %c0_41] : memref<2x9x2x9x16xbf16, #tpu.memory_space<vmem>>, vector<2x8x1x8x16xbf16>
    %48 = vector.shape_cast %47 : vector<2x8x1x8x16xbf16> to vector<2x8x8x16xbf16>
    %49 = vector.shape_cast %48 : vector<2x8x8x16xbf16> to vector<128x16xbf16>
    %c5 = arith.constant 5 : index
    %c0_42 = arith.constant 0 : index
    %c0_43 = arith.constant 0 : index
    %50 = vector.load %arg2[%c5, %c0_42, %c0_43] : memref<8x16x16xbf16, #tpu.memory_space<vmem>>, vector<1x16x16xbf16>
    %51 = vector.shape_cast %50 : vector<1x16x16xbf16> to vector<16x16xbf16>
    %cst_44 = arith.constant dense<0.000000e+00> : vector<128x16xf32>
    %52 = tpu.matmul %49, %51, %cst_44 {dimension_numbers = #tpu.dot_dimension_numbers<[1], [0], [0], [1], [0, 0, 1, 1], [], []>} : vector<128x16xbf16>, vector<16x16xbf16>, vector<128x16xf32> -> vector<128x16xf32>
    %53 = arith.addf %44, %52 : vector<128x16xf32>
    %c1_i32_45 = arith.constant 1 : i32
    %54 = arith.addi %0, %c1_i32_45 : i32
    %c0_46 = arith.constant 0 : index
    %55 = arith.index_cast %54 : i32 to index
    %c1_47 = arith.constant 1 : index
    %c0_48 = arith.constant 0 : index
    %c0_49 = arith.constant 0 : index
    %56 = vector.load %arg1[%c0_46, %55, %c1_47, %c0_48, %c0_49] : memref<2x9x2x9x16xbf16, #tpu.memory_space<vmem>>, vector<2x8x1x8x16xbf16>
    %57 = vector.shape_cast %56 : vector<2x8x1x8x16xbf16> to vector<2x8x8x16xbf16>
    %58 = vector.shape_cast %57 : vector<2x8x8x16xbf16> to vector<128x16xbf16>
    %c6 = arith.constant 6 : index
    %c0_50 = arith.constant 0 : index
    %c0_51 = arith.constant 0 : index
    %59 = vector.load %arg2[%c6, %c0_50, %c0_51] : memref<8x16x16xbf16, #tpu.memory_space<vmem>>, vector<1x16x16xbf16>
    %60 = vector.shape_cast %59 : vector<1x16x16xbf16> to vector<16x16xbf16>
    %cst_52 = arith.constant dense<0.000000e+00> : vector<128x16xf32>
    %61 = tpu.matmul %58, %60, %cst_52 {dimension_numbers = #tpu.dot_dimension_numbers<[1], [0], [0], [1], [0, 0, 1, 1], [], []>} : vector<128x16xbf16>, vector<16x16xbf16>, vector<128x16xf32> -> vector<128x16xf32>
    %62 = arith.addf %53, %61 : vector<128x16xf32>
    %c1_i32_53 = arith.constant 1 : i32
    %63 = arith.addi %0, %c1_i32_53 : i32
    %c0_54 = arith.constant 0 : index
    %64 = arith.index_cast %63 : i32 to index
    %c1_55 = arith.constant 1 : index
    %c1_56 = arith.constant 1 : index
    %c0_57 = arith.constant 0 : index
    %65 = vector.load %arg1[%c0_54, %64, %c1_55, %c1_56, %c0_57] : memref<2x9x2x9x16xbf16, #tpu.memory_space<vmem>>, vector<2x8x1x8x16xbf16>
    %66 = vector.shape_cast %65 : vector<2x8x1x8x16xbf16> to vector<2x8x8x16xbf16>
    %67 = vector.shape_cast %66 : vector<2x8x8x16xbf16> to vector<128x16xbf16>
    %c7 = arith.constant 7 : index
    %c0_58 = arith.constant 0 : index
    %c0_59 = arith.constant 0 : index
    %68 = vector.load %arg2[%c7, %c0_58, %c0_59] : memref<8x16x16xbf16, #tpu.memory_space<vmem>>, vector<1x16x16xbf16>
    %69 = vector.shape_cast %68 : vector<1x16x16xbf16> to vector<16x16xbf16>
    %cst_60 = arith.constant dense<0.000000e+00> : vector<128x16xf32>
    %70 = tpu.matmul %67, %69, %cst_60 {dimension_numbers = #tpu.dot_dimension_numbers<[1], [0], [0], [1], [0, 0, 1, 1], [], []>} : vector<128x16xbf16>, vector<16x16xbf16>, vector<128x16xf32> -> vector<128x16xf32>
    %71 = arith.addf %62, %70 : vector<128x16xf32>
    %c0_61 = arith.constant 0 : index
    %c0_62 = arith.constant 0 : index
    %72 = vector.load %arg3[%c0_61, %c0_62] : memref<1x16xf32, #tpu.memory_space<vmem>>, vector<1x16xf32>
    %73 = vector.broadcast %72 : vector<1x16xf32> to vector<128x16xf32>
    %74 = arith.addf %71, %73 : vector<128x16xf32>
    %cst_63 = arith.constant 0.00999999977 : f32
    %75 = vector.broadcast %cst_63 : f32 to vector<128x16xf32>
    %76 = arith.mulf %75, %74 : vector<128x16xf32>
    %77 = arith.maximumf %74, %76 : vector<128x16xf32>
    %78 = vector.shape_cast %77 : vector<128x16xf32> to vector<2x64x16xf32>
    %79 = arith.truncf %78 : vector<2x64x16xf32> to vector<2x64x16xbf16>
    %c0_64 = arith.constant 0 : index
    %c0_65 = arith.constant 0 : index
    %c0_66 = arith.constant 0 : index
    %80 = vector.load %arg4[%c0_64, %c0_65, %c0_66] : memref<2x64x16xbf16, #tpu.memory_space<vmem>>, vector<2x64x16xbf16>
    tpu.vector_store %arg4[%c0_64, %c0_65, %c0_66], %79 {strides = array<i32>} : memref<2x64x16xbf16, #tpu.memory_space<vmem>>, vector<2x64x16xbf16>,
    return
  }
  func.func @transform_0(%arg0: i32) -> (i32, i32, i32, i32, i32) {
    %c0_i32 = arith.constant 0 : i32
    %c0_i32_0 = arith.constant 0 : i32
    %c0_i32_1 = arith.constant 0 : i32
    %c0_i32_2 = arith.constant 0 : i32
    %c0_i32_3 = arith.constant 0 : i32
    %c0_i32_4 = arith.constant 0 : i32
    return %c0_i32, %c0_i32_0, %c0_i32_1, %c0_i32_2, %c0_i32_3 : i32, i32, i32, i32, i32
  }
  func.func @transform_1(%arg0: i32) -> (i32, i32, i32) {
    %c0_i32 = arith.constant 0 : i32
    %c0_i32_0 = arith.constant 0 : i32
    %c0_i32_1 = arith.constant 0 : i32
    %c0_i32_2 = arith.constant 0 : i32
    return %c0_i32, %c0_i32_0, %c0_i32_1 : i32, i32, i32
  }
  func.func @transform_2(%arg0: i32) -> (i32, i32) {
    %c0_i32 = arith.constant 0 : i32
    %c0_i32_0 = arith.constant 0 : i32
    %c0_i32_1 = arith.constant 0 : i32
    return %c0_i32, %c0_i32_0 : i32, i32
  }
  func.func @transform_3(%arg0: i32) -> (i32, i32, i32) {
    %c0_i32 = arith.constant 0 : i32
    %c0_i32_0 = arith.constant 0 : i32
    %c0_i32_1 = arith.constant 0 : i32
    return %c0_i32, %arg0, %c0_i32_0 : i32, i32, i32
  }
}

module attributes {stable_mosaic.version = 11 : i64} {
  func.func @_conv_kernel(%arg0: i32, %arg1: memref<2x5x2x5x32xbf16, #tpu.memory_space<vmem>>, %arg2: memref<8x32x32xbf16, #tpu.memory_space<vmem>>, %arg3: memref<1x32xf32, #tpu.memory_space<vmem>>, %arg4: memref<2x16x32xbf16, #tpu.memory_space<vmem>>) attributes {dimension_semantics = [#tpu.dimension_semantics<parallel>], iteration_bounds = array<i64: 1>, scalar_prefetch = 0 : i64, scratch_operands = 0 : i64, tpu.core_type = #tpu.core_type<tc>, window_params = [{pipeline_mode = #tpu.pipeline_mode<synchronous>, transform_indices = @transform_0, window_bounds = array<i64: 2, 5, 2, 5, 32>}, {pipeline_mode = #tpu.pipeline_mode<synchronous>, transform_indices = @transform_1, window_bounds = array<i64: 8, 32, 32>}, {pipeline_mode = #tpu.pipeline_mode<synchronous>, transform_indices = @transform_2, window_bounds = array<i64: 1, 32>}, {transform_indices = @transform_3, window_bounds = array<i64: 2, 16, 32>}]} {
    %c4_i32 = arith.constant 4 : i32
    %0 = arith.muli %arg0, %c4_i32 : i32
    %c0_i32 = arith.constant 0 : i32
    %1 = arith.addi %0, %c0_i32 : i32
    %c0 = arith.constant 0 : index
    %2 = arith.index_cast %1 : i32 to index
    %c0_0 = arith.constant 0 : index
    %c0_1 = arith.constant 0 : index
    %c0_2 = arith.constant 0 : index
    %3 = vector.load %arg1[%c0, %2, %c0_0, %c0_1, %c0_2] : memref<2x5x2x5x32xbf16, #tpu.memory_space<vmem>>, vector<2x4x1x4x32xbf16>
    %4 = vector.shape_cast %3 : vector<2x4x1x4x32xbf16> to vector<2x4x4x32xbf16>
    %5 = vector.shape_cast %4 : vector<2x4x4x32xbf16> to vector<32x32xbf16>
    %c0_3 = arith.constant 0 : index
    %c0_4 = arith.constant 0 : index
    %c0_5 = arith.constant 0 : index
    %6 = vector.load %arg2[%c0_3, %c0_4, %c0_5] : memref<8x32x32xbf16, #tpu.memory_space<vmem>>, vector<1x32x32xbf16>
    %7 = vector.shape_cast %6 : vector<1x32x32xbf16> to vector<32x32xbf16>
    %cst = arith.constant dense<0.000000e+00> : vector<32x32xf32>
    %8 = tpu.matmul %5, %7, %cst {dimension_numbers = #tpu.dot_dimension_numbers<[1], [0], [0], [1], [0, 0, 1, 1], [], []>} : vector<32x32xbf16>, vector<32x32xbf16>, vector<32x32xf32> -> vector<32x32xf32>
    %c0_i32_6 = arith.constant 0 : i32
    %9 = arith.addi %0, %c0_i32_6 : i32
    %c0_7 = arith.constant 0 : index
    %10 = arith.index_cast %9 : i32 to index
    %c0_8 = arith.constant 0 : index
    %c1 = arith.constant 1 : index
    %c0_9 = arith.constant 0 : index
    %11 = vector.load %arg1[%c0_7, %10, %c0_8, %c1, %c0_9] : memref<2x5x2x5x32xbf16, #tpu.memory_space<vmem>>, vector<2x4x1x4x32xbf16>
    %12 = vector.shape_cast %11 : vector<2x4x1x4x32xbf16> to vector<2x4x4x32xbf16>
    %13 = vector.shape_cast %12 : vector<2x4x4x32xbf16> to vector<32x32xbf16>
    %c1_10 = arith.constant 1 : index
    %c0_11 = arith.constant 0 : index
    %c0_12 = arith.constant 0 : index
    %14 = vector.load %arg2[%c1_10, %c0_11, %c0_12] : memref<8x32x32xbf16, #tpu.memory_space<vmem>>, vector<1x32x32xbf16>
    %15 = vector.shape_cast %14 : vector<1x32x32xbf16> to vector<32x32xbf16>
    %cst_13 = arith.constant dense<0.000000e+00> : vector<32x32xf32>
    %16 = tpu.matmul %13, %15, %cst_13 {dimension_numbers = #tpu.dot_dimension_numbers<[1], [0], [0], [1], [0, 0, 1, 1], [], []>} : vector<32x32xbf16>, vector<32x32xbf16>, vector<32x32xf32> -> vector<32x32xf32>
    %17 = arith.addf %8, %16 : vector<32x32xf32>
    %c0_i32_14 = arith.constant 0 : i32
    %18 = arith.addi %0, %c0_i32_14 : i32
    %c0_15 = arith.constant 0 : index
    %19 = arith.index_cast %18 : i32 to index
    %c1_16 = arith.constant 1 : index
    %c0_17 = arith.constant 0 : index
    %c0_18 = arith.constant 0 : index
    %20 = vector.load %arg1[%c0_15, %19, %c1_16, %c0_17, %c0_18] : memref<2x5x2x5x32xbf16, #tpu.memory_space<vmem>>, vector<2x4x1x4x32xbf16>
    %21 = vector.shape_cast %20 : vector<2x4x1x4x32xbf16> to vector<2x4x4x32xbf16>
    %22 = vector.shape_cast %21 : vector<2x4x4x32xbf16> to vector<32x32xbf16>
    %c2 = arith.constant 2 : index
    %c0_19 = arith.constant 0 : index
    %c0_20 = arith.constant 0 : index
    %23 = vector.load %arg2[%c2, %c0_19, %c0_20] : memref<8x32x32xbf16, #tpu.memory_space<vmem>>, vector<1x32x32xbf16>
    %24 = vector.shape_cast %23 : vector<1x32x32xbf16> to vector<32x32xbf16>
    %cst_21 = arith.constant dense<0.000000e+00> : vector<32x32xf32>
    %25 = tpu.matmul %22, %24, %cst_21 {dimension_numbers = #tpu.dot_dimension_numbers<[1], [0], [0], [1], [0, 0, 1, 1], [], []>} : vector<32x32xbf16>, vector<32x32xbf16>, vector<32x32xf32> -> vector<32x32xf32>
    %26 = arith.addf %17, %25 : vector<32x32xf32>
    %c0_i32_22 = arith.constant 0 : i32
    %27 = arith.addi %0, %c0_i32_22 : i32
    %c0_23 = arith.constant 0 : index
    %28 = arith.index_cast %27 : i32 to index
    %c1_24 = arith.constant 1 : index
    %c1_25 = arith.constant 1 : index
    %c0_26 = arith.constant 0 : index
    %29 = vector.load %arg1[%c0_23, %28, %c1_24, %c1_25, %c0_26] : memref<2x5x2x5x32xbf16, #tpu.memory_space<vmem>>, vector<2x4x1x4x32xbf16>
    %30 = vector.shape_cast %29 : vector<2x4x1x4x32xbf16> to vector<2x4x4x32xbf16>
    %31 = vector.shape_cast %30 : vector<2x4x4x32xbf16> to vector<32x32xbf16>
    %c3 = arith.constant 3 : index
    %c0_27 = arith.constant 0 : index
    %c0_28 = arith.constant 0 : index
    %32 = vector.load %arg2[%c3, %c0_27, %c0_28] : memref<8x32x32xbf16, #tpu.memory_space<vmem>>, vector<1x32x32xbf16>
    %33 = vector.shape_cast %32 : vector<1x32x32xbf16> to vector<32x32xbf16>
    %cst_29 = arith.constant dense<0.000000e+00> : vector<32x32xf32>
    %34 = tpu.matmul %31, %33, %cst_29 {dimension_numbers = #tpu.dot_dimension_numbers<[1], [0], [0], [1], [0, 0, 1, 1], [], []>} : vector<32x32xbf16>, vector<32x32xbf16>, vector<32x32xf32> -> vector<32x32xf32>
    %35 = arith.addf %26, %34 : vector<32x32xf32>
    %c1_i32 = arith.constant 1 : i32
    %36 = arith.addi %0, %c1_i32 : i32
    %c0_30 = arith.constant 0 : index
    %37 = arith.index_cast %36 : i32 to index
    %c0_31 = arith.constant 0 : index
    %c0_32 = arith.constant 0 : index
    %c0_33 = arith.constant 0 : index
    %38 = vector.load %arg1[%c0_30, %37, %c0_31, %c0_32, %c0_33] : memref<2x5x2x5x32xbf16, #tpu.memory_space<vmem>>, vector<2x4x1x4x32xbf16>
    %39 = vector.shape_cast %38 : vector<2x4x1x4x32xbf16> to vector<2x4x4x32xbf16>
    %40 = vector.shape_cast %39 : vector<2x4x4x32xbf16> to vector<32x32xbf16>
    %c4 = arith.constant 4 : index
    %c0_34 = arith.constant 0 : index
    %c0_35 = arith.constant 0 : index
    %41 = vector.load %arg2[%c4, %c0_34, %c0_35] : memref<8x32x32xbf16, #tpu.memory_space<vmem>>, vector<1x32x32xbf16>
    %42 = vector.shape_cast %41 : vector<1x32x32xbf16> to vector<32x32xbf16>
    %cst_36 = arith.constant dense<0.000000e+00> : vector<32x32xf32>
    %43 = tpu.matmul %40, %42, %cst_36 {dimension_numbers = #tpu.dot_dimension_numbers<[1], [0], [0], [1], [0, 0, 1, 1], [], []>} : vector<32x32xbf16>, vector<32x32xbf16>, vector<32x32xf32> -> vector<32x32xf32>
    %44 = arith.addf %35, %43 : vector<32x32xf32>
    %c1_i32_37 = arith.constant 1 : i32
    %45 = arith.addi %0, %c1_i32_37 : i32
    %c0_38 = arith.constant 0 : index
    %46 = arith.index_cast %45 : i32 to index
    %c0_39 = arith.constant 0 : index
    %c1_40 = arith.constant 1 : index
    %c0_41 = arith.constant 0 : index
    %47 = vector.load %arg1[%c0_38, %46, %c0_39, %c1_40, %c0_41] : memref<2x5x2x5x32xbf16, #tpu.memory_space<vmem>>, vector<2x4x1x4x32xbf16>
    %48 = vector.shape_cast %47 : vector<2x4x1x4x32xbf16> to vector<2x4x4x32xbf16>
    %49 = vector.shape_cast %48 : vector<2x4x4x32xbf16> to vector<32x32xbf16>
    %c5 = arith.constant 5 : index
    %c0_42 = arith.constant 0 : index
    %c0_43 = arith.constant 0 : index
    %50 = vector.load %arg2[%c5, %c0_42, %c0_43] : memref<8x32x32xbf16, #tpu.memory_space<vmem>>, vector<1x32x32xbf16>
    %51 = vector.shape_cast %50 : vector<1x32x32xbf16> to vector<32x32xbf16>
    %cst_44 = arith.constant dense<0.000000e+00> : vector<32x32xf32>
    %52 = tpu.matmul %49, %51, %cst_44 {dimension_numbers = #tpu.dot_dimension_numbers<[1], [0], [0], [1], [0, 0, 1, 1], [], []>} : vector<32x32xbf16>, vector<32x32xbf16>, vector<32x32xf32> -> vector<32x32xf32>
    %53 = arith.addf %44, %52 : vector<32x32xf32>
    %c1_i32_45 = arith.constant 1 : i32
    %54 = arith.addi %0, %c1_i32_45 : i32
    %c0_46 = arith.constant 0 : index
    %55 = arith.index_cast %54 : i32 to index
    %c1_47 = arith.constant 1 : index
    %c0_48 = arith.constant 0 : index
    %c0_49 = arith.constant 0 : index
    %56 = vector.load %arg1[%c0_46, %55, %c1_47, %c0_48, %c0_49] : memref<2x5x2x5x32xbf16, #tpu.memory_space<vmem>>, vector<2x4x1x4x32xbf16>
    %57 = vector.shape_cast %56 : vector<2x4x1x4x32xbf16> to vector<2x4x4x32xbf16>
    %58 = vector.shape_cast %57 : vector<2x4x4x32xbf16> to vector<32x32xbf16>
    %c6 = arith.constant 6 : index
    %c0_50 = arith.constant 0 : index
    %c0_51 = arith.constant 0 : index
    %59 = vector.load %arg2[%c6, %c0_50, %c0_51] : memref<8x32x32xbf16, #tpu.memory_space<vmem>>, vector<1x32x32xbf16>
    %60 = vector.shape_cast %59 : vector<1x32x32xbf16> to vector<32x32xbf16>
    %cst_52 = arith.constant dense<0.000000e+00> : vector<32x32xf32>
    %61 = tpu.matmul %58, %60, %cst_52 {dimension_numbers = #tpu.dot_dimension_numbers<[1], [0], [0], [1], [0, 0, 1, 1], [], []>} : vector<32x32xbf16>, vector<32x32xbf16>, vector<32x32xf32> -> vector<32x32xf32>
    %62 = arith.addf %53, %61 : vector<32x32xf32>
    %c1_i32_53 = arith.constant 1 : i32
    %63 = arith.addi %0, %c1_i32_53 : i32
    %c0_54 = arith.constant 0 : index
    %64 = arith.index_cast %63 : i32 to index
    %c1_55 = arith.constant 1 : index
    %c1_56 = arith.constant 1 : index
    %c0_57 = arith.constant 0 : index
    %65 = vector.load %arg1[%c0_54, %64, %c1_55, %c1_56, %c0_57] : memref<2x5x2x5x32xbf16, #tpu.memory_space<vmem>>, vector<2x4x1x4x32xbf16>
    %66 = vector.shape_cast %65 : vector<2x4x1x4x32xbf16> to vector<2x4x4x32xbf16>
    %67 = vector.shape_cast %66 : vector<2x4x4x32xbf16> to vector<32x32xbf16>
    %c7 = arith.constant 7 : index
    %c0_58 = arith.constant 0 : index
    %c0_59 = arith.constant 0 : index
    %68 = vector.load %arg2[%c7, %c0_58, %c0_59] : memref<8x32x32xbf16, #tpu.memory_space<vmem>>, vector<1x32x32xbf16>
    %69 = vector.shape_cast %68 : vector<1x32x32xbf16> to vector<32x32xbf16>
    %cst_60 = arith.constant dense<0.000000e+00> : vector<32x32xf32>
    %70 = tpu.matmul %67, %69, %cst_60 {dimension_numbers = #tpu.dot_dimension_numbers<[1], [0], [0], [1], [0, 0, 1, 1], [], []>} : vector<32x32xbf16>, vector<32x32xbf16>, vector<32x32xf32> -> vector<32x32xf32>
    %71 = arith.addf %62, %70 : vector<32x32xf32>
    %c0_61 = arith.constant 0 : index
    %c0_62 = arith.constant 0 : index
    %72 = vector.load %arg3[%c0_61, %c0_62] : memref<1x32xf32, #tpu.memory_space<vmem>>, vector<1x32xf32>
    %73 = vector.broadcast %72 : vector<1x32xf32> to vector<32x32xf32>
    %74 = arith.addf %71, %73 : vector<32x32xf32>
    %cst_63 = arith.constant 0.00999999977 : f32
    %75 = vector.broadcast %cst_63 : f32 to vector<32x32xf32>
    %76 = arith.mulf %75, %74 : vector<32x32xf32>
    %77 = arith.maximumf %74, %76 : vector<32x32xf32>
    %78 = vector.shape_cast %77 : vector<32x32xf32> to vector<2x16x32xf32>
    %79 = arith.truncf %78 : vector<2x16x32xf32> to vector<2x16x32xbf16>
    %c0_64 = arith.constant 0 : index
    %c0_65 = arith.constant 0 : index
    %c0_66 = arith.constant 0 : index
    %80 = vector.load %arg4[%c0_64, %c0_65, %c0_66] : memref<2x16x32xbf16, #tpu.memory_space<vmem>>, vector<2x16x32xbf16>
    tpu.vector_store %arg4[%c0_64, %c0_65, %c0_66], %79 {strides = array<i32>} : memref<2x16x32xbf16, #tpu.memory_space<vmem>>, vector<2x16x32xbf16>,
    return
  }
  func.func @transform_0(%arg0: i32) -> (i32, i32, i32, i32, i32) {
    %c0_i32 = arith.constant 0 : i32
    %c0_i32_0 = arith.constant 0 : i32
    %c0_i32_1 = arith.constant 0 : i32
    %c0_i32_2 = arith.constant 0 : i32
    %c0_i32_3 = arith.constant 0 : i32
    %c0_i32_4 = arith.constant 0 : i32
    return %c0_i32, %c0_i32_0, %c0_i32_1, %c0_i32_2, %c0_i32_3 : i32, i32, i32, i32, i32
  }
  func.func @transform_1(%arg0: i32) -> (i32, i32, i32) {
    %c0_i32 = arith.constant 0 : i32
    %c0_i32_0 = arith.constant 0 : i32
    %c0_i32_1 = arith.constant 0 : i32
    %c0_i32_2 = arith.constant 0 : i32
    return %c0_i32, %c0_i32_0, %c0_i32_1 : i32, i32, i32
  }
  func.func @transform_2(%arg0: i32) -> (i32, i32) {
    %c0_i32 = arith.constant 0 : i32
    %c0_i32_0 = arith.constant 0 : i32
    %c0_i32_1 = arith.constant 0 : i32
    return %c0_i32, %c0_i32_0 : i32, i32
  }
  func.func @transform_3(%arg0: i32) -> (i32, i32, i32) {
    %c0_i32 = arith.constant 0 : i32
    %c0_i32_0 = arith.constant 0 : i32
    %c0_i32_1 = arith.constant 0 : i32
    return %c0_i32, %arg0, %c0_i32_0 : i32, i32, i32
  }
}

module attributes {stable_mosaic.version = 11 : i64} {
  func.func @_conv_kernel(%arg0: i32, %arg1: memref<2x6x1x6x32xbf16, #tpu.memory_space<vmem>>, %arg2: memref<9x32x1xbf16, #tpu.memory_space<vmem>>, %arg3: memref<1x1xf32, #tpu.memory_space<vmem>>, %arg4: memref<2x16x1xf32, #tpu.memory_space<vmem>>) attributes {dimension_semantics = [#tpu.dimension_semantics<parallel>], iteration_bounds = array<i64: 1>, scalar_prefetch = 0 : i64, scratch_operands = 0 : i64, tpu.core_type = #tpu.core_type<tc>, window_params = [{pipeline_mode = #tpu.pipeline_mode<synchronous>, transform_indices = @transform_0, window_bounds = array<i64: 2, 6, 1, 6, 32>}, {pipeline_mode = #tpu.pipeline_mode<synchronous>, transform_indices = @transform_1, window_bounds = array<i64: 9, 32, 1>}, {pipeline_mode = #tpu.pipeline_mode<synchronous>, transform_indices = @transform_2, window_bounds = array<i64: 1, 1>}, {transform_indices = @transform_3, window_bounds = array<i64: 2, 16, 1>}]} {
    %c4_i32 = arith.constant 4 : i32
    %0 = arith.muli %arg0, %c4_i32 : i32
    %c0_i32 = arith.constant 0 : i32
    %1 = arith.addi %0, %c0_i32 : i32
    %c0 = arith.constant 0 : index
    %2 = arith.index_cast %1 : i32 to index
    %c0_0 = arith.constant 0 : index
    %c0_1 = arith.constant 0 : index
    %c0_2 = arith.constant 0 : index
    %3 = vector.load %arg1[%c0, %2, %c0_0, %c0_1, %c0_2] : memref<2x6x1x6x32xbf16, #tpu.memory_space<vmem>>, vector<2x4x1x4x32xbf16>
    %4 = vector.shape_cast %3 : vector<2x4x1x4x32xbf16> to vector<2x4x4x32xbf16>
    %5 = vector.shape_cast %4 : vector<2x4x4x32xbf16> to vector<32x32xbf16>
    %c0_3 = arith.constant 0 : index
    %c0_4 = arith.constant 0 : index
    %c0_5 = arith.constant 0 : index
    %6 = vector.load %arg2[%c0_3, %c0_4, %c0_5] : memref<9x32x1xbf16, #tpu.memory_space<vmem>>, vector<1x32x1xbf16>
    %7 = vector.shape_cast %6 : vector<1x32x1xbf16> to vector<32x1xbf16>
    %cst = arith.constant dense<0.000000e+00> : vector<32x1xf32>
    %8 = tpu.matmul %5, %7, %cst {dimension_numbers = #tpu.dot_dimension_numbers<[1], [0], [0], [1], [0, 0, 1, 1], [], []>} : vector<32x32xbf16>, vector<32x1xbf16>, vector<32x1xf32> -> vector<32x1xf32>
    %c0_i32_6 = arith.constant 0 : i32
    %9 = arith.addi %0, %c0_i32_6 : i32
    %c0_7 = arith.constant 0 : index
    %10 = arith.index_cast %9 : i32 to index
    %c0_8 = arith.constant 0 : index
    %c1 = arith.constant 1 : index
    %c0_9 = arith.constant 0 : index
    %11 = vector.load %arg1[%c0_7, %10, %c0_8, %c1, %c0_9] : memref<2x6x1x6x32xbf16, #tpu.memory_space<vmem>>, vector<2x4x1x4x32xbf16>
    %12 = vector.shape_cast %11 : vector<2x4x1x4x32xbf16> to vector<2x4x4x32xbf16>
    %13 = vector.shape_cast %12 : vector<2x4x4x32xbf16> to vector<32x32xbf16>
    %c1_10 = arith.constant 1 : index
    %c0_11 = arith.constant 0 : index
    %c0_12 = arith.constant 0 : index
    %14 = vector.load %arg2[%c1_10, %c0_11, %c0_12] : memref<9x32x1xbf16, #tpu.memory_space<vmem>>, vector<1x32x1xbf16>
    %15 = vector.shape_cast %14 : vector<1x32x1xbf16> to vector<32x1xbf16>
    %cst_13 = arith.constant dense<0.000000e+00> : vector<32x1xf32>
    %16 = tpu.matmul %13, %15, %cst_13 {dimension_numbers = #tpu.dot_dimension_numbers<[1], [0], [0], [1], [0, 0, 1, 1], [], []>} : vector<32x32xbf16>, vector<32x1xbf16>, vector<32x1xf32> -> vector<32x1xf32>
    %17 = arith.addf %8, %16 : vector<32x1xf32>
    %c0_i32_14 = arith.constant 0 : i32
    %18 = arith.addi %0, %c0_i32_14 : i32
    %c0_15 = arith.constant 0 : index
    %19 = arith.index_cast %18 : i32 to index
    %c0_16 = arith.constant 0 : index
    %c2 = arith.constant 2 : index
    %c0_17 = arith.constant 0 : index
    %20 = vector.load %arg1[%c0_15, %19, %c0_16, %c2, %c0_17] : memref<2x6x1x6x32xbf16, #tpu.memory_space<vmem>>, vector<2x4x1x4x32xbf16>
    %21 = vector.shape_cast %20 : vector<2x4x1x4x32xbf16> to vector<2x4x4x32xbf16>
    %22 = vector.shape_cast %21 : vector<2x4x4x32xbf16> to vector<32x32xbf16>
    %c2_18 = arith.constant 2 : index
    %c0_19 = arith.constant 0 : index
    %c0_20 = arith.constant 0 : index
    %23 = vector.load %arg2[%c2_18, %c0_19, %c0_20] : memref<9x32x1xbf16, #tpu.memory_space<vmem>>, vector<1x32x1xbf16>
    %24 = vector.shape_cast %23 : vector<1x32x1xbf16> to vector<32x1xbf16>
    %cst_21 = arith.constant dense<0.000000e+00> : vector<32x1xf32>
    %25 = tpu.matmul %22, %24, %cst_21 {dimension_numbers = #tpu.dot_dimension_numbers<[1], [0], [0], [1], [0, 0, 1, 1], [], []>} : vector<32x32xbf16>, vector<32x1xbf16>, vector<32x1xf32> -> vector<32x1xf32>
    %26 = arith.addf %17, %25 : vector<32x1xf32>
    %c1_i32 = arith.constant 1 : i32
    %27 = arith.addi %0, %c1_i32 : i32
    %c0_22 = arith.constant 0 : index
    %28 = arith.index_cast %27 : i32 to index
    %c0_23 = arith.constant 0 : index
    %c0_24 = arith.constant 0 : index
    %c0_25 = arith.constant 0 : index
    %29 = vector.load %arg1[%c0_22, %28, %c0_23, %c0_24, %c0_25] : memref<2x6x1x6x32xbf16, #tpu.memory_space<vmem>>, vector<2x4x1x4x32xbf16>
    %30 = vector.shape_cast %29 : vector<2x4x1x4x32xbf16> to vector<2x4x4x32xbf16>
    %31 = vector.shape_cast %30 : vector<2x4x4x32xbf16> to vector<32x32xbf16>
    %c3 = arith.constant 3 : index
    %c0_26 = arith.constant 0 : index
    %c0_27 = arith.constant 0 : index
    %32 = vector.load %arg2[%c3, %c0_26, %c0_27] : memref<9x32x1xbf16, #tpu.memory_space<vmem>>, vector<1x32x1xbf16>
    %33 = vector.shape_cast %32 : vector<1x32x1xbf16> to vector<32x1xbf16>
    %cst_28 = arith.constant dense<0.000000e+00> : vector<32x1xf32>
    %34 = tpu.matmul %31, %33, %cst_28 {dimension_numbers = #tpu.dot_dimension_numbers<[1], [0], [0], [1], [0, 0, 1, 1], [], []>} : vector<32x32xbf16>, vector<32x1xbf16>, vector<32x1xf32> -> vector<32x1xf32>
    %35 = arith.addf %26, %34 : vector<32x1xf32>
    %c1_i32_29 = arith.constant 1 : i32
    %36 = arith.addi %0, %c1_i32_29 : i32
    %c0_30 = arith.constant 0 : index
    %37 = arith.index_cast %36 : i32 to index
    %c0_31 = arith.constant 0 : index
    %c1_32 = arith.constant 1 : index
    %c0_33 = arith.constant 0 : index
    %38 = vector.load %arg1[%c0_30, %37, %c0_31, %c1_32, %c0_33] : memref<2x6x1x6x32xbf16, #tpu.memory_space<vmem>>, vector<2x4x1x4x32xbf16>
    %39 = vector.shape_cast %38 : vector<2x4x1x4x32xbf16> to vector<2x4x4x32xbf16>
    %40 = vector.shape_cast %39 : vector<2x4x4x32xbf16> to vector<32x32xbf16>
    %c4 = arith.constant 4 : index
    %c0_34 = arith.constant 0 : index
    %c0_35 = arith.constant 0 : index
    %41 = vector.load %arg2[%c4, %c0_34, %c0_35] : memref<9x32x1xbf16, #tpu.memory_space<vmem>>, vector<1x32x1xbf16>
    %42 = vector.shape_cast %41 : vector<1x32x1xbf16> to vector<32x1xbf16>
    %cst_36 = arith.constant dense<0.000000e+00> : vector<32x1xf32>
    %43 = tpu.matmul %40, %42, %cst_36 {dimension_numbers = #tpu.dot_dimension_numbers<[1], [0], [0], [1], [0, 0, 1, 1], [], []>} : vector<32x32xbf16>, vector<32x1xbf16>, vector<32x1xf32> -> vector<32x1xf32>
    %44 = arith.addf %35, %43 : vector<32x1xf32>
    %c1_i32_37 = arith.constant 1 : i32
    %45 = arith.addi %0, %c1_i32_37 : i32
    %c0_38 = arith.constant 0 : index
    %46 = arith.index_cast %45 : i32 to index
    %c0_39 = arith.constant 0 : index
    %c2_40 = arith.constant 2 : index
    %c0_41 = arith.constant 0 : index
    %47 = vector.load %arg1[%c0_38, %46, %c0_39, %c2_40, %c0_41] : memref<2x6x1x6x32xbf16, #tpu.memory_space<vmem>>, vector<2x4x1x4x32xbf16>
    %48 = vector.shape_cast %47 : vector<2x4x1x4x32xbf16> to vector<2x4x4x32xbf16>
    %49 = vector.shape_cast %48 : vector<2x4x4x32xbf16> to vector<32x32xbf16>
    %c5 = arith.constant 5 : index
    %c0_42 = arith.constant 0 : index
    %c0_43 = arith.constant 0 : index
    %50 = vector.load %arg2[%c5, %c0_42, %c0_43] : memref<9x32x1xbf16, #tpu.memory_space<vmem>>, vector<1x32x1xbf16>
    %51 = vector.shape_cast %50 : vector<1x32x1xbf16> to vector<32x1xbf16>
    %cst_44 = arith.constant dense<0.000000e+00> : vector<32x1xf32>
    %52 = tpu.matmul %49, %51, %cst_44 {dimension_numbers = #tpu.dot_dimension_numbers<[1], [0], [0], [1], [0, 0, 1, 1], [], []>} : vector<32x32xbf16>, vector<32x1xbf16>, vector<32x1xf32> -> vector<32x1xf32>
    %53 = arith.addf %44, %52 : vector<32x1xf32>
    %c2_i32 = arith.constant 2 : i32
    %54 = arith.addi %0, %c2_i32 : i32
    %c0_45 = arith.constant 0 : index
    %55 = arith.index_cast %54 : i32 to index
    %c0_46 = arith.constant 0 : index
    %c0_47 = arith.constant 0 : index
    %c0_48 = arith.constant 0 : index
    %56 = vector.load %arg1[%c0_45, %55, %c0_46, %c0_47, %c0_48] : memref<2x6x1x6x32xbf16, #tpu.memory_space<vmem>>, vector<2x4x1x4x32xbf16>
    %57 = vector.shape_cast %56 : vector<2x4x1x4x32xbf16> to vector<2x4x4x32xbf16>
    %58 = vector.shape_cast %57 : vector<2x4x4x32xbf16> to vector<32x32xbf16>
    %c6 = arith.constant 6 : index
    %c0_49 = arith.constant 0 : index
    %c0_50 = arith.constant 0 : index
    %59 = vector.load %arg2[%c6, %c0_49, %c0_50] : memref<9x32x1xbf16, #tpu.memory_space<vmem>>, vector<1x32x1xbf16>
    %60 = vector.shape_cast %59 : vector<1x32x1xbf16> to vector<32x1xbf16>
    %cst_51 = arith.constant dense<0.000000e+00> : vector<32x1xf32>
    %61 = tpu.matmul %58, %60, %cst_51 {dimension_numbers = #tpu.dot_dimension_numbers<[1], [0], [0], [1], [0, 0, 1, 1], [], []>} : vector<32x32xbf16>, vector<32x1xbf16>, vector<32x1xf32> -> vector<32x1xf32>
    %62 = arith.addf %53, %61 : vector<32x1xf32>
    %c2_i32_52 = arith.constant 2 : i32
    %63 = arith.addi %0, %c2_i32_52 : i32
    %c0_53 = arith.constant 0 : index
    %64 = arith.index_cast %63 : i32 to index
    %c0_54 = arith.constant 0 : index
    %c1_55 = arith.constant 1 : index
    %c0_56 = arith.constant 0 : index
    %65 = vector.load %arg1[%c0_53, %64, %c0_54, %c1_55, %c0_56] : memref<2x6x1x6x32xbf16, #tpu.memory_space<vmem>>, vector<2x4x1x4x32xbf16>
    %66 = vector.shape_cast %65 : vector<2x4x1x4x32xbf16> to vector<2x4x4x32xbf16>
    %67 = vector.shape_cast %66 : vector<2x4x4x32xbf16> to vector<32x32xbf16>
    %c7 = arith.constant 7 : index
    %c0_57 = arith.constant 0 : index
    %c0_58 = arith.constant 0 : index
    %68 = vector.load %arg2[%c7, %c0_57, %c0_58] : memref<9x32x1xbf16, #tpu.memory_space<vmem>>, vector<1x32x1xbf16>
    %69 = vector.shape_cast %68 : vector<1x32x1xbf16> to vector<32x1xbf16>
    %cst_59 = arith.constant dense<0.000000e+00> : vector<32x1xf32>
    %70 = tpu.matmul %67, %69, %cst_59 {dimension_numbers = #tpu.dot_dimension_numbers<[1], [0], [0], [1], [0, 0, 1, 1], [], []>} : vector<32x32xbf16>, vector<32x1xbf16>, vector<32x1xf32> -> vector<32x1xf32>
    %71 = arith.addf %62, %70 : vector<32x1xf32>
    %c2_i32_60 = arith.constant 2 : i32
    %72 = arith.addi %0, %c2_i32_60 : i32
    %c0_61 = arith.constant 0 : index
    %73 = arith.index_cast %72 : i32 to index
    %c0_62 = arith.constant 0 : index
    %c2_63 = arith.constant 2 : index
    %c0_64 = arith.constant 0 : index
    %74 = vector.load %arg1[%c0_61, %73, %c0_62, %c2_63, %c0_64] : memref<2x6x1x6x32xbf16, #tpu.memory_space<vmem>>, vector<2x4x1x4x32xbf16>
    %75 = vector.shape_cast %74 : vector<2x4x1x4x32xbf16> to vector<2x4x4x32xbf16>
    %76 = vector.shape_cast %75 : vector<2x4x4x32xbf16> to vector<32x32xbf16>
    %c8 = arith.constant 8 : index
    %c0_65 = arith.constant 0 : index
    %c0_66 = arith.constant 0 : index
    %77 = vector.load %arg2[%c8, %c0_65, %c0_66] : memref<9x32x1xbf16, #tpu.memory_space<vmem>>, vector<1x32x1xbf16>
    %78 = vector.shape_cast %77 : vector<1x32x1xbf16> to vector<32x1xbf16>
    %cst_67 = arith.constant dense<0.000000e+00> : vector<32x1xf32>
    %79 = tpu.matmul %76, %78, %cst_67 {dimension_numbers = #tpu.dot_dimension_numbers<[1], [0], [0], [1], [0, 0, 1, 1], [], []>} : vector<32x32xbf16>, vector<32x1xbf16>, vector<32x1xf32> -> vector<32x1xf32>
    %80 = arith.addf %71, %79 : vector<32x1xf32>
    %c0_68 = arith.constant 0 : index
    %c0_69 = arith.constant 0 : index
    %81 = vector.load %arg3[%c0_68, %c0_69] : memref<1x1xf32, #tpu.memory_space<vmem>>, vector<1x1xf32>
    %82 = vector.broadcast %81 : vector<1x1xf32> to vector<32x1xf32>
    %83 = arith.addf %80, %82 : vector<32x1xf32>
    %84 = vector.shape_cast %83 : vector<32x1xf32> to vector<2x16x1xf32>
    %c0_70 = arith.constant 0 : index
    %c0_71 = arith.constant 0 : index
    %c0_72 = arith.constant 0 : index
    %85 = vector.load %arg4[%c0_70, %c0_71, %c0_72] : memref<2x16x1xf32, #tpu.memory_space<vmem>>, vector<2x16x1xf32>
    tpu.vector_store %arg4[%c0_70, %c0_71, %c0_72], %84 {strides = array<i32>} : memref<2x16x1xf32, #tpu.memory_space<vmem>>, vector<2x16x1xf32>,
    return
  }
  func.func @transform_0(%arg0: i32) -> (i32, i32, i32, i32, i32) {
    %c0_i32 = arith.constant 0 : i32
    %c0_i32_0 = arith.constant 0 : i32
    %c0_i32_1 = arith.constant 0 : i32
    %c0_i32_2 = arith.constant 0 : i32
    %c0_i32_3 = arith.constant 0 : i32
    %c0_i32_4 = arith.constant 0 : i32
    return %c0_i32, %c0_i32_0, %c0_i32_1, %c0_i32_2, %c0_i32_3 : i32, i32, i32, i32, i32
  }
  func.func @transform_1(%arg0: i32) -> (i32, i32, i32) {
    %c0_i32 = arith.constant 0 : i32
    %c0_i32_0 = arith.constant 0 : i32
    %c0_i32_1 = arith.constant 0 : i32
    %c0_i32_2 = arith.constant 0 : i32
    return %c0_i32, %c0_i32_0, %c0_i32_1 : i32, i32, i32
  }
  func.func @transform_2(%arg0: i32) -> (i32, i32) {
    %c0_i32 = arith.constant 0 : i32
    %c0_i32_0 = arith.constant 0 : i32
    %c0_i32_1 = arith.constant 0 : i32
    return %c0_i32, %c0_i32_0 : i32, i32
  }
  func.func @transform_3(%arg0: i32) -> (i32, i32, i32) {
    %c0_i32 = arith.constant 0 : i32
    %c0_i32_0 = arith.constant 0 : i32
    %c0_i32_1 = arith.constant 0 : i32
    return %c0_i32, %arg0, %c0_i32_0 : i32, i32, i32
  }
}

</mosaic_0001>

<bundles_post_ra>
// kernel: discriminator_forward.5
= control target key start
LH: loop header
LB: loop body
LE: loop exit
PB: predicated region body
PF: predicated region fallthrough
CT: control target
= control target key end

     0   :  { %vm53_vm0 = vsmask.f32 3328  ;;  %vm313_vm1 = vcmask 130048   ;;  %vm54_vm2 = vsmask.f32 7440  ;;  %vm2180_vm4 = vcmask 125952   ;;  %s3581_s1 = inlined_call_operand.vmem [shape: bf16[8,16,16], index: 1, kind: input, shape index: {}]   ;;  %s3582_s0 = inlined_call_operand.vmem [shape: bf16[2,9,2,9,16], index: 0, kind: input, shape index: {}]   ;;  %s3583_s2 = inlined_call_operand.vmem [shape: f32[1,16], index: 2, kind: input, shape index: {}]   ;;  %s3584_s3 = inlined_call_operand.vmem [shape: bf16[2,64,16], index: 3, kind: output, shape index: {}]  }
   0x1   :  { %v2604_v0 = vld [vmem:[%s3581_s1 + $0x10] sm:$0xff]  ;;  %v2594_v1 = vld [vmem:[%s3581_s1] sm:$0xff]  ;;  %v2282_v2 = vld [vmem:[%s3582_s0 + $0x8] sm:$0xf] }
   0x2   :  { %v2596_v3 = vld [vmem:[%s3582_s0 + $0x14] sm:$0xf0]  ;;  %v2220_v4 = vld [vmem:[%s3582_s0] sm:$0xf]  ;;  %v2586_v5 = vld [vmem:[%s3582_s0 + $0xc] sm:$0xf0]  ;;  %605 = vmatpush.bf16.msra.mxu2 %v2604_v0  ;;  %464 = vmatpush.bf16.msra.mxu1 %v2594_v1 }
   0x3   :  { %v2283_v6 = vor.u32 %v2596_v3, %v2282_v2  ;;  %v2221_v7 = vor.u32 %v2586_v5, %v2220_v4  ;;  %v2595_v8 = vld [vmem:[%s3581_s1 + $0x8] sm:$0xff]  ;;  %v2605_v9 = vld [vmem:[%s3581_s1 + $0x18] sm:$0xff]  ;;  %v2624_v10 = vld [vmem:[%s3581_s1 + $0x30] sm:$0xff] }
   0x4   :  { %v19_v11 = vld [vmem:[%s3582_s0] sm:$0xf]  ;;  %v20_v12 = vld [vmem:[%s3582_s0 + $0x10] sm:$0xf]  ;;  %v37_v13 = vld [vmem:[%s3582_s0 + $0x4] sm:$0x1]  ;;  %345 = vmatpush.bf16.msra.mxu0 %v2595_v8  ;;  %983 = vmatpush.bf16.msra.mxu3 %v2605_v9 }
   0x5   :  { %v38_v14 = vld [vmem:[%s3582_s0 + $0x14] sm:$0x1]  ;;  %v57_v15 = vshrl.u32 %v19_v11, 16  ;;  %v60_v16 = vshll.u32 %v19_v11, 16  ;;  %v66_v17 = vshll.u32 %v37_v13, 16  ;;  %v71_v18 = vshrl.u32 %v20_v12, 16  ;;  %2316 = vmatmul.msk.bf16.vlgmr.msra.gmra.mxu2 %vm313_vm1, %v2283_v6  ;;  %2254 = vmatmul.msk.bf16.vlgmr.msra.gmra.mxu1 %vm313_vm1, %v2221_v7  ;;  %vm2711_vm3 = vmor %vm53_vm0, %vm54_vm2 }
   0x6   :  { %v74_v19 = vshll.u32 %v20_v12, 16  ;;  %v80_v20 = vshll.u32 %v38_v14, 16  ;;  %v2324_v21 = vld [vmem:[%s3582_s0 + $0x8] sm:$0xf]  ;;  %v2325_v22 = vld [vmem:[%s3582_s0 + $0xc] sm:$0x1]  ;;  %1676 = vmatpush.bf16.msrb.mxu2 %v2624_v10 }
   0x7   :  { %v59_v23 = vrot.slane %v57_v15, 4  ;;  %v62_v24 = vrot.slane %v60_v16, 5  ;;  %v68_v25 = vrot.slane %v66_v17, 5  ;;  %v73_v26 = vrot.slane %v71_v18, 4  ;;  %v2326_v27 = vld [vmem:[%s3582_s0 + $0x18] sm:$0xf] }
   0x8   :  { %v76_v28 = vrot.slane %v74_v19, 5  ;;  %v82_v29 = vrot.slane %v80_v20, 5  ;;  %v2327_v30 = vld [vmem:[%s3582_s0 + $0x1c] sm:$0x1]  ;;  %v696_v31 = vshrl.u32 %v2324_v21, 16  ;;  %v699_v32 = vshll.u32 %v2324_v21, 16 }
   0x9   :  { %v63_v33 = vor.u32 %v62_v24, %v59_v23  ;;  %v705_v34 = vshll.u32 %v2325_v22, 16  ;;  %v710_v35 = vshrl.u32 %v2326_v27, 16  ;;  %v713_v36 = vshll.u32 %v2326_v27, 16  ;;  %v2614_v37 = vld [vmem:[%s3581_s1 + $0x20] sm:$0xff]  ;;  %v2625_v38 = vld [vmem:[%s3581_s1 + $0x38] sm:$0xff]  ;;  %v2615_v39 = vld [vmem:[%s3581_s1 + $0x28] sm:$0xff] }
   0xa   :  { %v77_v41 = vor.u32 %v76_v28, %v73_v26  ;;  %v698_v42 = vrot.slane %v696_v31, 4  ;;  %v701_v43 = vrot.slane %v699_v32, 5  ;;  %v719_v44 = vshll.u32 %v2327_v30, 16  ;;  %v2286_v45 = vld [vmem:[%s3582_s0 + $0x28] sm:$0xf]  ;;  %1141 = vmatpush.bf16.msrb.mxu0 %v2614_v37  ;;  %2054 = vmatpush.bf16.msrb.mxu3 %v2625_v38 }
   0xb   :  { %v64_v46 = vrot.slane %v63_v33, 4  ;;  %v707_v47 = vrot.slane %v705_v34, 5  ;;  %v712_v48 = vrot.slane %v710_v35, 4  ;;  %v715_v49 = vrot.slane %v713_v36, 5  ;;  %v2597_v50 = vld [vmem:[%s3582_s0 + $0x34] sm:$0xf0]  ;;  %1519 = vmatpush.bf16.msrb.mxu1 %v2615_v39 }
   0xc   :  { %v78_v51 = vrot.slane %v77_v41, 4  ;;  %v702_v52 = vor.u32 %v701_v43, %v698_v42  ;;  %v721_v53 = vrot.slane %v719_v44, 5  ;;  %v2224_v54 = vld [vmem:[%s3582_s0 + $0x20] sm:$0xf]  ;;  %v2587_v55 = vld [vmem:[%s3582_s0 + $0x2c] sm:$0xf0]  ;;  %v2287_v58 = vor.u32 %v2597_v50, %v2286_v45 }
   0xd   :  { %v69_v56 = vsel %vm2711_vm3, %v64_v46, %v68_v25  ;;  %v716_v57 = vor.u32 %v715_v49, %v712_v48  ;;  %v2225_v59 = vor.u32 %v2587_v55, %v2224_v54  ;;  %v21_v60 = vld [vmem:[%s3582_s0 + $0x20] sm:$0xf]  ;;  %v22_v61 = vld [vmem:[%s3582_s0 + $0x30] sm:$0xf]  ;;  %v39_v62 = vld [vmem:[%s3582_s0 + $0x24] sm:$0x1] }
   0xe   :  { %v83_v63 = vsel %vm2711_vm3, %v78_v51, %v82_v29  ;;  %v283_v0 = vunpack.c.l.b16 %v69_v56  ;;  %v703_v1 = vrot.slane %v702_v52, 4  ;;  %v85_v2 = vshrl.u32 %v21_v60, 16  ;;  %v40_v5 = vld [vmem:[%s3582_s0 + $0x34] sm:$0x1]  ;;  %v2328_v12 = vld [vmem:[%s3582_s0 + $0x28] sm:$0xf] }
   0xf   :  { %v284_v3 = vunpack.c.l.b16 %v83_v63  ;;  %v717_v4 = vrot.slane %v716_v57, 4  ;;  %v88_v6 = vshll.u32 %v21_v60, 16  ;;  %v94_v7 = vshll.u32 %v39_v62, 16  ;;  %v2329_v17 = vld [vmem:[%s3582_s0 + $0x2c] sm:$0x1] }
  0x10   :  { %v708_v8 = vsel %vm2711_vm3, %v703_v1, %v707_v47  ;;  %v87_v9 = vrot.slane %v85_v2, 4  ;;  %v99_v10 = vshrl.u32 %v22_v61, 16  ;;  %v102_v11 = vshll.u32 %v22_v61, 16  ;;  %v2330_v18 = vld [vmem:[%s3582_s0 + $0x38] sm:$0xf] }
  0x11   :  { %v299_v13 = vpack.c.b16 %v284_v3, %v283_v0  ;;  %v722_v14 = vsel %vm2711_vm3, %v717_v4, %v721_v53  ;;  %v922_v15 = vunpack.c.l.b16 %v708_v8  ;;  %v90_v16 = vrot.slane %v88_v6, 5  ;;  %v2331_v29 = vld [vmem:[%s3582_s0 + $0x3c] sm:$0x1]  ;;  %v23_v39 = vld [vmem:[%s3582_s0 + $0x40] sm:$0xf] }
  0x12   :  { %v923_v19 = vunpack.c.l.b16 %v722_v14  ;;  %v96_v20 = vrot.slane %v94_v7, 5  ;;  %v101_v21 = vrot.slane %v99_v10, 4  ;;  %v104_v22 = vrot.slane %v102_v11, 5  ;;  %v24_v44 = vld [vmem:[%s3582_s0 + $0x50] sm:$0xf] }
  0x13   :  { %2210 = vmatmul.msk.bf16.vlgmr.msra.gmra.mxu0 %vm313_vm1, %v299_v13  ;;  %v91_v23 = vor.u32 %v90_v16, %v87_v9  ;;  %v108_v24 = vshll.u32 %v40_v5, 16  ;;  %v724_v25 = vshrl.u32 %v2328_v12, 16  ;;  %v727_v26 = vshll.u32 %v2328_v12, 16  ;;  %v2332_v54 = vld [vmem:[%s3582_s0 + $0x48] sm:$0xf] }
  0x14   :  { %v938_v27 = vpack.c.b16 %v923_v19, %v922_v15  ;;  %v105_v28 = vor.u32 %v104_v22, %v101_v21  ;;  %v733_v30 = vshll.u32 %v2329_v17, 16  ;;  %v738_v31 = vshrl.u32 %v2330_v18, 16  ;;  %v42_v61 = vld [vmem:[%s3582_s0 + $0x54] sm:$0x1]  ;;  %v2334_v2 = vld [vmem:[%s3582_s0 + $0x58] sm:$0xf] }
  0x15   :  { %v92_v32 = vrot.slane %v91_v23, 4  ;;  %v110_v33 = vrot.slane %v108_v24, 5  ;;  %v726_v34 = vrot.slane %v724_v25, 4  ;;  %v729_v35 = vrot.slane %v727_v26, 5  ;;  %2317 = vmatmul.msk.bf16.gmra.mxu2 %vm313_vm1, %v2287_v58  ;;  %2255 = vmatmul.msk.bf16.gmra.mxu1 %vm313_vm1, %v2225_v59  ;;  %v41_v58 = vld [vmem:[%s3582_s0 + $0x44] sm:$0x1] }
  0x16   :  { %2362 = vmatmul.msk.bf16.vlgmr.msra.gmra.mxu3 %vm313_vm1, %v938_v27  ;;  %v106_v36 = vrot.slane %v105_v28, 4  ;;  %v740_v37 = vrot.slane %v738_v31, 4  ;;  %v741_v38 = vshll.u32 %v2330_v18, 16  ;;  %v735_v42 = vrot.slane %v733_v30, 5  ;;  %v2290_v6 = vld [vmem:[%s3582_s0 + $0x48] sm:$0xf] }
  0x17   :  { %v730_v41 = vor.u32 %v729_v35, %v726_v34  ;;  %v747_v43 = vshll.u32 %v2331_v29, 16  ;;  %v97_v45 = vsel %vm2711_vm3, %v92_v32, %v96_v20  ;;  %v113_v49 = vshrl.u32 %v23_v39, 16  ;;  %v2333_v8 = vld [vmem:[%s3582_s0 + $0x4c] sm:$0x1]  ;;  %v2598_v12 = vld [vmem:[%s3582_s0 + $0x54] sm:$0xf0] }
  0x18   :  { %v111_v46 = vsel %vm2711_vm3, %v106_v36, %v110_v33  ;;  %v743_v47 = vrot.slane %v741_v38, 5  ;;  %v116_v52 = vshll.u32 %v23_v39, 16  ;;  %v127_v53 = vshrl.u32 %v24_v44, 16  ;;  %v2228_v13 = vld [vmem:[%s3582_s0 + $0x40] sm:$0xf] }
  0x19   :  { %v731_v48 = vrot.slane %v730_v41, 4  ;;  %v749_v51 = vrot.slane %v747_v43, 5  ;;  %v285_v55 = vunpack.c.l.b16 %v97_v45  ;;  %v286_v56 = vunpack.c.l.b16 %v111_v46  ;;  %v2588_v16 = vld [vmem:[%s3582_s0 + $0x4c] sm:$0xf0]  ;;  %v2335_v19 = vld [vmem:[%s3582_s0 + $0x5c] sm:$0x1] }
  0x1a   :  { %v744_v50 = vor.u32 %v743_v47, %v740_v37  ;;  %v130_v59 = vshll.u32 %v24_v44, 16  ;;  %v115_v62 = vrot.slane %v113_v49, 4  ;;  %v118_v63 = vrot.slane %v116_v52, 5  ;;  %v25_v31 = vld [vmem:[%s3582_s0 + $0x60] sm:$0xf] }
  0x1b   :  { %v736_v57 = vsel %vm2711_vm3, %v731_v48, %v735_v42  ;;  %v129_v0 = vrot.slane %v127_v53, 4  ;;  %v752_v3 = vshrl.u32 %v2332_v54, 16  ;;  %v122_v7 = vshll.u32 %v41_v58, 16  ;;  %v26_v32 = vld [vmem:[%s3582_s0 + $0x70] sm:$0xf] }
  0x1c   :  { %v745_v60 = vrot.slane %v744_v50, 4  ;;  %v132_v1 = vrot.slane %v130_v59, 5  ;;  %v924_v5 = vunpack.c.l.b16 %v736_v57  ;;  %v755_v9 = vshll.u32 %v2332_v54, 16  ;;  %v2336_v45 = vld [vmem:[%s3582_s0 + $0x68] sm:$0xf] }
  0x1d   :  { %v300_v10 = vpack.c.b16 %v286_v56, %v285_v55  ;;  %v136_v14 = vshll.u32 %v42_v61, 16  ;;  %v754_v15 = vrot.slane %v752_v3, 4  ;;  %v119_v17 = vor.u32 %v118_v63, %v115_v62  ;;  %v2338_v50 = vld [vmem:[%s3582_s0 + $0x78] sm:$0xf]  ;;  %v43_v54 = vld [vmem:[%s3582_s0 + $0x64] sm:$0x1] }
  0x1e   :  { %v750_v4 = vsel %vm2711_vm3, %v745_v60, %v749_v51  ;;  %v133_v18 = vor.u32 %v132_v1, %v129_v0  ;;  %v757_v20 = vrot.slane %v755_v9, 5  ;;  %v766_v21 = vshrl.u32 %v2334_v2, 16  ;;  %v44_v62 = vld [vmem:[%s3582_s0 + $0x74] sm:$0x1] }
  0x1f   :  { %v925_v11 = vunpack.c.l.b16 %v750_v4  ;;  %v761_v22 = vshll.u32 %v2333_v8, 16  ;;  %v769_v23 = vshll.u32 %v2334_v2, 16  ;;  %v2291_v25 = vor.u32 %v2598_v12, %v2290_v6  ;;  %v2294_v2 = vld [vmem:[%s3582_s0 + $0x68] sm:$0xf] }
  0x20   :  { %v758_v26 = vor.u32 %v757_v20, %v754_v15  ;;  %v768_v27 = vrot.slane %v766_v21, 4  ;;  %v2229_v28 = vor.u32 %v2588_v16, %v2228_v13  ;;  %v775_v30 = vshll.u32 %v2335_v19, 16  ;;  %v2232_v15 = vld [vmem:[%s3582_s0 + $0x60] sm:$0xf]  ;;  %v2589_v16 = vld [vmem:[%s3582_s0 + $0x6c] sm:$0xf0] }
  0x21   :  { %v939_v24 = vpack.c.b16 %v925_v11, %v924_v5  ;;  %v771_v29 = vrot.slane %v769_v23, 5  ;;  %v120_v33 = vrot.slane %v119_v17, 4  ;;  %v124_v34 = vrot.slane %v122_v7, 5  ;;  %v2599_v7 = vld [vmem:[%s3582_s0 + $0x74] sm:$0xf0] }
  0x22   :  { %v134_v35 = vrot.slane %v133_v18, 4  ;;  %v138_v36 = vrot.slane %v136_v14, 5  ;;  %v759_v37 = vrot.slane %v758_v26, 4  ;;  %v763_v38 = vrot.slane %v761_v22, 5  ;;  %v2337_v11 = vld [vmem:[%s3582_s0 + $0x6c] sm:$0x1] }
  0x23   :  { %2211 = vmatmul.msk.bf16.gmra.mxu0 %vm313_vm1, %v300_v10  ;;  %v772_v39 = vor.u32 %v771_v29, %v768_v27  ;;  %v141_v41 = vshrl.u32 %v25_v31, 16  ;;  %v144_v42 = vshll.u32 %v25_v31, 16  ;;  %v155_v43 = vshrl.u32 %v26_v32, 16  ;;  %v2339_v17 = vld [vmem:[%s3582_s0 + $0x7c] sm:$0x1] }
  0x24   :  { %v158_v44 = vshll.u32 %v26_v32, 16  ;;  %v777_v47 = vrot.slane %v775_v30, 5  ;;  %v125_v48 = vsel %vm2711_vm3, %v120_v33, %v124_v34  ;;  %v139_v49 = vsel %vm2711_vm3, %v134_v35, %v138_v36  ;;  %v27_v26 = vld [vmem:[%s3582_s0 + $0x90] sm:$0xf]  ;;  %v28_v30 = vld [vmem:[%s3582_s0 + $0xa0] sm:$0xf] }
  0x25   :  { %2318 = vmatmul.msk.bf16.gmra.mxu2 %vm313_vm1, %v2291_v25  ;;  %2256 = vmatmul.msk.bf16.gmra.mxu1 %vm313_vm1, %v2229_v28  ;;  %v773_v46 = vrot.slane %v772_v39, 4  ;;  %v764_v51 = vsel %vm2711_vm3, %v759_v37, %v763_v38  ;;  %v780_v52 = vshrl.u32 %v2336_v45, 16  ;;  %v783_v53 = vshll.u32 %v2336_v45, 16 }
  0x26   :  { %2363 = vmatmul.msk.bf16.gmra.mxu3 %vm313_vm1, %v939_v24  ;;  %v143_v55 = vrot.slane %v141_v41, 4  ;;  %v146_v56 = vrot.slane %v144_v42, 5  ;;  %v157_v57 = vrot.slane %v155_v43, 4  ;;  %v160_v58 = vrot.slane %v158_v44, 5  ;;  %v2340_v42 = vld [vmem:[%s3582_s0 + $0x98] sm:$0xf] }
  0x27   :  { %v287_v59 = vunpack.c.l.b16 %v125_v48  ;;  %v288_v60 = vunpack.c.l.b16 %v139_v49  ;;  %v778_v61 = vsel %vm2711_vm3, %v773_v46, %v777_v47  ;;  %v794_v63 = vshrl.u32 %v2338_v50, 16  ;;  %v2342_v43 = vld [vmem:[%s3582_s0 + $0xa8] sm:$0xf]  ;;  %v45_v48 = vld [vmem:[%s3582_s0 + $0x94] sm:$0x1] }
  0x28   :  { %v797_v0 = vshll.u32 %v2338_v50, 16  ;;  %v926_v1 = vunpack.c.l.b16 %v764_v51  ;;  %v150_v3 = vshll.u32 %v43_v54, 16  ;;  %v782_v4 = vrot.slane %v780_v52, 4 }
  0x29   :  { %v785_v5 = vrot.slane %v783_v53, 5  ;;  %v927_v6 = vunpack.c.l.b16 %v778_v61  ;;  %v147_v8 = vor.u32 %v146_v56, %v143_v55  ;;  %v161_v9 = vor.u32 %v160_v58, %v157_v57  ;;  %v46_v57 = vld [vmem:[%s3582_s0 + $0xa4] sm:$0x1]  ;;  %v2600_v61 = vld [vmem:[%s3582_s0 + $0xa4] sm:$0xf0] }
  0x2a   :  { %v164_v10 = vshll.u32 %v44_v62, 16  ;;  %v301_v12 = vpack.c.b16 %v288_v60, %v287_v59  ;;  %v796_v13 = vrot.slane %v794_v63, 4  ;;  %v799_v14 = vrot.slane %v797_v0, 5  ;;  %v2298_v60 = vld [vmem:[%s3582_s0 + $0x98] sm:$0xf] }
  0x2b   :  { %v2295_v18 = vor.u32 %v2599_v7, %v2294_v2  ;;  %v152_v19 = vrot.slane %v150_v3, 5  ;;  %v786_v20 = vor.u32 %v785_v5, %v782_v4  ;;  %v789_v21 = vshll.u32 %v2337_v11, 16  ;;  %v2236_v0 = vld [vmem:[%s3582_s0 + $0x90] sm:$0xf]  ;;  %v2341_v7 = vld [vmem:[%s3582_s0 + $0x9c] sm:$0x1] }
  0x2c   :  { %v940_v22 = vpack.c.b16 %v927_v6, %v926_v1  ;;  %v148_v23 = vrot.slane %v147_v8, 4  ;;  %v162_v24 = vrot.slane %v161_v9, 4  ;;  %v166_v25 = vrot.slane %v164_v10, 5  ;;  %v2590_v1 = vld [vmem:[%s3582_s0 + $0x9c] sm:$0xf0] }
  0x2d   :  { %v2233_v27 = vor.u32 %v2589_v16, %v2232_v15  ;;  %v800_v28 = vor.u32 %v799_v14, %v796_v13  ;;  %v803_v29 = vshll.u32 %v2339_v17, 16  ;;  %v787_v31 = vrot.slane %v786_v20, 4  ;;  %v2343_v10 = vld [vmem:[%s3582_s0 + $0xac] sm:$0x1] }
  0x2e   :  { %v791_v32 = vrot.slane %v789_v21, 5  ;;  %v169_v33 = vshrl.u32 %v27_v26, 16  ;;  %v153_v34 = vsel %vm2711_vm3, %v148_v23, %v152_v19  ;;  %v167_v35 = vsel %vm2711_vm3, %v162_v24, %v166_v25  ;;  %v30_v23 = vld [vmem:[%s3582_s0 + $0xc0] sm:$0xf]  ;;  %v2344_v24 = vld [vmem:[%s3582_s0 + $0xb8] sm:$0xf] }
  0x2f   :  { %v172_v36 = vshll.u32 %v27_v26, 16  ;;  %v183_v37 = vshrl.u32 %v28_v30, 16  ;;  %v801_v38 = vrot.slane %v800_v28, 4  ;;  %v805_v39 = vrot.slane %v803_v29, 5 }
  0x30   :  { %v186_v41 = vshll.u32 %v28_v30, 16  ;;  %v289_v44 = vunpack.c.l.b16 %v153_v34  ;;  %v290_v45 = vunpack.c.l.b16 %v167_v35  ;;  %v792_v46 = vsel %vm2711_vm3, %v787_v31, %v791_v32  ;;  %v2346_v35 = vld [vmem:[%s3582_s0 + $0xc8] sm:$0xf] }
  0x31   :  { %v171_v47 = vrot.slane %v169_v33, 4  ;;  %v174_v49 = vrot.slane %v172_v36, 5  ;;  %v185_v50 = vrot.slane %v183_v37, 4  ;;  %v808_v51 = vshrl.u32 %v2340_v42, 16 }
  0x32   :  { %v811_v52 = vshll.u32 %v2340_v42, 16  ;;  %v806_v53 = vsel %vm2711_vm3, %v801_v38, %v805_v39  ;;  %v188_v54 = vrot.slane %v186_v41, 5  ;;  %v822_v55 = vshrl.u32 %v2342_v43, 16 }
  0x33   :  { %2212 = vmatmul.msk.bf16.gmra.mxu0 %vm313_vm1, %v301_v12  ;;  %v825_v56 = vshll.u32 %v2342_v43, 16  ;;  %v302_v58 = vpack.c.b16 %v290_v45, %v289_v44  ;;  %v928_v59 = vunpack.c.l.b16 %v792_v46  ;;  %v178_v62 = vshll.u32 %v45_v48, 16  ;;  %v47_v44 = vld [vmem:[%s3582_s0 + $0xb4] sm:$0x1]  ;;  %v48_v48 = vld [vmem:[%s3582_s0 + $0xc4] sm:$0x1] }
  0x34   :  { %v929_v63 = vunpack.c.l.b16 %v806_v53  ;;  %v175_v2 = vor.u32 %v174_v49, %v171_v47  ;;  %v810_v3 = vrot.slane %v808_v51, 4  ;;  %v813_v4 = vrot.slane %v811_v52, 5  ;;  %v2302_v53 = vld [vmem:[%s3582_s0 + $0xb8] sm:$0xf] }
  0x35   :  { %2319 = vmatmul.msk.bf16.gmra.mxu2 %vm313_vm1, %v2295_v18  ;;  %2257 = vmatmul.msk.bf16.gmra.mxu1 %vm313_vm1, %v2233_v27  ;;  %v189_v5 = vor.u32 %v188_v54, %v185_v50  ;;  %v192_v6 = vshll.u32 %v46_v57, 16  ;;  %v824_v8 = vrot.slane %v822_v55, 4  ;;  %v827_v9 = vrot.slane %v825_v56, 5  ;;  %v2345_v54 = vld [vmem:[%s3582_s0 + $0xbc] sm:$0x1] }
  0x36   :  { %2364 = vmatmul.msk.bf16.gmra.mxu3 %vm313_vm1, %v940_v22  ;;  %v2299_v11 = vor.u32 %v2600_v61, %v2298_v60  ;;  %v2237_v12 = vor.u32 %v2590_v1, %v2236_v0  ;;  %v180_v13 = vrot.slane %v178_v62, 5  ;;  %v941_v14 = vpack.c.b16 %v929_v63, %v928_v59  ;;  %v29_v22 = vld [vmem:[%s3582_s0 + $0xb0] sm:$0xf]  ;;  %v2601_v57 = vld [vmem:[%s3582_s0 + $0xc4] sm:$0xf0] }
  0x37   :  { %v176_v15 = vrot.slane %v175_v2, 4  ;;  %v814_v16 = vor.u32 %v813_v4, %v810_v3  ;;  %v817_v17 = vshll.u32 %v2341_v7, 16  ;;  %v190_v18 = vrot.slane %v189_v5, 4  ;;  %v2591_v61 = vld [vmem:[%s3582_s0 + $0xbc] sm:$0xf0] }
  0x38   :  { %v194_v19 = vrot.slane %v192_v6, 5  ;;  %v828_v20 = vor.u32 %v827_v9, %v824_v8  ;;  %v831_v21 = vshll.u32 %v2343_v10, 16  ;;  %v197_v28 = vshrl.u32 %v29_v22, 16  ;;  %v2347_v3 = vld [vmem:[%s3582_s0 + $0xcc] sm:$0x1] }
  0x39   :  { %v181_v25 = vsel %vm2711_vm3, %v176_v15, %v180_v13  ;;  %v815_v26 = vrot.slane %v814_v16, 4  ;;  %v819_v27 = vrot.slane %v817_v17, 5  ;;  %v200_v32 = vshll.u32 %v29_v22, 16  ;;  %v31_v9 = vld [vmem:[%s3582_s0 + $0xd0] sm:$0xf] }
  0x3a   :  { %v195_v29 = vsel %vm2711_vm3, %v190_v18, %v194_v19  ;;  %v829_v30 = vrot.slane %v828_v20, 4  ;;  %v833_v31 = vrot.slane %v831_v21, 5  ;;  %v211_v33 = vshrl.u32 %v30_v23, 16 }
  0x3b   :  { %v214_v34 = vshll.u32 %v30_v23, 16  ;;  %v836_v36 = vshrl.u32 %v2344_v24, 16  ;;  %v839_v37 = vshll.u32 %v2344_v24, 16  ;;  %v291_v38 = vunpack.c.l.b16 %v181_v25  ;;  %v2348_v23 = vld [vmem:[%s3582_s0 + $0xd8] sm:$0xf] }
  0x3c   :  { %v292_v39 = vunpack.c.l.b16 %v195_v29  ;;  %v820_v41 = vsel %vm2711_vm3, %v815_v26, %v819_v27  ;;  %v199_v42 = vrot.slane %v197_v28, 4  ;;  %v834_v43 = vsel %vm2711_vm3, %v829_v30, %v833_v31  ;;  %v2350_v24 = vld [vmem:[%s3582_s0 + $0xe8] sm:$0xf]  ;;  %v49_v30 = vld [vmem:[%s3582_s0 + $0xd4] sm:$0x1] }
  0x3d   :  { %v202_v45 = vrot.slane %v200_v32, 5  ;;  %v850_v46 = vshrl.u32 %v2346_v35, 16  ;;  %v853_v47 = vshll.u32 %v2346_v35, 16  ;;  %v213_v49 = vrot.slane %v211_v33, 4 }
  0x3e   :  { %v216_v50 = vrot.slane %v214_v34, 5  ;;  %v838_v51 = vrot.slane %v836_v36, 4  ;;  %v841_v52 = vrot.slane %v839_v37, 5  ;;  %v930_v55 = vunpack.c.l.b16 %v820_v41 }
  0x3f   :  { %v931_v56 = vunpack.c.l.b16 %v834_v43  ;;  %v206_v59 = vshll.u32 %v47_v44, 16  ;;  %v303_v60 = vpack.c.b16 %v292_v39, %v291_v38  ;;  %v220_v62 = vshll.u32 %v48_v48, 16  ;;  %v2306_v43 = vld [vmem:[%s3582_s0 + $0xd8] sm:$0xf]  ;;  %v50_v44 = vld [vmem:[%s3582_s0 + $0xe4] sm:$0x1] }
  0x40   :  { %v852_v63 = vrot.slane %v850_v46, 4  ;;  %v855_v0 = vrot.slane %v853_v47, 5  ;;  %v203_v1 = vor.u32 %v202_v45, %v199_v42  ;;  %v217_v2 = vor.u32 %v216_v50, %v213_v49  ;;  %v2602_v46 = vld [vmem:[%s3582_s0 + $0xe4] sm:$0xf0]  ;;  %v2244_v47 = vld [vmem:[%s3582_s0 + $0xd0] sm:$0xf] }
  0x41   :  { %v842_v4 = vor.u32 %v841_v52, %v838_v51  ;;  %v845_v5 = vshll.u32 %v2345_v54, 16  ;;  %v942_v6 = vpack.c.b16 %v931_v56, %v930_v55  ;;  %v2303_v7 = vor.u32 %v2601_v57, %v2302_v53  ;;  %v2592_v49 = vld [vmem:[%s3582_s0 + $0xdc] sm:$0xf0] }
  0x42   :  { %v208_v10 = vrot.slane %v206_v59, 5  ;;  %v859_v13 = vshll.u32 %v2347_v3, 16  ;;  %v204_v15 = vrot.slane %v203_v1, 4  ;;  %v218_v16 = vrot.slane %v217_v2, 4  ;;  %v2351_v59 = vld [vmem:[%s3582_s0 + $0xec] sm:$0x1] }
  0x43   :  { %2213 = vmatmul.msk.bf16.gmra.mxu0 %vm313_vm1, %v302_v58  ;;  %v2240_v58 = vld [vmem:[%s3582_s0 + $0xb0] sm:$0xf]  ;;  %v843_v17 = vrot.slane %v842_v4, 4  ;;  %v847_v18 = vrot.slane %v845_v5, 5  ;;  %v225_v19 = vshrl.u32 %v31_v9, 16  ;;  %v228_v20 = vshll.u32 %v31_v9, 16 }
  0x44   :  { %v2241_v8 = vor.u32 %v2591_v61, %v2240_v58  ;;  %v861_v26 = vrot.slane %v859_v13, 5  ;;  %v209_v27 = vsel %vm2711_vm3, %v204_v15, %v208_v10  ;;  %v864_v31 = vshrl.u32 %v2348_v23, 16  ;;  %v2349_v58 = vld [vmem:[%s3582_s0 + $0xdc] sm:$0x1]  ;;  %v34_v1 = vld [vmem:[%s3582_s0 + $0x100] sm:$0xf] }
  0x45   :  { %2320 = vmatmul.msk.bf16.gmra.mxu2 %vm313_vm1, %v2299_v11  ;;  %2258 = vmatmul.msk.bf16.gmra.mxu1 %vm313_vm1, %v2237_v12  ;;  %v222_v11 = vrot.slane %v220_v62, 5  ;;  %v856_v12 = vor.u32 %v855_v0, %v852_v63  ;;  %v848_v29 = vsel %vm2711_vm3, %v843_v17, %v847_v18  ;;  %v867_v32 = vshll.u32 %v2348_v23, 16  ;;  %v33_v0 = vld [vmem:[%s3582_s0 + $0xf0] sm:$0xf] }
  0x46   :  { %2365 = vmatmul.msk.bf16.gmra.mxu3 %vm313_vm1, %v941_v14  ;;  %v32_v14 = vld [vmem:[%s3582_s0 + $0xe0] sm:$0xf]  ;;  %v878_v33 = vshrl.u32 %v2350_v24, 16  ;;  %v881_v34 = vshll.u32 %v2350_v24, 16  ;;  %v227_v35 = vrot.slane %v225_v19, 4  ;;  %v230_v36 = vrot.slane %v228_v20, 5 }
  0x47   :  { %v239_v21 = vshrl.u32 %v32_v14, 16  ;;  %v242_v22 = vshll.u32 %v32_v14, 16  ;;  %v857_v25 = vrot.slane %v856_v12, 4  ;;  %v223_v28 = vsel %vm2711_vm3, %v218_v16, %v222_v11  ;;  %v51_v20 = vld [vmem:[%s3582_s0 + $0xf4] sm:$0x1] }
  0x48   :  { %v293_v39 = vunpack.c.l.b16 %v209_v27  ;;  %v294_v41 = vunpack.c.l.b16 %v223_v28  ;;  %v932_v45 = vunpack.c.l.b16 %v848_v29  ;;  %v234_v48 = vshll.u32 %v49_v30, 16  ;;  %v2354_v27 = vld [vmem:[%s3582_s0 + $0x108] sm:$0xf] }
  0x49   :  { %v241_v37 = vrot.slane %v239_v21, 4  ;;  %v244_v38 = vrot.slane %v242_v22, 5  ;;  %v862_v42 = vsel %vm2711_vm3, %v857_v25, %v861_v26  ;;  %v866_v50 = vrot.slane %v864_v31, 4  ;;  %v52_v21 = vld [vmem:[%s3582_s0 + $0x104] sm:$0x1] }
  0x4a   :  { %v869_v51 = vrot.slane %v867_v32, 5  ;;  %v880_v52 = vrot.slane %v878_v33, 4  ;;  %v883_v53 = vrot.slane %v881_v34, 5  ;;  %v933_v54 = vunpack.c.l.b16 %v862_v42  ;;  %v2352_v26 = vld [vmem:[%s3582_s0 + $0xf8] sm:$0xf] }
  0x4b   :  { %v231_v55 = vor.u32 %v230_v36, %v227_v35  ;;  %v245_v56 = vor.u32 %v244_v38, %v241_v37  ;;  %v248_v57 = vshll.u32 %v50_v44, 16  ;;  %v2307_v61 = vor.u32 %v2602_v46, %v2306_v43  ;;  %v2432_v32 = vld [vmem:[%s3582_s0 + $0x10] sm:$0xf]  ;;  %v2434_v33 = vld [vmem:[%s3582_s0 + $0x20] sm:$0xf] }
  0x4c   :  { %v2245_v62 = vor.u32 %v2592_v49, %v2244_v47  ;;  %v236_v63 = vrot.slane %v234_v48, 5  ;;  %v870_v2 = vor.u32 %v869_v51, %v866_v50  ;;  %v873_v3 = vshll.u32 %v2349_v58, 16  ;;  %v2310_v43 = vld [vmem:[%s3582_s0 + $0xf8] sm:$0xf]  ;;  %v2603_v51 = vld [vmem:[%s3582_s0 + $0x104] sm:$0xf0] }
  0x4d   :  { %v884_v4 = vor.u32 %v883_v53, %v880_v52  ;;  %v887_v5 = vshll.u32 %v2351_v59, 16  ;;  %v250_v9 = vrot.slane %v248_v57, 5  ;;  %v253_v10 = vshrl.u32 %v33_v0, 16  ;;  %v2248_v52 = vld [vmem:[%s3582_s0 + $0xf0] sm:$0xf] }
  0x4e   :  { %v256_v11 = vshll.u32 %v33_v0, 16  ;;  %v267_v12 = vshrl.u32 %v34_v1, 16  ;;  %v270_v13 = vshll.u32 %v34_v1, 16  ;;  %v871_v14 = vrot.slane %v870_v2, 4  ;;  %v2593_v53 = vld [vmem:[%s3582_s0 + $0xfc] sm:$0xf0] }
  0x4f   :  { %v875_v15 = vrot.slane %v873_v3, 5  ;;  %v885_v16 = vrot.slane %v884_v4, 4  ;;  %v889_v17 = vrot.slane %v887_v5, 5  ;;  %v255_v22 = vrot.slane %v253_v10, 4  ;;  %v2433_v5 = vld [vmem:[%s3582_s0 + $0x14] sm:$0x1] }
  0x50   :  { %v258_v23 = vrot.slane %v256_v11, 5  ;;  %v269_v24 = vrot.slane %v267_v12, 4  ;;  %v272_v25 = vrot.slane %v270_v13, 5  ;;  %v262_v34 = vshll.u32 %v51_v20, 16 }
  0x51   :  { %v876_v30 = vsel %vm2711_vm3, %v871_v14, %v875_v15  ;;  %v890_v31 = vsel %vm2711_vm3, %v885_v16, %v889_v17  ;;  %v276_v35 = vshll.u32 %v52_v21, 16  ;;  %v892_v36 = vshrl.u32 %v2352_v26, 16  ;;  %v2540_v21 = vld [vmem:[%s3582_s0 + $0x18] sm:$0xf] }
  0x52   :  { %v895_v37 = vshll.u32 %v2352_v26, 16  ;;  %v259_v38 = vor.u32 %v258_v23, %v255_v22  ;;  %v909_v42 = vshll.u32 %v2354_v27, 16  ;;  %v1232_v44 = vshrl.u32 %v2432_v32, 16  ;;  %v2542_v22 = vld [vmem:[%s3582_s0 + $0x28] sm:$0xf] }
  0x53   :  { %2214 = vmatmul.msk.bf16.gmra.mxu0 %vm313_vm1, %v303_v60  ;;  %v304_v60 = vpack.c.b16 %v294_v41, %v293_v39  ;;  %v273_v39 = vor.u32 %v272_v25, %v269_v24  ;;  %v906_v41 = vshrl.u32 %v2354_v27, 16  ;;  %v1246_v46 = vshrl.u32 %v2434_v33, 16  ;;  %v2436_v27 = vld [vmem:[%s3582_s0 + $0x30] sm:$0xf] }
  0x54   :  { %v1249_v47 = vshll.u32 %v2434_v33, 16  ;;  %v934_v49 = vunpack.c.l.b16 %v876_v30  ;;  %v935_v50 = vunpack.c.l.b16 %v890_v31  ;;  %v894_v57 = vrot.slane %v892_v36, 4 }
  0x55   :  { %2321 = vmatmul.msk.bf16.gmra.mxu2 %vm313_vm1, %v2303_v7  ;;  %2259 = vmatmul.msk.bf16.gmra.mxu1 %vm313_vm1, %v2241_v8  ;;  %v232_v7 = vrot.slane %v231_v55, 4  ;;  %v246_v8 = vrot.slane %v245_v56, 4  ;;  %v278_v55 = vrot.slane %v276_v35, 5  ;;  %v2353_v56 = vld [vmem:[%s3582_s0 + $0xfc] sm:$0x1]  ;;  %v897_v58 = vrot.slane %v895_v37, 5 }
  0x56   :  { %2366 = vmatmul.msk.bf16.gmra.mxu3 %vm313_vm1, %v942_v6  ;;  %v943_v6 = vpack.c.b16 %v933_v54, %v932_v45  ;;  %v1235_v45 = vshll.u32 %v2432_v32, 16  ;;  %v264_v54 = vrot.slane %v262_v34, 5  ;;  %v260_v59 = vrot.slane %v259_v38, 4  ;;  %v2438_v32 = vld [vmem:[%s3582_s0 + $0x40] sm:$0xf] }
  0x57   :  { %v237_v18 = vsel %vm2711_vm3, %v232_v7, %v236_v63  ;;  %v251_v19 = vsel %vm2711_vm3, %v246_v8, %v250_v9  ;;  %v911_v63 = vrot.slane %v909_v42, 5  ;;  %v1234_v0 = vrot.slane %v1232_v44, 4 }
  0x58   :  { %v295_v28 = vunpack.c.l.b16 %v237_v18  ;;  %v296_v29 = vunpack.c.l.b16 %v251_v19  ;;  %v1237_v1 = vrot.slane %v1235_v45, 5  ;;  %v1248_v2 = vrot.slane %v1246_v46, 4  ;;  %v2498_v45 = vld [vmem:[%s3582_s0 + $0x18] sm:$0xf] }
  0x59   :  { %v1251_v3 = vrot.slane %v1249_v47, 5  ;;  %v2311_v4 = vor.u32 %v2603_v51, %v2310_v43  ;;  %v944_v7 = vpack.c.b16 %v935_v50, %v934_v49  ;;  %v2249_v8 = vor.u32 %v2593_v53, %v2248_v52 }
  0x5a   :  { %v305_v48 = vpack.c.b16 %v296_v29, %v295_v28  ;;  %v901_v9 = vshll.u32 %v2353_v56, 16  ;;  %v265_v11 = vsel %vm2711_vm3, %v260_v59, %v264_v54  ;;  %v898_v13 = vor.u32 %v897_v58, %v894_v57  ;;  %v2543_v56 = vld [vmem:[%s3582_s0 + $0x2c] sm:$0x1] }
  0x5b   :  { %v1238_v15 = vor.u32 %v1237_v1, %v1234_v0  ;;  %v1241_v16 = vshll.u32 %v2433_v5, 16  ;;  %v1252_v17 = vor.u32 %v1251_v3, %v1248_v2  ;;  %v297_v23 = vunpack.c.l.b16 %v265_v11 }
  0x5c   :  { %v903_v19 = vrot.slane %v901_v9, 5  ;;  %v899_v25 = vrot.slane %v898_v13, 4  ;;  %v1767_v33 = vshrl.u32 %v2540_v21, 16  ;;  %v1770_v34 = vshll.u32 %v2540_v21, 16  ;;  %v2544_v13 = vld [vmem:[%s3582_s0 + $0x38] sm:$0xf] }
  0x5d   :  { %v1239_v28 = vrot.slane %v1238_v15, 4  ;;  %v1243_v29 = vrot.slane %v1241_v16, 5  ;;  %v1253_v30 = vrot.slane %v1252_v17, 4  ;;  %v1781_v35 = vshrl.u32 %v2542_v22, 16 }
  0x5e   :  { %v1784_v36 = vshll.u32 %v2542_v22, 16  ;;  %v1260_v37 = vshrl.u32 %v2436_v27, 16  ;;  %v1263_v38 = vshll.u32 %v2436_v27, 16  ;;  %v1274_v42 = vshrl.u32 %v2438_v32, 16 }
  0x5f   :  { %v1277_v43 = vshll.u32 %v2438_v32, 16  ;;  %v1244_v46 = vsel %vm2711_vm3, %v1239_v28, %v1243_v29  ;;  %v1769_v49 = vrot.slane %v1767_v33, 4  ;;  %v1772_v50 = vrot.slane %v1770_v34, 5  ;;  %v2440_v28 = vld [vmem:[%s3582_s0 + $0x50] sm:$0xf] }
  0x60   :  { %v1783_v51 = vrot.slane %v1781_v35, 4  ;;  %v1786_v52 = vrot.slane %v1784_v36, 5  ;;  %v1262_v57 = vrot.slane %v1260_v37, 4  ;;  %v1265_v58 = vrot.slane %v1263_v38, 5  ;;  %v2442_v29 = vld [vmem:[%s3582_s0 + $0x60] sm:$0xf] }
  0x61   :  { %v1458_v59 = vunpack.c.l.b16 %v1244_v46  ;;  %v1279_v0 = vrot.slane %v1277_v43, 5  ;;  %v1773_v2 = vor.u32 %v1772_v50, %v1769_v49  ;;  %v1790_v5 = vshll.u32 %v2543_v56, 16  ;;  %v2545_v34 = vld [vmem:[%s3582_s0 + $0x3c] sm:$0x1]  ;;  %v2547_v38 = vld [vmem:[%s3582_s0 + $0x4c] sm:$0x1] }
  0x62   :  { %v1795_v22 = vshrl.u32 %v2544_v13, 16  ;;  %v2606_v43 = vld [vmem:[%s3582_s0 + $0x1c] sm:$0xf0]  ;;  %v1302_v46 = vshrl.u32 %v2442_v29, 16  ;;  %v2617_v56 = vld [vmem:[%s3582_s0 + $0x44] sm:$0xf0] }
  0x63   :  { %2215 = vmatmul.msk.bf16.gmra.mxu0 %vm313_vm1, %v304_v60  ;;  %v274_v60 = vrot.slane %v273_v39, 4  ;;  %v904_v39 = vsel %vm2711_vm3, %v899_v25, %v903_v19  ;;  %v1774_v15 = vrot.slane %v1773_v2, 4 }
  0x64   :  { %v936_v53 = vunpack.c.l.b16 %v904_v39  ;;  %v1797_v35 = vrot.slane %v1795_v22, 4 }
  0x65   :  { %2322 = vmatmul.msk.bf16.gmra.mxu2 %vm313_vm1, %v2307_v61  ;;  %2260 = vmatmul.msk.bf16.gmra.mxu1 %vm313_vm1, %v2245_v62  ;;  %v2355_v61 = vld [vmem:[%s3582_s0 + $0x10c] sm:$0x1]  ;;  %v908_v62 = vrot.slane %v906_v41, 4  ;;  %v279_v12 = vsel %vm2711_vm3, %v274_v60, %v278_v55  ;;  %v2541_v55 = vld [vmem:[%s3582_s0 + $0x1c] sm:$0x1] }
  0x66   :  { %2367 = vmatmul.msk.bf16.gmra.mxu3 %vm313_vm1, %v943_v6  ;;  %v2435_v6 = vld [vmem:[%s3582_s0 + $0x24] sm:$0x1]  ;;  %v915_v10 = vshll.u32 %v2355_v61, 16  ;;  %v298_v24 = vunpack.c.l.b16 %v279_v12  ;;  %v2437_v61 = vld [vmem:[%s3582_s0 + $0x34] sm:$0x1]  ;;  %v1776_v3 = vshll.u32 %v2541_v55, 16 }
  0x67   :  { %v912_v14 = vor.u32 %v911_v63, %v908_v62  ;;  %v1255_v18 = vshll.u32 %v2435_v6, 16  ;;  %v2439_v62 = vld [vmem:[%s3582_s0 + $0x44] sm:$0x1]  ;;  %v1276_v63 = vrot.slane %v1274_v42, 4  ;;  %v2502_v55 = vld [vmem:[%s3582_s0 + $0x38] sm:$0xf] }
  0x68   :  { %v917_v20 = vrot.slane %v915_v10, 5  ;;  %v306_v44 = vpack.c.b16 %v298_v24, %v297_v23  ;;  %v1283_v9 = vshll.u32 %v2439_v62, 16  ;;  %v1778_v16 = vrot.slane %v1776_v3, 5 }
  0x69   :  { %v913_v26 = vrot.slane %v912_v14, 4  ;;  %v1257_v31 = vrot.slane %v1255_v18, 5  ;;  %v1280_v12 = vor.u32 %v1279_v0, %v1276_v63  ;;  %v2546_v14 = vld [vmem:[%s3582_s0 + $0x48] sm:$0xf]  ;;  %v1792_v18 = vrot.slane %v1790_v5, 5 }
  0x6a   :  { %v1285_v21 = vrot.slane %v1283_v9, 5  ;;  %v1798_v24 = vshll.u32 %v2544_v13, 16  ;;  %v1809_v25 = vshrl.u32 %v2546_v14, 16  ;;  %v1304_v63 = vrot.slane %v1302_v46, 4 }
  0x6b   :  { %v918_v41 = vsel %vm2711_vm3, %v913_v26, %v917_v20  ;;  %v1258_v47 = vsel %vm2711_vm3, %v1253_v30, %v1257_v31  ;;  %v1281_v23 = vrot.slane %v1280_v12, 4  ;;  %v1812_v26 = vshll.u32 %v2546_v14, 16  ;;  %v2390_v30 = vld [vmem:[%s3582_s0 + $0x10] sm:$0xf] }
  0x6c   :  { %v937_v54 = vunpack.c.l.b16 %v918_v41  ;;  %v1459_v60 = vunpack.c.l.b16 %v1258_v47  ;;  %v1779_v31 = vsel %vm2711_vm3, %v1774_v15, %v1778_v16  ;;  %v1800_v39 = vrot.slane %v1798_v24, 5 }
  0x6d   :  { %v1286_v37 = vsel %vm2711_vm3, %v1281_v23, %v1285_v21  ;;  %v1811_v41 = vrot.slane %v1809_v25, 4  ;;  %v1814_v42 = vrot.slane %v1812_v26, 5  ;;  %v1305_v47 = vshll.u32 %v2442_v29, 16  ;;  %v2444_v23 = vld [vmem:[%s3582_s0 + $0x70] sm:$0xf] }
  0x6e   :  { %v945_v6 = vpack.c.b16 %v937_v54, %v936_v53  ;;  %v1474_v11 = vpack.c.b16 %v1459_v60, %v1458_v59  ;;  %v1818_v53 = vshll.u32 %v2547_v38, 16  ;;  %v2391_v54 = vor.u32 %v2606_v43, %v2390_v30  ;;  %v2441_v60 = vld [vmem:[%s3582_s0 + $0x54] sm:$0x1]  ;;  %v2446_v29 = vld [vmem:[%s3582_s0 + $0x80] sm:$0xf] }
  0x6f   :  { %v1307_v0 = vrot.slane %v1305_v47, 5  ;;  %v2503_v5 = vor.u32 %v2617_v56, %v2502_v55  ;;  %v1297_v13 = vshll.u32 %v2441_v60, 16  ;;  %v1316_v38 = vshrl.u32 %v2444_v23, 16  ;;  %v2607_v43 = vld [vmem:[%s3582_s0 + $0x3c] sm:$0xf0] }
  0x70   :  { %v2549_v55 = vld [vmem:[%s3582_s0 + $0x5c] sm:$0x1]  ;;  %v2551_v56 = vld [vmem:[%s3582_s0 + $0x6c] sm:$0x1] }
  0x71   :  { %v1308_v16 = vor.u32 %v1307_v0, %v1304_v63  ;;  %v1299_v21 = vrot.slane %v1297_v13, 5 }
  0x73   :  { %2216 = vmatmul.msk.bf16.gmra.mxu0 %vm313_vm1, %v305_v48  ;;  %v2616_v48 = vld [vmem:[%s3582_s0 + $0x24] sm:$0xf0]  ;;  %v1309_v26 = vrot.slane %v1308_v16, 4 }
  0x74   :  { %v2499_v1 = vor.u32 %v2616_v48, %v2498_v45  ;;  %v1291_v45 = vshll.u32 %v2440_v28, 16  ;;  %v1993_v48 = vunpack.c.l.b16 %v1779_v31 }
  0x75   :  { %2323 = vmatmul.msk.bf16.gmra.mxu2 %vm313_vm1, %v2311_v4  ;;  %2261 = vmatmul.msk.bf16.gmra.mxu1 %vm313_vm1, %v2249_v8  ;;  %v1787_v4 = vor.u32 %v1786_v52, %v1783_v51  ;;  %v1269_v8 = vshll.u32 %v2437_v61, 16  ;;  %v1461_v51 = vunpack.c.l.b16 %v1286_v37  ;;  %v1804_v52 = vshll.u32 %v2545_v34, 16 }
  0x76   :  { %2368 = vmatmul.msk.bf16.gmra.mxu3 %vm313_vm1, %v944_v7  ;;  %v1266_v7 = vor.u32 %v1265_v58, %v1262_v57  ;;  %v1801_v57 = vor.u32 %v1800_v39, %v1797_v35  ;;  %v1815_v58 = vor.u32 %v1814_v42, %v1811_v41  ;;  %v1293_v62 = vrot.slane %v1291_v45, 5  ;;  %v2394_v42 = vld [vmem:[%s3582_s0 + $0x30] sm:$0xf] }
  0x77   :  { %v1788_v17 = vrot.slane %v1787_v4, 4  ;;  %v1271_v20 = vrot.slane %v1269_v8, 5  ;;  %v2443_v4 = vld [vmem:[%s3582_s0 + $0x64] sm:$0x1]  ;;  %v1820_v8 = vrot.slane %v1818_v53, 5  ;;  %v1319_v39 = vshll.u32 %v2444_v23, 16 }
  0x78   :  { %v1267_v19 = vrot.slane %v1266_v7, 4  ;;  %v1806_v7 = vrot.slane %v1804_v52, 5  ;;  %v1816_v12 = vrot.slane %v1815_v58, 4  ;;  %v1330_v45 = vshrl.u32 %v2446_v29, 16 }
  0x79   :  { %v1793_v32 = vsel %vm2711_vm3, %v1788_v17, %v1792_v18  ;;  %v2548_v17 = vld [vmem:[%s3582_s0 + $0x58] sm:$0xf]  ;;  %v2550_v18 = vld [vmem:[%s3582_s0 + $0x68] sm:$0xf]  ;;  %v1321_v58 = vrot.slane %v1319_v39, 5 }
  0x7a   :  { %v1272_v33 = vsel %vm2711_vm3, %v1267_v19, %v1271_v20  ;;  %v1994_v49 = vunpack.c.l.b16 %v1793_v32  ;;  %v1821_v20 = vsel %vm2711_vm3, %v1816_v12, %v1820_v8  ;;  %v1823_v22 = vshrl.u32 %v2548_v17, 16 }
  0x7b   :  { %v1460_v50 = vunpack.c.l.b16 %v1272_v33  ;;  %v1837_v33 = vshrl.u32 %v2550_v18, 16  ;;  %v1840_v34 = vshll.u32 %v2550_v18, 16  ;;  %v1332_v63 = vrot.slane %v1330_v45, 4 }
  0x7c   :  { %v2009_v2 = vpack.c.b16 %v1994_v49, %v1993_v48  ;;  %v1825_v49 = vrot.slane %v1823_v22, 4  ;;  %v1832_v8 = vshll.u32 %v2549_v55, 16 }
  0x7d   :  { %v1839_v52 = vrot.slane %v1837_v33, 4  ;;  %v1842_v53 = vrot.slane %v1840_v34, 5 }
  0x7e   :  { %v1834_v23 = vrot.slane %v1832_v8, 5  ;;  %v2449_v8 = vld [vmem:[%s3582_s0 + $0xa4] sm:$0x1] }
  0x82   :  { %v466_v10 = vpop.f32.mrf.mxu1 }
  0x83   :  { %2217 = vmatmul.msk.bf16.gmra.mxu0 %vm313_vm1, %v306_v44  ;;  %v1288_v44 = vshrl.u32 %v2440_v28, 16  ;;  %v1826_v28 = vshll.u32 %v2548_v17, 16 }
  0x85   :  { %2532 = vmatmul.msk.bf16.vlgmr.msrb.gmra.mxu2 %vm313_vm1, %v2499_v1  ;;  %2470 = vmatmul.msk.bf16.vlgmr.msrb.gmra.mxu1 %vm313_vm1, %v1474_v11  ;;  %v1290_v61 = vrot.slane %v1288_v44, 4  ;;  %v1802_v11 = vrot.slane %v1801_v57, 4  ;;  %v1996_v44 = vunpack.c.l.b16 %v1821_v20  ;;  %v1318_v57 = vrot.slane %v1316_v38, 4  ;;  %v2552_v20 = vld [vmem:[%s3582_s0 + $0x78] sm:$0xf] }
  0x86   :  { %2369 = vmatmul.msk.bf16.gmra.mxu3 %vm313_vm1, %v945_v6  ;;  %v1475_v6 = vpack.c.b16 %v1461_v51, %v1460_v50  ;;  %v1828_v50 = vrot.slane %v1826_v28, 5  ;;  %v2506_v51 = vld [vmem:[%s3582_s0 + $0x58] sm:$0xf]  ;;  %v1851_v28 = vshrl.u32 %v2552_v20, 16 }
  0x87   :  { %v1294_v15 = vor.u32 %v1293_v62, %v1290_v61  ;;  %v1807_v19 = vsel %vm2711_vm3, %v1802_v11, %v1806_v7  ;;  %v2445_v62 = vld [vmem:[%s3582_s0 + $0x74] sm:$0x1]  ;;  %v1846_v11 = vshll.u32 %v2551_v56, 16  ;;  %v2608_v56 = vld [vmem:[%s3582_s0 + $0x5c] sm:$0xf0] }
  0x88   :  { %v607_v27 = vpop.f32.mrf.mxu2  ;;  %v1995_v37 = vunpack.c.l.b16 %v1807_v19  ;;  %v1325_v16 = vshll.u32 %v2445_v62, 16 }
  0x89   :  { %v1295_v25 = vrot.slane %v1294_v15, 4  ;;  %v1322_v15 = vor.u32 %v1321_v58, %v1318_v57 }
  0x8a   :  { %v3133_v36 = vpop.f32.mrf.mxu1 }
  0x8b   :  { %v1300_v47 = vsel %vm2711_vm3, %v1295_v25, %v1299_v21  ;;  %v2554_v21 = vld [vmem:[%s3582_s0 + $0x88] sm:$0xf]  ;;  %v1848_v25 = vrot.slane %v1846_v11, 5  ;;  %v2451_v11 = vld [vmem:[%s3582_s0 + $0xb4] sm:$0x1] }
  0x8c   :  { %v1462_v60 = vunpack.c.l.b16 %v1300_v47  ;;  %v1868_v33 = vshll.u32 %v2554_v21, 16  ;;  %v1853_v47 = vrot.slane %v1851_v28, 4 }
  0x90   :  { %v347_v59 = vpop.f32.mrf.mxu0  ;;  %v609_v3 = vpop.f32.mrf.mxu2 }
  0x91   :  { %v467_v1 = vadd.f32 %v466_v10, %v347_v59  ;;  %v1311_v10 = vshll.u32 %v2443_v4, 16  ;;  %v2618_v59 = vld [vmem:[%s3582_s0 + $0x64] sm:$0xf0]  ;;  %v2447_v4 = vld [vmem:[%s3582_s0 + $0x84] sm:$0x1] }
  0x92   :  { %v471_v14 = vpop.f32.mrf.mxu1  ;;  %v2507_v13 = vor.u32 %v2618_v59, %v2506_v51  ;;  %v1339_v19 = vshll.u32 %v2447_v4, 16 }
  0x93   :  { %2424 = vmatmul.msk.bf16.vlgmr.msrb.gmra.mxu0 %vm313_vm1, %v2391_v54  ;;  %v647_v9 = vadd.f32 %v607_v27, %v467_v1  ;;  %v1313_v27 = vrot.slane %v1311_v10, 5  ;;  %v2395_v54 = vor.u32 %v2607_v43, %v2394_v42  ;;  %v2448_v43 = vld [vmem:[%s3582_s0 + $0xa0] sm:$0xf] }
  0x94   :  { %v1344_v57 = vshrl.u32 %v2448_v43, 16  ;;  %v1347_v58 = vshll.u32 %v2448_v43, 16  ;;  %v2454_v43 = vld [vmem:[%s3582_s0 + $0xd0] sm:$0xf] }
  0x95   :  { %2533 = vmatmul.msk.bf16.gmra.mxu2 %vm313_vm1, %v2503_v5  ;;  %2471 = vmatmul.msk.bf16.gmra.mxu1 %vm313_vm1, %v1475_v6  ;;  %v1314_v48 = vsel %vm2711_vm3, %v1309_v26, %v1313_v27  ;;  %v1323_v26 = vrot.slane %v1322_v15, 4  ;;  %v1327_v27 = vrot.slane %v1325_v16, 5 }
  0x96   :  { %2578 = vmatmul.msk.bf16.vlgmr.msrb.gmra.mxu3 %vm313_vm1, %v2009_v2  ;;  %v1463_v61 = vunpack.c.l.b16 %v1314_v48  ;;  %v2010_v2 = vpack.c.b16 %v1996_v44, %v1995_v37  ;;  %v2450_v44 = vld [vmem:[%s3582_s0 + $0xb0] sm:$0xf]  ;;  %v1349_v15 = vrot.slane %v1347_v58, 5  ;;  %v1386_v58 = vshrl.u32 %v2454_v43, 16 }
  0x97   :  { %v1358_v59 = vshrl.u32 %v2450_v44, 16 }
  0x98   :  { %v349_v24 = vpop.f32.mrf.mxu0  ;;  %v612_v32 = vpop.f32.mrf.mxu2  ;;  %v1476_v17 = vpack.c.b16 %v1463_v61, %v1462_v60  ;;  %v1361_v60 = vshll.u32 %v2450_v44, 16 }
  0x99   :  { %v985_v30 = vpop.f32.mrf.mxu3  ;;  %v469_v31 = vadd.f32 %v3133_v36, %v349_v24  ;;  %v1333_v36 = vshll.u32 %v2446_v29, 16  ;;  %v1854_v29 = vshll.u32 %v2552_v20, 16  ;;  %v1360_v16 = vrot.slane %v1358_v59, 4 }
  0x9a   :  { %v3176_v35 = vadd.f32 %v985_v30, %v647_v9  ;;  %v473_v46 = vpop.f32.mrf.mxu1  ;;  %v1843_v9 = vor.u32 %v1842_v53, %v1839_v52  ;;  %v2555_v52 = vld [vmem:[%s3582_s0 + $0x8c] sm:$0x1]  ;;  %v1389_v59 = vshll.u32 %v2454_v43, 16  ;;  %v2560_v43 = vld [vmem:[%s3582_s0 + $0xc8] sm:$0xf] }
  0x9b   :  { %v648_v41 = vadd.f32 %v609_v3, %v469_v31  ;;  %v1335_v0 = vrot.slane %v1333_v36, 5  ;;  %v1829_v3 = vor.u32 %v1828_v50, %v1825_v49  ;;  %v1341_v31 = vrot.slane %v1339_v19, 5  ;;  %v2398_v50 = vld [vmem:[%s3582_s0 + $0x50] sm:$0xf] }
  0x9c   :  { %v1844_v24 = vrot.slane %v1843_v9, 4  ;;  %v1328_v36 = vsel %vm2711_vm3, %v1323_v26, %v1327_v27  ;;  %v1856_v48 = vrot.slane %v1854_v29, 5  ;;  %v1353_v29 = vshll.u32 %v2449_v8, 16 }
  0x9d   :  { %v1336_v18 = vor.u32 %v1335_v0, %v1332_v63  ;;  %v1830_v22 = vrot.slane %v1829_v3, 4  ;;  %v2510_v0 = vld [vmem:[%s3582_s0 + $0x78] sm:$0xf] }
  0x9e   :  { %v1849_v42 = vsel %vm2711_vm3, %v1844_v24, %v1848_v25  ;;  %v1857_v4 = vor.u32 %v1856_v48, %v1853_v47 }
  0x9f   :  { %v1337_v30 = vrot.slane %v1336_v18, 4  ;;  %v1998_v62 = vunpack.c.l.b16 %v1849_v42 }
  0xa0   :  { %v352_v1 = vpop.f32.mrf.mxu0  ;;  %v614_v7 = vpop.f32.mrf.mxu2  ;;  %v1858_v25 = vrot.slane %v1857_v4, 4 }
  0xa1   :  { %v987_v5 = vpop.f32.mrf.mxu3  ;;  %v472_v6 = vadd.f32 %v471_v14, %v352_v1  ;;  %v1342_v51 = vsel %vm2711_vm3, %v1337_v30, %v1341_v31  ;;  %v2619_v1 = vld [vmem:[%s3582_s0 + $0x84] sm:$0xf0]  ;;  %v1367_v30 = vshll.u32 %v2451_v11, 16 }
  0xa2   :  { %v3206_v12 = vadd.f32 %v987_v5, %v648_v41  ;;  %v476_v14 = vpop.f32.mrf.mxu1  ;;  %v1835_v41 = vsel %vm2711_vm3, %v1830_v22, %v1834_v23  ;;  %v1465_v3 = vunpack.c.l.b16 %v1342_v51  ;;  %v1874_v5 = vshll.u32 %v2555_v52, 16 }
  0xa3   :  { %2425 = vmatmul.msk.bf16.gmra.mxu0 %vm313_vm1, %v2395_v54  ;;  %v649_v10 = vadd.f32 %v612_v32, %v472_v6  ;;  %v1865_v32 = vshrl.u32 %v2554_v21, 16  ;;  %v1870_v54 = vrot.slane %v1868_v33, 5  ;;  %v1997_v61 = vunpack.c.l.b16 %v1835_v41 }
  0xa4   :  { %v2399_v6 = vor.u32 %v2608_v56, %v2398_v50  ;;  %v2511_v21 = vor.u32 %v2619_v1, %v2510_v0  ;;  %v1876_v26 = vrot.slane %v1874_v5, 5  ;;  %v1355_v41 = vrot.slane %v1353_v29, 5  ;;  %v2514_v1 = vld [vmem:[%s3582_s0 + $0xa8] sm:$0xf]  ;;  %v2557_v5 = vld [vmem:[%s3582_s0 + $0xac] sm:$0x1] }
  0xa5   :  { %2534 = vmatmul.msk.bf16.gmra.mxu2 %vm313_vm1, %v2507_v13  ;;  %2472 = vmatmul.msk.bf16.gmra.mxu1 %vm313_vm1, %v1476_v17  ;;  %v1867_v53 = vrot.slane %v1865_v32, 4  ;;  %v1346_v13 = vrot.slane %v1344_v57, 4  ;;  %v2011_v19 = vpack.c.b16 %v1998_v62, %v1997_v61  ;;  %v1369_v42 = vrot.slane %v1367_v30, 5  ;;  %v2402_v61 = vld [vmem:[%s3582_s0 + $0x70] sm:$0xf] }
  0xa6   :  { %2579 = vmatmul.msk.bf16.gmra.mxu3 %vm313_vm1, %v2010_v2  ;;  %v1464_v2 = vunpack.c.l.b16 %v1328_v36  ;;  %v2609_v62 = vld [vmem:[%s3582_s0 + $0x7c] sm:$0xf0] }
  0xa7   :  { %v1350_v32 = vor.u32 %v1349_v15, %v1346_v13  ;;  %v2453_v13 = vld [vmem:[%s3582_s0 + $0xc4] sm:$0x1] }
  0xa8   :  { %v354_v34 = vpop.f32.mrf.mxu0  ;;  %v617_v39 = vpop.f32.mrf.mxu2  ;;  %v1477_v24 = vpack.c.b16 %v1465_v3, %v1464_v2  ;;  %v2620_v2 = vld [vmem:[%s3582_s0 + $0xb4] sm:$0xf0] }
  0xa9   :  { %v990_v37 = vpop.f32.mrf.mxu3  ;;  %v474_v38 = vadd.f32 %v473_v46, %v354_v34  ;;  %v2553_v46 = vld [vmem:[%s3582_s0 + $0x7c] sm:$0x1]  ;;  %v2558_v34 = vld [vmem:[%s3582_s0 + $0xb8] sm:$0xf]  ;;  %v1351_v36 = vrot.slane %v1350_v32, 4 }
  0xaa   :  { %v3228_v45 = vadd.f32 %v990_v37, %v649_v10  ;;  %v478_v55 = vpop.f32.mrf.mxu1  ;;  %v1860_v63 = vshll.u32 %v2553_v46, 16  ;;  %v1363_v10 = vrot.slane %v1361_v60, 5  ;;  %v2452_v37 = vld [vmem:[%s3582_s0 + $0xc0] sm:$0xf]  ;;  %v1893_v52 = vshrl.u32 %v2558_v34, 16 }
  0xab   :  { %v650_v49 = vadd.f32 %v614_v7, %v474_v38  ;;  %v1871_v7 = vor.u32 %v1870_v54, %v1867_v53  ;;  %v1896_v53 = vshll.u32 %v2558_v34, 16  ;;  %v1372_v54 = vshrl.u32 %v2452_v37, 16 }
  0xac   :  { %v1862_v22 = vrot.slane %v1860_v63, 5  ;;  %v1364_v33 = vor.u32 %v1363_v10, %v1360_v16  ;;  %v1375_v57 = vshll.u32 %v2452_v37, 16  ;;  %v1356_v3 = vsel %vm2711_vm3, %v1351_v36, %v1355_v41 }
  0xad   :  { %v1872_v28 = vrot.slane %v1871_v7, 4  ;;  %v1898_v11 = vrot.slane %v1896_v53, 5  ;;  %v1374_v15 = vrot.slane %v1372_v54, 4  ;;  %v1388_v10 = vrot.slane %v1386_v58, 4 }
  0xae   :  { %v1863_v38 = vsel %vm2711_vm3, %v1858_v25, %v1862_v22  ;;  %v1365_v46 = vrot.slane %v1364_v33, 4  ;;  %v1377_v16 = vrot.slane %v1375_v57, 5  ;;  %v2515_v25 = vor.u32 %v2620_v2, %v2514_v1  ;;  %v2456_v1 = vld [vmem:[%s3582_s0 + $0xe0] sm:$0xf]  ;;  %v2458_v2 = vld [vmem:[%s3582_s0 + $0xf0] sm:$0xf] }
  0xaf   :  { %v1907_v53 = vshrl.u32 %v2560_v43, 16  ;;  %v1910_v54 = vshll.u32 %v2560_v43, 16 }
  0xb0   :  { %v357_v9 = vpop.f32.mrf.mxu0  ;;  %v619_v20 = vpop.f32.mrf.mxu2  ;;  %v1370_v4 = vsel %vm2711_vm3, %v1365_v46, %v1369_v42  ;;  %v1378_v37 = vor.u32 %v1377_v16, %v1374_v15 }
  0xb1   :  { %v992_v17 = vpop.f32.mrf.mxu3  ;;  %v477_v18 = vadd.f32 %v476_v14, %v357_v9  ;;  %v2556_v14 = vld [vmem:[%s3582_s0 + $0xa8] sm:$0xf]  ;;  %v1895_v9 = vrot.slane %v1893_v52, 4 }
  0xb2   :  { %v3258_v23 = vadd.f32 %v992_v17, %v650_v49  ;;  %v481_v31 = vpop.f32.mrf.mxu1  ;;  %v1879_v47 = vshrl.u32 %v2556_v14, 16  ;;  %v1882_v48 = vshll.u32 %v2556_v14, 16  ;;  %v1391_v17 = vrot.slane %v1389_v59, 5 }
  0xb3   :  { %2426 = vmatmul.msk.bf16.gmra.mxu0 %vm313_vm1, %v2399_v6  ;;  %v651_v27 = vadd.f32 %v617_v39, %v477_v18  ;;  %v1877_v39 = vsel %vm2711_vm3, %v1872_v28, %v1876_v26  ;;  %v2559_v6 = vld [vmem:[%s3582_s0 + $0xbc] sm:$0x1]  ;;  %v2403_v18 = vor.u32 %v2609_v62, %v2402_v61  ;;  %v1888_v26 = vshll.u32 %v2557_v5, 16 }
  0xb4   :  { %v2000_v0 = vunpack.c.l.b16 %v1877_v39  ;;  %v1881_v7 = vrot.slane %v1879_v47, 4  ;;  %v1884_v8 = vrot.slane %v1882_v48, 5  ;;  %v1899_v33 = vor.u32 %v1898_v11, %v1895_v9  ;;  %v2561_v9 = vld [vmem:[%s3582_s0 + $0xcc] sm:$0x1] }
  0xb5   :  { %2535 = vmatmul.msk.bf16.gmra.mxu2 %vm313_vm1, %v2511_v21  ;;  %2473 = vmatmul.msk.bf16.gmra.mxu1 %vm313_vm1, %v1477_v24  ;;  %v2455_v21 = vld [vmem:[%s3582_s0 + $0xd4] sm:$0x1]  ;;  %v1381_v14 = vshll.u32 %v2453_v13, 16  ;;  %v1890_v36 = vrot.slane %v1888_v26, 5  ;;  %v1912_v11 = vrot.slane %v1910_v54, 5  ;;  %v1916_v26 = vshll.u32 %v2561_v9, 16 }
  0xb6   :  { %2580 = vmatmul.msk.bf16.gmra.mxu3 %vm313_vm1, %v2011_v19  ;;  %v1466_v19 = vunpack.c.l.b16 %v1356_v3  ;;  %v1885_v32 = vor.u32 %v1884_v8, %v1881_v7  ;;  %v1395_v39 = vshll.u32 %v2455_v21, 16  ;;  %v1900_v47 = vrot.slane %v1899_v33, 4 }
  0xb7   :  { %v1909_v7 = vrot.slane %v1907_v53, 4 }
  0xb8   :  { %v359_v44 = vpop.f32.mrf.mxu0  ;;  %v622_v51 = vpop.f32.mrf.mxu2  ;;  %v1886_v46 = vrot.slane %v1885_v32, 4  ;;  %v1397_v52 = vrot.slane %v1395_v39, 5 }
  0xb9   :  { %v995_v49 = vpop.f32.mrf.mxu3  ;;  %v479_v50 = vadd.f32 %v478_v55, %v359_v44  ;;  %v1999_v55 = vunpack.c.l.b16 %v1863_v38  ;;  %v1392_v38 = vor.u32 %v1391_v17, %v1388_v10  ;;  %v2563_v10 = vld [vmem:[%s3582_s0 + $0xdc] sm:$0x1]  ;;  %v1400_v17 = vshrl.u32 %v2456_v1, 16 }
  0xba   :  { %v3280_v56 = vadd.f32 %v995_v49, %v651_v27  ;;  %v483_v63 = vpop.f32.mrf.mxu1  ;;  %v1902_v27 = vshll.u32 %v2559_v6, 16  ;;  %v1383_v49 = vrot.slane %v1381_v14, 5  ;;  %v1930_v33 = vshll.u32 %v2563_v10, 16 }
  0xbb   :  { %v652_v60 = vadd.f32 %v619_v20, %v479_v50  ;;  %v1467_v20 = vunpack.c.l.b16 %v1370_v4  ;;  %v2012_v24 = vpack.c.b16 %v2000_v0, %v1999_v55  ;;  %v1379_v50 = vrot.slane %v1378_v37, 4  ;;  %v2610_v4 = vld [vmem:[%s3582_s0 + $0xac] sm:$0xf0] }
  0xbc   :  { %v1904_v48 = vrot.slane %v1902_v27, 5  ;;  %v1891_v55 = vsel %vm2711_vm3, %v1886_v46, %v1890_v36  ;;  %v1402_v37 = vrot.slane %v1400_v17, 4  ;;  %v2457_v46 = vld [vmem:[%s3582_s0 + $0xe4] sm:$0x1]  ;;  %v1932_v54 = vrot.slane %v1930_v33, 5 }
  0xbd   :  { %v1478_v42 = vpack.c.b16 %v1467_v20, %v1466_v19  ;;  %v1384_v5 = vsel %vm2711_vm3, %v1379_v50, %v1383_v49  ;;  %v1414_v19 = vshrl.u32 %v2458_v2, 16  ;;  %v1417_v20 = vshll.u32 %v2458_v2, 16  ;;  %v2460_v2 = vld [vmem:[%s3582_s0 + $0x100] sm:$0xf]  ;;  %v2462_v17 = vld [vmem:[%s3582_s0 + $0x110] sm:$0xf] }
  0xbe   :  { %v1905_v0 = vsel %vm2711_vm3, %v1900_v47, %v1904_v48  ;;  %v2001_v21 = vunpack.c.l.b16 %v1891_v55  ;;  %v2459_v47 = vld [vmem:[%s3582_s0 + $0xf4] sm:$0x1]  ;;  %v2564_v55 = vld [vmem:[%s3582_s0 + $0xe8] sm:$0xf]  ;;  %v1445_v33 = vshll.u32 %v2462_v17, 16 }
  0xbf   :  { %v1416_v39 = vrot.slane %v1414_v19, 4 }
  0xc0   :  { %v362_v22 = vpop.f32.mrf.mxu0  ;;  %v624_v30 = vpop.f32.mrf.mxu2 }
  0xc1   :  { %v997_v28 = vpop.f32.mrf.mxu3  ;;  %v482_v29 = vadd.f32 %v481_v31, %v362_v22  ;;  %v2562_v31 = vld [vmem:[%s3582_s0 + $0xd8] sm:$0xf]  ;;  %v2002_v22 = vunpack.c.l.b16 %v1905_v0 }
  0xc2   :  { %v3310_v34 = vadd.f32 %v997_v28, %v652_v60  ;;  %v486_v44 = vpop.f32.mrf.mxu1  ;;  %v1921_v57 = vshrl.u32 %v2562_v31, 16  ;;  %v1924_v58 = vshll.u32 %v2562_v31, 16  ;;  %v2518_v28 = vld [vmem:[%s3582_s0 + $0xc8] sm:$0xf] }
  0xc3   :  { %2427 = vmatmul.msk.bf16.gmra.mxu0 %vm313_vm1, %v2403_v18  ;;  %v653_v41 = vadd.f32 %v622_v51, %v482_v29  ;;  %v1393_v51 = vrot.slane %v1392_v38, 4  ;;  %v1403_v18 = vshll.u32 %v2456_v1, 16  ;;  %v2621_v29 = vld [vmem:[%s3582_s0 + $0xd4] sm:$0xf0]  ;;  %v2013_v36 = vpack.c.b16 %v2002_v22, %v2001_v21 }
  0xc4   :  { %v1923_v13 = vrot.slane %v1921_v57, 4  ;;  %v1926_v15 = vrot.slane %v1924_v58, 5  ;;  %v2519_v49 = vor.u32 %v2621_v29, %v2518_v28  ;;  %v1431_v21 = vshll.u32 %v2460_v2, 16  ;;  %v2522_v28 = vld [vmem:[%s3582_s0 + $0xe8] sm:$0xf] }
  0xc5   :  { %2536 = vmatmul.msk.bf16.gmra.mxu2 %vm313_vm1, %v2515_v25  ;;  %2474 = vmatmul.msk.bf16.gmra.mxu1 %vm313_vm1, %v1478_v42  ;;  %v1398_v6 = vsel %vm2711_vm3, %v1393_v51, %v1397_v52  ;;  %v1405_v38 = vrot.slane %v1403_v18, 5  ;;  %v1918_v51 = vrot.slane %v1916_v26, 5 }
  0xc6   :  { %2581 = vmatmul.msk.bf16.gmra.mxu3 %vm313_vm1, %v2012_v24  ;;  %v1468_v24 = vunpack.c.l.b16 %v1384_v5  ;;  %v1469_v25 = vunpack.c.l.b16 %v1398_v6  ;;  %v1927_v32 = vor.u32 %v1926_v15, %v1923_v13  ;;  %v1935_v13 = vshrl.u32 %v2564_v55, 16 }
  0xc7   :  { %v1406_v58 = vor.u32 %v1405_v38, %v1402_v37  ;;  %v1938_v15 = vshll.u32 %v2564_v55, 16  ;;  %v2565_v37 = vld [vmem:[%s3582_s0 + $0xec] sm:$0x1] }
  0xc8   :  { %v364_v59 = vpop.f32.mrf.mxu0  ;;  %v627_v62 = vpop.f32.mrf.mxu2  ;;  %v1479_v50 = vpack.c.b16 %v1469_v25, %v1468_v24  ;;  %v2410_v24 = vld [vmem:[%s3582_s0 + $0xc0] sm:$0xf]  ;;  %v1937_v38 = vrot.slane %v1935_v13, 4  ;;  %v1944_v55 = vshll.u32 %v2565_v37, 16 }
  0xc9   :  { %v1000_v60 = vpop.f32.mrf.mxu3  ;;  %v484_v61 = vadd.f32 %v483_v63, %v364_v59  ;;  %v2406_v63 = vld [vmem:[%s3582_s0 + $0xa0] sm:$0xf]  ;;  %v1409_v59 = vshll.u32 %v2457_v46, 16 }
  0xca   :  { %v3332_v3 = vadd.f32 %v1000_v60, %v653_v41  ;;  %v488_v16 = vpop.f32.mrf.mxu1  ;;  %v2407_v27 = vor.u32 %v2610_v4, %v2406_v63  ;;  %v1419_v41 = vrot.slane %v1417_v20, 5  ;;  %v1407_v4 = vrot.slane %v1406_v58, 4 }
  0xcb   :  { %v654_v8 = vadd.f32 %v624_v30, %v484_v61  ;;  %v1913_v30 = vor.u32 %v1912_v11, %v1909_v7  ;;  %v1423_v61 = vshll.u32 %v2459_v47, 16  ;;  %v1411_v5 = vrot.slane %v1409_v59, 5 }
  0xcc   :  { %v1420_v60 = vor.u32 %v1419_v41, %v1416_v39  ;;  %v1428_v20 = vshrl.u32 %v2460_v2, 16  ;;  %v1940_v39 = vrot.slane %v1938_v15, 5  ;;  %v2567_v41 = vld [vmem:[%s3582_s0 + $0xfc] sm:$0x1]  ;;  %v1946_v13 = vrot.slane %v1944_v55, 5 }
  0xcd   :  { %v1914_v53 = vrot.slane %v1913_v30, 4  ;;  %v1425_v7 = vrot.slane %v1423_v61, 5  ;;  %v1412_v29 = vsel %vm2711_vm3, %v1407_v4, %v1411_v5 }
  0xce   :  { %v1421_v6 = vrot.slane %v1420_v60, 4  ;;  %v1470_v47 = vunpack.c.l.b16 %v1412_v29  ;;  %v1941_v61 = vor.u32 %v1940_v39, %v1937_v38 }
  0xcf   :  { %v1919_v0 = vsel %vm2711_vm3, %v1914_v53, %v1918_v51 }
  0xd0   :  { %v367_v14 = vpop.f32.mrf.mxu0  ;;  %v629_v31 = vpop.f32.mrf.mxu2  ;;  %v2003_v25 = vunpack.c.l.b16 %v1919_v0  ;;  %v1426_v30 = vsel %vm2711_vm3, %v1421_v6, %v1425_v7  ;;  %v2463_v0 = vld [vmem:[%s3582_s0 + $0x114] sm:$0x1] }
  0xd1   :  { %v1002_v42 = vpop.f32.mrf.mxu3  ;;  %v487_v43 = vadd.f32 %v486_v44, %v367_v14  ;;  %v1928_v44 = vrot.slane %v1927_v32, 4  ;;  %v1442_v32 = vshrl.u32 %v2462_v17, 16  ;;  %v2622_v14 = vld [vmem:[%s3582_s0 + $0xf4] sm:$0xf0] }
  0xd2   :  { %v3362_v48 = vadd.f32 %v1002_v42, %v654_v8  ;;  %v491_v57 = vpop.f32.mrf.mxu1  ;;  %v2523_v53 = vor.u32 %v2622_v14, %v2522_v28 }
  0xd3   :  { %2428 = vmatmul.msk.bf16.gmra.mxu0 %vm313_vm1, %v2407_v27  ;;  %v655_v52 = vadd.f32 %v627_v62, %v487_v43  ;;  %v2566_v62 = vld [vmem:[%s3582_s0 + $0xf8] sm:$0xf]  ;;  %v1933_v1 = vsel %vm2711_vm3, %v1928_v44, %v1932_v54  ;;  %v2611_v27 = vld [vmem:[%s3582_s0 + $0xcc] sm:$0xf0]  ;;  %v1444_v44 = vrot.slane %v1442_v32, 4  ;;  %v1447_v54 = vrot.slane %v1445_v33, 5 }
  0xd4   :  { %v1949_v10 = vshrl.u32 %v2566_v62, 16  ;;  %v1952_v19 = vshll.u32 %v2566_v62, 16  ;;  %v2411_v46 = vor.u32 %v2611_v27, %v2410_v24  ;;  %v1958_v62 = vshll.u32 %v2567_v41, 16  ;;  %v2570_v24 = vld [vmem:[%s3582_s0 + $0x118] sm:$0xf] }
  0xd5   :  { %2537 = vmatmul.msk.bf16.gmra.mxu2 %vm313_vm1, %v2519_v49  ;;  %2475 = vmatmul.msk.bf16.gmra.mxu1 %vm313_vm1, %v1479_v50  ;;  %v1471_v49 = vunpack.c.l.b16 %v1426_v30  ;;  %v2461_v50 = vld [vmem:[%s3582_s0 + $0x104] sm:$0x1]  ;;  %v2414_v30 = vld [vmem:[%s3582_s0 + $0xe0] sm:$0xf]  ;;  %v1977_v39 = vshrl.u32 %v2570_v24, 16  ;;  %v1980_v41 = vshll.u32 %v2570_v24, 16 }
  0xd6   :  { %2582 = vmatmul.msk.bf16.gmra.mxu3 %vm313_vm1, %v2013_v36  ;;  %v1951_v42 = vrot.slane %v1949_v10, 4  ;;  %v1954_v43 = vrot.slane %v1952_v19, 5  ;;  %v1430_v36 = vrot.slane %v1428_v20, 4  ;;  %v1437_v4 = vshll.u32 %v2461_v50, 16 }
  0xd7   :  { %v1480_v6 = vpack.c.b16 %v1471_v49, %v1470_v47  ;;  %v1960_v10 = vrot.slane %v1958_v62, 5  ;;  %v2623_v49 = vld [vmem:[%s3582_s0 + $0x114] sm:$0xf0] }
  0xd8   :  { %v369_v63 = vpop.f32.mrf.mxu0  ;;  %v632_v11 = vpop.f32.mrf.mxu2  ;;  %v1955_v2 = vor.u32 %v1954_v43, %v1951_v42  ;;  %v1439_v19 = vrot.slane %v1437_v4, 5 }
  0xd9   :  { %v1005_v8 = vpop.f32.mrf.mxu3  ;;  %v489_v9 = vadd.f32 %v488_v16, %v369_v63  ;;  %v2004_v16 = vunpack.c.l.b16 %v1933_v1 }
  0xda   :  { %v3384_v18 = vadd.f32 %v1005_v8, %v655_v52  ;;  %v493_v26 = vpop.f32.mrf.mxu1  ;;  %v1448_v8 = vor.u32 %v1447_v54, %v1444_v44  ;;  %v1956_v15 = vrot.slane %v1955_v2, 4  ;;  %v2571_v44 = vld [vmem:[%s3582_s0 + $0x11c] sm:$0x1] }
  0xdb   :  { %v656_v22 = vadd.f32 %v629_v31, %v489_v9  ;;  %v1433_v31 = vrot.slane %v1431_v21, 5  ;;  %v2014_v52 = vpack.c.b16 %v2004_v16, %v2003_v25  ;;  %v1942_v9 = vrot.slane %v1941_v61, 4 }
  0xdc   :  { %v1449_v21 = vrot.slane %v1448_v8, 4  ;;  %v1961_v32 = vsel %vm2711_vm3, %v1956_v15, %v1960_v10 }
  0xdd   :  { %v1434_v63 = vor.u32 %v1433_v31, %v1430_v36  ;;  %v1947_v28 = vsel %vm2711_vm3, %v1942_v9, %v1946_v13  ;;  %v2006_v31 = vunpack.c.l.b16 %v1961_v32 }
  0xde   :  { %v2005_v36 = vunpack.c.l.b16 %v1947_v28  ;;  %v2418_v28 = vld [vmem:[%s3582_s0 + $0x100] sm:$0xf] }
  0xdf   :  { %v1435_v17 = vrot.slane %v1434_v63, 4 }
  0xe0   :  { %v372_v51 = vpop.f32.mrf.mxu0  ;;  %v634_v60 = vpop.f32.mrf.mxu2  ;;  %v2015_v62 = vpack.c.b16 %v2006_v31, %v2005_v36 }
  0xe1   :  { %v1007_v58 = vpop.f32.mrf.mxu3  ;;  %v492_v59 = vadd.f32 %v491_v57, %v372_v51  ;;  %v1451_v57 = vshll.u32 %v2463_v0, 16  ;;  %v1440_v33 = vsel %vm2711_vm3, %v1435_v17, %v1439_v19  ;;  %v2569_v51 = vld [vmem:[%s3582_s0 + $0x10c] sm:$0x1] }
  0xe2   :  { %v3414_v1 = vadd.f32 %v1007_v58, %v656_v22  ;;  %v496_v7 = vpop.f32.mrf.mxu1  ;;  %v1472_v50 = vunpack.c.l.b16 %v1440_v33  ;;  %v1979_v58 = vrot.slane %v1977_v39, 4  ;;  %v1972_v4 = vshll.u32 %v2569_v51, 16 }
  0xe3   :  { %2429 = vmatmul.msk.bf16.gmra.mxu0 %vm313_vm1, %v2411_v46  ;;  %v657_v5 = vadd.f32 %v632_v11, %v492_v59  ;;  %v2568_v11 = vld [vmem:[%s3582_s0 + $0x108] sm:$0xf]  ;;  %v1453_v22 = vrot.slane %v1451_v57, 5  ;;  %v1982_v59 = vrot.slane %v1980_v41, 5 }
  0xe4   :  { %v1963_v14 = vshrl.u32 %v2568_v11, 16  ;;  %v1966_v38 = vshll.u32 %v2568_v11, 16  ;;  %v2526_v46 = vld [vmem:[%s3582_s0 + $0x108] sm:$0xf]  ;;  %v1974_v15 = vrot.slane %v1972_v4, 5 }
  0xe5   :  { %2538 = vmatmul.msk.bf16.gmra.mxu2 %vm313_vm1, %v2523_v53  ;;  %2476 = vmatmul.msk.bf16.gmra.mxu1 %vm313_vm1, %v1480_v6  ;;  %v1454_v43 = vsel %vm2711_vm3, %v1449_v21, %v1453_v22  ;;  %v2527_v63 = vor.u32 %v2623_v49, %v2526_v46  ;;  %v1983_v9 = vor.u32 %v1982_v59, %v1979_v58 }
  0xe6   :  { %2583 = vmatmul.msk.bf16.gmra.mxu3 %vm313_vm1, %v2014_v52  ;;  %v1965_v52 = vrot.slane %v1963_v14, 4  ;;  %v1473_v53 = vunpack.c.l.b16 %v1454_v43  ;;  %v1968_v54 = vrot.slane %v1966_v38, 5 }
  0xe7   :  { %v1984_v10 = vrot.slane %v1983_v9, 4 }
  0xe8   :  { %v374_v20 = vpop.f32.mrf.mxu0  ;;  %v637_v27 = vpop.f32.mrf.mxu2  ;;  %v1481_v8 = vpack.c.b16 %v1473_v53, %v1472_v50  ;;  %v1969_v57 = vor.u32 %v1968_v54, %v1965_v52 }
  0xe9   :  { %v1010_v25 = vpop.f32.mrf.mxu3  ;;  %v494_v16 = vadd.f32 %v493_v26, %v374_v20  ;;  %v2612_v26 = vld [vmem:[%s3582_s0 + $0xec] sm:$0xf0] }
  0xea   :  { %v3428_v29 = vadd.f32 %v1010_v25, %v657_v5  ;;  %v498_v42 = vpop.f32.mrf.mxu1  ;;  %v2415_v47 = vor.u32 %v2612_v26, %v2414_v30  ;;  %v1986_v5 = vshll.u32 %v2571_v44, 16  ;;  %v2613_v30 = vld [vmem:[%s3582_s0 + $0x10c] sm:$0xf0] }
  0xeb   :  { %v658_v37 = vadd.f32 %v634_v60, %v494_v16  ;;  %v2419_v14 = vor.u32 %v2613_v30, %v2418_v28 }
  0xec   :  { %v1988_v17 = vrot.slane %v1986_v5, 5 }
  0xee   :  { %v1989_v16 = vsel %vm2711_vm3, %v1984_v10, %v1988_v17 }
  0xef   :  { %v2008_v33 = vunpack.c.l.b16 %v1989_v16 }
  0xf0   :  { %v377_v60 = vpop.f32.mrf.mxu0  ;;  %v639_v0 = vpop.f32.mrf.mxu2 }
  0xf1   :  { %v1012_v61 = vpop.f32.mrf.mxu3  ;;  %v497_v55 = vadd.f32 %v496_v7, %v377_v60  ;;  %v1970_v7 = vrot.slane %v1969_v57, 4 }
  0xf2   :  { %v3454_v2 = vadd.f32 %v1012_v61, %v658_v37  ;;  %v501_v13 = vpop.f32.mrf.mxu1 }
  0xf3   :  { %2430 = vmatmul.msk.bf16.gmra.mxu0 %vm313_vm1, %v2415_v47  ;;  %v659_v6 = vadd.f32 %v637_v27, %v497_v55  ;;  %v1975_v25 = vsel %vm2711_vm3, %v1970_v7, %v1974_v15  ;;  %v3484_v55 = vld [vmem:[%s3583_s2] ss:$0 sm:$0xff] }
  0xf4   :  { %v2007_v32 = vunpack.c.l.b16 %v1975_v25 }
  0xf5   :  { %2539 = vmatmul.msk.bf16.gmra.mxu2 %vm313_vm1, %v2527_v63  ;;  %2477 = vmatmul.msk.bf16.gmra.mxu1 %vm313_vm1, %v1481_v8 }
  0xf6   :  { %2584 = vmatmul.msk.bf16.gmra.mxu3 %vm313_vm1, %v2015_v62  ;;  %v2016_v40 = vpack.c.b16 %v2008_v33, %v2007_v32 }
  0xf8   :  { %v379_v19 = vpop.f32.mrf.mxu0  ;;  %v642_v21 = vpop.f32.mrf.mxu2 }
  0xf9   :  { %v1015_v11 = vpop.f32.mrf.mxu3  ;;  %v499_v20 = vadd.f32 %v498_v42, %v379_v19 }
  0xfa   :  { %v3460_v22 = vadd.f32 %v1015_v11, %v659_v6  ;;  %v503_v27 = vpop.f32.mrf.mxu1 }
  0xfb   :  { %v660_v24 = vadd.f32 %v639_v0, %v499_v20 }
 0x100   :  { %v382_v37 = vpop.f32.mrf.mxu0  ;;  %v644_v39 = vpop.f32.mrf.mxu2 }
 0x101   :  { %v1017_v26 = vpop.f32.mrf.mxu3  ;;  %v502_v38 = vadd.f32 %v501_v13, %v382_v37 }
 0x102   :  { %v3472_v41 = vadd.f32 %v1017_v26, %v660_v24  ;;  %v1521_v43 = vpop.f32.mrf.mxu1 }
 0x103   :  { %2431 = vmatmul.msk.bf16.gmra.mxu0 %vm313_vm1, %v2419_v14  ;;  %v661_v42 = vadd.f32 %v642_v21, %v502_v38 }
 0x106   :  { %2585 = vmatmul.msk.bf16.gmra.mxu3 %vm313_vm1, %v2016_v40 }
 0x108   :  { %v384_v36 = vpop.f32.mrf.mxu0  ;;  %v1678_v47 = vpop.f32.mrf.mxu2 }
 0x109   :  { %v1020_v31 = vpop.f32.mrf.mxu3  ;;  %v504_v46 = vadd.f32 %v503_v27, %v384_v36 }
 0x10a   :  { %v3476_v49 = vadd.f32 %v1020_v31, %v661_v42  ;;  %v1523_v51 = vpop.f32.mrf.mxu1 }
 0x10b   :  { %v662_v50 = vadd.f32 %v644_v39, %v504_v46 }
 0x110   :  { %v1143_v52 = vpop.f32.mrf.mxu0  ;;  %v1680_v54 = vpop.f32.mrf.mxu2 }
 0x111   :  { %v1022_v53 = vpop.f32.mrf.mxu3  ;;  %v1183_v44 = vadd.f32 %v1143_v52, %v3176_v35 }
 0x112   :  { %v3479_v58 = vadd.f32 %v1022_v53, %v662_v50  ;;  %v1526_v60 = vpop.f32.mrf.mxu1 }
 0x113   :  { %v1561_v59 = vadd.f32 %v1521_v43, %v1183_v44 }
 0x115   :  { %v1718_v61 = vadd.f32 %v1678_v47, %v1561_v59 }
 0x118   :  { %v1145_v62 = vpop.f32.mrf.mxu0  ;;  %v1683_v4 = vpop.f32.mrf.mxu2 }
 0x119   :  { %v2056_v0 = vpop.f32.mrf.mxu3  ;;  %v1184_v63 = vadd.f32 %v1145_v62, %v3206_v12 }
 0x11a   :  { %v2096_v5 = vadd.f32 %v2056_v0, %v1718_v61  ;;  %v1528_v8 = vpop.f32.mrf.mxu1 }
 0x11b   :  { %v1562_v6 = vadd.f32 %v1523_v51, %v1184_v63 }
 0x11c   :  { %v2116_v35 = vadd.f32 %v3484_v55, %v2096_v5 }
 0x11d   :  { %v1719_v9 = vadd.f32 %v1680_v54, %v1562_v6 }
 0x11e   :  { %v2132_v57 = vmul.f32 0.01, %v2116_v35 }
 0x120   :  { %v2148_v13 = vmax.f32 %v2116_v35, %v2132_v57  ;;  %v1148_v7 = vpop.f32.mrf.mxu0  ;;  %v1685_v17 = vpop.f32.mrf.mxu2 }
 0x121   :  { %v2058_v15 = vpop.f32.mrf.mxu3  ;;  %v1185_v10 = vadd.f32 %v1148_v7, %v3228_v45 }
 0x122   :  { %v2164_v19 = vpack.c.bf16 %v2148_v13, %v2148_v13  ;;  %v2097_v11 = vadd.f32 %v2058_v15, %v1719_v9  ;;  %v1531_v21 = vpop.f32.mrf.mxu1 }
 0x123   :  { %v1563_v20 = vadd.f32 %v1526_v60, %v1185_v10 }
 0x124   :  { %2181 = vst.msk [vmem:[%s3584_s3] sm:$0xf] %vm2180_vm4, %v2164_v19  ;;  %v2117_v12 = vadd.f32 %v3484_v55, %v2097_v11 }
 0x125   :  { %v1720_v25 = vadd.f32 %v1683_v4, %v1563_v20 }
 0x126   :  { %v2133_v24 = vmul.f32 0.01, %v2117_v12 }
 0x128   :  { %v2149_v16 = vmax.f32 %v2117_v12, %v2133_v24  ;;  %v1150_v27 = vpop.f32.mrf.mxu0  ;;  %v1688_v45 = vpop.f32.mrf.mxu2 }
 0x129   :  { %v2061_v28 = vpop.f32.mrf.mxu3  ;;  %v1186_v30 = vadd.f32 %v1150_v27, %v3258_v23 }
 0x12a   :  { %v2165_v32 = vpack.c.bf16 %v2149_v16, %v2149_v16  ;;  %v2098_v33 = vadd.f32 %v2061_v28, %v1720_v25  ;;  %v1533_v26 = vpop.f32.mrf.mxu1 }
 0x12b   :  { %v1564_v14 = vadd.f32 %v1528_v8, %v1186_v30 }
 0x12c   :  { %2182 = vst.msk [vmem:[%s3584_s3 + $0x4] sm:$0xf] %vm2180_vm4, %v2165_v32  ;;  %v2118_v37 = vadd.f32 %v3484_v55, %v2098_v33 }
 0x12d   :  { %v1721_v39 = vadd.f32 %v1685_v17, %v1564_v14 }
 0x12e   :  { %v2134_v38 = vmul.f32 0.01, %v2118_v37 }
 0x130   :  { %v2150_v40 = vmax.f32 %v2118_v37, %v2134_v38  ;;  %v1153_v42 = vpop.f32.mrf.mxu0  ;;  %v1690_v23 = vpop.f32.mrf.mxu2 }
 0x131   :  { %v2063_v43 = vpop.f32.mrf.mxu3  ;;  %v1187_v36 = vadd.f32 %v1153_v42, %v3280_v56 }
 0x132   :  { %v2166_v31 = vpack.c.bf16 %v2150_v40, %v2150_v40  ;;  %v2099_v46 = vadd.f32 %v2063_v43, %v1721_v39  ;;  %v1536_v51 = vpop.f32.mrf.mxu1 }
 0x133   :  { %v1565_v47 = vadd.f32 %v1531_v21, %v1187_v36 }
 0x134   :  { %2183 = vst.msk [vmem:[%s3584_s3 + $0x8] sm:$0xf] %vm2180_vm4, %v2166_v31  ;;  %v2119_v50 = vadd.f32 %v3484_v55, %v2099_v46 }
 0x135   :  { %v1722_v53 = vadd.f32 %v1688_v45, %v1565_v47 }
 0x136   :  { %v2135_v52 = vmul.f32 0.01, %v2119_v50 }
 0x138   :  { %v2151_v44 = vmax.f32 %v2119_v50, %v2135_v52  ;;  %v1155_v54 = vpop.f32.mrf.mxu0  ;;  %v1693_v56 = vpop.f32.mrf.mxu2 }
 0x139   :  { %v2066_v59 = vpop.f32.mrf.mxu3  ;;  %v1188_v60 = vadd.f32 %v1155_v54, %v3310_v34 }
 0x13a   :  { %v2167_v61 = vpack.c.bf16 %v2151_v44, %v2151_v44  ;;  %v2100_v62 = vadd.f32 %v2066_v59, %v1722_v53  ;;  %v1538_v4 = vpop.f32.mrf.mxu1 }
 0x13b   :  { %v1566_v0 = vadd.f32 %v1533_v26, %v1188_v60 }
 0x13c   :  { %2184 = vst.msk [vmem:[%s3584_s3 + $0xc] sm:$0xf] %vm2180_vm4, %v2167_v61  ;;  %v2120_v63 = vadd.f32 %v3484_v55, %v2100_v62 }
 0x13d   :  { %v1723_v6 = vadd.f32 %v1690_v23, %v1566_v0 }
 0x13e   :  { %v2136_v5 = vmul.f32 0.01, %v2120_v63 }
 0x140   :  { %v2152_v35 = vmax.f32 %v2120_v63, %v2136_v5  ;;  %v1158_v8 = vpop.f32.mrf.mxu0  ;;  %v1695_v34 = vpop.f32.mrf.mxu2 }
 0x141   :  { %v2068_v57 = vpop.f32.mrf.mxu3  ;;  %v1189_v9 = vadd.f32 %v1158_v8, %v3332_v3 }
 0x142   :  { %v2168_v13 = vpack.c.bf16 %v2152_v35, %v2152_v35  ;;  %v2101_v7 = vadd.f32 %v2068_v57, %v1723_v6  ;;  %v1541_v17 = vpop.f32.mrf.mxu1 }
 0x143   :  { %v1567_v15 = vadd.f32 %v1536_v51, %v1189_v9 }
 0x144   :  { %2185 = vst.msk [vmem:[%s3584_s3 + $0x10] sm:$0xf] %vm2180_vm4, %v2168_v13  ;;  %v2121_v10 = vadd.f32 %v3484_v55, %v2101_v7 }
 0x145   :  { %v1724_v11 = vadd.f32 %v1693_v56, %v1567_v15 }
 0x146   :  { %v2137_v19 = vmul.f32 0.01, %v2121_v10 }
 0x148   :  { %v2153_v20 = vmax.f32 %v2121_v10, %v2137_v19  ;;  %v1160_v12 = vpop.f32.mrf.mxu0  ;;  %v1698_v3 = vpop.f32.mrf.mxu2 }
 0x149   :  { %v2071_v21 = vpop.f32.mrf.mxu3  ;;  %v1190_v24 = vadd.f32 %v1160_v12, %v3362_v48 }
 0x14a   :  { %v2169_v25 = vpack.c.bf16 %v2153_v20, %v2153_v20  ;;  %v2102_v16 = vadd.f32 %v2071_v21, %v1724_v11  ;;  %v1543_v32 = vpop.f32.mrf.mxu1 }
 0x14b   :  { %v1568_v27 = vadd.f32 %v1538_v4, %v1190_v24 }
 0x14c   :  { %2186 = vst.msk [vmem:[%s3584_s3 + $0x14] sm:$0xf] %vm2180_vm4, %v2169_v25  ;;  %v2122_v28 = vadd.f32 %v3484_v55, %v2102_v16 }
 0x14d   :  { %v1725_v45 = vadd.f32 %v1695_v34, %v1568_v27 }
 0x14e   :  { %v2138_v30 = vmul.f32 0.01, %v2122_v28 }
 0x150   :  { %v2154_v33 = vmax.f32 %v2122_v28, %v2138_v30  ;;  %v1163_v14 = vpop.f32.mrf.mxu0  ;;  %v1700_v48 = vpop.f32.mrf.mxu2 }
 0x151   :  { %v2073_v37 = vpop.f32.mrf.mxu3  ;;  %v1191_v26 = vadd.f32 %v1163_v14, %v3384_v18 }
 0x152   :  { %v2170_v38 = vpack.c.bf16 %v2154_v33, %v2154_v33  ;;  %v2103_v39 = vadd.f32 %v2073_v37, %v1725_v45  ;;  %v1546_v46 = vpop.f32.mrf.mxu1 }
 0x153   :  { %v1569_v40 = vadd.f32 %v1541_v17, %v1191_v26 }
 0x154   :  { %2187 = vst.msk [vmem:[%s3584_s3 + $0x18] sm:$0xf] %vm2180_vm4, %v2170_v38  ;;  %v2123_v42 = vadd.f32 %v3484_v55, %v2103_v39 }
 0x155   :  { %v1726_v36 = vadd.f32 %v1698_v3, %v1569_v40 }
 0x156   :  { %v2139_v43 = vmul.f32 0.01, %v2123_v42 }
 0x158   :  { %v2155_v23 = vmax.f32 %v2123_v42, %v2139_v43  ;;  %v1165_v31 = vpop.f32.mrf.mxu0  ;;  %v1703_v53 = vpop.f32.mrf.mxu2 }
 0x159   :  { %v2076_v47 = vpop.f32.mrf.mxu3  ;;  %v1192_v50 = vadd.f32 %v1165_v31, %v3414_v1 }
 0x15a   :  { %v2171_v18 = vpack.c.bf16 %v2155_v23, %v2155_v23  ;;  %v2104_v51 = vadd.f32 %v2076_v47, %v1726_v36  ;;  %v1548_v63 = vpop.f32.mrf.mxu1 }
 0x15b   :  { %v1570_v52 = vadd.f32 %v1543_v32, %v1192_v50 }
 0x15c   :  { %2188 = vst.msk [vmem:[%s3584_s3 + $0x1c] sm:$0xf] %vm2180_vm4, %v2171_v18  ;;  %v2124_v44 = vadd.f32 %v3484_v55, %v2104_v51 }
 0x15d   :  { %v1727_v59 = vadd.f32 %v1700_v48, %v1570_v52 }
 0x15e   :  { %v2140_v54 = vmul.f32 0.01, %v2124_v44 }
 0x160   :  { %v2156_v60 = vmax.f32 %v2124_v44, %v2140_v54  ;;  %v1168_v56 = vpop.f32.mrf.mxu0  ;;  %v1705_v6 = vpop.f32.mrf.mxu2 }
 0x161   :  { %v2078_v61 = vpop.f32.mrf.mxu3  ;;  %v1193_v62 = vadd.f32 %v1168_v56, %v3428_v29 }
 0x162   :  { %v2172_v0 = vpack.c.bf16 %v2156_v60, %v2156_v60  ;;  %v2105_v1 = vadd.f32 %v2078_v61, %v1727_v59  ;;  %v1551_v17 = vpop.f32.mrf.mxu1 }
 0x163   :  { %v1571_v4 = vadd.f32 %v1546_v46, %v1193_v62 }
 0x164   :  { %2189 = vst.msk [vmem:[%s3584_s3 + $0x20] sm:$0xf] %vm2180_vm4, %v2172_v0  ;;  %v2125_v5 = vadd.f32 %v3484_v55, %v2105_v1 }
 0x165   :  { %v1728_v8 = vadd.f32 %v1703_v53, %v1571_v4 }
 0x166   :  { %v2141_v35 = vmul.f32 0.01, %v2125_v5 }
 0x168   :  { %v2157_v57 = vmax.f32 %v2125_v5, %v2141_v35  ;;  %v1170_v9 = vpop.f32.mrf.mxu0  ;;  %v1708_v20 = vpop.f32.mrf.mxu2 }
 0x169   :  { %v2081_v34 = vpop.f32.mrf.mxu3  ;;  %v1194_v13 = vadd.f32 %v1170_v9, %v3454_v2 }
 0x16a   :  { %v2173_v29 = vpack.c.bf16 %v2157_v57, %v2157_v57  ;;  %v2106_v7 = vadd.f32 %v2081_v34, %v1728_v8  ;;  %v1553_v30 = vpop.f32.mrf.mxu1 }
 0x16b   :  { %v1572_v15 = vadd.f32 %v1548_v63, %v1194_v13 }
 0x16c   :  { %2190 = vst.msk [vmem:[%s3584_s3 + $0x24] sm:$0xf] %vm2180_vm4, %v2173_v29  ;;  %v2126_v10 = vadd.f32 %v3484_v55, %v2106_v7 }
 0x16d   :  { %v1729_v11 = vadd.f32 %v1705_v6, %v1572_v15 }
 0x16e   :  { %v2142_v19 = vmul.f32 0.01, %v2126_v10 }
 0x170   :  { %v2158_v12 = vmax.f32 %v2126_v10, %v2142_v19  ;;  %v1173_v21 = vpop.f32.mrf.mxu0  ;;  %v1710_v14 = vpop.f32.mrf.mxu2 }
 0x171   :  { %v2083_v24 = vpop.f32.mrf.mxu3  ;;  %v1195_v3 = vadd.f32 %v1173_v21, %v3460_v22 }
 0x172   :  { %v2174_v2 = vpack.c.bf16 %v2158_v12, %v2158_v12  ;;  %v2107_v25 = vadd.f32 %v2083_v24, %v1729_v11  ;;  %v1556_v36 = vpop.f32.mrf.mxu1 }
 0x173   :  { %v1573_v16 = vadd.f32 %v1551_v17, %v1195_v3 }
 0x174   :  { %2191 = vst.msk [vmem:[%s3584_s3 + $0x28] sm:$0xf] %vm2180_vm4, %v2174_v2  ;;  %v2127_v27 = vadd.f32 %v3484_v55, %v2107_v25 }
 0x175   :  { %v1730_v45 = vadd.f32 %v1708_v20, %v1573_v16 }
 0x176   :  { %v2143_v28 = vmul.f32 0.01, %v2127_v27 }
 0x178   :  { %v2159_v32 = vmax.f32 %v2127_v27, %v2143_v28  ;;  %v1175_v33 = vpop.f32.mrf.mxu0  ;;  %v1713_v50 = vpop.f32.mrf.mxu2 }
 0x179   :  { %v2086_v37 = vpop.f32.mrf.mxu3  ;;  %v1196_v26 = vadd.f32 %v1175_v33, %v3472_v41 }
 0x17a   :  { %v2175_v22 = vpack.c.bf16 %v2159_v32, %v2159_v32  ;;  %v2108_v48 = vadd.f32 %v2086_v37, %v1730_v45 }
 0x17b   :  { %v1574_v38 = vadd.f32 %v1553_v30, %v1196_v26 }
 0x17c   :  { %2192 = vst.msk [vmem:[%s3584_s3 + $0x2c] sm:$0xf] %vm2180_vm4, %v2175_v22  ;;  %v2128_v39 = vadd.f32 %v3484_v55, %v2108_v48 }
 0x17d   :  { %v1731_v42 = vadd.f32 %v1710_v14, %v1574_v38 }
 0x17e   :  { %v2144_v40 = vmul.f32 0.01, %v2128_v39 }
 0x180   :  { %v2160_v43 = vmax.f32 %v2128_v39, %v2144_v40  ;;  %v1178_v23 = vpop.f32.mrf.mxu0  ;;  %v1715_v1 = vpop.f32.mrf.mxu2 }
 0x181   :  { %v2088_v31 = vpop.f32.mrf.mxu3  ;;  %v1197_v46 = vadd.f32 %v1178_v23, %v3476_v49  ;;  %v1558_v49 = vpop.f32.mrf.mxu1 }
 0x182   :  { %v2176_v47 = vpack.c.bf16 %v2160_v43, %v2160_v43  ;;  %v2109_v41 = vadd.f32 %v2088_v31, %v1731_v42 }
 0x183   :  { %v1575_v18 = vadd.f32 %v1556_v36, %v1197_v46 }
 0x184   :  { %2193 = vst.msk [vmem:[%s3584_s3 + $0x30] sm:$0xf] %vm2180_vm4, %v2176_v47  ;;  %v2129_v51 = vadd.f32 %v3484_v55, %v2109_v41 }
 0x185   :  { %v1732_v53 = vadd.f32 %v1713_v50, %v1575_v18 }
 0x186   :  { %v2145_v52 = vmul.f32 0.01, %v2129_v51 }
 0x188   :  { %v2161_v44 = vmax.f32 %v2129_v51, %v2145_v52  ;;  %v1180_v54 = vpop.f32.mrf.mxu0 }
 0x189   :  { %v2091_v59 = vpop.f32.mrf.mxu3  ;;  %v1198_v60 = vadd.f32 %v1180_v54, %v3479_v58 }
 0x18a   :  { %v2177_v56 = vpack.c.bf16 %v2161_v44, %v2161_v44  ;;  %v2110_v61 = vadd.f32 %v2091_v59, %v1732_v53 }
 0x18b   :  { %v1576_v62 = vadd.f32 %v1558_v49, %v1198_v60 }
 0x18c   :  { %2194 = vst.msk [vmem:[%s3584_s3 + $0x34] sm:$0xf] %vm2180_vm4, %v2177_v56  ;;  %v2130_v0 = vadd.f32 %v3484_v55, %v2110_v61 }
 0x18d   :  { %v1733_v4 = vadd.f32 %v1715_v1, %v1576_v62 }
 0x18e   :  { %v2146_v63 = vmul.f32 0.01, %v2130_v0 }
 0x190   :  { %v2162_v5 = vmax.f32 %v2130_v0, %v2146_v63 }
 0x191   :  { %v2093_v6 = vpop.f32.mrf.mxu3 }
 0x192   :  { %v2178_v35 = vpack.c.bf16 %v2162_v5, %v2162_v5  ;;  %v2111_v8 = vadd.f32 %v2093_v6, %v1733_v4 }
 0x194   :  { %2195 = vst.msk [vmem:[%s3584_s3 + $0x38] sm:$0xf] %vm2180_vm4, %v2178_v35  ;;  %v2131_v58 = vadd.f32 %v3484_v55, %v2111_v8 }
 0x196   :  { %v2147_v57 = vmul.f32 0.01, %v2131_v58 }
 0x198   :  { %v2163_v9 = vmax.f32 %v2131_v58, %v2147_v57 }
 0x19a   :  { %v2179_v34 = vpack.c.bf16 %v2163_v9, %v2163_v9 }
 0x19c   :  { %2196 = vst.msk [vmem:[%s3584_s3 + $0x3c] sm:$0xf] %vm2180_vm4, %v2179_v34 }

// kernel: discriminator_forward.6
= control target key start
LH: loop header
LB: loop body
LE: loop exit
PB: predicated region body
PF: predicated region fallthrough
CT: control target
= control target key end

     0   :  { %vm55_vm0 = vcmask 1041408   ;;  %vm59_vm1 = vcmask 1043458   ;;  %vm105_vm2 = vsmask.f32 1280  ;;  %vm106_vm3 = vsmask.f32 3336  ;;  %s1960_s1 = inlined_call_operand.vmem [shape: bf16[8,32,32], index: 1, kind: input, shape index: {}]   ;;  %s1961_s0 = inlined_call_operand.vmem [shape: bf16[2,5,2,5,32], index: 0, kind: input, shape index: {}]   ;;  %s1962_s2 = inlined_call_operand.vmem [shape: f32[1,32], index: 2, kind: input, shape index: {}]   ;;  %s1963_s3 = inlined_call_operand.vmem [shape: bf16[2,16,32], index: 3, kind: output, shape index: {}]  }
   0x1   :  { %v1509_v0 = vld [vmem:[%s1960_s1 + $0x18] sm:$0xff]  ;;  %v31_v1 = vld [vmem:[%s1961_s0] sm:$0x7]  ;;  %v32_v2 = vld [vmem:[%s1961_s0 + $0x8] sm:$0x7]  ;;  %vm258_vm9 = vcmask 261120  }
   0x2   :  { %v33_v3 = vld [vmem:[%s1961_s0 + $0x10] sm:$0x7]  ;;  %v34_v4 = vld [vmem:[%s1961_s0 + $0x18] sm:$0x7]  ;;  %269 = vmatpush.bf16.msra.mxu0 %v1509_v0  ;;  %v47_v6 = vrot.slane %v31_v1, 2  ;;  %v48_v7 = vrot.slane %v32_v2, 2  ;;  %vm107_vm6 = vmor %vm105_vm2, %vm106_vm3 }
   0x3   :  { %v1508_v5 = vld [vmem:[%s1960_s1 + $0x10] sm:$0xff]  ;;  %v49_v8 = vrot.slane %v33_v3, 2  ;;  %v50_v9 = vrot.slane %v34_v4, 2  ;;  %v1507_v10 = vld [vmem:[%s1960_s1 + $0x8] sm:$0xff]  ;;  %vm108_vm4 = vsmask.f32 5392 }
   0x4   :  { %vm110_vm5 = vsmask.f32 7448  ;;  %v58_v11 = vsel %vm55_vm0, %v31_v1, %v47_v6  ;;  %v60_v12 = vsel %vm59_vm1, %v31_v1, %v47_v6  ;;  %v65_v13 = vsel %vm55_vm0, %v32_v2, %v48_v7  ;;  %329 = vmatpush.bf16.msra.mxu1 %v1507_v10  ;;  %v1506_v15 = vld [vmem:[%s1960_s1] sm:$0xff]  ;;  %v1511_v24 = vld [vmem:[%s1960_s1 + $0x28] sm:$0xff]  ;;  %vm1584_vm7 = vmor %vm107_vm6, %vm108_vm4 }
   0x5   :  { %v66_v14 = vsel %vm59_vm1, %v32_v2, %v48_v7  ;;  %v62_v16 = vrot.slane %v60_v12, 2  ;;  %v71_v18 = vsel %vm55_vm0, %v33_v3, %v49_v8  ;;  %v72_v19 = vsel %vm59_vm1, %v33_v3, %v49_v8  ;;  %405 = vmatpush.bf16.msra.mxu2 %v1511_v24  ;;  %v1510_v33 = vld [vmem:[%s1960_s1 + $0x20] sm:$0xff]  ;;  %v35_v39 = vld [vmem:[%s1961_s0 + $0x28] sm:$0x7]  ;;  %v36_v44 = vld [vmem:[%s1961_s0 + $0x30] sm:$0x7] }
   0x6   :  { %v68_v17 = vrot.slane %v66_v14, 2  ;;  %270 = vmatpush.bf16.msra.mxu0 %v1508_v5  ;;  %v74_v20 = vrot.slane %v72_v19, 2  ;;  %v77_v21 = vsel %vm55_vm0, %v34_v4, %v50_v9  ;;  %v78_v22 = vsel %vm59_vm1, %v34_v4, %v50_v9  ;;  %v37_v49 = vld [vmem:[%s1961_s0 + $0x38] sm:$0x7]  ;;  %vm1600_vm8 = vmor %vm1584_vm7, %vm110_vm5  ;;  %v38_v54 = vld [vmem:[%s1961_s0 + $0x40] sm:$0x7] }
   0x7   :  { %v112_v23 = vshrl.u32 %v58_v11, 16  ;;  %v80_v25 = vrot.slane %v78_v22, 2  ;;  %v115_v26 = vshll.u32 %v58_v11, 16  ;;  %v121_v27 = vshll.u32 %v62_v16, 16  ;;  %v1513_v12 = vld [vmem:[%s1960_s1 + $0x38] sm:$0xff]  ;;  %v1512_v22 = vld [vmem:[%s1960_s1 + $0x30] sm:$0xff] }
   0x8   :  { %v125_v28 = vshrl.u32 %v65_v13, 16  ;;  %v128_v30 = vshll.u32 %v65_v13, 16  ;;  %v134_v31 = vshll.u32 %v68_v17, 16  ;;  %v138_v32 = vshrl.u32 %v71_v18, 16  ;;  %330 = vmatpush.bf16.msra.mxu1 %v1506_v15  ;;  %v1519_v17 = vld [vmem:[%s1960_s1 + $0x68] sm:$0xff]  ;;  %650 = vmatpush.bf16.msra.mxu3 %v1513_v12 }
   0x9   :  { %v114_v29 = vrot.slane %v112_v23, 6  ;;  %v117_v35 = vrot.slane %v115_v26, 7  ;;  %v123_v36 = vrot.slane %v121_v27, 7  ;;  %v141_v38 = vshll.u32 %v71_v18, 16  ;;  %406 = vmatpush.bf16.msra.mxu2 %v1510_v33  ;;  %v1396_v34 = vld [vmem:[%s1961_s0 + $0x4] sm:$0x7] }
   0xa   :  { %v127_v37 = vrot.slane %v125_v28, 6  ;;  %v130_v40 = vrot.slane %v128_v30, 7  ;;  %v136_v41 = vrot.slane %v134_v31, 7  ;;  %v140_v42 = vrot.slane %v138_v32, 6 }
   0xb   :  { %v147_v43 = vshll.u32 %v74_v20, 16  ;;  %v118_v45 = vor.u32 %v117_v35, %v114_v29  ;;  %v143_v46 = vrot.slane %v141_v38, 7  ;;  %v151_v47 = vshrl.u32 %v77_v21, 16  ;;  %v19_v35 = vld [vmem:[%s1961_s0] sm:$0x3] }
   0xc   :  { %v154_v48 = vshll.u32 %v77_v21, 16  ;;  %v131_v51 = vor.u32 %v130_v40, %v127_v37  ;;  %v160_v53 = vshll.u32 %v80_v25, 16  ;;  %v51_v55 = vrot.slane %v35_v39, 2  ;;  %651 = vmatpush.bf16.msra.mxu3 %v1512_v22  ;;  %v20_v40 = vld [vmem:[%s1961_s0 + $0x8] sm:$0x3] }
   0xd   :  { %v149_v52 = vrot.slane %v147_v43, 7  ;;  %v119_v56 = vrot.slane %v118_v45, 2  ;;  %v144_v57 = vor.u32 %v143_v46, %v140_v42  ;;  %v153_v58 = vrot.slane %v151_v47, 6  ;;  %1056 = vmatpush.bf16.msrb.mxu2 %v1519_v17  ;;  %v1397_v45 = vld [vmem:[%s1961_s0 + $0xc] sm:$0x7] }
   0xe   :  { %v156_v59 = vrot.slane %v154_v48, 7  ;;  %v132_v60 = vrot.slane %v131_v51, 2  ;;  %v162_v61 = vrot.slane %v160_v53, 7  ;;  %v52_v62 = vrot.slane %v36_v44, 2  ;;  %v21_v46 = vld [vmem:[%s1961_s0 + $0x10] sm:$0x3] }
   0xf   :  { %v53_v63 = vrot.slane %v37_v49, 2  ;;  %v124_v0 = vsel %vm1600_vm8, %v119_v56, %v123_v36  ;;  %v145_v1 = vrot.slane %v144_v57, 2  ;;  %v54_v3 = vrot.slane %v38_v54, 2  ;;  %v1398_v51 = vld [vmem:[%s1961_s0 + $0x14] sm:$0x7] }
  0x10   :  { %v157_v2 = vor.u32 %v156_v59, %v153_v58  ;;  %v137_v4 = vsel %vm1600_vm8, %v132_v60, %v136_v41  ;;  %222 = vst [vmem:[#allocation1] ss:$4 sm:$0xff] %v124_v0  ;;  %v83_v5 = vsel %vm55_vm0, %v35_v39, %v51_v55  ;;  %v84_v6 = vsel %vm59_vm1, %v35_v39, %v51_v55  ;;  %v22_v53 = vld [vmem:[%s1961_s0 + $0x18] sm:$0x3]  ;;  %v1399_v58 = vld [vmem:[%s1961_s0 + $0x1c] sm:$0x7] }
  0x11   :  { %v89_v7 = vsel %vm55_vm0, %v36_v44, %v52_v62  ;;  %v150_v8 = vsel %vm1600_vm8, %v145_v1, %v149_v52  ;;  %225 = vst [vmem:[#allocation1 + $0x1] ss:$4 sm:$0xff] %v137_v4  ;;  %v86_v10 = vrot.slane %v84_v6, 2  ;;  %v90_v11 = vsel %vm59_vm1, %v36_v44, %v52_v62 }
  0x12   :  { %v158_v9 = vrot.slane %v157_v2, 2  ;;  %228 = vst [vmem:[#allocation1 + $0x2] ss:$4 sm:$0xff] %v150_v8  ;;  %v92_v13 = vrot.slane %v90_v11, 2  ;;  %v95_v14 = vsel %vm55_vm0, %v37_v49, %v53_v63  ;;  %v96_v15 = vsel %vm59_vm1, %v37_v49, %v53_v63  ;;  %v1521_v8 = vld [vmem:[%s1960_s1 + $0x78] sm:$0xff] }
  0x13   :  { %v101_v16 = vsel %vm55_vm0, %v38_v54, %v54_v3  ;;  %v98_v19 = vrot.slane %v96_v15, 2  ;;  %v102_v20 = vsel %vm59_vm1, %v38_v54, %v54_v3  ;;  %v164_v21 = vshrl.u32 %v83_v5, 16  ;;  %v1515_v3 = vld [vmem:[%s1960_s1 + $0x48] sm:$0xff]  ;;  %1301 = vmatpush.bf16.msrb.mxu3 %v1521_v8  ;;  %v1403_v8 = vld [vmem:[%s1961_s0 + $0x44] sm:$0x7] }
  0x14   :  { %v163_v18 = vsel %vm1600_vm8, %v158_v9, %v162_v61  ;;  %v104_v23 = vrot.slane %v102_v20, 2  ;;  %v167_v24 = vshll.u32 %v83_v5, 16  ;;  %v173_v25 = vshll.u32 %v86_v10, 16  ;;  %v1517_v9 = vld [vmem:[%s1960_s1 + $0x58] sm:$0xff]  ;;  %731 = vmatpush.bf16.msrb.mxu0 %v1515_v3 }
  0x15   :  { %231 = vst [vmem:[#allocation1 + $0x3] ss:$4 sm:$0xff] %v163_v18  ;;  %v177_v26 = vshrl.u32 %v89_v7, 16  ;;  %v166_v27 = vrot.slane %v164_v21, 6  ;;  %v180_v28 = vshll.u32 %v89_v7, 16  ;;  %v186_v29 = vshll.u32 %v92_v13, 16  ;;  %976 = vmatpush.bf16.msrb.mxu1 %v1517_v9 }
  0x16   :  { %v190_v30 = vshrl.u32 %v95_v14, 16  ;;  %v169_v31 = vrot.slane %v167_v24, 7  ;;  %v193_v33 = vshll.u32 %v95_v14, 16  ;;  %v175_v36 = vrot.slane %v173_v25, 7  ;;  %v1514_v14 = vld [vmem:[%s1960_s1 + $0x40] sm:$0xff] }
  0x17   :  { %v179_v32 = vrot.slane %v177_v26, 6  ;;  %v182_v37 = vrot.slane %v180_v28, 7  ;;  %v199_v39 = vshll.u32 %v98_v19, 16  ;;  %v203_v43 = vshrl.u32 %v101_v16, 16  ;;  %v1374_v26 = vld [vmem:[%s1961_s0 + $0x4] sm:$0x3] }
  0x18   :  { %v192_v38 = vrot.slane %v190_v30, 6  ;;  %v170_v41 = vor.u32 %v169_v31, %v166_v27  ;;  %v195_v42 = vrot.slane %v193_v33, 7  ;;  %v206_v44 = vshll.u32 %v101_v16, 16  ;;  %732 = vmatpush.bf16.msrb.mxu0 %v1514_v14  ;;  %v1375_v31 = vld [vmem:[%s1961_s0 + $0xc] sm:$0x3] }
  0x19   :  { %v183_v47 = vor.u32 %v182_v37, %v179_v32  ;;  %v188_v48 = vrot.slane %v186_v29, 7  ;;  %v212_v49 = vshll.u32 %v104_v23, 16  ;;  %v438_v52 = vrot.slane %v1396_v34, 2 }
  0x1a   :  { %v171_v54 = vrot.slane %v170_v41, 2  ;;  %v196_v55 = vor.u32 %v195_v42, %v192_v38  ;;  %v205_v56 = vrot.slane %v203_v43, 6  ;;  %v208_v57 = vrot.slane %v206_v44, 7  ;;  %v1377_v41 = vld [vmem:[%s1961_s0 + $0x1c] sm:$0x3] }
  0x1b   :  { %v184_v60 = vrot.slane %v183_v47, 2  ;;  %v201_v61 = vrot.slane %v199_v39, 7  ;;  %v439_v62 = vrot.slane %v1397_v45, 2  ;;  %v214_v1 = vrot.slane %v212_v49, 7  ;;  %v23_v47 = vld [vmem:[%s1961_s0 + $0x28] sm:$0x3] }
  0x1c   :  { %v244_v59 = vld.sshfl [vmem:[#allocation1] sm:$0xff pattern:$0x73625140]  ;;  %v197_v63 = vrot.slane %v196_v55, 2  ;;  %v209_v0 = vor.u32 %v208_v57, %v205_v56  ;;  %v440_v2 = vrot.slane %v1398_v51, 2  ;;  %v176_v4 = vsel %vm1600_vm8, %v171_v54, %v175_v36 }
  0x1d   :  { %1362 = vmatmul.msk.bf16.vlgmr.msra.gmra.mxu0 %vm258_vm9, %v244_v59  ;;  %283 = vst [vmem:[#allocation1] ss:$4 sm:$0xff] %v19_v35  ;;  %v189_v5 = vsel %vm1600_vm8, %v184_v60, %v188_v48  ;;  %v448_v6 = vsel %vm55_vm0, %v1396_v34, %v438_v52  ;;  %v449_v7 = vsel %vm59_vm1, %v1396_v34, %v438_v52  ;;  %v441_v11 = vrot.slane %v1399_v58, 2  ;;  %v1376_v36 = vld [vmem:[%s1961_s0 + $0x14] sm:$0x3] }
  0x1e   :  { %286 = vst [vmem:[#allocation1 + $0x1] ss:$4 sm:$0xff] %v20_v40  ;;  %v210_v10 = vrot.slane %v209_v0, 2  ;;  %v454_v12 = vsel %vm55_vm0, %v1397_v45, %v439_v62  ;;  %v455_v13 = vsel %vm59_vm1, %v1397_v45, %v439_v62  ;;  %v202_v15 = vsel %vm1600_vm8, %v197_v63, %v201_v61  ;;  %v24_v55 = vld [vmem:[%s1961_s0 + $0x30] sm:$0x3]  ;;  %v1518_v0 = vld [vmem:[%s1960_s1 + $0x60] sm:$0xff] }
  0x1f   :  { %289 = vst [vmem:[#allocation1 + $0x2] ss:$4 sm:$0xff] %v21_v46  ;;  %v451_v16 = vrot.slane %v449_v7, 2  ;;  %v460_v17 = vsel %vm55_vm0, %v1398_v51, %v440_v2  ;;  %v461_v18 = vsel %vm59_vm1, %v1398_v51, %v440_v2  ;;  %v457_v20 = vrot.slane %v455_v13, 2  ;;  %v25_v56 = vld [vmem:[%s1961_s0 + $0x38] sm:$0x3]  ;;  %1057 = vmatpush.bf16.msrb.mxu2 %v1518_v0 }
  0x20   :  { %292 = vst [vmem:[#allocation1 + $0x3] ss:$4 sm:$0xff] %v22_v53  ;;  %v215_v19 = vsel %vm1600_vm8, %v210_v10, %v214_v1  ;;  %v467_v21 = vsel %vm59_vm1, %v1399_v58, %v441_v11  ;;  %v494_v22 = vshrl.u32 %v448_v6, 16  ;;  %v463_v23 = vrot.slane %v461_v18, 2  ;;  %v26_v57 = vld [vmem:[%s1961_s0 + $0x40] sm:$0x3] }
  0x21   :  { %234 = vst [vmem:[#allocation1 + $0x20] ss:$4 sm:$0xff] %v176_v4  ;;  %v497_v24 = vshll.u32 %v448_v6, 16  ;;  %v507_v25 = vshrl.u32 %v454_v12, 16  ;;  %v466_v27 = vsel %vm55_vm0, %v1399_v58, %v441_v11  ;;  %v510_v29 = vshll.u32 %v454_v12, 16  ;;  %v1516_v61 = vld [vmem:[%s1960_s1 + $0x50] sm:$0xff] }
  0x22   :  { %237 = vst [vmem:[#allocation1 + $0x21] ss:$4 sm:$0xff] %v189_v5  ;;  %v496_v28 = vrot.slane %v494_v22, 6  ;;  %v520_v30 = vshrl.u32 %v460_v17, 16  ;;  %v469_v32 = vrot.slane %v467_v21, 2  ;;  %v523_v35 = vshll.u32 %v460_v17, 16  ;;  %977 = vmatpush.bf16.msrb.mxu1 %v1516_v61 }
  0x23   :  { %240 = vst [vmem:[#allocation1 + $0x22] ss:$4 sm:$0xff] %v202_v15  ;;  %v499_v33 = vrot.slane %v497_v24, 7  ;;  %v509_v34 = vrot.slane %v507_v25, 6  ;;  %v503_v37 = vshll.u32 %v451_v16, 16  ;;  %v512_v38 = vrot.slane %v510_v29, 7 }
  0x24   :  { %243 = vst [vmem:[#allocation1 + $0x23] ss:$4 sm:$0xff] %v215_v19  ;;  %v516_v39 = vshll.u32 %v457_v20, 16  ;;  %v522_v40 = vrot.slane %v520_v30, 6  ;;  %v525_v42 = vrot.slane %v523_v35, 7  ;;  %v529_v43 = vshll.u32 %v463_v23, 16 }
  0x25   :  { %v533_v44 = vshrl.u32 %v466_v27, 16  ;;  %v536_v45 = vshll.u32 %v466_v27, 16  ;;  %v500_v48 = vor.u32 %v499_v33, %v496_v28  ;;  %v513_v49 = vor.u32 %v512_v38, %v509_v34  ;;  %v1400_v5 = vld [vmem:[%s1961_s0 + $0x2c] sm:$0x7]  ;;  %v1401_v6 = vld [vmem:[%s1961_s0 + $0x34] sm:$0x7] }
  0x26   :  { %v526_v51 = vor.u32 %v525_v42, %v522_v40  ;;  %v542_v54 = vshll.u32 %v469_v32, 16  ;;  %v505_v58 = vrot.slane %v503_v37, 7  ;;  %v518_v59 = vrot.slane %v516_v39, 7  ;;  %v1402_v7 = vld [vmem:[%s1961_s0 + $0x3c] sm:$0x7] }
  0x27   :  { %v305_v46 = vld.sshfl [vmem:[#allocation1] sm:$0xff pattern:$0x73625140]  ;;  %v535_v52 = vrot.slane %v533_v44, 6  ;;  %v538_v53 = vrot.slane %v536_v45, 7  ;;  %v531_v60 = vrot.slane %v529_v43, 7 }
  0x28   :  { %1372 = vmatmul.msk.bf16.vlgmr.msra.gmra.mxu1 %vm258_vm9, %v305_v46  ;;  %359 = vst [vmem:[#allocation1] ss:$4 sm:$0xff] %v1374_v26  ;;  %v501_v1 = vrot.slane %v500_v48, 2  ;;  %v514_v2 = vrot.slane %v513_v49, 2  ;;  %v527_v3 = vrot.slane %v526_v51, 2  ;;  %v544_v4 = vrot.slane %v542_v54, 7 }
  0x29   :  { %362 = vst [vmem:[#allocation1 + $0x1] ss:$4 sm:$0xff] %v1375_v31  ;;  %v539_v63 = vor.u32 %v538_v53, %v535_v52  ;;  %v442_v10 = vrot.slane %v1400_v5, 2  ;;  %v443_v11 = vrot.slane %v1401_v6, 2  ;;  %v444_v12 = vrot.slane %v1402_v7, 2 }
  0x2a   :  { %365 = vst [vmem:[#allocation1 + $0x2] ss:$4 sm:$0xff] %v1376_v36  ;;  %v506_v13 = vsel %vm1600_vm8, %v501_v1, %v505_v58  ;;  %v519_v14 = vsel %vm1600_vm8, %v514_v2, %v518_v59  ;;  %v532_v15 = vsel %vm1600_vm8, %v527_v3, %v531_v60  ;;  %v445_v16 = vrot.slane %v1403_v8, 2  ;;  %v1378_v22 = vld [vmem:[%s1961_s0 + $0x2c] sm:$0x3] }
  0x2b   :  { %v245_v62 = vld.sshfl [vmem:[#allocation1 + $0x20] sm:$0xff pattern:$0x73625140]  ;;  %368 = vst [vmem:[#allocation1 + $0x3] ss:$4 sm:$0xff] %v1377_v41  ;;  %v540_v9 = vrot.slane %v539_v63, 2  ;;  %v472_v17 = vsel %vm55_vm0, %v1400_v5, %v442_v10  ;;  %v473_v18 = vsel %vm59_vm1, %v1400_v5, %v442_v10  ;;  %v478_v19 = vsel %vm55_vm0, %v1401_v6, %v443_v11 }
  0x2c   :  { %295 = vst [vmem:[#allocation1 + $0x20] ss:$4 sm:$0xff] %v23_v47  ;;  %v479_v20 = vsel %vm59_vm1, %v1401_v6, %v443_v11  ;;  %v475_v23 = vrot.slane %v473_v18, 2  ;;  %v484_v25 = vsel %vm55_vm0, %v1402_v7, %v444_v12  ;;  %v485_v26 = vsel %vm59_vm1, %v1402_v7, %v444_v12  ;;  %v1379_v28 = vld [vmem:[%s1961_s0 + $0x34] sm:$0x3] }
  0x2d   :  { %1363 = vmatmul.msk.bf16.gmra.mxu0 %vm258_vm9, %v245_v62  ;;  %298 = vst [vmem:[#allocation1 + $0x21] ss:$4 sm:$0xff] %v24_v55  ;;  %v481_v24 = vrot.slane %v479_v20, 2  ;;  %v545_v27 = vsel %vm1600_vm8, %v540_v9, %v544_v4  ;;  %v487_v29 = vrot.slane %v485_v26, 2  ;;  %v491_v30 = vsel %vm59_vm1, %v1403_v8, %v445_v16  ;;  %v1380_v32 = vld [vmem:[%s1961_s0 + $0x3c] sm:$0x3] }
  0x2e   :  { %301 = vst [vmem:[#allocation1 + $0x22] ss:$4 sm:$0xff] %v25_v56  ;;  %v546_v31 = vshrl.u32 %v472_v17, 16  ;;  %v493_v33 = vrot.slane %v491_v30, 2  ;;  %v549_v34 = vshll.u32 %v472_v17, 16  ;;  %v555_v35 = vshll.u32 %v475_v23, 16 }
  0x2f   :  { %304 = vst [vmem:[#allocation1 + $0x23] ss:$4 sm:$0xff] %v26_v57  ;;  %v559_v36 = vshrl.u32 %v478_v19, 16  ;;  %v1381_v37 = vld [vmem:[%s1961_s0 + $0x44] sm:$0x3]  ;;  %v562_v39 = vshll.u32 %v478_v19, 16  ;;  %v490_v43 = vsel %vm55_vm0, %v1403_v8, %v445_v16 }
  0x30   :  { %v548_v38 = vrot.slane %v546_v31, 6  ;;  %v568_v40 = vshll.u32 %v481_v24, 16  ;;  %v572_v41 = vshrl.u32 %v484_v25, 16  ;;  %v551_v44 = vrot.slane %v549_v34, 7  ;;  %v1440_v45 = vld [vmem:[%s1961_s0 + $0x8] sm:$0x7] }
  0x31   :  { %v557_v46 = vrot.slane %v555_v35, 7  ;;  %v561_v47 = vrot.slane %v559_v36, 6  ;;  %v564_v48 = vrot.slane %v562_v39, 7  ;;  %v1441_v49 = vld [vmem:[%s1961_s0 + $0x10] sm:$0x7]  ;;  %v575_v54 = vshll.u32 %v484_v25, 16 }
  0x32   :  { %v381_v21 = vld.sshfl [vmem:[#allocation1] sm:$0xff pattern:$0x73625140]  ;;  %v1442_v51 = vld [vmem:[%s1961_s0 + $0x18] sm:$0x7]  ;;  %v552_v52 = vor.u32 %v551_v44, %v548_v38  ;;  %v574_v53 = vrot.slane %v572_v41, 6 }
  0x33   :  { %1394 = vmatmul.msk.bf16.vlgmr.msra.gmra.mxu2 %vm258_vm9, %v381_v21  ;;  %604 = vst [vmem:[#allocation1] ss:$4 sm:$0xff] %v506_v13  ;;  %v581_v55 = vshll.u32 %v487_v29, 16  ;;  %v1443_v56 = vld [vmem:[%s1961_s0 + $0x20] sm:$0x7]  ;;  %v1520_v57 = vld [vmem:[%s1960_s1 + $0x70] sm:$0xff]  ;;  %v565_v59 = vor.u32 %v564_v48, %v561_v47 }
  0x34   :  { %607 = vst [vmem:[#allocation1 + $0x1] ss:$4 sm:$0xff] %v519_v14  ;;  %v1418_v58 = vld [vmem:[%s1961_s0 + $0x8] sm:$0x3]  ;;  %v585_v60 = vshrl.u32 %v490_v43, 16  ;;  %v588_v61 = vshll.u32 %v490_v43, 16  ;;  %1302 = vmatpush.bf16.msrb.mxu3 %v1520_v57 }
  0x35   :  { %610 = vst [vmem:[#allocation1 + $0x2] ss:$4 sm:$0xff] %v532_v15  ;;  %v594_v62 = vshll.u32 %v493_v33, 16  ;;  %v553_v63 = vrot.slane %v552_v52, 2  ;;  %v570_v0 = vrot.slane %v568_v40, 7  ;;  %v577_v1 = vrot.slane %v575_v54, 7 }
  0x36   :  { %v306_v42 = vld.sshfl [vmem:[#allocation1 + $0x20] sm:$0xff pattern:$0x73625140]  ;;  %613 = vst [vmem:[#allocation1 + $0x3] ss:$4 sm:$0xff] %v545_v27  ;;  %v566_v3 = vrot.slane %v565_v59, 2 }
  0x37   :  { %371 = vst [vmem:[#allocation1 + $0x20] ss:$4 sm:$0xff] %v1378_v22  ;;  %v1419_v2 = vld [vmem:[%s1961_s0 + $0x10] sm:$0x3]  ;;  %v587_v4 = vrot.slane %v585_v60, 6  ;;  %v590_v5 = vrot.slane %v588_v61, 7  ;;  %v578_v8 = vor.u32 %v577_v1, %v574_v53  ;;  %v558_v13 = vsel %vm1600_vm8, %v553_v63, %v557_v46 }
  0x38   :  { %1373 = vmatmul.msk.bf16.gmra.mxu1 %vm258_vm9, %v306_v42  ;;  %374 = vst [vmem:[#allocation1 + $0x21] ss:$4 sm:$0xff] %v1379_v28  ;;  %v764_v6 = vrot.slane %v1440_v45, 2  ;;  %v1420_v7 = vld [vmem:[%s1961_s0 + $0x18] sm:$0x3]  ;;  %v583_v9 = vrot.slane %v581_v55, 7  ;;  %v571_v18 = vsel %vm1600_vm8, %v566_v3, %v570_v0 }
  0x39   :  { %377 = vst [vmem:[#allocation1 + $0x22] ss:$4 sm:$0xff] %v1380_v32  ;;  %v765_v10 = vrot.slane %v1441_v49, 2  ;;  %v766_v11 = vrot.slane %v1442_v51, 2  ;;  %v591_v14 = vor.u32 %v590_v5, %v587_v4  ;;  %v596_v15 = vrot.slane %v594_v62, 7 }
  0x3a   :  { %380 = vst [vmem:[#allocation1 + $0x23] ss:$4 sm:$0xff] %v1381_v37  ;;  %v767_v16 = vrot.slane %v1443_v56, 2  ;;  %v1421_v17 = vld [vmem:[%s1961_s0 + $0x20] sm:$0x3]  ;;  %v579_v19 = vrot.slane %v578_v8, 2  ;;  %v775_v20 = vsel %vm59_vm1, %v1440_v45, %v764_v6  ;;  %v774_v23 = vsel %vm55_vm0, %v1440_v45, %v764_v6 }
  0x3b   :  { %v781_v21 = vsel %vm59_vm1, %v1441_v49, %v765_v10  ;;  %v592_v22 = vrot.slane %v591_v14, 2  ;;  %v777_v24 = vrot.slane %v775_v20, 2  ;;  %v780_v26 = vsel %vm55_vm0, %v1441_v49, %v765_v10  ;;  %v1484_v59 = vld [vmem:[%s1961_s0 + $0xc] sm:$0x7]  ;;  %v1485_v60 = vld [vmem:[%s1961_s0 + $0x14] sm:$0x7] }
  0x3c   :  { %v783_v25 = vrot.slane %v781_v21, 2  ;;  %v786_v27 = vsel %vm55_vm0, %v1442_v51, %v766_v11  ;;  %v787_v28 = vsel %vm59_vm1, %v1442_v51, %v766_v11  ;;  %v793_v29 = vsel %vm59_vm1, %v1443_v56, %v767_v16  ;;  %v1422_v5 = vld [vmem:[%s1961_s0 + $0x30] sm:$0x3]  ;;  %v1486_v6 = vld [vmem:[%s1961_s0 + $0x1c] sm:$0x7] }
  0x3d   :  { %v626_v12 = vld.sshfl [vmem:[#allocation1] sm:$0xff pattern:$0x73625140]  ;;  %v584_v31 = vsel %vm1600_vm8, %v579_v19, %v583_v9  ;;  %v597_v32 = vsel %vm1600_vm8, %v592_v22, %v596_v15  ;;  %v789_v33 = vrot.slane %v787_v28, 2  ;;  %v792_v34 = vsel %vm55_vm0, %v1443_v56, %v767_v16  ;;  %v1423_v15 = vld [vmem:[%s1961_s0 + $0x38] sm:$0x3] }
  0x3e   :  { %1416 = vmatmul.msk.bf16.vlgmr.msra.gmra.mxu3 %vm258_vm9, %v626_v12  ;;  %685 = vst [vmem:[#allocation1] ss:$4 sm:$0xff] %v1418_v58  ;;  %v795_v35 = vrot.slane %v793_v29, 2  ;;  %v820_v36 = vshrl.u32 %v774_v23, 16  ;;  %v823_v37 = vshll.u32 %v774_v23, 16  ;;  %v829_v38 = vshll.u32 %v777_v24, 16 }
  0x3f   :  { %688 = vst [vmem:[#allocation1 + $0x1] ss:$4 sm:$0xff] %v1419_v2  ;;  %v833_v39 = vshrl.u32 %v780_v26, 16  ;;  %v836_v40 = vshll.u32 %v780_v26, 16  ;;  %v842_v41 = vshll.u32 %v783_v25, 16  ;;  %v846_v42 = vshrl.u32 %v786_v27, 16 }
  0x40   :  { %691 = vst [vmem:[#allocation1 + $0x2] ss:$4 sm:$0xff] %v1420_v7  ;;  %v822_v43 = vrot.slane %v820_v36, 6  ;;  %v825_v44 = vrot.slane %v823_v37, 7  ;;  %v831_v45 = vrot.slane %v829_v38, 7  ;;  %v849_v46 = vshll.u32 %v786_v27, 16 }
  0x41   :  { %v382_v30 = vld.sshfl [vmem:[#allocation1 + $0x20] sm:$0xff pattern:$0x73625140]  ;;  %694 = vst [vmem:[#allocation1 + $0x3] ss:$4 sm:$0xff] %v1421_v17  ;;  %v835_v47 = vrot.slane %v833_v39, 6 }
  0x42   :  { %616 = vst [vmem:[#allocation1 + $0x20] ss:$4 sm:$0xff] %v558_v13  ;;  %v838_v48 = vrot.slane %v836_v40, 7  ;;  %v844_v49 = vrot.slane %v842_v41, 7  ;;  %v848_v51 = vrot.slane %v846_v42, 6  ;;  %v826_v52 = vor.u32 %v825_v44, %v822_v43 }
  0x43   :  { %1395 = vmatmul.msk.bf16.gmra.mxu2 %vm258_vm9, %v382_v30  ;;  %619 = vst [vmem:[#allocation1 + $0x21] ss:$4 sm:$0xff] %v571_v18  ;;  %v851_v53 = vrot.slane %v849_v46, 7  ;;  %v855_v54 = vshll.u32 %v789_v33, 16  ;;  %v859_v55 = vshrl.u32 %v792_v34, 16  ;;  %v862_v57 = vshll.u32 %v792_v34, 16 }
  0x44   :  { %622 = vst [vmem:[#allocation1 + $0x22] ss:$4 sm:$0xff] %v584_v31  ;;  %v839_v56 = vor.u32 %v838_v48, %v835_v47  ;;  %v868_v58 = vshll.u32 %v795_v35, 16  ;;  %v827_v62 = vrot.slane %v826_v52, 2  ;;  %v1089_v7 = vrot.slane %v1484_v59, 2 }
  0x45   :  { %625 = vst [vmem:[#allocation1 + $0x23] ss:$4 sm:$0xff] %v597_v32  ;;  %v852_v63 = vor.u32 %v851_v53, %v848_v51  ;;  %v857_v0 = vrot.slane %v855_v54, 7  ;;  %v861_v1 = vrot.slane %v859_v55, 6  ;;  %v864_v3 = vrot.slane %v862_v57, 7 }
  0x46   :  { %v840_v2 = vrot.slane %v839_v56, 2  ;;  %v870_v4 = vrot.slane %v868_v58, 7  ;;  %v832_v8 = vsel %vm1600_vm8, %v827_v62, %v831_v45  ;;  %v1487_v10 = vld [vmem:[%s1961_s0 + $0x24] sm:$0x7]  ;;  %v1090_v11 = vrot.slane %v1485_v60, 2 }
  0x47   :  { %v853_v9 = vrot.slane %v852_v63, 2  ;;  %v1091_v12 = vrot.slane %v1486_v6, 2  ;;  %v865_v14 = vor.u32 %v864_v3, %v861_v1  ;;  %v1092_v16 = vrot.slane %v1487_v10, 2  ;;  %v1424_v20 = vld [vmem:[%s1961_s0 + $0x40] sm:$0x3] }
  0x48   :  { %v707_v61 = vld.sshfl [vmem:[#allocation1] sm:$0xff pattern:$0x73625140]  ;;  %v845_v13 = vsel %vm1600_vm8, %v840_v2, %v844_v49  ;;  %v1099_v17 = vsel %vm55_vm0, %v1484_v59, %v1089_v7  ;;  %v1100_v21 = vsel %vm59_vm1, %v1484_v59, %v1089_v7  ;;  %v1105_v22 = vsel %vm55_vm0, %v1485_v60, %v1090_v11  ;;  %v1425_v28 = vld [vmem:[%s1961_s0 + $0x48] sm:$0x3] }
  0x49   :  { %1438 = vmatmul.msk.bf16.vlgmr.msrb.gmra.mxu0 %vm258_vm9, %v707_v61  ;;  %930 = vst [vmem:[#allocation1] ss:$4 sm:$0xff] %v832_v8  ;;  %v858_v19 = vsel %vm1600_vm8, %v853_v9, %v857_v0  ;;  %v1106_v23 = vsel %vm59_vm1, %v1485_v60, %v1090_v11  ;;  %v866_v24 = vrot.slane %v865_v14, 2  ;;  %v1102_v25 = vrot.slane %v1100_v21, 2  ;;  %v1444_v41 = vld [vmem:[%s1961_s0 + $0x30] sm:$0x7] }
  0x4a   :  { %933 = vst [vmem:[#allocation1 + $0x1] ss:$4 sm:$0xff] %v845_v13  ;;  %v1108_v26 = vrot.slane %v1106_v23, 2  ;;  %v1111_v27 = vsel %vm55_vm0, %v1486_v6, %v1091_v12  ;;  %v1112_v29 = vsel %vm59_vm1, %v1486_v6, %v1091_v12  ;;  %v1117_v30 = vsel %vm55_vm0, %v1487_v10, %v1092_v16  ;;  %v1462_v51 = vld [vmem:[%s1961_s0 + $0xc] sm:$0x3] }
  0x4b   :  { %936 = vst [vmem:[#allocation1 + $0x2] ss:$4 sm:$0xff] %v858_v19  ;;  %v1118_v31 = vsel %vm59_vm1, %v1487_v10, %v1092_v16  ;;  %v1145_v32 = vshrl.u32 %v1099_v17, 16  ;;  %v871_v33 = vsel %vm1600_vm8, %v866_v24, %v870_v4  ;;  %v1114_v34 = vrot.slane %v1112_v29, 2  ;;  %v1445_v56 = vld [vmem:[%s1961_s0 + $0x38] sm:$0x7] }
  0x4c   :  { %v627_v18 = vld.sshfl [vmem:[#allocation1 + $0x20] sm:$0xff pattern:$0x73625140]  ;;  %v1120_v35 = vrot.slane %v1118_v31, 2  ;;  %v1148_v36 = vshll.u32 %v1099_v17, 16  ;;  %v1154_v38 = vshll.u32 %v1102_v25, 16 }
  0x4d   :  { %697 = vst [vmem:[#allocation1 + $0x20] ss:$4 sm:$0xff] %v1422_v5  ;;  %v1147_v37 = vrot.slane %v1145_v32, 6  ;;  %v1158_v39 = vshrl.u32 %v1105_v22, 16  ;;  %v1161_v40 = vshll.u32 %v1105_v22, 16  ;;  %v1167_v43 = vshll.u32 %v1108_v26, 16 }
  0x4e   :  { %1417 = vmatmul.msk.bf16.gmra.mxu3 %vm258_vm9, %v627_v18  ;;  %700 = vst [vmem:[#allocation1 + $0x21] ss:$4 sm:$0xff] %v1423_v15  ;;  %v1150_v42 = vrot.slane %v1148_v36, 7  ;;  %v1171_v44 = vshrl.u32 %v1111_v27, 16  ;;  %v1174_v45 = vshll.u32 %v1111_v27, 16  ;;  %v1156_v46 = vrot.slane %v1154_v38, 7 }
  0x4f   :  { %939 = vst [vmem:[#allocation1 + $0x3] ss:$4 sm:$0xff] %v871_v33  ;;  %v1160_v47 = vrot.slane %v1158_v39, 6  ;;  %v1163_v48 = vrot.slane %v1161_v40, 7  ;;  %v1180_v49 = vshll.u32 %v1114_v34, 16  ;;  %v1169_v53 = vrot.slane %v1167_v43, 7 }
  0x50   :  { %703 = vst [vmem:[#allocation1 + $0x22] ss:$4 sm:$0xff] %v1424_v20  ;;  %v1151_v52 = vor.u32 %v1150_v42, %v1147_v37  ;;  %v1173_v54 = vrot.slane %v1171_v44, 6  ;;  %v1176_v55 = vrot.slane %v1174_v45, 7  ;;  %v1463_v57 = vld [vmem:[%s1961_s0 + $0x14] sm:$0x3] }
  0x51   :  { %706 = vst [vmem:[#allocation1 + $0x23] ss:$4 sm:$0xff] %v1425_v28  ;;  %v1164_v58 = vor.u32 %v1163_v48, %v1160_v47  ;;  %v1182_v59 = vrot.slane %v1180_v49, 7  ;;  %v1184_v60 = vshrl.u32 %v1117_v30, 16  ;;  %v1187_v61 = vshll.u32 %v1117_v30, 16 }
  0x52   :  { %v1446_v62 = vld [vmem:[%s1961_s0 + $0x40] sm:$0x7]  ;;  %v1152_v63 = vrot.slane %v1151_v52, 2  ;;  %v1177_v0 = vor.u32 %v1176_v55, %v1173_v54  ;;  %v1193_v1 = vshll.u32 %v1120_v35, 16  ;;  %v1447_v2 = vld [vmem:[%s1961_s0 + $0x48] sm:$0x7] }
  0x53   :  { %v768_v3 = vrot.slane %v1444_v41, 2  ;;  %v1464_v4 = vld [vmem:[%s1961_s0 + $0x1c] sm:$0x3]  ;;  %v1165_v5 = vrot.slane %v1164_v58, 2  ;;  %v1186_v6 = vrot.slane %v1184_v60, 6  ;;  %v1189_v7 = vrot.slane %v1187_v61, 7 }
  0x54   :  { %v769_v8 = vrot.slane %v1445_v56, 2  ;;  %v1157_v10 = vsel %vm1600_vm8, %v1152_v63, %v1156_v46  ;;  %v1178_v11 = vrot.slane %v1177_v0, 2  ;;  %v770_v12 = vrot.slane %v1446_v62, 2  ;;  %v1465_v13 = vld [vmem:[%s1961_s0 + $0x24] sm:$0x3] }
  0x55   :  { %v1190_v14 = vor.u32 %v1189_v7, %v1186_v6  ;;  %v1195_v15 = vrot.slane %v1193_v1, 7  ;;  %v771_v16 = vrot.slane %v1447_v2, 2  ;;  %v798_v17 = vsel %vm55_vm0, %v1444_v41, %v768_v3  ;;  %v1488_v47 = vld [vmem:[%s1961_s0 + $0x34] sm:$0x7]  ;;  %v1490_v58 = vld [vmem:[%s1961_s0 + $0x44] sm:$0x7] }
  0x56   :  { %v952_v9 = vld.sshfl [vmem:[#allocation1] sm:$0xff pattern:$0x73625140]  ;;  %v1170_v19 = vsel %vm1600_vm8, %v1165_v5, %v1169_v53  ;;  %v1183_v20 = vsel %vm1600_vm8, %v1178_v11, %v1182_v59  ;;  %v799_v21 = vsel %vm59_vm1, %v1444_v41, %v768_v3  ;;  %v805_v22 = vsel %vm59_vm1, %v1445_v56, %v769_v8  ;;  %v1489_v53 = vld [vmem:[%s1961_s0 + $0x3c] sm:$0x7] }
  0x57   :  { %1460 = vmatmul.msk.bf16.vlgmr.msrb.gmra.mxu1 %vm258_vm9, %v952_v9  ;;  %1010 = vst [vmem:[#allocation1] ss:$4 sm:$0xff] %v1462_v51  ;;  %v1191_v23 = vrot.slane %v1190_v14, 2  ;;  %v801_v24 = vrot.slane %v799_v21, 2  ;;  %v804_v25 = vsel %vm55_vm0, %v1445_v56, %v769_v8  ;;  %v807_v26 = vrot.slane %v805_v22, 2 }
  0x58   :  { %v708_v18 = vld.sshfl [vmem:[#allocation1 + $0x20] sm:$0xff pattern:$0x73625140]  ;;  %1013 = vst [vmem:[#allocation1 + $0x1] ss:$4 sm:$0xff] %v1463_v57  ;;  %v810_v27 = vsel %vm55_vm0, %v1446_v62, %v770_v12  ;;  %v811_v28 = vsel %vm59_vm1, %v1446_v62, %v770_v12  ;;  %v817_v29 = vsel %vm59_vm1, %v1447_v2, %v771_v16  ;;  %v872_v30 = vshrl.u32 %v798_v17, 16 }
  0x59   :  { %1439 = vmatmul.msk.bf16.gmra.mxu0 %vm258_vm9, %v708_v18  ;;  %1016 = vst [vmem:[#allocation1 + $0x2] ss:$4 sm:$0xff] %v1464_v4  ;;  %v813_v31 = vrot.slane %v811_v28, 2  ;;  %v816_v32 = vsel %vm55_vm0, %v1447_v2, %v771_v16  ;;  %v819_v33 = vrot.slane %v817_v29, 2  ;;  %v875_v34 = vshll.u32 %v798_v17, 16 }
  0x5a   :  { %1019 = vst [vmem:[#allocation1 + $0x3] ss:$4 sm:$0xff] %v1465_v13  ;;  %v874_v35 = vrot.slane %v872_v30, 6  ;;  %v881_v36 = vshll.u32 %v801_v24, 16  ;;  %v885_v37 = vshrl.u32 %v804_v25, 16  ;;  %v888_v38 = vshll.u32 %v804_v25, 16 }
  0x5b   :  { %v877_v39 = vrot.slane %v875_v34, 7  ;;  %v894_v40 = vshll.u32 %v807_v26, 16  ;;  %v898_v41 = vshrl.u32 %v810_v27, 16  ;;  %v901_v42 = vshll.u32 %v810_v27, 16  ;;  %v1491_v6 = vld [vmem:[%s1961_s0 + $0x4c] sm:$0x7] }
  0x5c   :  { %v1196_v43 = vsel %vm1600_vm8, %v1191_v23, %v1195_v15  ;;  %v887_v44 = vrot.slane %v885_v37, 6  ;;  %v890_v45 = vrot.slane %v888_v38, 7  ;;  %v907_v46 = vshll.u32 %v813_v31, 16  ;;  %v1466_v29 = vld [vmem:[%s1961_s0 + $0x34] sm:$0x3] }
  0x5d   :  { %v878_v48 = vor.u32 %v877_v39, %v874_v35  ;;  %v883_v49 = vrot.slane %v881_v36, 7  ;;  %v900_v51 = vrot.slane %v898_v41, 6  ;;  %v903_v52 = vrot.slane %v901_v42, 7  ;;  %v1468_v38 = vld [vmem:[%s1961_s0 + $0x44] sm:$0x3] }
  0x5e   :  { %v891_v54 = vor.u32 %v890_v45, %v887_v44  ;;  %v896_v55 = vrot.slane %v894_v40, 7  ;;  %v911_v56 = vshrl.u32 %v816_v32, 16  ;;  %v914_v57 = vshll.u32 %v816_v32, 16  ;;  %v1469_v42 = vld [vmem:[%s1961_s0 + $0x4c] sm:$0x3] }
  0x5f   :  { %v879_v60 = vrot.slane %v878_v48, 2  ;;  %v904_v61 = vor.u32 %v903_v52, %v900_v51  ;;  %v909_v62 = vrot.slane %v907_v46, 7  ;;  %v920_v63 = vshll.u32 %v819_v33, 16  ;;  %v1467_v33 = vld [vmem:[%s1961_s0 + $0x3c] sm:$0x3] }
  0x60   :  { %v892_v0 = vrot.slane %v891_v54, 2  ;;  %v913_v1 = vrot.slane %v911_v56, 6  ;;  %v916_v2 = vrot.slane %v914_v57, 7  ;;  %v1093_v3 = vrot.slane %v1488_v47, 2 }
  0x61   :  { %v1032_v59 = vld.sshfl [vmem:[#allocation1] sm:$0xff pattern:$0x73625140]  ;;  %v884_v4 = vsel %vm1600_vm8, %v879_v60, %v883_v49  ;;  %v905_v5 = vrot.slane %v904_v61, 2  ;;  %v1094_v7 = vrot.slane %v1489_v53, 2  ;;  %v1095_v11 = vrot.slane %v1490_v58, 2 }
  0x62   :  { %1482 = vmatmul.msk.bf16.vlgmr.msrb.gmra.mxu2 %vm258_vm9, %v1032_v59  ;;  %1255 = vst [vmem:[#allocation1] ss:$4 sm:$0xff] %v1157_v10  ;;  %v897_v8 = vsel %vm1600_vm8, %v892_v0, %v896_v55  ;;  %v917_v9 = vor.u32 %v916_v2, %v913_v1  ;;  %v922_v10 = vrot.slane %v920_v63, 7  ;;  %v1096_v14 = vrot.slane %v1491_v6, 2 }
  0x63   :  { %1258 = vst [vmem:[#allocation1 + $0x1] ss:$4 sm:$0xff] %v1170_v19  ;;  %v910_v12 = vsel %vm1600_vm8, %v905_v5, %v909_v62  ;;  %v1123_v15 = vsel %vm55_vm0, %v1488_v47, %v1093_v3  ;;  %v1129_v16 = vsel %vm55_vm0, %v1489_v53, %v1094_v7  ;;  %v1135_v18 = vsel %vm55_vm0, %v1490_v58, %v1095_v11 }
  0x64   :  { %1261 = vst [vmem:[#allocation1 + $0x2] ss:$4 sm:$0xff] %v1183_v20  ;;  %v918_v13 = vrot.slane %v917_v9, 2  ;;  %v1124_v19 = vsel %vm59_vm1, %v1488_v47, %v1093_v3  ;;  %v1197_v20 = vshrl.u32 %v1123_v15, 16  ;;  %v1200_v21 = vshll.u32 %v1123_v15, 16 }
  0x65   :  { %1264 = vst [vmem:[#allocation1 + $0x3] ss:$4 sm:$0xff] %v1196_v43  ;;  %v1141_v22 = vsel %vm55_vm0, %v1491_v6, %v1096_v14  ;;  %v1210_v23 = vshrl.u32 %v1129_v16, 16  ;;  %v1213_v24 = vshll.u32 %v1129_v16, 16  ;;  %v1130_v25 = vsel %vm59_vm1, %v1489_v53, %v1094_v7 }
  0x66   :  { %942 = vst [vmem:[#allocation1 + $0x20] ss:$4 sm:$0xff] %v884_v4  ;;  %v923_v17 = vsel %vm1600_vm8, %v918_v13, %v922_v10  ;;  %v1223_v26 = vshrl.u32 %v1135_v18, 16  ;;  %v1226_v27 = vshll.u32 %v1135_v18, 16  ;;  %v1126_v30 = vrot.slane %v1124_v19, 2 }
  0x67   :  { %945 = vst [vmem:[#allocation1 + $0x21] ss:$4 sm:$0xff] %v897_v8  ;;  %v1136_v31 = vsel %vm59_vm1, %v1490_v58, %v1095_v11  ;;  %v1142_v32 = vsel %vm59_vm1, %v1491_v6, %v1096_v14  ;;  %v1199_v34 = vrot.slane %v1197_v20, 6  ;;  %v1202_v35 = vrot.slane %v1200_v21, 7 }
  0x68   :  { %948 = vst [vmem:[#allocation1 + $0x22] ss:$4 sm:$0xff] %v910_v12  ;;  %v1236_v36 = vshrl.u32 %v1141_v22, 16  ;;  %v1239_v37 = vshll.u32 %v1141_v22, 16  ;;  %v1132_v39 = vrot.slane %v1130_v25, 2  ;;  %v1212_v40 = vrot.slane %v1210_v23, 6 }
  0x69   :  { %951 = vst [vmem:[#allocation1 + $0x23] ss:$4 sm:$0xff] %v923_v17  ;;  %v1215_v41 = vrot.slane %v1213_v24, 7  ;;  %v1138_v43 = vrot.slane %v1136_v31, 2  ;;  %v1225_v44 = vrot.slane %v1223_v26, 6  ;;  %v1228_v45 = vrot.slane %v1226_v27, 7 }
  0x6a   :  { %v1144_v47 = vrot.slane %v1142_v32, 2  ;;  %v1238_v48 = vrot.slane %v1236_v36, 6  ;;  %v1241_v49 = vrot.slane %v1239_v37, 7  ;;  %v1203_v51 = vor.u32 %v1202_v35, %v1199_v34  ;;  %v1522_v36 = vld [vmem:[%s1962_s2] ss:$0 sm:$0xff] }
  0x6b   :  { %v1206_v52 = vshll.u32 %v1126_v30, 16  ;;  %v1216_v53 = vor.u32 %v1215_v41, %v1212_v40  ;;  %v1219_v54 = vshll.u32 %v1132_v39, 16  ;;  %v1229_v55 = vor.u32 %v1228_v45, %v1225_v44 }
  0x6c   :  { %v1277_v28 = vld.sshfl [vmem:[#allocation1] sm:$0xff pattern:$0x73625140]  ;;  %v1232_v56 = vshll.u32 %v1138_v43, 16  ;;  %v1242_v57 = vor.u32 %v1241_v49, %v1238_v48  ;;  %v1245_v58 = vshll.u32 %v1144_v47, 16  ;;  %v1204_v59 = vrot.slane %v1203_v51, 2 }
  0x6d   :  { %1504 = vmatmul.msk.bf16.vlgmr.msrb.gmra.mxu3 %vm258_vm9, %v1277_v28  ;;  %v1208_v60 = vrot.slane %v1206_v52, 7  ;;  %v1217_v61 = vrot.slane %v1216_v53, 2  ;;  %v1221_v62 = vrot.slane %v1219_v54, 7  ;;  %v1230_v63 = vrot.slane %v1229_v55, 2 }
  0x6e   :  { %v1234_v0 = vrot.slane %v1232_v56, 7  ;;  %v1243_v1 = vrot.slane %v1242_v57, 2  ;;  %v1247_v2 = vrot.slane %v1245_v58, 7  ;;  %vm1338_vm10 = vcmask 257024  }
  0x6f   :  { %v1209_v3 = vsel %vm1600_vm8, %v1204_v59, %v1208_v60  ;;  %v1222_v4 = vsel %vm1600_vm8, %v1217_v61, %v1221_v62 }
  0x70   :  { %v953_v46 = vld.sshfl [vmem:[#allocation1 + $0x20] sm:$0xff pattern:$0x73625140]  ;;  %v1235_v6 = vsel %vm1600_vm8, %v1230_v63, %v1234_v0  ;;  %v1248_v7 = vsel %vm1600_vm8, %v1243_v1, %v1247_v2 }
  0x71   :  { %1461 = vmatmul.msk.bf16.gmra.mxu1 %vm258_vm9, %v953_v46  ;;  %1022 = vst [vmem:[#allocation1 + $0x20] ss:$4 sm:$0xff] %v1466_v29 }
  0x72   :  { %1025 = vst [vmem:[#allocation1 + $0x21] ss:$4 sm:$0xff] %v1467_v33 }
  0x73   :  { %1028 = vst [vmem:[#allocation1 + $0x22] ss:$4 sm:$0xff] %v1468_v38 }
  0x74   :  { %1031 = vst [vmem:[#allocation1 + $0x23] ss:$4 sm:$0xff] %v1469_v42 }
  0x7b   :  { %v1033_v5 = vld.sshfl [vmem:[#allocation1 + $0x20] sm:$0xff pattern:$0x73625140] }
  0x7c   :  { %1483 = vmatmul.msk.bf16.gmra.mxu2 %vm258_vm9, %v1033_v5  ;;  %1267 = vst [vmem:[#allocation1 + $0x20] ss:$4 sm:$0xff] %v1209_v3 }
  0x7d   :  { %1270 = vst [vmem:[#allocation1 + $0x21] ss:$4 sm:$0xff] %v1222_v4 }
  0x7e   :  { %1273 = vst [vmem:[#allocation1 + $0x22] ss:$4 sm:$0xff] %v1235_v6 }
  0x7f   :  { %1276 = vst [vmem:[#allocation1 + $0x23] ss:$4 sm:$0xff] %v1248_v7 }
  0x86   :  { %v1278_v8 = vld.sshfl [vmem:[#allocation1 + $0x20] sm:$0xff pattern:$0x73625140] }
  0x87   :  { %1505 = vmatmul.msk.bf16.gmra.mxu3 %vm258_vm9, %v1278_v8 }
  0x9a   :  { %v272_v9 = vpop.f32.mrf.mxu0 }
  0xa2   :  { %v274_v12 = vpop.f32.mrf.mxu0 }
  0xa5   :  { %v332_v10 = vpop.f32.mrf.mxu1 }
  0xa6   :  { %v333_v23 = vadd.f32 %v332_v10, %v272_v9 }
  0xaa   :  { %v277_v16 = vpop.f32.mrf.mxu0 }
  0xad   :  { %v334_v14 = vpop.f32.mrf.mxu1 }
  0xae   :  { %v335_v30 = vadd.f32 %v334_v14, %v274_v12 }
  0xb2   :  { %v279_v50 = vpop.f32.mrf.mxu0 }
  0xb5   :  { %v337_v18 = vpop.f32.mrf.mxu1 }
  0xb6   :  { %v408_v11 = vpop.f32.mrf.mxu2  ;;  %v338_v52 = vadd.f32 %v337_v18, %v277_v16 }
  0xb7   :  { %v418_v24 = vadd.f32 %v408_v11, %v333_v23 }
  0xbd   :  { %v339_v21 = vpop.f32.mrf.mxu1 }
  0xbe   :  { %v410_v15 = vpop.f32.mrf.mxu2  ;;  %v340_v62 = vadd.f32 %v339_v21, %v279_v50 }
  0xbf   :  { %v419_v32 = vadd.f32 %v410_v15, %v335_v30 }
  0xc1   :  { %v653_v13 = vpop.f32.mrf.mxu3 }
  0xc2   :  { %v663_v27 = vadd.f32 %v653_v13, %v418_v24 }
  0xc6   :  { %v413_v19 = vpop.f32.mrf.mxu2  ;;  %v734_v25 = vpop.f32.mrf.mxu0 }
  0xc7   :  { %v744_v31 = vadd.f32 %v734_v25, %v663_v27  ;;  %v420_v55 = vadd.f32 %v413_v19, %v338_v52 }
  0xc9   :  { %v655_v17 = vpop.f32.mrf.mxu3 }
  0xca   :  { %v664_v34 = vadd.f32 %v655_v17, %v419_v32 }
  0xce   :  { %v415_v22 = vpop.f32.mrf.mxu2  ;;  %v736_v37 = vpop.f32.mrf.mxu0 }
  0xcf   :  { %v745_v41 = vadd.f32 %v736_v37, %v664_v34  ;;  %v421_v0 = vadd.f32 %v415_v22, %v340_v62 }
  0xd1   :  { %v658_v20 = vpop.f32.mrf.mxu3 }
  0xd2   :  { %v665_v58 = vadd.f32 %v658_v20, %v420_v55 }
  0xd4   :  { %v979_v28 = vpop.f32.mrf.mxu1 }
  0xd5   :  { %v989_v33 = vadd.f32 %v979_v28, %v744_v31 }
  0xd6   :  { %v739_v57 = vpop.f32.mrf.mxu0 }
  0xd7   :  { %v746_v63 = vadd.f32 %v739_v57, %v665_v58 }
  0xd9   :  { %v660_v26 = vpop.f32.mrf.mxu3 }
  0xda   :  { %v666_v2 = vadd.f32 %v660_v26, %v421_v0 }
  0xdc   :  { %v981_v40 = vpop.f32.mrf.mxu1 }
  0xdd   :  { %v990_v44 = vadd.f32 %v981_v40, %v745_v41 }
  0xde   :  { %v741_v4 = vpop.f32.mrf.mxu0 }
  0xdf   :  { %v747_v8 = vadd.f32 %v741_v4, %v666_v2 }
  0xe5   :  { %v1059_v29 = vpop.f32.mrf.mxu2 }
  0xe6   :  { %v1069_v35 = vadd.f32 %v1059_v29, %v989_v33 }
  0xed   :  { %v1061_v43 = vpop.f32.mrf.mxu2 }
  0xee   :  { %v1070_v46 = vadd.f32 %v1061_v43, %v990_v44  ;;  %v984_v60 = vpop.f32.mrf.mxu1 }
  0xef   :  { %v991_v1 = vadd.f32 %v984_v60, %v746_v63 }
  0xf0   :  { %v1304_v38 = vpop.f32.mrf.mxu3 }
  0xf1   :  { %v1314_v39 = vadd.f32 %v1304_v38, %v1069_v35 }
  0xf3   :  { %v1322_v42 = vadd.f32 %v1522_v36, %v1314_v39 }
  0xf5   :  { %v1326_v45 = vmul.f32 0.01, %v1322_v42 }
  0xf6   :  { %v986_v7 = vpop.f32.mrf.mxu1 }
  0xf7   :  { %v1330_v47 = vmax.f32 %v1322_v42, %v1326_v45  ;;  %v992_v11 = vadd.f32 %v986_v7, %v747_v8 }
  0xf8   :  { %v1306_v48 = vpop.f32.mrf.mxu3 }
  0xf9   :  { %v1334_v49 = vpack.c.bf16 %v1330_v47, %v1330_v47  ;;  %v1315_v51 = vadd.f32 %v1306_v48, %v1070_v46 }
  0xfb   :  { %1339 = vst.msk [vmem:[%s1963_s3] sm:$0xf] %vm1338_vm10, %v1334_v49  ;;  %v1323_v53 = vadd.f32 %v1522_v36, %v1315_v51 }
  0xfd   :  { %v1327_v54 = vmul.f32 0.01, %v1323_v53 }
  0xff   :  { %v1331_v56 = vmax.f32 %v1323_v53, %v1327_v54  ;;  %v1064_v61 = vpop.f32.mrf.mxu2 }
 0x100   :  { %v1071_v3 = vadd.f32 %v1064_v61, %v991_v1 }
 0x101   :  { %v1335_v59 = vpack.c.bf16 %v1331_v56, %v1331_v56 }
 0x103   :  { %1340 = vst.msk [vmem:[%s1963_s3 + $0x4] sm:$0xf] %vm1338_vm10, %v1335_v59 }
 0x107   :  { %v1066_v10 = vpop.f32.mrf.mxu2 }
 0x108   :  { %v1072_v13 = vadd.f32 %v1066_v10, %v992_v11 }
 0x10a   :  { %v1309_v5 = vpop.f32.mrf.mxu3 }
 0x10b   :  { %v1316_v6 = vadd.f32 %v1309_v5, %v1071_v3 }
 0x10d   :  { %v1324_v9 = vadd.f32 %v1522_v36, %v1316_v6 }
 0x10f   :  { %v1328_v12 = vmul.f32 0.01, %v1324_v9 }
 0x111   :  { %v1332_v14 = vmax.f32 %v1324_v9, %v1328_v12 }
 0x112   :  { %v1311_v15 = vpop.f32.mrf.mxu3 }
 0x113   :  { %v1336_v16 = vpack.c.bf16 %v1332_v14, %v1332_v14  ;;  %v1317_v17 = vadd.f32 %v1311_v15, %v1072_v13 }
 0x115   :  { %1341 = vst.msk [vmem:[%s1963_s3 + $0x8] sm:$0xf] %vm1338_vm10, %v1336_v16  ;;  %v1325_v18 = vadd.f32 %v1522_v36, %v1317_v17 }
 0x117   :  { %v1329_v19 = vmul.f32 0.01, %v1325_v18 }
 0x119   :  { %v1333_v50 = vmax.f32 %v1325_v18, %v1329_v19 }
 0x11b   :  { %v1337_v20 = vpack.c.bf16 %v1333_v50, %v1333_v50 }
 0x11d   :  { %1342 = vst.msk [vmem:[%s1963_s3 + $0xc] sm:$0xf] %vm1338_vm10, %v1337_v20 }

// kernel: discriminator_forward.7
= control target key start
LH: loop header
LB: loop body
LE: loop exit
PB: predicated region body
PF: predicated region fallthrough
CT: control target
= control target key end

     0   :  { %vm56_vm0 = vcmask 1041408   ;;  %vm60_vm1 = vcmask 1043458   ;;  %vm106_vm2 = vsmask.f32 1280  ;;  %vm107_vm3 = vsmask.f32 3336  ;;  %s2427_s1 = inlined_call_operand.vmem [shape: bf16[9,32,1], index: 1, kind: input, shape index: {}]   ;;  %s2428_s0 = inlined_call_operand.vmem [shape: bf16[2,6,1,6,32], index: 0, kind: input, shape index: {}]   ;;  %s2429_s2 = inlined_call_operand.<no memory space> [shape: f32[1,1], index: 2, kind: input, shape index: {}]   ;;  %s2430_s3 = inlined_call_operand.vmem [shape: f32[2,16,1], index: 3, kind: output, shape index: {}]  }
   0x1   :  { %v1783_v0 = vld [vmem:[%s2427_s1 + $0x18] sm:$0xff]  ;;  %v1782_v1 = vld [vmem:[%s2427_s1 + $0x10] sm:$0xff]  ;;  %v38_v4 = vld [vmem:[%s2428_s0 + $0x20] sm:$0x7]  ;;  %vm109_vm4 = vsmask.f32 5392 }
   0x2   :  { %v36_v2 = vld [vmem:[%s2428_s0 + $0x18] sm:$0x7]  ;;  %v37_v3 = vld [vmem:[%s2428_s0 + $0x1c] sm:$0x7]  ;;  %v39_v5 = vld [vmem:[%s2428_s0 + $0x24] sm:$0x7]  ;;  %1798 = vmatpush.bf16.msra.mxu1 %v1783_v0  ;;  %270 = vmatpush.bf16.msra.mxu0 %v1783_v0 }
   0x3   :  { %v52_v6 = vrot.slane %v36_v2, 2  ;;  %v53_v7 = vrot.slane %v37_v3, 2  ;;  %v54_v8 = vrot.slane %v38_v4, 2  ;;  %v55_v9 = vrot.slane %v39_v5, 2  ;;  %v1842_v10 = vld [vmem:[%s2428_s0] sm:$0x7]  ;;  %vm108_vm6 = vmor %vm106_vm2, %vm107_vm3 }
   0x4   :  { %vm111_vm5 = vsmask.f32 7448  ;;  %v48_v11 = vrot.slane %v1842_v10, 2  ;;  %v33_v32 = vld [vmem:[%s2428_s0 + $0x4] sm:$0x7]  ;;  %vm1859_vm7 = vmor %vm108_vm6, %vm109_vm4  ;;  %v1781_v39 = vld [vmem:[%s2427_s1 + $0x8] sm:$0xff] }
   0x5   :  { %v84_v12 = vsel %vm56_vm0, %v36_v2, %v52_v6  ;;  %v85_v13 = vsel %vm60_vm1, %v36_v2, %v52_v6  ;;  %v90_v14 = vsel %vm56_vm0, %v37_v3, %v53_v7  ;;  %v91_v15 = vsel %vm60_vm1, %v37_v3, %v53_v7  ;;  %v34_v38 = vld [vmem:[%s2428_s0 + $0x8] sm:$0x7]  ;;  %v35_v45 = vld [vmem:[%s2428_s0 + $0xc] sm:$0x7]  ;;  %v1780_v50 = vld [vmem:[%s2427_s1] sm:$0xff] }
   0x6   :  { %v87_v16 = vrot.slane %v85_v13, 2  ;;  %v93_v17 = vrot.slane %v91_v15, 2  ;;  %v96_v18 = vsel %vm56_vm0, %v38_v4, %v54_v8  ;;  %v97_v19 = vsel %vm60_vm1, %v38_v4, %v54_v8  ;;  %1799 = vmatpush.bf16.msra.mxu1 %v1782_v1  ;;  %271 = vmatpush.bf16.msra.mxu0 %v1782_v1  ;;  %v1785_v40 = vld [vmem:[%s2427_s1 + $0x28] sm:$0xff]  ;;  %v1784_v51 = vld [vmem:[%s2427_s1 + $0x20] sm:$0xff]  ;;  %vm1884_vm8 = vmor %vm1859_vm7, %vm111_vm5 }
   0x7   :  { %v99_v20 = vrot.slane %v97_v19, 2  ;;  %v102_v21 = vsel %vm56_vm0, %v39_v5, %v55_v9  ;;  %v103_v22 = vsel %vm60_vm1, %v39_v5, %v55_v9  ;;  %v165_v23 = vshrl.u32 %v84_v12, 16  ;;  %514 = vmatpush.bf16.msra.mxu2 %v1785_v40  ;;  %v343_v33 = vld [vmem:[%s2428_s0] sm:$0x6] }
   0x8   :  { %v105_v24 = vrot.slane %v103_v22, 2  ;;  %v168_v25 = vshll.u32 %v84_v12, 16  ;;  %v174_v26 = vshll.u32 %v87_v16, 16  ;;  %v178_v27 = vshrl.u32 %v90_v14, 16 }
   0x9   :  { %v167_v28 = vrot.slane %v165_v23, 6  ;;  %v181_v29 = vshll.u32 %v90_v14, 16  ;;  %v187_v30 = vshll.u32 %v93_v17, 16  ;;  %v191_v31 = vshrl.u32 %v96_v18, 16 }
   0xa   :  { %v170_v34 = vrot.slane %v168_v25, 7  ;;  %v176_v35 = vrot.slane %v174_v26, 7  ;;  %v180_v36 = vrot.slane %v178_v27, 6  ;;  %v194_v37 = vshll.u32 %v96_v18, 16  ;;  %330 = vmatpush.bf16.msrb.mxu1 %v1781_v39 }
   0xb   :  { %v183_v41 = vrot.slane %v181_v29, 7  ;;  %v189_v42 = vrot.slane %v187_v30, 7  ;;  %v193_v43 = vrot.slane %v191_v31, 6  ;;  %v200_v44 = vshll.u32 %v99_v20, 16  ;;  %515 = vmatpush.bf16.msra.mxu2 %v1784_v51 }
   0xc   :  { %v171_v46 = vor.u32 %v170_v34, %v167_v28  ;;  %v196_v47 = vrot.slane %v194_v37, 7  ;;  %v204_v48 = vshrl.u32 %v102_v21, 16  ;;  %v207_v49 = vshll.u32 %v102_v21, 16 }
   0xd   :  { %v184_v53 = vor.u32 %v183_v41, %v180_v36  ;;  %v202_v54 = vrot.slane %v200_v44, 7  ;;  %v213_v55 = vshll.u32 %v105_v24, 16  ;;  %v49_v56 = vrot.slane %v33_v32, 2 }
   0xe   :  { %v172_v57 = vrot.slane %v171_v46, 2  ;;  %v197_v58 = vor.u32 %v196_v47, %v193_v43  ;;  %v206_v59 = vrot.slane %v204_v48, 6  ;;  %v209_v60 = vrot.slane %v207_v49, 7  ;;  %331 = vmatpush.bf16.msrb.mxu1 %v1780_v50  ;;  %v345_v46 = vld [vmem:[%s2428_s0 + $0x8] sm:$0x6] }
   0xf   :  { %v185_v61 = vrot.slane %v184_v53, 2  ;;  %v215_v62 = vrot.slane %v213_v55, 7  ;;  %v50_v63 = vrot.slane %v34_v38, 2  ;;  %v51_v0 = vrot.slane %v35_v45, 2  ;;  %v346_v53 = vld [vmem:[%s2428_s0 + $0xc] sm:$0x6] }
  0x10   :  { %v177_v1 = vsel %vm1884_vm8, %v172_v57, %v176_v35  ;;  %v198_v2 = vrot.slane %v197_v58, 2  ;;  %v210_v3 = vor.u32 %v209_v60, %v206_v59  ;;  %v59_v4 = vsel %vm56_vm0, %v1842_v10, %v48_v11 }
  0x11   :  { %v190_v5 = vsel %vm1884_vm8, %v185_v61, %v189_v42  ;;  %235 = vst [vmem:[#allocation1 + $0x20] ss:$4 sm:$0xff] %v177_v1  ;;  %v61_v6 = vsel %vm60_vm1, %v1842_v10, %v48_v11  ;;  %v66_v7 = vsel %vm56_vm0, %v33_v32, %v49_v56  ;;  %v67_v8 = vsel %vm60_vm1, %v33_v32, %v49_v56  ;;  %v344_v42 = vld [vmem:[%s2428_s0 + $0x4] sm:$0x6] }
  0x12   :  { %v203_v9 = vsel %vm1884_vm8, %v198_v2, %v202_v54  ;;  %v211_v12 = vrot.slane %v210_v3, 2  ;;  %238 = vst [vmem:[#allocation1 + $0x21] ss:$4 sm:$0xff] %v190_v5  ;;  %vm259_vm9 = vcmask 261120   ;;  %v63_v13 = vrot.slane %v61_v6, 2  ;;  %v1787_v6 = vld [vmem:[%s2427_s1 + $0x38] sm:$0xff] }
  0x13   :  { %v69_v14 = vrot.slane %v67_v8, 2  ;;  %241 = vst [vmem:[#allocation1 + $0x22] ss:$4 sm:$0xff] %v203_v9  ;;  %v72_v15 = vsel %vm56_vm0, %v34_v38, %v50_v63  ;;  %v73_v16 = vsel %vm60_vm1, %v34_v38, %v50_v63  ;;  %v78_v17 = vsel %vm56_vm0, %v35_v45, %v51_v0  ;;  %594 = vmatpush.bf16.msra.mxu3 %v1787_v6 }
  0x14   :  { %v79_v10 = vsel %vm60_vm1, %v35_v45, %v51_v0  ;;  %v216_v11 = vsel %vm1884_vm8, %v211_v12, %v215_v62  ;;  %v75_v18 = vrot.slane %v73_v16, 2  ;;  %v113_v20 = vshrl.u32 %v59_v4, 16  ;;  %v1789_v12 = vld [vmem:[%s2427_s1 + $0x48] sm:$0xff] }
  0x15   :  { %v81_v19 = vrot.slane %v79_v10, 2  ;;  %244 = vst [vmem:[#allocation1 + $0x23] ss:$4 sm:$0xff] %v216_v11  ;;  %v116_v21 = vshll.u32 %v59_v4, 16  ;;  %v122_v22 = vshll.u32 %v63_v13, 16  ;;  %v126_v23 = vshrl.u32 %v66_v7, 16  ;;  %839 = vmatpush.bf16.msrb.mxu0 %v1789_v12 }
  0x16   :  { %v129_v24 = vshll.u32 %v66_v7, 16  ;;  %v115_v25 = vrot.slane %v113_v20, 6  ;;  %v135_v26 = vshll.u32 %v69_v14, 16  ;;  %v139_v27 = vshrl.u32 %v72_v15, 16  ;;  %v1638_v7 = vld [vmem:[%s2428_s0 + $0x4] sm:$0x7] }
  0x17   :  { %v142_v28 = vshll.u32 %v72_v15, 16  ;;  %v118_v29 = vrot.slane %v116_v21, 7  ;;  %v124_v30 = vrot.slane %v122_v22, 7  ;;  %v128_v31 = vrot.slane %v126_v23, 6  ;;  %v1786_v15 = vld [vmem:[%s2427_s1 + $0x30] sm:$0xff]  ;;  %v1793_v16 = vld [vmem:[%s2427_s1 + $0x68] sm:$0xff] }
  0x18   :  { %v131_v32 = vrot.slane %v129_v24, 7  ;;  %v137_v34 = vrot.slane %v135_v26, 7  ;;  %v141_v35 = vrot.slane %v139_v27, 6  ;;  %v148_v37 = vshll.u32 %v75_v18, 16  ;;  %1100 = vmatpush.bf16.msrb.mxu2 %v1793_v16  ;;  %v24_v24 = vld [vmem:[%s2428_s0 + $0x18] sm:$0x3]  ;;  %595 = vmatpush.bf16.msra.mxu3 %v1786_v15 }
  0x19   :  { %v144_v36 = vrot.slane %v142_v28, 7  ;;  %v119_v38 = vor.u32 %v118_v29, %v115_v25  ;;  %v152_v40 = vshrl.u32 %v78_v17, 16  ;;  %v155_v41 = vshll.u32 %v78_v17, 16  ;;  %v25_v25 = vld [vmem:[%s2428_s0 + $0x1c] sm:$0x3] }
  0x1a   :  { %v132_v39 = vor.u32 %v131_v32, %v128_v31  ;;  %v150_v44 = vrot.slane %v148_v37, 7  ;;  %v161_v45 = vshll.u32 %v81_v19, 16  ;;  %v359_v47 = vrot.slane %v343_v33, 2  ;;  %v20_v27 = vld [vmem:[%s2428_s0] sm:$0x3] }
  0x1b   :  { %v145_v43 = vor.u32 %v144_v36, %v141_v35  ;;  %v120_v48 = vrot.slane %v119_v38, 2  ;;  %v154_v50 = vrot.slane %v152_v40, 6  ;;  %v157_v51 = vrot.slane %v155_v41, 7  ;;  %v26_v28 = vld [vmem:[%s2428_s0 + $0x20] sm:$0x3] }
  0x1c   :  { %v133_v49 = vrot.slane %v132_v39, 2  ;;  %v246_v54 = vld.sshfl [vmem:[#allocation1 + $0x20] sm:$0xff pattern:$0x73625140]  ;;  %v163_v56 = vrot.slane %v161_v45, 7  ;;  %v360_v57 = vrot.slane %v344_v42, 2  ;;  %v369_v0 = vsel %vm56_vm0, %v343_v33, %v359_v47 }
  0x1d   :  { %v146_v55 = vrot.slane %v145_v43, 2  ;;  %1575 = vmatmul.msk.bf16.vlgmr.msra.gmra.mxu1 %vm259_vm9, %v246_v54  ;;  %v125_v58 = vsel %vm1884_vm8, %v120_v48, %v124_v30  ;;  %v158_v60 = vor.u32 %v157_v51, %v154_v50  ;;  %v361_v61 = vrot.slane %v345_v46, 2  ;;  %v27_v29 = vld [vmem:[%s2428_s0 + $0x24] sm:$0x3]  ;;  %296 = vst [vmem:[#allocation1 + $0x20] ss:$4 sm:$0xff] %v24_v24 }
  0x1e   :  { %v138_v59 = vsel %vm1884_vm8, %v133_v49, %v137_v34  ;;  %223 = vst [vmem:[#allocation1] ss:$4 sm:$0xff] %v125_v58  ;;  %v362_v63 = vrot.slane %v346_v53, 2  ;;  %v371_v1 = vsel %vm60_vm1, %v343_v33, %v359_v47  ;;  %v376_v3 = vsel %vm56_vm0, %v344_v42, %v360_v57  ;;  %v21_v30 = vld [vmem:[%s2428_s0 + $0x4] sm:$0x3] }
  0x1f   :  { %v151_v62 = vsel %vm1884_vm8, %v146_v55, %v150_v44  ;;  %v159_v2 = vrot.slane %v158_v60, 2  ;;  %226 = vst [vmem:[#allocation1 + $0x1] ss:$4 sm:$0xff] %v138_v59  ;;  %v378_v4 = vsel %vm60_vm1, %v344_v42, %v360_v57  ;;  %v1934_v5 = vsel %vm56_vm0, %v345_v46, %v361_v61  ;;  %v347_v32 = vld [vmem:[%s2428_s0 + $0x18] sm:$0x6]  ;;  %v1788_v55 = vld [vmem:[%s2427_s1 + $0x40] sm:$0xff] }
  0x20   :  { %229 = vst [vmem:[#allocation1 + $0x2] ss:$4 sm:$0xff] %v151_v62  ;;  %v1943_v8 = vsel %vm60_vm1, %v345_v46, %v361_v61  ;;  %v1946_v9 = vsel %vm56_vm0, %v346_v53, %v362_v63  ;;  %vm423_vm10 = vcmask 1040384   ;;  %vm424_vm11 = vcmask 1042434   ;;  %v348_v33 = vld [vmem:[%s2428_s0 + $0x1c] sm:$0x6]  ;;  %840 = vmatpush.bf16.msrb.mxu0 %v1788_v55 }
  0x21   :  { %v164_v13 = vsel %vm1884_vm8, %v159_v2, %v163_v56  ;;  %v1954_v14 = vsel %vm60_vm1, %v346_v53, %v362_v63  ;;  %vm425_vm12 = vmor %vm423_vm10, %vm424_vm11  ;;  %vm426_vm13 = vcmask 1044484   ;;  %vm428_vm14 = vcmask 1046534   ;;  %299 = vst [vmem:[#allocation1 + $0x21] ss:$4 sm:$0xff] %v25_v25  ;;  %v22_v35 = vld [vmem:[%s2428_s0 + $0x8] sm:$0x3] }
  0x22   :  { %232 = vst [vmem:[#allocation1 + $0x3] ss:$4 sm:$0xff] %v164_v13  ;;  %v1586_v17 = vrot.slane %v369_v0, 9  ;;  %v1587_v10 = vrot.slane %v371_v1, 9  ;;  %v1588_v11 = vrot.slane %v376_v3, 9  ;;  %vm1962_vm15 = vmor %vm425_vm12, %vm426_vm13  ;;  %v1589_v19 = vrot.slane %v378_v4, 9 }
  0x23   :  { %v1590_v20 = vrot.slane %v1934_v5, 9  ;;  %v1591_v21 = vrot.slane %v1943_v8, 9  ;;  %v1592_v22 = vrot.slane %v1946_v9, 9  ;;  %v1593_v23 = vrot.slane %v1954_v14, 9  ;;  %vm1991_vm2 = vmor %vm1962_vm15, %vm428_vm14  ;;  %302 = vst [vmem:[#allocation1 + $0x22] ss:$4 sm:$0xff] %v26_v28 }
  0x24   :  { %v627_v26 = vrot.slane %v1638_v7, 2  ;;  %v349_v36 = vld [vmem:[%s2428_s0 + $0x20] sm:$0x6]  ;;  %v350_v37 = vld [vmem:[%s2428_s0 + $0x24] sm:$0x6]  ;;  %v363_v39 = vrot.slane %v347_v32, 2  ;;  %v2018_v44 = vsel %vm1991_vm2, %v1586_v17, %v1587_v10  ;;  %v2022_v45 = vsel %vm1991_vm2, %v1588_v11, %v1589_v19 }
  0x25   :  { %v23_v38 = vld [vmem:[%s2428_s0 + $0xc] sm:$0x3]  ;;  %305 = vst [vmem:[#allocation1 + $0x23] ss:$4 sm:$0xff] %v27_v29  ;;  %v364_v40 = vrot.slane %v348_v33, 2  ;;  %v365_v41 = vrot.slane %v349_v36, 2  ;;  %v441_v19 = vsel %vm1991_vm2, %v1590_v20, %v1591_v21  ;;  %v8_v31 = vstv %s2429_s2 }
  0x26   :  { %v2002_v34 = vsel %vm60_vm1, %v1638_v7, %v627_v26  ;;  %v366_v42 = vrot.slane %v350_v37, 2  ;;  %v1639_v46 = vld [vmem:[%s2428_s0 + $0x8] sm:$0x7]  ;;  %v637_v47 = vsel %vm56_vm0, %v1638_v7, %v627_v26  ;;  %v397_v49 = vsel %vm56_vm0, %v347_v32, %v363_v39  ;;  %v1640_v53 = vld [vmem:[%s2428_s0 + $0xc] sm:$0x7]  ;;  %v1795_v56 = vld [vmem:[%s2427_s1 + $0x78] sm:$0xff] }
  0x27   :  { %v640_v48 = vrot.slane %v2002_v34, 2  ;;  %v399_v50 = vsel %vm60_vm1, %v347_v32, %v363_v39  ;;  %v404_v51 = vsel %vm56_vm0, %v348_v33, %v364_v40  ;;  %v1641_v54 = vld [vmem:[%s2428_s0 + $0x10] sm:$0x7]  ;;  %v1791_v57 = vld [vmem:[%s2427_s1 + $0x58] sm:$0xff]  ;;  %v406_v58 = vsel %vm60_vm1, %v348_v33, %v364_v40  ;;  %1345 = vmatpush.bf16.msrb.mxu3 %v1795_v56  ;;  %v1797_v14 = vld [vmem:[%s2427_s1 + $0x88] sm:$0xff] }
  0x28   :  { %v411_v59 = vsel %vm56_vm0, %v349_v36, %v365_v41  ;;  %v413_v60 = vsel %vm60_vm1, %v349_v36, %v365_v41  ;;  %v418_v61 = vsel %vm56_vm0, %v350_v37, %v366_v42  ;;  %v420_v62 = vsel %vm60_vm1, %v350_v37, %v366_v42  ;;  %1020 = vmatpush.bf16.msra.mxu1 %v1791_v57  ;;  %v1620_v55 = vld [vmem:[%s2428_s0 + $0x1c] sm:$0x3] }
  0x29   :  { %v245_v43 = vld.sshfl [vmem:[#allocation1] sm:$0xff pattern:$0x73625140]  ;;  %v1594_v63 = vrot.slane %v397_v49, 9  ;;  %v1595_v0 = vrot.slane %v399_v50, 9  ;;  %v1596_v1 = vrot.slane %v404_v51, 9  ;;  %v445_v41 = vsel %vm1991_vm2, %v1592_v22, %v1593_v23 }
  0x2a   :  { %1574 = vmatmul.msk.bf16.vlgmr.msra.gmra.mxu0 %vm259_vm9, %v245_v43  ;;  %284 = vst [vmem:[#allocation1] ss:$4 sm:$0xff] %v20_v27  ;;  %v1597_v2 = vrot.slane %v406_v58, 9  ;;  %v1598_v3 = vrot.slane %v411_v59, 9  ;;  %v1599_v4 = vrot.slane %v413_v60, 9  ;;  %v1600_v6 = vrot.slane %v418_v61, 9 }
  0x2b   :  { %287 = vst [vmem:[#allocation1 + $0x1] ss:$4 sm:$0xff] %v21_v30  ;;  %v449_v7 = vsel %vm1991_vm2, %v1594_v63, %v1595_v0  ;;  %v1601_v12 = vrot.slane %v420_v62, 9  ;;  %v628_v13 = vrot.slane %v1639_v46, 2  ;;  %v629_v15 = vrot.slane %v1640_v53, 2  ;;  %1526 = vmatpush.bf16.msra.mxu0 %v1797_v14 }
  0x2c   :  { %290 = vst [vmem:[#allocation1 + $0x2] ss:$4 sm:$0xff] %v22_v35  ;;  %v2055_v16 = vld.sshfl [vmem:[#allocation1 + $0x20] sm:$0xff pattern:$0x73625140]  ;;  %v453_v17 = vsel %vm1991_vm2, %v1596_v1, %v1597_v2  ;;  %v457_v10 = vsel %vm1991_vm2, %v1598_v3, %v1599_v4  ;;  %v630_v11 = vrot.slane %v1641_v54, 2 }
  0x2d   :  { %293 = vst [vmem:[#allocation1 + $0x3] ss:$4 sm:$0xff] %v23_v38  ;;  %v683_v18 = vshrl.u32 %v637_v47, 16  ;;  %v461_v24 = vsel %vm1991_vm2, %v1600_v6, %v1601_v12  ;;  %v643_v25 = vsel %vm56_vm0, %v1639_v46, %v628_v13  ;;  %v644_v26 = vsel %vm60_vm1, %v1639_v46, %v628_v13  ;;  %v1642_v56 = vld [vmem:[%s2428_s0 + $0x1c] sm:$0x7]  ;;  %v1794_v3 = vld [vmem:[%s2427_s1 + $0x70] sm:$0xff] }
  0x2e   :  { %480 = vst [vmem:[#allocation1 + $0x20] ss:$4 sm:$0xff] %v449_v7  ;;  %v646_v27 = vrot.slane %v644_v26, 2  ;;  %v649_v28 = vsel %vm56_vm0, %v1640_v53, %v629_v15  ;;  %v650_v29 = vsel %vm60_vm1, %v1640_v53, %v629_v15  ;;  %v656_v8 = vsel %vm60_vm1, %v1641_v54, %v630_v11  ;;  %v1621_v61 = vld [vmem:[%s2428_s0 + $0x20] sm:$0x3]  ;;  %v1790_v4 = vld [vmem:[%s2427_s1 + $0x50] sm:$0xff]  ;;  %1346 = vmatpush.bf16.msrb.mxu3 %v1794_v3 }
  0x2f   :  { %483 = vst [vmem:[#allocation1 + $0x21] ss:$4 sm:$0xff] %v453_v17  ;;  %v652_v5 = vrot.slane %v650_v29, 2  ;;  %v658_v30 = vrot.slane %v656_v8, 2  ;;  %v685_v20 = vrot.slane %v683_v18, 6  ;;  %v686_v21 = vshll.u32 %v637_v47, 16  ;;  %1021 = vmatpush.bf16.msra.mxu1 %v1790_v4 }
  0x30   :  { %486 = vst [vmem:[#allocation1 + $0x22] ss:$4 sm:$0xff] %v457_v10  ;;  %v692_v32 = vshll.u32 %v640_v48, 16  ;;  %v696_v33 = vshrl.u32 %v643_v25, 16  ;;  %v699_v34 = vshll.u32 %v643_v25, 16  ;;  %v2074_v35 = vshll.u32 %v646_v27, 16 }
  0x31   :  { %489 = vst [vmem:[#allocation1 + $0x23] ss:$4 sm:$0xff] %v461_v24  ;;  %v655_v37 = vsel %vm56_vm0, %v1641_v54, %v630_v11  ;;  %v688_v38 = vrot.slane %v686_v21, 7  ;;  %v709_v39 = vshrl.u32 %v649_v28, 16  ;;  %v712_v40 = vshll.u32 %v649_v28, 16 }
  0x32   :  { %v694_v42 = vrot.slane %v692_v32, 7  ;;  %v698_v43 = vrot.slane %v696_v33, 6  ;;  %v701_v46 = vrot.slane %v699_v34, 7  ;;  %v718_v50 = vshll.u32 %v652_v5, 16  ;;  %v1622_v0 = vld [vmem:[%s2428_s0 + $0x24] sm:$0x3] }
  0x33   :  { %v689_v47 = vor.u32 %v688_v38, %v685_v20  ;;  %v711_v48 = vrot.slane %v709_v39, 6  ;;  %v714_v49 = vrot.slane %v712_v40, 7  ;;  %v707_v51 = vrot.slane %v2074_v35, 7  ;;  %v1616_v1 = vld [vmem:[%s2428_s0 + $0x4] sm:$0x3] }
  0x34   :  { %v306_v36 = vld.sshfl [vmem:[#allocation1] sm:$0xff pattern:$0x73625140]  ;;  %v702_v9 = vor.u32 %v701_v46, %v698_v43  ;;  %v722_v22 = vshrl.u32 %v655_v37, 16  ;;  %v725_v23 = vshll.u32 %v655_v37, 16  ;;  %v2093_v54 = vshll.u32 %v658_v30, 16 }
  0x35   :  { %1584 = vmatmul.msk.bf16.vlgmr.msrb.gmra.mxu1 %vm259_vm9, %v306_v36  ;;  %468 = vst [vmem:[#allocation1] ss:$4 sm:$0xff] %v2018_v44  ;;  %v1792_v44 = vld [vmem:[%s2427_s1 + $0x60] sm:$0xff]  ;;  %v715_v53 = vor.u32 %v714_v49, %v711_v48  ;;  %v720_v58 = vrot.slane %v718_v50, 7  ;;  %v1623_v2 = vld [vmem:[%s2428_s0 + $0x28] sm:$0x3] }
  0x36   :  { %471 = vst [vmem:[#allocation1 + $0x1] ss:$4 sm:$0xff] %v2022_v45  ;;  %v690_v45 = vrot.slane %v689_v47, 2  ;;  %v703_v57 = vrot.slane %v702_v9, 2  ;;  %v724_v59 = vrot.slane %v722_v22, 6  ;;  %v727_v60 = vrot.slane %v725_v23, 7  ;;  %1101 = vmatpush.bf16.msrb.mxu2 %v1792_v44 }
  0x37   :  { %474 = vst [vmem:[#allocation1 + $0x2] ss:$4 sm:$0xff] %v441_v19  ;;  %v716_v63 = vrot.slane %v715_v53, 2  ;;  %v1617_v6 = vld [vmem:[%s2428_s0 + $0x8] sm:$0x3]  ;;  %v733_v17 = vrot.slane %v2093_v54, 7 }
  0x38   :  { %477 = vst [vmem:[#allocation1 + $0x3] ss:$4 sm:$0xff] %v445_v41  ;;  %v2104_v62 = vld.sshfl [vmem:[#allocation1 + $0x20] sm:$0xff pattern:$0x73625140]  ;;  %v728_v7 = vor.u32 %v727_v60, %v724_v59  ;;  %v631_v11 = vrot.slane %v1642_v56, 2  ;;  %v2139_v18 = vsel %vm1884_vm8, %v690_v45, %v694_v42  ;;  %v2146_v28 = vsel %vm1884_vm8, %v703_v57, %v707_v51 }
  0x39   :  { %560 = vst [vmem:[#allocation1 + $0x20] ss:$4 sm:$0xff] %v1620_v55  ;;  %v1643_v12 = vld [vmem:[%s2428_s0 + $0x20] sm:$0x7]  ;;  %v1644_v13 = vld [vmem:[%s2428_s0 + $0x24] sm:$0x7]  ;;  %v2150_v29 = vsel %vm1884_vm8, %v716_v63, %v720_v58 }
  0x3a   :  { %563 = vst [vmem:[#allocation1 + $0x21] ss:$4 sm:$0xff] %v1621_v61  ;;  %v1618_v15 = vld [vmem:[%s2428_s0 + $0xc] sm:$0x3]  ;;  %v1645_v10 = vld [vmem:[%s2428_s0 + $0x28] sm:$0x7]  ;;  %v661_v8 = vsel %vm56_vm0, %v1642_v56, %v631_v11  ;;  %v662_v5 = vsel %vm60_vm1, %v1642_v56, %v631_v11 }
  0x3b   :  { %566 = vst [vmem:[#allocation1 + $0x22] ss:$4 sm:$0xff] %v1622_v0  ;;  %v632_v19 = vrot.slane %v1643_v12, 2  ;;  %v633_v24 = vrot.slane %v1644_v13, 2  ;;  %v634_v25 = vrot.slane %v1645_v10, 2  ;;  %v729_v30 = vrot.slane %v728_v7, 2 }
  0x3c   :  { %569 = vst [vmem:[#allocation1 + $0x23] ss:$4 sm:$0xff] %v1623_v2  ;;  %v1619_v27 = vld [vmem:[%s2428_s0 + $0x10] sm:$0x3]  ;;  %v664_v20 = vrot.slane %v662_v5, 2  ;;  %v735_v41 = vshrl.u32 %v661_v8, 16 }
  0x3d   :  { %v667_v21 = vsel %vm56_vm0, %v1643_v12, %v632_v19  ;;  %v668_v32 = vsel %vm60_vm1, %v1643_v12, %v632_v19  ;;  %v1660_v33 = vld [vmem:[%s2428_s0 + $0x4] sm:$0x6]  ;;  %v673_v35 = vsel %vm56_vm0, %v1644_v13, %v633_v24  ;;  %v674_v36 = vsel %vm60_vm1, %v1644_v13, %v633_v24  ;;  %v1661_v38 = vld [vmem:[%s2428_s0 + $0x8] sm:$0x6]  ;;  %v1662_v61 = vld [vmem:[%s2428_s0 + $0xc] sm:$0x6] }
  0x3e   :  { %v670_v34 = vrot.slane %v668_v32, 2  ;;  %v680_v37 = vsel %vm60_vm1, %v1645_v10, %v634_v25  ;;  %v676_v39 = vrot.slane %v674_v36, 2  ;;  %v679_v40 = vsel %vm56_vm0, %v1645_v10, %v634_v25  ;;  %v1663_v2 = vld [vmem:[%s2428_s0 + $0x10] sm:$0x6]  ;;  %9 = vst [vmem:[#allocation2] sm:$0x1] %v8_v31 }
  0x3f   :  { %v490_v26 = vld.sshfl [vmem:[#allocation1] sm:$0xff pattern:$0x73625140]  ;;  %v738_v42 = vshll.u32 %v661_v8, 16  ;;  %v682_v43 = vrot.slane %v680_v37, 2  ;;  %v744_v46 = vshll.u32 %v664_v20, 16  ;;  %v734_v13 = vsel %vm1884_vm8, %v729_v30, %v733_v17 }
  0x40   :  { %1614 = vmatmul.msk.bf16.vlgmr.msra.gmra.mxu2 %vm259_vm9, %v490_v26  ;;  %548 = vst [vmem:[#allocation1] ss:$4 sm:$0xff] %v1616_v1  ;;  %v748_v47 = vshrl.u32 %v667_v21, 16  ;;  %v751_v48 = vshll.u32 %v667_v21, 16  ;;  %v737_v49 = vrot.slane %v735_v41, 6  ;;  %v761_v14 = vshrl.u32 %v673_v35, 16 }
  0x41   :  { %551 = vst [vmem:[#allocation1 + $0x1] ss:$4 sm:$0xff] %v1617_v6  ;;  %v740_v50 = vrot.slane %v738_v42, 7  ;;  %v764_v9 = vshll.u32 %v673_v35, 16  ;;  %v757_v23 = vshll.u32 %v670_v34, 16  ;;  %v872_v44 = vrot.slane %v1660_v33, 2 }
  0x42   :  { %554 = vst [vmem:[#allocation1 + $0x2] ss:$4 sm:$0xff] %v1618_v15  ;;  %v750_v51 = vrot.slane %v748_v47, 6  ;;  %v753_v22 = vrot.slane %v751_v48, 7  ;;  %v763_v53 = vrot.slane %v761_v14, 6  ;;  %v873_v56 = vrot.slane %v1661_v38, 2 }
  0x43   :  { %557 = vst [vmem:[#allocation1 + $0x3] ss:$4 sm:$0xff] %v1619_v27  ;;  %v741_v45 = vor.u32 %v740_v50, %v737_v49  ;;  %v766_v55 = vrot.slane %v764_v9, 7  ;;  %v770_v58 = vshll.u32 %v676_v39, 16  ;;  %v774_v59 = vshrl.u32 %v679_v40, 16  ;;  %v1796_v8 = vld [vmem:[%s2427_s1 + $0x80] sm:$0xff] }
  0x44   :  { %v754_v57 = vor.u32 %v753_v22, %v750_v51  ;;  %v777_v60 = vshll.u32 %v679_v40, 16  ;;  %v746_v0 = vrot.slane %v744_v46, 7  ;;  %v759_v4 = vrot.slane %v757_v23, 7  ;;  %v2179_v15 = vld.sshfl [vmem:[#allocation1 + $0x20] sm:$0xff pattern:$0x73625140]  ;;  %1527 = vmatpush.bf16.msra.mxu0 %v1796_v8 }
  0x45   :  { %1585 = vmatmul.msk.bf16.gmra.mxu1 %vm259_vm9, %v2055_v16  ;;  %v742_v63 = vrot.slane %v741_v45, 2  ;;  %v767_v1 = vor.u32 %v766_v55, %v763_v53  ;;  %v783_v16 = vshll.u32 %v682_v43, 16  ;;  %v776_v6 = vrot.slane %v774_v59, 6  ;;  %v1721_v21 = vld [vmem:[%s2428_s0 + $0xc] sm:$0x7] }
  0x46   :  { %v755_v3 = vrot.slane %v754_v57, 2  ;;  %v779_v7 = vrot.slane %v777_v60, 7  ;;  %v772_v11 = vrot.slane %v770_v58, 7  ;;  %v874_v19 = vrot.slane %v1662_v61, 2  ;;  %v1722_v39 = vld [vmem:[%s2428_s0 + $0x10] sm:$0x7] }
  0x47   :  { %v768_v10 = vrot.slane %v767_v1, 2  ;;  %v785_v25 = vrot.slane %v783_v16, 7  ;;  %v875_v26 = vrot.slane %v1663_v2, 2  ;;  %v882_v27 = vsel %vm56_vm0, %v1660_v33, %v872_v44  ;;  %v1723_v48 = vld [vmem:[%s2428_s0 + $0x14] sm:$0x7] }
  0x48   :  { %v780_v24 = vor.u32 %v779_v7, %v776_v6  ;;  %v747_v54 = vsel %vm1884_vm8, %v742_v63, %v746_v0  ;;  %v884_v17 = vsel %vm60_vm1, %v1660_v33, %v872_v44  ;;  %v760_v5 = vsel %vm1884_vm8, %v755_v3, %v759_v4  ;;  %v1699_v8 = vld [vmem:[%s2428_s0 + $0xc] sm:$0x3] }
  0x49   :  { %v891_v20 = vsel %vm60_vm1, %v1661_v38, %v873_v56  ;;  %v773_v32 = vsel %vm1884_vm8, %v768_v10, %v772_v11  ;;  %v896_v33 = vsel %vm56_vm0, %v1662_v61, %v874_v19  ;;  %v1668_v34 = vrot.slane %v882_v27, 9  ;;  %805 = vst [vmem:[#allocation1 + $0x20] ss:$4 sm:$0xff] %v747_v54 }
  0x4a   :  { %v570_v12 = vld.sshfl [vmem:[#allocation1] sm:$0xff pattern:$0x73625140]  ;;  %v781_v30 = vrot.slane %v780_v24, 2  ;;  %v903_v36 = vsel %vm56_vm0, %v1663_v2, %v875_v26  ;;  %v905_v37 = vsel %vm60_vm1, %v1663_v2, %v875_v26  ;;  %808 = vst [vmem:[#allocation1 + $0x21] ss:$4 sm:$0xff] %v760_v5 }
  0x4b   :  { %1636 = vmatmul.msk.bf16.vlgmr.msra.gmra.mxu3 %vm259_vm9, %v570_v12  ;;  %793 = vst [vmem:[#allocation1] ss:$4 sm:$0xff] %v2139_v18  ;;  %v1720_v18 = vld [vmem:[%s2428_s0 + $0x8] sm:$0x7]  ;;  %v1671_v41 = vrot.slane %v891_v20, 9  ;;  %v1134_v43 = vrot.slane %v1721_v21, 2 }
  0x4c   :  { %796 = vst [vmem:[#allocation1 + $0x1] ss:$4 sm:$0xff] %v2146_v28  ;;  %v889_v28 = vsel %vm56_vm0, %v1661_v38, %v873_v56  ;;  %v786_v35 = vsel %vm1884_vm8, %v781_v30, %v785_v25  ;;  %v1669_v38 = vrot.slane %v884_v17, 9  ;;  %v1133_v42 = vrot.slane %v1720_v18, 2  ;;  %v1698_v25 = vld [vmem:[%s2428_s0 + $0x8] sm:$0x3] }
  0x4d   :  { %799 = vst [vmem:[#allocation1 + $0x2] ss:$4 sm:$0xff] %v2150_v29  ;;  %v898_v29 = vsel %vm60_vm1, %v1662_v61, %v874_v19  ;;  %v1670_v40 = vrot.slane %v889_v28, 9  ;;  %v1672_v46 = vrot.slane %v896_v33, 9  ;;  %v1674_v49 = vrot.slane %v903_v36, 9 }
  0x4e   :  { %802 = vst [vmem:[#allocation1 + $0x3] ss:$4 sm:$0xff] %v734_v13  ;;  %v1673_v47 = vrot.slane %v898_v29, 9  ;;  %v1675_v50 = vrot.slane %v905_v37, 9  ;;  %v1135_v14 = vrot.slane %v1722_v39, 2  ;;  %v939_v9 = vsel %vm1991_vm2, %v1668_v34, %v1669_v38 }
  0x4f   :  { %811 = vst [vmem:[#allocation1 + $0x22] ss:$4 sm:$0xff] %v773_v32  ;;  %v1143_v51 = vsel %vm56_vm0, %v1720_v18, %v1133_v42  ;;  %v1149_v22 = vsel %vm56_vm0, %v1721_v21, %v1134_v43  ;;  %v1136_v45 = vrot.slane %v1723_v48, 2  ;;  %v1144_v53 = vsel %vm60_vm1, %v1720_v18, %v1133_v42  ;;  %v1701_v5 = vld [vmem:[%s2428_s0 + $0x14] sm:$0x3] }
  0x50   :  { %1615 = vmatmul.msk.bf16.gmra.mxu2 %vm259_vm9, %v2104_v62  ;;  %814 = vst [vmem:[#allocation1 + $0x23] ss:$4 sm:$0xff] %v786_v35  ;;  %v943_v62 = vsel %vm1991_vm2, %v1670_v40, %v1671_v41  ;;  %v947_v44 = vsel %vm1991_vm2, %v1672_v46, %v1673_v47  ;;  %v1150_v55 = vsel %vm60_vm1, %v1721_v21, %v1134_v43  ;;  %v1189_v59 = vshrl.u32 %v1143_v51, 16  ;;  %v1742_v20 = vld [vmem:[%s2428_s0 + $0x8] sm:$0x6] }
  0x51   :  { %v951_v56 = vsel %vm1991_vm2, %v1674_v49, %v1675_v50  ;;  %v1155_v57 = vsel %vm56_vm0, %v1722_v39, %v1135_v14  ;;  %v1156_v58 = vsel %vm60_vm1, %v1722_v39, %v1135_v14  ;;  %v1192_v60 = vshll.u32 %v1143_v51, 16  ;;  %v2257_v21 = vld [vmem:[%s2428_s0 + $0xc] sm:$0x6]  ;;  %v1664_v32 = vld [vmem:[%s2428_s0 + $0x1c] sm:$0x6] }
  0x52   :  { %v1202_v61 = vshrl.u32 %v1149_v22, 16  ;;  %v1205_v63 = vshll.u32 %v1149_v22, 16  ;;  %v1146_v0 = vrot.slane %v1144_v53, 2  ;;  %v1152_v1 = vrot.slane %v1150_v55, 2  ;;  %v1665_v33 = vld [vmem:[%s2428_s0 + $0x20] sm:$0x6] }
  0x53   :  { %v1161_v16 = vsel %vm56_vm0, %v1723_v48, %v1136_v45  ;;  %v1162_v2 = vsel %vm60_vm1, %v1723_v48, %v1136_v45  ;;  %v1215_v3 = vshrl.u32 %v1155_v57, 16  ;;  %v1218_v4 = vshll.u32 %v1155_v57, 16  ;;  %v2268_v37 = vld [vmem:[%s2428_s0 + $0x10] sm:$0x6]  ;;  %v1666_v38 = vld [vmem:[%s2428_s0 + $0x24] sm:$0x6] }
  0x54   :  { %v1158_v6 = vrot.slane %v1156_v58, 2  ;;  %v1191_v7 = vrot.slane %v1189_v59, 6  ;;  %v1194_v12 = vrot.slane %v1192_v60, 7  ;;  %v1204_v13 = vrot.slane %v1202_v61, 6  ;;  %v1667_v42 = vld [vmem:[%s2428_s0 + $0x28] sm:$0x6] }
  0x55   :  { %v815_v23 = vld.sshfl [vmem:[#allocation1] sm:$0xff pattern:$0x73625140]  ;;  %v1207_v10 = vrot.slane %v1205_v63, 7  ;;  %v1164_v11 = vrot.slane %v1162_v2, 2  ;;  %v1228_v19 = vshrl.u32 %v1161_v16, 16 }
  0x56   :  { %1658 = vmatmul.msk.bf16.vlgmr.msrb.gmra.mxu0 %vm259_vm9, %v815_v23  ;;  %974 = vst [vmem:[#allocation1] ss:$4 sm:$0xff] %v939_v9  ;;  %v1231_v24 = vshll.u32 %v1161_v16, 16  ;;  %v1198_v26 = vshll.u32 %v1146_v0, 16  ;;  %v1211_v27 = vshll.u32 %v1152_v1, 16  ;;  %v1217_v54 = vrot.slane %v1215_v3, 6 }
  0x57   :  { %977 = vst [vmem:[#allocation1 + $0x1] ss:$4 sm:$0xff] %v943_v62  ;;  %v1220_v17 = vrot.slane %v1218_v4, 7  ;;  %v2246_v18 = vshll.u32 %v1158_v6, 16  ;;  %v1195_v30 = vor.u32 %v1194_v12, %v1191_v7  ;;  %v1208_v28 = vor.u32 %v1207_v10, %v1204_v13  ;;  %v2281_v47 = vld [vmem:[%s2428_s0 + $0x14] sm:$0x6] }
  0x58   :  { %980 = vst [vmem:[#allocation1 + $0x2] ss:$4 sm:$0xff] %v947_v44  ;;  %v1230_v34 = vrot.slane %v1228_v19, 6  ;;  %v1233_v35 = vrot.slane %v1231_v24, 7  ;;  %v1237_v36 = vshll.u32 %v1164_v11, 16  ;;  %v1200_v39 = vrot.slane %v1198_v26, 7 }
  0x59   :  { %983 = vst [vmem:[#allocation1 + $0x3] ss:$4 sm:$0xff] %v951_v56  ;;  %v1213_v40 = vrot.slane %v1211_v27, 7  ;;  %v1221_v41 = vor.u32 %v1220_v17, %v1217_v54  ;;  %v816_v43 = vld.sshfl [vmem:[#allocation1 + $0x20] sm:$0xff pattern:$0x73625140] }
  0x5a   :  { %v1226_v46 = vrot.slane %v2246_v18, 7  ;;  %v1196_v48 = vrot.slane %v1195_v30, 2  ;;  %v1209_v49 = vrot.slane %v1208_v28, 2  ;;  %v1378_v50 = vrot.slane %v1742_v20, 2  ;;  %v1724_v12 = vld [vmem:[%s2428_s0 + $0x20] sm:$0x7] }
  0x5b   :  { %1637 = vmatmul.msk.bf16.gmra.mxu3 %vm259_vm9, %v2179_v15  ;;  %v1700_v15 = vld [vmem:[%s2428_s0 + $0x10] sm:$0x3]  ;;  %v1379_v14 = vrot.slane %v2257_v21, 2  ;;  %v1234_v9 = vor.u32 %v1233_v35, %v1230_v34  ;;  %v1239_v62 = vrot.slane %v1237_v36, 7  ;;  %v876_v51 = vrot.slane %v1664_v32, 2 }
  0x5c   :  { %v877_v22 = vrot.slane %v1665_v33, 2  ;;  %v1222_v23 = vrot.slane %v1221_v41, 2  ;;  %v1380_v44 = vrot.slane %v2268_v37, 2  ;;  %v878_v45 = vrot.slane %v1666_v38, 2  ;;  %v1725_v13 = vld [vmem:[%s2428_s0 + $0x24] sm:$0x7] }
  0x5d   :  { %v879_v53 = vrot.slane %v1667_v42, 2  ;;  %v910_v55 = vsel %vm56_vm0, %v1664_v32, %v876_v51  ;;  %v912_v56 = vsel %vm60_vm1, %v1664_v32, %v876_v51  ;;  %v1381_v59 = vrot.slane %v2281_v47, 2  ;;  %v1727_v30 = vld [vmem:[%s2428_s0 + $0x2c] sm:$0x7] }
  0x5e   :  { %v917_v57 = vsel %vm56_vm0, %v1665_v33, %v877_v22  ;;  %v919_v58 = vsel %vm60_vm1, %v1665_v33, %v877_v22  ;;  %v924_v60 = vsel %vm56_vm0, %v1666_v38, %v878_v45  ;;  %v926_v61 = vsel %vm60_vm1, %v1666_v38, %v878_v45 }
  0x5f   :  { %v931_v63 = vsel %vm56_vm0, %v1667_v42, %v879_v53  ;;  %v1235_v0 = vrot.slane %v1234_v9, 2  ;;  %v933_v1 = vsel %vm60_vm1, %v1667_v42, %v879_v53  ;;  %v1676_v16 = vrot.slane %v910_v55, 9 }
  0x60   :  { %v996_v29 = vld.sshfl [vmem:[#allocation1] sm:$0xff pattern:$0x73625140]  ;;  %v1677_v2 = vrot.slane %v912_v56, 9  ;;  %v1201_v3 = vsel %vm1884_vm8, %v1196_v48, %v1200_v39  ;;  %v1214_v4 = vsel %vm1884_vm8, %v1209_v49, %v1213_v40  ;;  %v1678_v6 = vrot.slane %v917_v57, 9 }
  0x61   :  { %1696 = vmatmul.msk.bf16.vlgmr.msra.gmra.mxu1 %vm259_vm9, %v996_v29  ;;  %1054 = vst [vmem:[#allocation1] ss:$4 sm:$0xff] %v1698_v25  ;;  %v1679_v7 = vrot.slane %v919_v58, 9  ;;  %v1680_v11 = vrot.slane %v924_v60, 9  ;;  %v1681_v19 = vrot.slane %v926_v61, 9  ;;  %v1682_v24 = vrot.slane %v931_v63, 9 }
  0x62   :  { %1057 = vst [vmem:[#allocation1 + $0x1] ss:$4 sm:$0xff] %v1699_v8  ;;  %v955_v10 = vsel %vm1991_vm2, %v1676_v16, %v1677_v2  ;;  %v1726_v25 = vld [vmem:[%s2428_s0 + $0x28] sm:$0x7]  ;;  %v1227_v27 = vsel %vm1884_vm8, %v1222_v23, %v1226_v46  ;;  %v1388_v54 = vsel %vm56_vm0, %v1742_v20, %v1378_v50  ;;  %v1390_v17 = vsel %vm60_vm1, %v1742_v20, %v1378_v50  ;;  %v1702_v63 = vld [vmem:[%s2428_s0 + $0x20] sm:$0x3] }
  0x63   :  { %1060 = vst [vmem:[#allocation1 + $0x2] ss:$4 sm:$0xff] %v1700_v15  ;;  %v1683_v8 = vrot.slane %v933_v1, 9  ;;  %v1240_v15 = vsel %vm1884_vm8, %v1235_v0, %v1239_v62  ;;  %v1395_v18 = vsel %vm56_vm0, %v2257_v21, %v1379_v14  ;;  %v1137_v28 = vrot.slane %v1724_v12, 2  ;;  %v1703_v2 = vld [vmem:[%s2428_s0 + $0x24] sm:$0x3] }
  0x64   :  { %1063 = vst [vmem:[#allocation1 + $0x3] ss:$4 sm:$0xff] %v1701_v5  ;;  %v1397_v5 = vsel %vm60_vm1, %v2257_v21, %v1379_v14  ;;  %v1402_v20 = vsel %vm56_vm0, %v2268_v37, %v1380_v44  ;;  %v959_v32 = vsel %vm1991_vm2, %v1678_v6, %v1679_v7  ;;  %v1138_v33 = vrot.slane %v1725_v13, 2 }
  0x65   :  { %986 = vst [vmem:[#allocation1 + $0x20] ss:$4 sm:$0xff] %v955_v10  ;;  %v1139_v29 = vrot.slane %v1726_v25, 2  ;;  %v1404_v34 = vsel %vm60_vm1, %v2268_v37, %v1380_v44  ;;  %v1750_v35 = vrot.slane %v1388_v54, 9  ;;  %v1751_v21 = vrot.slane %v1390_v17, 9 }
  0x66   :  { %1659 = vmatmul.msk.bf16.gmra.mxu0 %vm259_vm9, %v816_v43  ;;  %v963_v36 = vsel %vm1991_vm2, %v1680_v11, %v1681_v19  ;;  %v1409_v38 = vsel %vm56_vm0, %v2281_v47, %v1381_v59  ;;  %v1411_v39 = vsel %vm60_vm1, %v2281_v47, %v1381_v59  ;;  %v967_v40 = vsel %vm1991_vm2, %v1682_v24, %v1683_v8  ;;  %v1705_v17 = vld [vmem:[%s2428_s0 + $0x2c] sm:$0x3] }
  0x67   :  { %v1140_v41 = vrot.slane %v1727_v30, 2  ;;  %v1752_v42 = vrot.slane %v1395_v18, 9  ;;  %v1753_v43 = vrot.slane %v1397_v5, 9  ;;  %989 = vst [vmem:[#allocation1 + $0x21] ss:$4 sm:$0xff] %v959_v32  ;;  %v1167_v37 = vsel %vm56_vm0, %v1724_v12, %v1137_v28 }
  0x68   :  { %v1754_v46 = vrot.slane %v1402_v20, 9  ;;  %v1755_v48 = vrot.slane %v1404_v34, 9  ;;  %992 = vst [vmem:[#allocation1 + $0x22] ss:$4 sm:$0xff] %v963_v36  ;;  %v1173_v49 = vsel %vm56_vm0, %v1725_v13, %v1138_v33  ;;  %v1179_v50 = vsel %vm56_vm0, %v1726_v25, %v1139_v29  ;;  %v1747_v36 = vld [vmem:[%s2428_s0 + $0x24] sm:$0x6] }
  0x69   :  { %v1445_v14 = vsel %vm1991_vm2, %v1750_v35, %v1751_v21  ;;  %v1756_v47 = vrot.slane %v1409_v38, 9  ;;  %v1757_v9 = vrot.slane %v1411_v39, 9  ;;  %995 = vst [vmem:[#allocation1 + $0x23] ss:$4 sm:$0xff] %v967_v40  ;;  %v1168_v62 = vsel %vm60_vm1, %v1724_v12, %v1137_v28  ;;  %v1704_v12 = vld [vmem:[%s2428_s0 + $0x28] sm:$0x3] }
  0x6a   :  { %v1185_v51 = vsel %vm56_vm0, %v1727_v30, %v1140_v41  ;;  %v1241_v22 = vshrl.u32 %v1167_v37, 16  ;;  %v1244_v23 = vshll.u32 %v1167_v37, 16  ;;  %v1174_v44 = vsel %vm60_vm1, %v1725_v13, %v1138_v33  ;;  %v1746_v21 = vld [vmem:[%s2428_s0 + $0x20] sm:$0x6] }
  0x6b   :  { %v1076_v26 = vld.sshfl [vmem:[#allocation1] sm:$0xff pattern:$0x73625140]  ;;  %v1254_v45 = vshrl.u32 %v1173_v49, 16  ;;  %v1257_v53 = vshll.u32 %v1173_v49, 16  ;;  %v1267_v55 = vshrl.u32 %v1179_v50, 16  ;;  %v1449_v56 = vsel %vm1991_vm2, %v1752_v42, %v1753_v43 }
  0x6c   :  { %1718 = vmatmul.msk.bf16.vlgmr.msrb.gmra.mxu2 %vm259_vm9, %v1076_v26  ;;  %1299 = vst [vmem:[#allocation1] ss:$4 sm:$0xff] %v1201_v3  ;;  %v1453_v57 = vsel %vm1991_vm2, %v1754_v46, %v1755_v48  ;;  %v1180_v58 = vsel %vm60_vm1, %v1726_v25, %v1139_v29  ;;  %v1270_v59 = vshll.u32 %v1179_v50, 16  ;;  %v1457_v61 = vsel %vm1991_vm2, %v1756_v47, %v1757_v9  ;;  %v1748_v43 = vld [vmem:[%s2428_s0 + $0x28] sm:$0x6] }
  0x6d   :  { %1302 = vst [vmem:[#allocation1 + $0x1] ss:$4 sm:$0xff] %v1214_v4  ;;  %v1170_v0 = vrot.slane %v1168_v62, 2  ;;  %v1280_v1 = vshrl.u32 %v1185_v51, 16  ;;  %v1283_v16 = vshll.u32 %v1185_v51, 16  ;;  %v1176_v3 = vrot.slane %v1174_v44, 2 }
  0x6e   :  { %1305 = vst [vmem:[#allocation1 + $0x2] ss:$4 sm:$0xff] %v1227_v27  ;;  %v1186_v4 = vsel %vm60_vm1, %v1727_v30, %v1140_v41  ;;  %v1243_v6 = vrot.slane %v1241_v22, 6  ;;  %v1246_v7 = vrot.slane %v1244_v23, 7  ;;  %v1182_v13 = vrot.slane %v1180_v58, 2 }
  0x6f   :  { %1308 = vst [vmem:[#allocation1 + $0x3] ss:$4 sm:$0xff] %v1240_v15  ;;  %v1256_v10 = vrot.slane %v1254_v45, 6  ;;  %v1259_v11 = vrot.slane %v1257_v53, 7  ;;  %v1269_v19 = vrot.slane %v1267_v55, 6  ;;  %v1272_v25 = vrot.slane %v1270_v59, 7 }
  0x70   :  { %v997_v24 = vld.sshfl [vmem:[#allocation1 + $0x20] sm:$0xff pattern:$0x73625140]  ;;  %v1188_v26 = vrot.slane %v1186_v4, 2  ;;  %v1282_v27 = vrot.slane %v1280_v1, 6  ;;  %v1285_v54 = vrot.slane %v1283_v16, 7  ;;  %v1247_v8 = vor.u32 %v1246_v7, %v1243_v6 }
  0x71   :  { %1697 = vmatmul.msk.bf16.gmra.mxu1 %vm259_vm9, %v997_v24  ;;  %1066 = vst [vmem:[#allocation1 + $0x20] ss:$4 sm:$0xff] %v1702_v63  ;;  %v1250_v15 = vshll.u32 %v1170_v0, 16  ;;  %v1260_v18 = vor.u32 %v1259_v11, %v1256_v10  ;;  %v1263_v5 = vshll.u32 %v1176_v3, 16  ;;  %v1273_v30 = vor.u32 %v1272_v25, %v1269_v19  ;;  %v1749_v46 = vld [vmem:[%s2428_s0 + $0x2c] sm:$0x6] }
  0x72   :  { %1069 = vst [vmem:[#allocation1 + $0x21] ss:$4 sm:$0xff] %v1703_v2  ;;  %v1276_v28 = vshll.u32 %v1182_v13, 16  ;;  %v1286_v20 = vor.u32 %v1285_v54, %v1282_v27  ;;  %v1289_v32 = vshll.u32 %v1188_v26, 16  ;;  %v1248_v33 = vrot.slane %v1247_v8, 2 }
  0x73   :  { %1072 = vst [vmem:[#allocation1 + $0x22] ss:$4 sm:$0xff] %v1704_v12  ;;  %v1252_v29 = vrot.slane %v1250_v15, 7  ;;  %v1261_v34 = vrot.slane %v1260_v18, 2  ;;  %v1265_v35 = vrot.slane %v1263_v5, 7  ;;  %v1274_v39 = vrot.slane %v1273_v30, 2 }
  0x74   :  { %1075 = vst [vmem:[#allocation1 + $0x23] ss:$4 sm:$0xff] %v1705_v17  ;;  %v1278_v40 = vrot.slane %v1276_v28, 7  ;;  %v1287_v41 = vrot.slane %v1286_v20, 2  ;;  %v1291_v42 = vrot.slane %v1289_v32, 7  ;;  %v1382_v48 = vrot.slane %v1746_v21, 2 }
  0x75   :  { %v1253_v37 = vsel %vm1884_vm8, %v1248_v33, %v1252_v29  ;;  %v1266_v49 = vsel %vm1884_vm8, %v1261_v34, %v1265_v35  ;;  %v1383_v50 = vrot.slane %v1747_v36, 2  ;;  %v1384_v9 = vrot.slane %v1748_v43, 2 }
  0x76   :  { %v1321_v60 = vld.sshfl [vmem:[#allocation1] sm:$0xff pattern:$0x73625140]  ;;  %v1279_v47 = vsel %vm1884_vm8, %v1274_v39, %v1278_v40  ;;  %v1292_v62 = vsel %vm1884_vm8, %v1287_v41, %v1291_v42  ;;  %v1385_v51 = vrot.slane %v1749_v46, 2  ;;  %v1416_v22 = vsel %vm56_vm0, %v1746_v21, %v1382_v48 }
  0x77   :  { %1740 = vmatmul.msk.bf16.vlgmr.msrb.gmra.mxu3 %vm259_vm9, %v1321_v60  ;;  %1480 = vst [vmem:[#allocation1] ss:$4 sm:$0xff] %v1445_v14  ;;  %v1418_v23 = vsel %vm60_vm1, %v1746_v21, %v1382_v48  ;;  %v1423_v44 = vsel %vm56_vm0, %v1747_v36, %v1383_v50  ;;  %v1425_v45 = vsel %vm60_vm1, %v1747_v36, %v1383_v50  ;;  %v1800_v50 = vld [vmem:[#allocation2] ss:$0 sm:$0xff] }
  0x78   :  { %1483 = vst [vmem:[#allocation1 + $0x1] ss:$4 sm:$0xff] %v1449_v56  ;;  %v1430_v53 = vsel %vm56_vm0, %v1748_v43, %v1384_v9  ;;  %v1432_v55 = vsel %vm60_vm1, %v1748_v43, %v1384_v9  ;;  %v1437_v52 = vsel %vm56_vm0, %v1749_v46, %v1385_v51  ;;  %v1439_v56 = vsel %vm60_vm1, %v1749_v46, %v1385_v51 }
  0x79   :  { %1486 = vst [vmem:[#allocation1 + $0x2] ss:$4 sm:$0xff] %v1453_v57  ;;  %v1758_v57 = vrot.slane %v1416_v22, 9  ;;  %v1759_v58 = vrot.slane %v1418_v23, 9  ;;  %v1760_v59 = vrot.slane %v1423_v44, 9  ;;  %v1761_v60 = vrot.slane %v1425_v45, 9 }
  0x7a   :  { %1489 = vst [vmem:[#allocation1 + $0x3] ss:$4 sm:$0xff] %v1457_v61  ;;  %v1762_v61 = vrot.slane %v1430_v53, 9  ;;  %v1763_v63 = vrot.slane %v1432_v55, 9  ;;  %v1764_v0 = vrot.slane %v1437_v52, 9  ;;  %v1765_v1 = vrot.slane %v1439_v56, 9 }
  0x7b   :  { %v1077_v14 = vld.sshfl [vmem:[#allocation1 + $0x20] sm:$0xff pattern:$0x73625140]  ;;  %v1461_v16 = vsel %vm1991_vm2, %v1758_v57, %v1759_v58  ;;  %v1465_v2 = vsel %vm1991_vm2, %v1760_v59, %v1761_v60  ;;  %vm1551_vm0 = vcmask 7168  }
  0x7c   :  { %1719 = vmatmul.msk.bf16.gmra.mxu2 %vm259_vm9, %v1077_v14  ;;  %1311 = vst [vmem:[#allocation1 + $0x20] ss:$4 sm:$0xff] %v1253_v37  ;;  %v1469_v4 = vsel %vm1991_vm2, %v1762_v61, %v1763_v63  ;;  %v1473_v6 = vsel %vm1991_vm2, %v1764_v0, %v1765_v1 }
  0x7d   :  { %1314 = vst [vmem:[#allocation1 + $0x21] ss:$4 sm:$0xff] %v1266_v49 }
  0x7e   :  { %1317 = vst [vmem:[#allocation1 + $0x22] ss:$4 sm:$0xff] %v1279_v47 }
  0x7f   :  { %1320 = vst [vmem:[#allocation1 + $0x23] ss:$4 sm:$0xff] %v1292_v62 }
  0x81   :  { %v1502_v38 = vld.sshfl [vmem:[#allocation1] sm:$0xff pattern:$0x73625140] }
  0x82   :  { %1778 = vmatmul.msk.bf16.vlgmr.msra.gmra.mxu0 %vm259_vm9, %v1502_v38 }
  0x86   :  { %v1322_v3 = vld.sshfl [vmem:[#allocation1 + $0x20] sm:$0xff pattern:$0x73625140] }
  0x87   :  { %1741 = vmatmul.msk.bf16.gmra.mxu3 %vm259_vm9, %v1322_v3  ;;  %1492 = vst [vmem:[#allocation1 + $0x20] ss:$4 sm:$0xff] %v1461_v16 }
  0x88   :  { %1495 = vst [vmem:[#allocation1 + $0x21] ss:$4 sm:$0xff] %v1465_v2 }
  0x89   :  { %1498 = vst [vmem:[#allocation1 + $0x22] ss:$4 sm:$0xff] %v1469_v4 }
  0x8a   :  { %1501 = vst [vmem:[#allocation1 + $0x23] ss:$4 sm:$0xff] %v1473_v6 }
  0x91   :  { %v1503_v7 = vld.sshfl [vmem:[#allocation1 + $0x20] sm:$0xff pattern:$0x73625140] }
  0x92   :  { %1779 = vmatmul.msk.bf16.gmra.mxu0 %vm259_vm9, %v1503_v7 }
  0x9a   :  { %v278_v12 = vpop.f32.mrf.mxu1 }
  0xa2   :  { %v280_v13 = vpop.f32.mrf.mxu1 }
  0xa7   :  { %v273_v10 = vpop.f32.mrf.mxu0 }
  0xaf   :  { %v275_v24 = vpop.f32.mrf.mxu0 }
  0xb2   :  { %v333_v11 = vpop.f32.mrf.mxu1 }
  0xb3   :  { %v334_v32 = vadd.f32 %v333_v11, %v273_v10 }
  0xba   :  { %v335_v26 = vpop.f32.mrf.mxu1 }
  0xbb   :  { %v336_v38 = vadd.f32 %v335_v26, %v275_v24 }
  0xc2   :  { %v338_v8 = vpop.f32.mrf.mxu1 }
  0xc3   :  { %v517_v19 = vpop.f32.mrf.mxu2  ;;  %v339_v53 = vadd.f32 %v338_v8, %v278_v12 }
  0xc4   :  { %v527_v33 = vadd.f32 %v517_v19, %v334_v32 }
  0xca   :  { %v340_v30 = vpop.f32.mrf.mxu1 }
  0xcb   :  { %v519_v27 = vpop.f32.mrf.mxu2  ;;  %v341_v60 = vadd.f32 %v340_v30, %v280_v13 }
  0xcc   :  { %v528_v40 = vadd.f32 %v519_v27, %v336_v38 }
  0xce   :  { %v597_v25 = vpop.f32.mrf.mxu3 }
  0xcf   :  { %v607_v34 = vadd.f32 %v597_v25, %v527_v33 }
  0xd3   :  { %v842_v54 = vpop.f32.mrf.mxu0  ;;  %v522_v15 = vpop.f32.mrf.mxu2 }
  0xd4   :  { %v852_v39 = vadd.f32 %v842_v54, %v607_v34  ;;  %v529_v52 = vadd.f32 %v522_v15, %v339_v53 }
  0xd6   :  { %v599_v17 = vpop.f32.mrf.mxu3 }
  0xd7   :  { %v608_v42 = vadd.f32 %v599_v17, %v528_v40 }
  0xdb   :  { %v844_v18 = vpop.f32.mrf.mxu0  ;;  %v524_v28 = vpop.f32.mrf.mxu2 }
  0xdc   :  { %v853_v49 = vadd.f32 %v844_v18, %v608_v42  ;;  %v530_v63 = vadd.f32 %v524_v28, %v341_v60 }
  0xde   :  { %v602_v5 = vpop.f32.mrf.mxu3  ;;  %v1023_v35 = vpop.f32.mrf.mxu1 }
  0xdf   :  { %v1033_v41 = vadd.f32 %v1023_v35, %v852_v39  ;;  %v609_v57 = vadd.f32 %v602_v5, %v529_v52 }
  0xe3   :  { %v847_v20 = vpop.f32.mrf.mxu0 }
  0xe4   :  { %v854_v61 = vadd.f32 %v847_v20, %v609_v57 }
  0xe6   :  { %v604_v29 = vpop.f32.mrf.mxu3  ;;  %v1025_v48 = vpop.f32.mrf.mxu1 }
  0xe7   :  { %v1034_v9 = vadd.f32 %v1025_v48, %v853_v49  ;;  %v610_v1 = vadd.f32 %v604_v29, %v530_v63 }
  0xeb   :  { %v849_v36 = vpop.f32.mrf.mxu0 }
  0xec   :  { %v855_v6 = vadd.f32 %v849_v36, %v610_v1 }
  0xee   :  { %v1028_v58 = vpop.f32.mrf.mxu1 }
  0xef   :  { %v1103_v21 = vpop.f32.mrf.mxu2  ;;  %v1035_v0 = vadd.f32 %v1028_v58, %v854_v61 }
  0xf0   :  { %v1113_v43 = vadd.f32 %v1103_v21, %v1033_v41 }
  0xf6   :  { %v1030_v4 = vpop.f32.mrf.mxu1 }
  0xf7   :  { %v1105_v14 = vpop.f32.mrf.mxu2  ;;  %v1036_v10 = vadd.f32 %v1030_v4, %v855_v6 }
  0xf8   :  { %v1114_v51 = vadd.f32 %v1105_v14, %v1034_v9 }
  0xfa   :  { %v1348_v37 = vpop.f32.mrf.mxu3 }
  0xfb   :  { %v1358_v46 = vadd.f32 %v1348_v37, %v1113_v43 }
  0xff   :  { %v1529_v47 = vpop.f32.mrf.mxu0  ;;  %v1108_v59 = vpop.f32.mrf.mxu2 }
 0x100   :  { %v1539_v62 = vadd.f32 %v1529_v47, %v1358_v46  ;;  %v1115_v16 = vadd.f32 %v1108_v59, %v1035_v0 }
 0x102   :  { %v1547_v22 = vadd.f32 %v1800_v50, %v1539_v62  ;;  %v1350_v23 = vpop.f32.mrf.mxu3 }
 0x103   :  { %v1359_v44 = vadd.f32 %v1350_v23, %v1114_v51 }
 0x104   :  { %1552 = vst.msk [vmem:[%s2430_s3] sm:$0xff] %vm1551_vm0, %v1547_v22 }
 0x107   :  { %v1531_v45 = vpop.f32.mrf.mxu0  ;;  %v1110_v7 = vpop.f32.mrf.mxu2 }
 0x108   :  { %v1540_v55 = vadd.f32 %v1531_v45, %v1359_v44  ;;  %v1116_v19 = vadd.f32 %v1110_v7, %v1036_v10 }
 0x10a   :  { %v1548_v56 = vadd.f32 %v1800_v50, %v1540_v55  ;;  %v1353_v2 = vpop.f32.mrf.mxu3 }
 0x10b   :  { %v1360_v3 = vadd.f32 %v1353_v2, %v1115_v16 }
 0x10c   :  { %1553 = vst.msk [vmem:[%s2430_s3 + $0x8] sm:$0xff] %vm1551_vm0, %v1548_v56 }
 0x10f   :  { %v1534_v12 = vpop.f32.mrf.mxu0 }
 0x110   :  { %v1541_v11 = vadd.f32 %v1534_v12, %v1360_v3 }
 0x112   :  { %v1549_v24 = vadd.f32 %v1800_v50, %v1541_v11  ;;  %v1355_v25 = vpop.f32.mrf.mxu3 }
 0x113   :  { %v1361_v13 = vadd.f32 %v1355_v25, %v1116_v19 }
 0x114   :  { %1554 = vst.msk [vmem:[%s2430_s3 + $0x10] sm:$0xff] %vm1551_vm0, %v1549_v24 }
 0x117   :  { %v1536_v26 = vpop.f32.mrf.mxu0 }
 0x118   :  { %v1542_v27 = vadd.f32 %v1536_v26, %v1361_v13 }
 0x11a   :  { %v1550_v54 = vadd.f32 %v1800_v50, %v1542_v27 }
 0x11c   :  { %1555 = vst.msk [vmem:[%s2430_s3 + $0x18] sm:$0xff] %vm1551_vm0, %v1550_v54 }

// kernel: discriminator_forward.4
= control target key start
LH: loop header
LB: loop body
LE: loop exit
PB: predicated region body
PF: predicated region fallthrough
CT: control target
= control target key end

     0   :  { %vm1082_vm0 = vcmask 1042432   ;;  %vm116_vm1 = vsmask.f32 3328  ;;  %vm117_vm2 = vsmask.f32 7440  ;;  %vm985_vm3 = vcmask 48128   ;;  %s12260_s1 = inlined_call_operand.vmem [shape: bf16[8,6,8], index: 1, kind: input, shape index: {}]   ;;  %s12261_s0 = inlined_call_operand.vmem [shape: bf16[2,17,2,17,6], index: 0, kind: input, shape index: {}]   ;;  %s12262_s2 = inlined_call_operand.vmem [shape: f32[1,8], index: 2, kind: input, shape index: {}]   ;;  %s12263_s3 = inlined_call_operand.vmem [shape: bf16[2,256,8], index: 3, kind: output, shape index: {}]  }
   0x1   :  { %v7838_v0 = vld [vmem:[%s12260_s1 + $0x8] sm:$0x7]  ;;  %v83_v1 = vld [vmem:[%s12260_s1] sm:$0x7]  ;;  %v8868_v4 = vld [vmem:[%s12261_s0 + $0xc] sm:$0xff]  ;;  %vm7509_vm5 = vcmask 60416  }
   0x2   :  { %v2009_v2 = vsel %vm1082_vm0, %v7838_v0, 0  ;;  %v1512_v3 = vsel %vm1082_vm0, %v83_v1, 0  ;;  %v8836_v5 = vld [vmem:[%s12261_s0] sm:$0xff]  ;;  %v8095_v8 = vld [vmem:[%s12260_s1 + $0xc] sm:$0x7]  ;;  %vm9045_vm4 = vmor %vm116_vm1, %vm117_vm2 }
   0x3   :  { %v7581_v6 = vld [vmem:[%s12260_s1 + $0x4] sm:$0x7]  ;;  %2018 = vmatpush.bf16.msra.mxu2 %v2009_v2  ;;  %1521 = vmatpush.bf16.msra.mxu1 %v1512_v3  ;;  %v8546_v9 = vld [vmem:[%s12260_s1 + $0x18] sm:$0x7]  ;;  %v3303_v10 = vsel %vm1082_vm0, %v8095_v8, 0 }
   0x4   :  { %v1084_v7 = vsel %vm1082_vm0, %v7581_v6, 0  ;;  %v5720_v11 = vsel %vm1082_vm0, %v8546_v9, 0  ;;  %v19_v12 = vld [vmem:[%s12261_s0] sm:$0xf]  ;;  %v20_v13 = vld [vmem:[%s12261_s0 + $0x4] sm:$0xf]  ;;  %3312 = vmatpush.bf16.msra.mxu3 %v3303_v10 }
   0x5   :  { %1093 = vmatpush.bf16.msra.mxu0 %v1084_v7  ;;  %v84_v14 = vld [vmem:[%s12261_s0 + $0x8] sm:$0x1]  ;;  %v120_v15 = vshrl.u32 %v19_v12, 16  ;;  %v123_v16 = vshll.u32 %v19_v12, 16  ;;  %v129_v17 = vshll.u32 %v20_v13, 16  ;;  %v133_v18 = vshrl.u32 %v20_v13, 16 }
   0x6   :  { %7967 = vmatmul.msk.bf16.vlgmr.msra.gmra.mxu2 %vm985_vm3, %v8868_v4  ;;  %7742 = vmatmul.msk.bf16.vlgmr.msra.gmra.mxu1 %vm985_vm3, %v8836_v5  ;;  %v139_v19 = vshll.u32 %v84_v14, 16  ;;  %v7999_v20 = vld [vmem:[%s12261_s0 + $0xc] sm:$0xf]  ;;  %v8000_v21 = vld [vmem:[%s12261_s0 + $0x10] sm:$0xf] }
   0x7   :  { %5729 = vmatpush.bf16.msrb.mxu2 %v5720_v11  ;;  %v122_v22 = vrot.slane %v120_v15, 4  ;;  %v125_v23 = vrot.slane %v123_v16, 5  ;;  %v131_v24 = vrot.slane %v129_v17, 5  ;;  %v135_v25 = vrot.slane %v133_v18, 4  ;;  %v8001_v26 = vld [vmem:[%s12261_s0 + $0x14] sm:$0x1] }
   0x8   :  { %v141_v27 = vrot.slane %v139_v19, 5  ;;  %v2341_v28 = vshrl.u32 %v7999_v20, 16  ;;  %v2344_v29 = vshll.u32 %v7999_v20, 16  ;;  %v2350_v30 = vshll.u32 %v8000_v21, 16  ;;  %v8192_v31 = vld [vmem:[%s12260_s1 + $0x10] sm:$0x7] }
   0x9   :  { %v126_v32 = vor.u32 %v125_v23, %v122_v22  ;;  %v136_v33 = vor.u32 %v135_v25, %v131_v24  ;;  %v2354_v34 = vshrl.u32 %v8000_v21, 16  ;;  %v2360_v35 = vshll.u32 %v8001_v26, 16  ;;  %v8803_v36 = vld [vmem:[%s12260_s1 + $0x1c] sm:$0x7]  ;;  %v8449_v37 = vld [vmem:[%s12260_s1 + $0x14] sm:$0x7] }
   0xa   :  { %v2343_v39 = vrot.slane %v2341_v28, 4  ;;  %v2346_v40 = vrot.slane %v2344_v29, 5  ;;  %v2352_v41 = vrot.slane %v2350_v30, 5  ;;  %v3865_v42 = vsel %vm1082_vm0, %v8192_v31, 0  ;;  %v21_v43 = vld [vmem:[%s12261_s0 + $0x18] sm:$0xf] }
   0xb   :  { %v127_v44 = vrot.slane %v126_v32, 4  ;;  %v137_v45 = vrot.slane %v136_v33, 4  ;;  %v2356_v46 = vrot.slane %v2354_v34, 4  ;;  %v2362_v47 = vrot.slane %v2360_v35, 5  ;;  %3874 = vmatpush.bf16.msrb.mxu0 %v3865_v42  ;;  %v22_v51 = vld [vmem:[%s12261_s0 + $0x1c] sm:$0xf] }
   0xc   :  { %v2347_v48 = vor.u32 %v2346_v40, %v2343_v39  ;;  %v7014_v49 = vsel %vm1082_vm0, %v8803_v36, 0  ;;  %v5159_v50 = vsel %vm1082_vm0, %v8449_v37, 0  ;;  %v144_v52 = vshrl.u32 %v21_v43, 16  ;;  %v85_v56 = vld [vmem:[%s12261_s0 + $0x20] sm:$0x1]  ;;  %v8869_v15 = vld [vmem:[%s12261_s0 + $0x24] sm:$0xff] }
   0xd   :  { %v132_v53 = vsel %vm9045_vm4, %v127_v44, %v131_v24  ;;  %v142_v54 = vsel %vm9045_vm4, %v137_v45, %v141_v27  ;;  %v2357_v55 = vor.u32 %v2356_v46, %v2352_v41  ;;  %7023 = vmatpush.bf16.msrb.mxu3 %v7014_v49  ;;  %5168 = vmatpush.bf16.msrb.mxu1 %v5159_v50  ;;  %v147_v57 = vshll.u32 %v21_v43, 16  ;;  %v8002_v58 = vld [vmem:[%s12261_s0 + $0x24] sm:$0xf]  ;;  %v8003_v6 = vld [vmem:[%s12261_s0 + $0x28] sm:$0xf]  ;;  %v8837_v19 = vld [vmem:[%s12261_s0 + $0x18] sm:$0xff] }
   0xe   :  { %v889_v59 = vunpack.c.l.b16 %v132_v53  ;;  %v890_v60 = vunpack.c.l.b16 %v142_v54  ;;  %v2348_v61 = vrot.slane %v2347_v48, 4  ;;  %v146_v62 = vrot.slane %v144_v52, 4  ;;  %v8004_v12 = vld [vmem:[%s12261_s0 + $0x2c] sm:$0x1]  ;;  %v23_v13 = vld [vmem:[%s12261_s0 + $0x30] sm:$0xf] }
   0xf   :  { %v2358_v63 = vrot.slane %v2357_v55, 4  ;;  %v149_v0 = vrot.slane %v147_v57, 5  ;;  %v153_v1 = vshll.u32 %v22_v51, 16  ;;  %v157_v2 = vshrl.u32 %v22_v51, 16  ;;  %v24_v27 = vld [vmem:[%s12261_s0 + $0x34] sm:$0xf] }
  0x10   :  { %v953_v3 = vpack.c.b16 %v890_v60, %v889_v59  ;;  %v2353_v4 = vsel %vm9045_vm4, %v2348_v61, %v2352_v41  ;;  %v163_v5 = vshll.u32 %v85_v56, 16  ;;  %v2365_v7 = vshrl.u32 %v8002_v58, 16  ;;  %v8005_v35 = vld [vmem:[%s12261_s0 + $0x3c] sm:$0xf]  ;;  %v86_v46 = vld [vmem:[%s12261_s0 + $0x38] sm:$0x1] }
  0x11   :  { %v2363_v8 = vsel %vm9045_vm4, %v2358_v63, %v2362_v47  ;;  %v3110_v9 = vunpack.c.l.b16 %v2353_v4  ;;  %v150_v10 = vor.u32 %v149_v0, %v146_v62  ;;  %v155_v11 = vrot.slane %v153_v1, 5  ;;  %v8006_v53 = vld [vmem:[%s12261_s0 + $0x40] sm:$0xf] }
  0x12   :  { %7582 = vmatmul.msk.bf16.vlgmr.msra.gmra.mxu0 %vm985_vm3, %v953_v3  ;;  %v3111_v14 = vunpack.c.l.b16 %v2363_v8  ;;  %v159_v16 = vrot.slane %v157_v2, 4  ;;  %v165_v17 = vrot.slane %v163_v5, 5  ;;  %v2367_v18 = vrot.slane %v2365_v7, 4  ;;  %v8007_v3 = vld [vmem:[%s12261_s0 + $0x44] sm:$0x1] }
  0x13   :  { %v151_v20 = vrot.slane %v150_v10, 4  ;;  %v2368_v21 = vshll.u32 %v8002_v58, 16  ;;  %v2374_v22 = vshll.u32 %v8003_v6, 16  ;;  %v2378_v23 = vshrl.u32 %v8003_v6, 16  ;;  %v25_v10 = vld [vmem:[%s12261_s0 + $0x48] sm:$0xf] }
  0x14   :  { %v3174_v24 = vpack.c.b16 %v3111_v14, %v3110_v9  ;;  %v160_v25 = vor.u32 %v159_v16, %v155_v11  ;;  %v2384_v26 = vshll.u32 %v8004_v12, 16  ;;  %v168_v28 = vshrl.u32 %v23_v13, 16  ;;  %v8870_v12 = vld [vmem:[%s12261_s0 + $0x3c] sm:$0xff]  ;;  %v8838_v16 = vld [vmem:[%s12261_s0 + $0x30] sm:$0xff] }
  0x15   :  { %v2370_v29 = vrot.slane %v2368_v21, 5  ;;  %v2376_v30 = vrot.slane %v2374_v22, 5  ;;  %v2380_v31 = vrot.slane %v2378_v23, 4  ;;  %v156_v32 = vsel %vm9045_vm4, %v151_v20, %v155_v11 }
  0x16   :  { %8096 = vmatmul.msk.bf16.vlgmr.msra.gmra.mxu3 %vm985_vm3, %v3174_v24  ;;  %7968 = vmatmul.msk.bf16.gmra.mxu2 %vm985_vm3, %v8869_v15  ;;  %v161_v33 = vrot.slane %v160_v25, 4  ;;  %v2386_v34 = vrot.slane %v2384_v26, 5  ;;  %v171_v39 = vshll.u32 %v23_v13, 16  ;;  %v177_v40 = vshll.u32 %v24_v27, 16  ;;  %v26_v15 = vld [vmem:[%s12261_s0 + $0x4c] sm:$0xf] }
  0x17   :  { %7743 = vmatmul.msk.bf16.gmra.mxu1 %vm985_vm3, %v8837_v19  ;;  %v2371_v36 = vor.u32 %v2370_v29, %v2367_v18  ;;  %v2381_v37 = vor.u32 %v2380_v31, %v2376_v30  ;;  %v170_v42 = vrot.slane %v168_v28, 4  ;;  %v181_v43 = vshrl.u32 %v24_v27, 16  ;;  %v8008_v24 = vld [vmem:[%s12261_s0 + $0x54] sm:$0xf]  ;;  %v8009_v27 = vld [vmem:[%s12261_s0 + $0x58] sm:$0xf] }
  0x18   :  { %v166_v41 = vsel %vm9045_vm4, %v161_v33, %v165_v17  ;;  %v173_v47 = vrot.slane %v171_v39, 5  ;;  %v2389_v48 = vshrl.u32 %v8005_v35, 16  ;;  %v891_v49 = vunpack.c.l.b16 %v156_v32  ;;  %v87_v33 = vld [vmem:[%s12261_s0 + $0x50] sm:$0x1] }
  0x19   :  { %v2372_v44 = vrot.slane %v2371_v36, 4  ;;  %v2382_v45 = vrot.slane %v2381_v37, 4  ;;  %v892_v50 = vunpack.c.l.b16 %v166_v41  ;;  %v179_v51 = vrot.slane %v177_v40, 5 }
  0x1a   :  { %v183_v52 = vrot.slane %v181_v43, 4  ;;  %v174_v56 = vor.u32 %v173_v47, %v170_v42  ;;  %v187_v58 = vshll.u32 %v86_v46, 16  ;;  %v2392_v59 = vshll.u32 %v8005_v35, 16 }
  0x1b   :  { %v2377_v54 = vsel %vm9045_vm4, %v2372_v44, %v2376_v30  ;;  %v2387_v55 = vsel %vm9045_vm4, %v2382_v45, %v2386_v34  ;;  %v2391_v60 = vrot.slane %v2389_v48, 4  ;;  %v2398_v61 = vshll.u32 %v8006_v53, 16 }
  0x1c   :  { %v184_v57 = vor.u32 %v183_v52, %v179_v51  ;;  %v2402_v62 = vshrl.u32 %v8006_v53, 16  ;;  %v954_v63 = vpack.c.b16 %v892_v50, %v891_v49  ;;  %v3112_v0 = vunpack.c.l.b16 %v2377_v54  ;;  %v8010_v49 = vld [vmem:[%s12261_s0 + $0x5c] sm:$0x1] }
  0x1d   :  { %v3113_v1 = vunpack.c.l.b16 %v2387_v55  ;;  %v2394_v2 = vrot.slane %v2392_v59, 5  ;;  %v2400_v4 = vrot.slane %v2398_v61, 5  ;;  %v175_v6 = vrot.slane %v174_v56, 4  ;;  %v27_v61 = vld [vmem:[%s12261_s0 + $0x60] sm:$0xf] }
  0x1e   :  { %v2404_v5 = vrot.slane %v2402_v62, 4  ;;  %v185_v7 = vrot.slane %v184_v57, 4  ;;  %v189_v8 = vrot.slane %v187_v58, 5  ;;  %v2408_v14 = vshll.u32 %v8007_v3, 16  ;;  %v8871_v57 = vld [vmem:[%s12261_s0 + $0x54] sm:$0xff]  ;;  %v8839_v62 = vld [vmem:[%s12261_s0 + $0x48] sm:$0xff] }
  0x1f   :  { %v2395_v9 = vor.u32 %v2394_v2, %v2391_v60  ;;  %v3175_v11 = vpack.c.b16 %v3113_v1, %v3112_v0  ;;  %v180_v17 = vsel %vm9045_vm4, %v175_v6, %v179_v51  ;;  %v192_v19 = vshrl.u32 %v25_v10, 16 }
  0x20   :  { %v2405_v13 = vor.u32 %v2404_v5, %v2400_v4  ;;  %v190_v18 = vsel %vm9045_vm4, %v185_v7, %v189_v8  ;;  %v195_v21 = vshll.u32 %v25_v10, 16  ;;  %v201_v22 = vshll.u32 %v26_v15, 16  ;;  %v8012_v10 = vld [vmem:[%s12261_s0 + $0x70] sm:$0xf] }
  0x21   :  { %v2396_v20 = vrot.slane %v2395_v9, 4  ;;  %v205_v23 = vshrl.u32 %v26_v15, 16  ;;  %v2410_v26 = vrot.slane %v2408_v14, 5  ;;  %v893_v28 = vunpack.c.l.b16 %v180_v17  ;;  %v8011_v9 = vld [vmem:[%s12261_s0 + $0x6c] sm:$0xf] }
  0x22   :  { %7583 = vmatmul.msk.bf16.gmra.mxu0 %vm985_vm3, %v954_v63  ;;  %v2406_v25 = vrot.slane %v2405_v13, 4  ;;  %v894_v29 = vunpack.c.l.b16 %v190_v18  ;;  %v194_v30 = vrot.slane %v192_v19, 4  ;;  %v2413_v31 = vshrl.u32 %v8008_v24, 16  ;;  %v28_v63 = vld [vmem:[%s12261_s0 + $0x64] sm:$0xf] }
  0x23   :  { %v2401_v32 = vsel %vm9045_vm4, %v2396_v20, %v2400_v4  ;;  %v197_v34 = vrot.slane %v195_v21, 5  ;;  %v203_v35 = vrot.slane %v201_v22, 5  ;;  %v207_v36 = vrot.slane %v205_v23, 4  ;;  %v88_v17 = vld [vmem:[%s12261_s0 + $0x68] sm:$0x1] }
  0x24   :  { %v2411_v37 = vsel %vm9045_vm4, %v2406_v25, %v2410_v26  ;;  %v2416_v39 = vshll.u32 %v8008_v24, 16  ;;  %v2422_v40 = vshll.u32 %v8009_v27, 16  ;;  %v2426_v41 = vshrl.u32 %v8009_v27, 16 }
  0x25   :  { %v955_v42 = vpack.c.b16 %v894_v29, %v893_v28  ;;  %v211_v43 = vshll.u32 %v87_v33, 16  ;;  %v3114_v44 = vunpack.c.l.b16 %v2401_v32  ;;  %v3115_v45 = vunpack.c.l.b16 %v2411_v37 }
  0x26   :  { %8097 = vmatmul.msk.bf16.gmra.mxu3 %vm985_vm3, %v3175_v11  ;;  %7969 = vmatmul.msk.bf16.gmra.mxu2 %vm985_vm3, %v8870_v12  ;;  %v198_v46 = vor.u32 %v197_v34, %v194_v30  ;;  %v2415_v47 = vrot.slane %v2413_v31, 4  ;;  %v208_v48 = vor.u32 %v207_v36, %v203_v35  ;;  %v2418_v50 = vrot.slane %v2416_v39, 5  ;;  %v8013_v34 = vld [vmem:[%s12261_s0 + $0x74] sm:$0x1] }
  0x27   :  { %7744 = vmatmul.msk.bf16.gmra.mxu1 %vm985_vm3, %v8838_v16  ;;  %v2424_v51 = vrot.slane %v2422_v40, 5  ;;  %v2428_v52 = vrot.slane %v2426_v41, 4  ;;  %v213_v54 = vrot.slane %v211_v43, 5  ;;  %v2432_v55 = vshll.u32 %v8010_v49, 16  ;;  %v29_v40 = vld [vmem:[%s12261_s0 + $0x78] sm:$0xf] }
  0x28   :  { %v199_v53 = vrot.slane %v198_v46, 4  ;;  %v3176_v56 = vpack.c.b16 %v3115_v45, %v3114_v44  ;;  %v209_v58 = vrot.slane %v208_v48, 4  ;;  %v2419_v59 = vor.u32 %v2418_v50, %v2415_v47  ;;  %v30_v41 = vld [vmem:[%s12261_s0 + $0x7c] sm:$0xf] }
  0x29   :  { %v2429_v60 = vor.u32 %v2428_v52, %v2424_v51  ;;  %v2434_v1 = vrot.slane %v2432_v55, 5  ;;  %v216_v2 = vshrl.u32 %v27_v61, 16  ;;  %v219_v3 = vshll.u32 %v27_v61, 16 }
  0x2a   :  { %v204_v0 = vsel %vm9045_vm4, %v199_v53, %v203_v35  ;;  %v214_v4 = vsel %vm9045_vm4, %v209_v58, %v213_v54  ;;  %v2420_v5 = vrot.slane %v2419_v59, 4  ;;  %v225_v7 = vshll.u32 %v28_v63, 16  ;;  %v8872_v35 = vld [vmem:[%s12261_s0 + $0x6c] sm:$0xff] }
  0x2b   :  { %v2430_v6 = vrot.slane %v2429_v60, 4  ;;  %v229_v8 = vshrl.u32 %v28_v63, 16  ;;  %v895_v11 = vunpack.c.l.b16 %v204_v0  ;;  %v896_v12 = vunpack.c.l.b16 %v214_v4 }
  0x2c   :  { %v218_v13 = vrot.slane %v216_v2, 4  ;;  %v221_v14 = vrot.slane %v219_v3, 5  ;;  %v2425_v15 = vsel %vm9045_vm4, %v2420_v5, %v2424_v51  ;;  %v227_v18 = vrot.slane %v225_v7, 5  ;;  %v8014_v51 = vld [vmem:[%s12261_s0 + $0x84] sm:$0xf] }
  0x2d   :  { %v2435_v16 = vsel %vm9045_vm4, %v2430_v6, %v2434_v1  ;;  %v2437_v19 = vshrl.u32 %v8011_v9, 16  ;;  %v231_v20 = vrot.slane %v229_v8, 4  ;;  %v2440_v21 = vshll.u32 %v8011_v9, 16  ;;  %v89_v2 = vld [vmem:[%s12261_s0 + $0x80] sm:$0x1] }
  0x2e   :  { %v2446_v22 = vshll.u32 %v8012_v10, 16  ;;  %v2450_v23 = vshrl.u32 %v8012_v10, 16  ;;  %v956_v24 = vpack.c.b16 %v896_v12, %v895_v11  ;;  %v235_v25 = vshll.u32 %v88_v17, 16  ;;  %v8016_v17 = vld [vmem:[%s12261_s0 + $0x8c] sm:$0x1] }
  0x2f   :  { %v3116_v26 = vunpack.c.l.b16 %v2425_v15  ;;  %v3117_v27 = vunpack.c.l.b16 %v2435_v16  ;;  %v222_v28 = vor.u32 %v221_v14, %v218_v13  ;;  %v2439_v29 = vrot.slane %v2437_v19, 4 }
  0x30   :  { %v232_v30 = vor.u32 %v231_v20, %v227_v18  ;;  %v2442_v31 = vrot.slane %v2440_v21, 5  ;;  %v2448_v32 = vrot.slane %v2446_v22, 5  ;;  %v2452_v33 = vrot.slane %v2450_v23, 4  ;;  %v8873_v23 = vld [vmem:[%s12261_s0 + $0x84] sm:$0xff] }
  0x31   :  { %v3177_v36 = vpack.c.b16 %v3117_v27, %v3116_v26  ;;  %v223_v37 = vrot.slane %v222_v28, 4  ;;  %v237_v39 = vrot.slane %v235_v25, 5  ;;  %v2456_v46 = vshll.u32 %v8013_v34, 16  ;;  %v8841_v25 = vld [vmem:[%s12261_s0 + $0x78] sm:$0xff]  ;;  %v32_v28 = vld [vmem:[%s12261_s0 + $0x94] sm:$0xf] }
  0x32   :  { %7584 = vmatmul.msk.bf16.gmra.mxu0 %vm985_vm3, %v955_v42  ;;  %v8840_v42 = vld [vmem:[%s12261_s0 + $0x60] sm:$0xff]  ;;  %v233_v43 = vrot.slane %v232_v30, 4  ;;  %v2443_v44 = vor.u32 %v2442_v31, %v2439_v29  ;;  %v2453_v45 = vor.u32 %v2452_v33, %v2448_v32  ;;  %v240_v47 = vshrl.u32 %v29_v40, 16 }
  0x33   :  { %v243_v48 = vshll.u32 %v29_v40, 16  ;;  %v249_v49 = vshll.u32 %v30_v41, 16  ;;  %v253_v50 = vshrl.u32 %v30_v41, 16  ;;  %v228_v52 = vsel %vm9045_vm4, %v223_v37, %v227_v18  ;;  %v8018_v37 = vld [vmem:[%s12261_s0 + $0xa0] sm:$0xf] }
  0x34   :  { %v238_v53 = vsel %vm9045_vm4, %v233_v43, %v237_v39  ;;  %v2444_v54 = vrot.slane %v2443_v44, 4  ;;  %v2454_v55 = vrot.slane %v2453_v45, 4  ;;  %v2461_v58 = vshrl.u32 %v8014_v51, 16 }
  0x35   :  { %v2464_v59 = vshll.u32 %v8014_v51, 16  ;;  %v242_v60 = vrot.slane %v240_v47, 4  ;;  %v245_v61 = vrot.slane %v243_v48, 5  ;;  %v255_v63 = vrot.slane %v253_v50, 4 }
  0x36   :  { %8098 = vmatmul.msk.bf16.gmra.mxu3 %vm985_vm3, %v3176_v56  ;;  %7970 = vmatmul.msk.bf16.gmra.mxu2 %vm985_vm3, %v8871_v57  ;;  %v2458_v56 = vrot.slane %v2456_v46, 5  ;;  %v8015_v57 = vld [vmem:[%s12261_s0 + $0x88] sm:$0xf]  ;;  %v897_v0 = vunpack.c.l.b16 %v228_v52  ;;  %v898_v1 = vunpack.c.l.b16 %v238_v53  ;;  %v2449_v3 = vsel %vm9045_vm4, %v2444_v54, %v2448_v32  ;;  %v90_v53 = vld [vmem:[%s12261_s0 + $0x98] sm:$0x1] }
  0x37   :  { %7745 = vmatmul.msk.bf16.gmra.mxu1 %vm985_vm3, %v8839_v62  ;;  %v251_v62 = vrot.slane %v249_v49, 5  ;;  %v2470_v5 = vshll.u32 %v8015_v57, 16  ;;  %v2474_v6 = vshrl.u32 %v8015_v57, 16  ;;  %v2463_v7 = vrot.slane %v2461_v58, 4 }
  0x38   :  { %v2459_v4 = vsel %vm9045_vm4, %v2454_v55, %v2458_v56  ;;  %v2466_v8 = vrot.slane %v2464_v59, 5  ;;  %v246_v9 = vor.u32 %v245_v61, %v242_v60  ;;  %v259_v11 = vshll.u32 %v89_v2, 16 }
  0x39   :  { %v256_v10 = vor.u32 %v255_v63, %v251_v62  ;;  %v957_v12 = vpack.c.b16 %v898_v1, %v897_v0  ;;  %v3118_v13 = vunpack.c.l.b16 %v2449_v3  ;;  %v3119_v14 = vunpack.c.l.b16 %v2459_v4  ;;  %v8019_v0 = vld [vmem:[%s12261_s0 + $0xa4] sm:$0x1] }
  0x3a   :  { %v2472_v15 = vrot.slane %v2470_v5, 5  ;;  %v2476_v16 = vrot.slane %v2474_v6, 4  ;;  %v2467_v18 = vor.u32 %v2466_v8, %v2463_v7  ;;  %v247_v19 = vrot.slane %v246_v9, 4  ;;  %v8874_v5 = vld [vmem:[%s12261_s0 + $0x9c] sm:$0xff]  ;;  %v8842_v9 = vld [vmem:[%s12261_s0 + $0x90] sm:$0xff] }
  0x3b   :  { %v257_v20 = vrot.slane %v256_v10, 4  ;;  %v261_v21 = vrot.slane %v259_v11, 5  ;;  %v3178_v22 = vpack.c.b16 %v3119_v14, %v3118_v13  ;;  %v2480_v27 = vshll.u32 %v8016_v17, 16  ;;  %v33_v10 = vld [vmem:[%s12261_s0 + $0xa8] sm:$0xf] }
  0x3c   :  { %v2477_v26 = vor.u32 %v2476_v16, %v2472_v15  ;;  %v2468_v29 = vrot.slane %v2467_v18, 4  ;;  %v252_v30 = vsel %vm9045_vm4, %v247_v19, %v251_v62  ;;  %v273_v34 = vshll.u32 %v32_v28, 16  ;;  %v34_v11 = vld [vmem:[%s12261_s0 + $0xac] sm:$0xf] }
  0x3d   :  { %v262_v31 = vsel %vm9045_vm4, %v257_v20, %v261_v21  ;;  %v2482_v40 = vrot.slane %v2480_v27, 5  ;;  %v899_v41 = vunpack.c.l.b16 %v252_v30  ;;  %v2494_v46 = vshll.u32 %v8018_v37, 16  ;;  %v8020_v21 = vld [vmem:[%s12261_s0 + $0xb4] sm:$0xf] }
  0x3e   :  { %v2478_v39 = vrot.slane %v2477_v26, 4  ;;  %v2473_v43 = vsel %vm9045_vm4, %v2468_v29, %v2472_v15  ;;  %v2498_v47 = vshrl.u32 %v8018_v37, 16  ;;  %v275_v50 = vrot.slane %v273_v34, 5 }
  0x3f   :  { %v3120_v55 = vunpack.c.l.b16 %v2473_v43  ;;  %v2496_v58 = vrot.slane %v2494_v46, 5  ;;  %v283_v63 = vshll.u32 %v90_v53, 16  ;;  %v2504_v3 = vshll.u32 %v8019_v0, 16  ;;  %v36_v53 = vld [vmem:[%s12261_s0 + $0xc4] sm:$0xf] }
  0x40   :  { %v2483_v52 = vsel %vm9045_vm4, %v2478_v39, %v2482_v40  ;;  %v2500_v59 = vrot.slane %v2498_v47, 4  ;;  %v288_v17 = vshrl.u32 %v33_v10, 16  ;;  %v291_v18 = vshll.u32 %v33_v10, 16  ;;  %v8022_v47 = vld [vmem:[%s12261_s0 + $0xbc] sm:$0x1] }
  0x41   :  { %v3121_v60 = vunpack.c.l.b16 %v2483_v52  ;;  %v285_v8 = vrot.slane %v283_v63, 5  ;;  %v2506_v14 = vrot.slane %v2504_v3, 5  ;;  %v297_v19 = vshll.u32 %v34_v11, 16  ;;  %v35_v52 = vld [vmem:[%s12261_s0 + $0xc0] sm:$0xf] }
  0x42   :  { %7585 = vmatmul.msk.bf16.gmra.mxu0 %vm985_vm3, %v956_v24  ;;  %v31_v24 = vld [vmem:[%s12261_s0 + $0x90] sm:$0xf]  ;;  %v2501_v2 = vor.u32 %v2500_v59, %v2496_v58  ;;  %v301_v20 = vshrl.u32 %v34_v11, 16  ;;  %v290_v27 = vrot.slane %v288_v17, 4  ;;  %v2509_v29 = vshrl.u32 %v8020_v21, 16 }
  0x43   :  { %v264_v32 = vshrl.u32 %v31_v24, 16  ;;  %v267_v33 = vshll.u32 %v31_v24, 16  ;;  %v3179_v4 = vpack.c.b16 %v3121_v60, %v3120_v55  ;;  %v2512_v30 = vshll.u32 %v8020_v21, 16  ;;  %v8023_v59 = vld [vmem:[%s12261_s0 + $0xcc] sm:$0xf] }
  0x44   :  { %v2502_v13 = vrot.slane %v2501_v2, 4  ;;  %v312_v60 = vshrl.u32 %v35_v52, 16  ;;  %v325_v63 = vshrl.u32 %v36_v53, 16  ;;  %v8024_v0 = vld [vmem:[%s12261_s0 + $0xd0] sm:$0xf] }
  0x45   :  { %v266_v48 = vrot.slane %v264_v32, 4  ;;  %v269_v49 = vrot.slane %v267_v33, 5  ;;  %v299_v32 = vrot.slane %v297_v19, 5  ;;  %v303_v33 = vrot.slane %v301_v20, 4 }
  0x46   :  { %8099 = vmatmul.msk.bf16.gmra.mxu3 %vm985_vm3, %v3177_v36  ;;  %7971 = vmatmul.msk.bf16.gmra.mxu2 %vm985_vm3, %v8872_v35  ;;  %v277_v35 = vshrl.u32 %v32_v28, 16  ;;  %v8017_v36 = vld [vmem:[%s12261_s0 + $0x9c] sm:$0xf]  ;;  %v2507_v26 = vsel %vm9045_vm4, %v2502_v13, %v2506_v14  ;;  %v293_v28 = vrot.slane %v291_v18, 5  ;;  %v314_v10 = vrot.slane %v312_v60, 4 }
  0x47   :  { %7746 = vmatmul.msk.bf16.gmra.mxu1 %vm985_vm3, %v8840_v42  ;;  %v900_v42 = vunpack.c.l.b16 %v262_v31  ;;  %v2485_v44 = vshrl.u32 %v8017_v36, 16  ;;  %v2488_v45 = vshll.u32 %v8017_v36, 16  ;;  %v270_v61 = vor.u32 %v269_v49, %v266_v48  ;;  %v91_v31 = vld [vmem:[%s12261_s0 + $0xb0] sm:$0x1]  ;;  %v8875_v49 = vld [vmem:[%s12261_s0 + $0xb4] sm:$0xff] }
  0x48   :  { %v279_v51 = vrot.slane %v277_v35, 4  ;;  %v3123_v39 = vunpack.c.l.b16 %v2507_v26  ;;  %v307_v40 = vshll.u32 %v91_v31, 16  ;;  %v294_v43 = vor.u32 %v293_v28, %v290_v27  ;;  %v8025_v26 = vld [vmem:[%s12261_s0 + $0xd4] sm:$0x1] }
  0x49   :  { %v958_v54 = vpack.c.b16 %v900_v42, %v899_v41  ;;  %v2487_v56 = vrot.slane %v2485_v44, 4  ;;  %v2490_v57 = vrot.slane %v2488_v45, 5  ;;  %v271_v6 = vrot.slane %v270_v61, 4 }
  0x4a   :  { %v280_v62 = vor.u32 %v279_v51, %v275_v50  ;;  %v2511_v41 = vrot.slane %v2509_v29, 4  ;;  %v2514_v42 = vrot.slane %v2512_v30, 5  ;;  %v304_v44 = vor.u32 %v303_v33, %v299_v32 }
  0x4b   :  { %v2491_v1 = vor.u32 %v2490_v57, %v2487_v56  ;;  %v276_v15 = vsel %vm9045_vm4, %v271_v6, %v275_v50  ;;  %v309_v50 = vrot.slane %v307_v40, 5  ;;  %v295_v55 = vrot.slane %v294_v43, 4 }
  0x4c   :  { %v281_v7 = vrot.slane %v280_v62, 4  ;;  %v2515_v51 = vor.u32 %v2514_v42, %v2511_v41  ;;  %v305_v56 = vrot.slane %v304_v44, 4  ;;  %v315_v61 = vshll.u32 %v35_v52, 16  ;;  %v8844_v41 = vld [vmem:[%s12261_s0 + $0xc0] sm:$0xff]  ;;  %v38_v42 = vld [vmem:[%s12261_s0 + $0xdc] sm:$0xf] }
  0x4d   :  { %v321_v62 = vshll.u32 %v36_v53, 16  ;;  %v300_v2 = vsel %vm9045_vm4, %v295_v55, %v299_v32  ;;  %v2533_v6 = vshrl.u32 %v8023_v59, 16  ;;  %v327_v13 = vrot.slane %v325_v63, 4  ;;  %v8026_v52 = vld [vmem:[%s12261_s0 + $0xe4] sm:$0xf] }
  0x4e   :  { %v286_v16 = vsel %vm9045_vm4, %v281_v7, %v285_v8  ;;  %v310_v3 = vsel %vm9045_vm4, %v305_v56, %v309_v50  ;;  %v2536_v7 = vshll.u32 %v8023_v59, 16  ;;  %v2542_v8 = vshll.u32 %v8024_v0, 16  ;;  %v8027_v53 = vld [vmem:[%s12261_s0 + $0xe8] sm:$0xf] }
  0x4f   :  { %v902_v24 = vunpack.c.l.b16 %v286_v16  ;;  %v317_v11 = vrot.slane %v315_v61, 5  ;;  %v903_v14 = vunpack.c.l.b16 %v300_v2  ;;  %v92_v16 = vld [vmem:[%s12261_s0 + $0xc8] sm:$0x1]  ;;  %v2535_v19 = vrot.slane %v2533_v6, 4 }
  0x50   :  { %v2538_v20 = vrot.slane %v2536_v7, 5  ;;  %v2544_v21 = vrot.slane %v2542_v8, 5  ;;  %v2552_v32 = vshll.u32 %v8025_v26, 16  ;;  %v345_v50 = vshll.u32 %v38_v42, 16  ;;  %v8877_v26 = vld [vmem:[%s12261_s0 + $0xe4] sm:$0xff] }
  0x51   :  { %v2557_v61 = vshrl.u32 %v8026_v52, 16  ;;  %v2570_v2 = vshrl.u32 %v8027_v53, 16 }
  0x52   :  { %7586 = vmatmul.msk.bf16.gmra.mxu0 %vm985_vm3, %v957_v12  ;;  %v2492_v12 = vrot.slane %v2491_v1, 4  ;;  %v2516_v1 = vrot.slane %v2515_v51, 4  ;;  %v2539_v30 = vor.u32 %v2538_v20, %v2535_v19  ;;  %v349_v51 = vshrl.u32 %v38_v42, 16 }
  0x53   :  { %v347_v63 = vrot.slane %v345_v50, 5 }
  0x54   :  { %v2540_v43 = vrot.slane %v2539_v30, 4  ;;  %v8845_v30 = vld [vmem:[%s12261_s0 + $0xd8] sm:$0xff] }
  0x56   :  { %8100 = vmatmul.msk.bf16.gmra.mxu3 %vm985_vm3, %v3178_v22  ;;  %7972 = vmatmul.msk.bf16.gmra.mxu2 %vm985_vm3, %v8873_v23  ;;  %v8021_v22 = vld [vmem:[%s12261_s0 + $0xb8] sm:$0xf]  ;;  %v901_v23 = vunpack.c.l.b16 %v276_v15  ;;  %v904_v15 = vunpack.c.l.b16 %v310_v3  ;;  %v2545_v56 = vsel %vm9045_vm4, %v2540_v43, %v2544_v21 }
  0x57   :  { %7747 = vmatmul.msk.bf16.gmra.mxu1 %vm985_vm3, %v8841_v25  ;;  %v2497_v25 = vsel %vm9045_vm4, %v2492_v12, %v2496_v58  ;;  %v2518_v34 = vshll.u32 %v8021_v22, 16  ;;  %v2522_v35 = vshrl.u32 %v8021_v22, 16  ;;  %v2528_v58 = vshll.u32 %v8022_v47, 16 }
  0x58   :  { %v959_v36 = vpack.c.b16 %v902_v24, %v901_v23  ;;  %v3122_v37 = vunpack.c.l.b16 %v2497_v25  ;;  %v323_v12 = vrot.slane %v321_v62, 5  ;;  %v318_v23 = vor.u32 %v317_v11, %v314_v10 }
  0x59   :  { %v2520_v45 = vrot.slane %v2518_v34, 5  ;;  %v2524_v46 = vrot.slane %v2522_v35, 4  ;;  %v331_v25 = vshll.u32 %v92_v16, 16  ;;  %v960_v27 = vpack.c.b16 %v904_v15, %v903_v14 }
  0x5a   :  { %v3180_v48 = vpack.c.b16 %v3123_v39, %v3122_v37  ;;  %v328_v24 = vor.u32 %v327_v13, %v323_v12  ;;  %v319_v33 = vrot.slane %v318_v23, 4  ;;  %v8876_v37 = vld [vmem:[%s12261_s0 + $0xcc] sm:$0xff]  ;;  %v37_v39 = vld [vmem:[%s12261_s0 + $0xd8] sm:$0xf]  ;;  %v2560_v62 = vshll.u32 %v8026_v52, 16 }
  0x5b   :  { %v2525_v57 = vor.u32 %v2524_v46, %v2520_v45  ;;  %v2521_v17 = vsel %vm9045_vm4, %v2516_v1, %v2520_v45  ;;  %v333_v35 = vrot.slane %v331_v25, 5  ;;  %v2554_v45 = vrot.slane %v2552_v32, 5  ;;  %v8028_v13 = vld [vmem:[%s12261_s0 + $0xec] sm:$0x1] }
  0x5c   :  { %v3124_v28 = vunpack.c.l.b16 %v2521_v17  ;;  %v329_v34 = vrot.slane %v328_v24, 4  ;;  %v324_v46 = vsel %vm9045_vm4, %v319_v33, %v323_v12  ;;  %v2566_v1 = vshll.u32 %v8027_v53, 16  ;;  %v40_v24 = vld [vmem:[%s12261_s0 + $0xf4] sm:$0xf]  ;;  %v8029_v33 = vld [vmem:[%s12261_s0 + $0xfc] sm:$0xf] }
  0x5d   :  { %v3126_v6 = vunpack.c.l.b16 %v2545_v56  ;;  %v2562_v10 = vrot.slane %v2560_v62, 5  ;;  %v2572_v15 = vrot.slane %v2570_v2, 4  ;;  %v2576_v23 = vshll.u32 %v8028_v13, 16 }
  0x5e   :  { %v334_v47 = vsel %vm9045_vm4, %v329_v34, %v333_v35  ;;  %v2568_v14 = vrot.slane %v2566_v1, 5  ;;  %v369_v35 = vshll.u32 %v40_v24, 16 }
  0x5f   :  { %v906_v55 = vunpack.c.l.b16 %v334_v47 }
  0x62   :  { %7587 = vmatmul.msk.bf16.gmra.mxu0 %vm985_vm3, %v958_v54  ;;  %v8843_v54 = vld [vmem:[%s12261_s0 + $0xa8] sm:$0xff] }
  0x66   :  { %8101 = vmatmul.msk.bf16.gmra.mxu3 %vm985_vm3, %v3179_v4  ;;  %7973 = vmatmul.msk.bf16.gmra.mxu2 %vm985_vm3, %v8874_v5  ;;  %v2526_v4 = vrot.slane %v2525_v57, 4  ;;  %v2530_v5 = vrot.slane %v2528_v58, 5 }
  0x67   :  { %7748 = vmatmul.msk.bf16.gmra.mxu1 %vm985_vm3, %v8842_v9  ;;  %v2546_v9 = vshrl.u32 %v8024_v0, 16  ;;  %v351_v0 = vrot.slane %v349_v51, 4  ;;  %v371_v51 = vrot.slane %v369_v35, 5 }
  0x68   :  { %v2531_v18 = vsel %vm9045_vm4, %v2526_v4, %v2530_v5  ;;  %v93_v4 = vld [vmem:[%s12261_s0 + $0xe0] sm:$0x1] }
  0x69   :  { %v2548_v22 = vrot.slane %v2546_v9, 4  ;;  %v3125_v29 = vunpack.c.l.b16 %v2531_v18  ;;  %v2559_v9 = vrot.slane %v2557_v61, 4  ;;  %v352_v11 = vor.u32 %v351_v0, %v347_v63  ;;  %v39_v18 = vld [vmem:[%s12261_s0 + $0xf0] sm:$0xf] }
  0x6a   :  { %v355_v12 = vshll.u32 %v93_v4, 16  ;;  %v363_v32 = vshll.u32 %v39_v18, 16 }
  0x6b   :  { %v2549_v31 = vor.u32 %v2548_v22, %v2544_v21  ;;  %v2563_v22 = vor.u32 %v2562_v10, %v2559_v9 }
  0x6c   :  { %v365_v47 = vrot.slane %v363_v32, 5 }
  0x6d   :  { %v2550_v44 = vrot.slane %v2549_v31, 4  ;;  %v360_v31 = vshrl.u32 %v39_v18, 16 }
  0x6f   :  { %v2555_v57 = vsel %vm9045_vm4, %v2550_v44, %v2554_v45  ;;  %v2581_v44 = vshrl.u32 %v8029_v33, 16 }
  0x70   :  { %v3127_v7 = vunpack.c.l.b16 %v2555_v57  ;;  %v94_v57 = vld [vmem:[%s12261_s0 + $0xf8] sm:$0x1] }
  0x71   :  { %v2583_v0 = vrot.slane %v2581_v44, 4  ;;  %v379_v4 = vshll.u32 %v94_v57, 16  ;;  %v8033_v44 = vld [vmem:[%s12261_s0 + $0x118] sm:$0xf] }
  0x72   :  { %7588 = vmatmul.msk.bf16.gmra.mxu0 %vm985_vm3, %v959_v36  ;;  %v3181_v36 = vpack.c.b16 %v3125_v29, %v3124_v28  ;;  %v3182_v19 = vpack.c.b16 %v3127_v7, %v3126_v6  ;;  %v357_v28 = vrot.slane %v355_v12, 5  ;;  %v2573_v29 = vor.u32 %v2572_v15, %v2568_v14 }
  0x73   :  { %v2614_v57 = vshll.u32 %v8033_v44, 16 }
  0x74   :  { %v2574_v43 = vrot.slane %v2573_v29, 4 }
  0x76   :  { %8102 = vmatmul.msk.bf16.gmra.mxu3 %vm985_vm3, %v3180_v48  ;;  %7974 = vmatmul.msk.bf16.gmra.mxu2 %vm985_vm3, %v8875_v49  ;;  %v336_v48 = vshrl.u32 %v37_v39, 16  ;;  %v339_v49 = vshll.u32 %v37_v39, 16  ;;  %v2564_v39 = vrot.slane %v2563_v22, 4 }
  0x77   :  { %7749 = vmatmul.msk.bf16.gmra.mxu1 %vm985_vm3, %v8843_v54  ;;  %v905_v54 = vunpack.c.l.b16 %v324_v46  ;;  %v362_v46 = vrot.slane %v360_v31, 4 }
  0x78   :  { %v338_v59 = vrot.slane %v336_v48, 4  ;;  %v341_v60 = vrot.slane %v339_v49, 5  ;;  %v2584_v48 = vshll.u32 %v8029_v33, 16  ;;  %v2569_v61 = vsel %vm9045_vm4, %v2564_v39, %v2568_v14  ;;  %v8032_v39 = vld [vmem:[%s12261_s0 + $0x114] sm:$0xf] }
  0x79   :  { %v961_v5 = vpack.c.b16 %v906_v55, %v905_v54  ;;  %v3128_v9 = vunpack.c.l.b16 %v2569_v61 }
  0x7a   :  { %v342_v8 = vor.u32 %v341_v60, %v338_v59  ;;  %v2586_v1 = vrot.slane %v2584_v48, 5  ;;  %v2608_v48 = vshll.u32 %v8032_v39, 16 }
  0x7c   :  { %v343_v21 = vrot.slane %v342_v8, 4  ;;  %v2587_v13 = vor.u32 %v2586_v1, %v2583_v0 }
  0x82   :  { %7589 = vmatmul.msk.bf16.gmra.mxu0 %vm985_vm3, %v960_v27  ;;  %v353_v27 = vrot.slane %v352_v11, 4 }
  0x83   :  { %v1523_v40 = vpop.f32.mrf.mxu1 }
  0x84   :  { %v358_v42 = vsel %vm9045_vm4, %v353_v27, %v357_v28  ;;  %v8846_v27 = vld [vmem:[%s12261_s0 + $0xf0] sm:$0xff]  ;;  %v2588_v28 = vrot.slane %v2587_v13, 4  ;;  %v44_v13 = vld [vmem:[%s12261_s0 + $0x124] sm:$0xf] }
  0x85   :  { %v908_v60 = vunpack.c.l.b16 %v358_v42 }
  0x86   :  { %8103 = vmatmul.msk.bf16.gmra.mxu3 %vm985_vm3, %v3181_v36  ;;  %7975 = vmatmul.msk.bf16.gmra.mxu2 %vm985_vm3, %v8876_v37  ;;  %v373_v36 = vshrl.u32 %v40_v24, 16  ;;  %v8030_v37 = vld [vmem:[%s12261_s0 + $0x100] sm:$0xf] }
  0x87   :  { %7750 = vmatmul.msk.bf16.gmra.mxu1 %vm985_vm3, %v8844_v41  ;;  %v348_v41 = vsel %vm9045_vm4, %v343_v21, %v347_v63  ;;  %v2590_v49 = vshll.u32 %v8030_v37, 16  ;;  %v2594_v53 = vshrl.u32 %v8030_v37, 16  ;;  %v366_v63 = vor.u32 %v365_v47, %v362_v46  ;;  %v8878_v24 = vld [vmem:[%s12261_s0 + $0xfc] sm:$0xff] }
  0x88   :  { %v375_v52 = vrot.slane %v373_v36, 4  ;;  %v907_v56 = vunpack.c.l.b16 %v348_v41  ;;  %v2605_v47 = vshrl.u32 %v8032_v39, 16 }
  0x89   :  { %v2020_v58 = vpop.f32.mrf.mxu2  ;;  %v2592_v6 = vrot.slane %v2590_v49, 5  ;;  %v2596_v7 = vrot.slane %v2594_v53, 4  ;;  %v367_v12 = vrot.slane %v366_v63, 4 }
  0x8a   :  { %v962_v8 = vpack.c.b16 %v908_v60, %v907_v56  ;;  %v95_v60 = vld [vmem:[%s12261_s0 + $0x110] sm:$0x1] }
  0x8b   :  { %v1525_v3 = vpop.f32.mrf.mxu1  ;;  %v2597_v18 = vor.u32 %v2596_v7, %v2592_v6  ;;  %v9447_v7 = vrot.slane %v2614_v57, 5 }
  0x8d   :  { %v2598_v32 = vrot.slane %v2597_v18, 4 }
  0x8f   :  { %v1095_v16 = vpop.f32.mrf.mxu0 }
  0x90   :  { %v1524_v17 = vadd.f32 %v1523_v40, %v1095_v16  ;;  %v2578_v40 = vrot.slane %v2576_v23, 5 }
  0x91   :  { %v2022_v20 = vpop.f32.mrf.mxu2 }
  0x92   :  { %7590 = vmatmul.msk.bf16.gmra.mxu0 %vm985_vm3, %v961_v5  ;;  %v2180_v25 = vadd.f32 %v2020_v58, %v1524_v17  ;;  %v2579_v62 = vsel %vm9045_vm4, %v2574_v43, %v2578_v40  ;;  %v8031_v5 = vld [vmem:[%s12261_s0 + $0x104] sm:$0x1]  ;;  %v381_v17 = vrot.slane %v379_v4, 5  ;;  %v2593_v43 = vsel %vm9045_vm4, %v2588_v28, %v2592_v6  ;;  %v8034_v6 = vld [vmem:[%s12261_s0 + $0x11c] sm:$0x1] }
  0x93   :  { %v3129_v10 = vunpack.c.l.b16 %v2579_v62  ;;  %v2600_v14 = vshll.u32 %v8031_v5, 16  ;;  %v3130_v62 = vunpack.c.l.b16 %v2593_v43  ;;  %v403_v5 = vshll.u32 %v95_v60, 16 }
  0x94   :  { %v1528_v34 = vpop.f32.mrf.mxu1 }
  0x95   :  { %v3183_v22 = vpack.c.b16 %v3129_v10, %v3128_v9  ;;  %v2602_v33 = vrot.slane %v2600_v14, 5 }
  0x96   :  { %8104 = vmatmul.msk.bf16.gmra.mxu3 %vm985_vm3, %v3182_v19  ;;  %7976 = vmatmul.msk.bf16.gmra.mxu2 %vm985_vm3, %v8877_v26  ;;  %v42_v26 = vld [vmem:[%s12261_s0 + $0x10c] sm:$0xf] }
  0x97   :  { %v1097_v45 = vpop.f32.mrf.mxu0  ;;  %7751 = vmatmul.msk.bf16.gmra.mxu1 %vm985_vm3, %v8845_v30  ;;  %v372_v30 = vsel %vm9045_vm4, %v367_v12, %v371_v51  ;;  %v393_v36 = vshll.u32 %v42_v26, 16  ;;  %v397_v37 = vshrl.u32 %v42_v26, 16  ;;  %v2603_v46 = vsel %vm9045_vm4, %v2598_v32, %v2602_v33  ;;  %v43_v12 = vld [vmem:[%s12261_s0 + $0x120] sm:$0xf]  ;;  %v8847_v26 = vld [vmem:[%s12261_s0 + $0x108] sm:$0xff] }
  0x98   :  { %v1526_v50 = vadd.f32 %v1525_v3, %v1097_v45  ;;  %v376_v3 = vor.u32 %v375_v52, %v371_v51  ;;  %v909_v41 = vunpack.c.l.b16 %v372_v30  ;;  %v3131_v63 = vunpack.c.l.b16 %v2603_v46  ;;  %v8035_v30 = vld [vmem:[%s12261_s0 + $0x12c] sm:$0xf] }
  0x99   :  { %v3314_v54 = vpop.f32.mrf.mxu3  ;;  %v2025_v55 = vpop.f32.mrf.mxu2  ;;  %v9436_v53 = vrot.slane %v393_v36, 5  ;;  %v411_v28 = vshll.u32 %v43_v12, 16  ;;  %v421_v32 = vshrl.u32 %v44_v13, 16 }
  0x9a   :  { %v9395_v58 = vadd.f32 %v3314_v54, %v2180_v25  ;;  %v2181_v59 = vadd.f32 %v2022_v20, %v1526_v50  ;;  %v377_v16 = vrot.slane %v376_v3, 4  ;;  %v41_v25 = vld [vmem:[%s12261_s0 + $0x108] sm:$0xf]  ;;  %v399_v54 = vrot.slane %v397_v37, 4 }
  0x9b   :  { %v387_v35 = vshll.u32 %v41_v25, 16  ;;  %v2610_v3 = vrot.slane %v2608_v48, 5  ;;  %v413_v43 = vrot.slane %v411_v28, 5 }
  0x9c   :  { %v1530_v2 = vpop.f32.mrf.mxu1  ;;  %v382_v31 = vsel %vm9045_vm4, %v377_v16, %v381_v17  ;;  %v400_v1 = vor.u32 %v399_v54, %v9436_v53 }
  0x9d   :  { %v910_v42 = vunpack.c.l.b16 %v382_v31  ;;  %v389_v52 = vrot.slane %v387_v35, 5  ;;  %v8036_v35 = vld [vmem:[%s12261_s0 + $0x130] sm:$0xf] }
  0x9e   :  { %v401_v17 = vrot.slane %v400_v1, 4  ;;  %v2638_v48 = vshll.u32 %v8036_v35, 16 }
  0x9f   :  { %v1100_v11 = vpop.f32.mrf.mxu0  ;;  %v963_v4 = vpack.c.b16 %v910_v42, %v909_v41 }
  0xa0   :  { %v1529_v15 = vadd.f32 %v1528_v34, %v1100_v11  ;;  %v384_v34 = vshrl.u32 %v41_v25, 16  ;;  %v3184_v11 = vpack.c.b16 %v3131_v63, %v3130_v62 }
  0xa1   :  { %v3316_v19 = vpop.f32.mrf.mxu3  ;;  %v2027_v20 = vpop.f32.mrf.mxu2 }
  0xa2   :  { %v9404_v21 = vadd.f32 %v3316_v19, %v2181_v59  ;;  %7591 = vmatmul.msk.bf16.gmra.mxu0 %vm985_vm3, %v962_v8  ;;  %v2182_v23 = vadd.f32 %v2025_v55, %v1529_v15  ;;  %v386_v51 = vrot.slane %v384_v34, 4  ;;  %v2618_v59 = vshrl.u32 %v8033_v44, 16 }
  0xa3   :  { %v2624_v19 = vshll.u32 %v8034_v6, 16 }
  0xa4   :  { %v1533_v29 = vpop.f32.mrf.mxu1  ;;  %v390_v0 = vor.u32 %v389_v52, %v386_v51  ;;  %v2620_v8 = vrot.slane %v2618_v59, 4 }
  0xa5   :  { %v2626_v34 = vrot.slane %v2624_v19, 5  ;;  %v45_v19 = vld [vmem:[%s12261_s0 + $0x138] sm:$0xf] }
  0xa6   :  { %8105 = vmatmul.msk.bf16.gmra.mxu3 %vm985_vm3, %v3183_v22  ;;  %7977 = vmatmul.msk.bf16.gmra.mxu2 %vm985_vm3, %v8878_v24  ;;  %v391_v16 = vrot.slane %v390_v0, 4  ;;  %v405_v24 = vrot.slane %v403_v5, 5  ;;  %v2621_v25 = vor.u32 %v2620_v8, %v9447_v7 }
  0xa7   :  { %v1102_v40 = vpop.f32.mrf.mxu0  ;;  %7752 = vmatmul.msk.bf16.gmra.mxu1 %vm985_vm3, %v8846_v27  ;;  %v408_v27 = vshrl.u32 %v43_v12, 16 }
  0xa8   :  { %v1531_v45 = vadd.f32 %v1530_v2, %v1102_v40  ;;  %v2607_v2 = vrot.slane %v2605_v47, 4  ;;  %v396_v36 = vsel %vm9045_vm4, %v391_v16, %v9436_v53  ;;  %v406_v37 = vsel %vm9045_vm4, %v401_v17, %v405_v24  ;;  %v96_v53 = vld [vmem:[%s12261_s0 + $0x128] sm:$0x1] }
  0xa9   :  { %v3319_v49 = vpop.f32.mrf.mxu3  ;;  %v2030_v50 = vpop.f32.mrf.mxu2  ;;  %v2622_v39 = vrot.slane %v2621_v25, 4  ;;  %v2629_v40 = vshrl.u32 %v8035_v30, 16  ;;  %v410_v42 = vrot.slane %v408_v27, 4  ;;  %v423_v47 = vrot.slane %v421_v32, 4  ;;  %v8880_v25 = vld [vmem:[%s12261_s0 + $0x12c] sm:$0xff]  ;;  %v8848_v27 = vld [vmem:[%s12261_s0 + $0x120] sm:$0xff] }
  0xaa   :  { %v9438_v55 = vadd.f32 %v3319_v49, %v2182_v23  ;;  %v2183_v56 = vadd.f32 %v2027_v20, %v1531_v45  ;;  %v2611_v18 = vor.u32 %v2610_v3, %v2607_v2  ;;  %v8879_v23 = vld [vmem:[%s12261_s0 + $0x114] sm:$0xff]  ;;  %v2632_v45 = vshll.u32 %v8035_v30, 16 }
  0xab   :  { %v2642_v49 = vshrl.u32 %v8036_v35, 16  ;;  %v911_v52 = vunpack.c.l.b16 %v396_v36  ;;  %v912_v57 = vunpack.c.l.b16 %v406_v37  ;;  %v2627_v60 = vsel %vm9045_vm4, %v2622_v39, %v2626_v34  ;;  %v8037_v3 = vld [vmem:[%s12261_s0 + $0x134] sm:$0x1]  ;;  %v8038_v39 = vld [vmem:[%s12261_s0 + $0x144] sm:$0xf] }
  0xac   :  { %v1535_v61 = vpop.f32.mrf.mxu1  ;;  %v2612_v33 = vrot.slane %v2611_v18, 4  ;;  %v2631_v62 = vrot.slane %v2629_v40, 4  ;;  %v2634_v63 = vrot.slane %v2632_v45, 5  ;;  %v427_v2 = vshll.u32 %v96_v53, 16 }
  0xad   :  { %v2644_v5 = vrot.slane %v2642_v49, 4  ;;  %v964_v6 = vpack.c.b16 %v912_v57, %v911_v52  ;;  %v2648_v12 = vshll.u32 %v8037_v3, 16  ;;  %v432_v34 = vshrl.u32 %v45_v19, 16 }
  0xae   :  { %v2617_v59 = vsel %vm9045_vm4, %v2612_v33, %v9447_v7  ;;  %v435_v35 = vshll.u32 %v45_v19, 16 }
  0xaf   :  { %v1105_v9 = vpop.f32.mrf.mxu0  ;;  %v3132_v8 = vunpack.c.l.b16 %v2617_v59 }
  0xb0   :  { %v1534_v10 = vadd.f32 %v1533_v29, %v1105_v9  ;;  %v417_v29 = vshll.u32 %v44_v13, 16  ;;  %v3133_v9 = vunpack.c.l.b16 %v2627_v60  ;;  %v97_v60 = vld [vmem:[%s12261_s0 + $0x140] sm:$0x1] }
  0xb1   :  { %v3321_v14 = vpop.f32.mrf.mxu3  ;;  %v2032_v15 = vpop.f32.mrf.mxu2 }
  0xb2   :  { %v9455_v20 = vadd.f32 %v3321_v14, %v2183_v56  ;;  %7592 = vmatmul.msk.bf16.gmra.mxu0 %vm985_vm3, %v963_v4  ;;  %v2184_v22 = vadd.f32 %v2030_v50, %v1534_v10  ;;  %v419_v44 = vrot.slane %v417_v29, 5  ;;  %v2640_v4 = vrot.slane %v2638_v48, 5 }
  0xb3   :  { %v2650_v29 = vrot.slane %v2648_v12, 5  ;;  %v2653_v48 = vshrl.u32 %v8038_v39, 16 }
  0xb4   :  { %v1538_v31 = vpop.f32.mrf.mxu1  ;;  %v424_v1 = vor.u32 %v423_v47, %v419_v44  ;;  %v2645_v16 = vor.u32 %v2644_v5, %v2640_v4  ;;  %v434_v47 = vrot.slane %v432_v34, 4  ;;  %v451_v5 = vshll.u32 %v97_v60, 16  ;;  %v8041_v34 = vld [vmem:[%s12261_s0 + $0x15c] sm:$0xf] }
  0xb6   :  { %8106 = vmatmul.msk.bf16.gmra.mxu3 %vm985_vm3, %v3184_v11  ;;  %7978 = vmatmul.msk.bf16.gmra.mxu2 %vm985_vm3, %v8879_v23  ;;  %v2635_v11 = vor.u32 %v2634_v63, %v2631_v62  ;;  %v425_v14 = vrot.slane %v424_v1, 4  ;;  %v3185_v23 = vpack.c.b16 %v3133_v9, %v3132_v8  ;;  %v2646_v33 = vrot.slane %v2645_v16, 4 }
  0xb7   :  { %v1107_v41 = vpop.f32.mrf.mxu0  ;;  %7753 = vmatmul.msk.bf16.gmra.mxu1 %vm985_vm3, %v8847_v26  ;;  %v46_v26 = vld [vmem:[%s12261_s0 + $0x13c] sm:$0xf]  ;;  %v2655_v8 = vrot.slane %v2653_v48, 4 }
  0xb8   :  { %v1536_v46 = vadd.f32 %v1535_v61, %v1107_v41  ;;  %v414_v61 = vor.u32 %v413_v43, %v410_v42  ;;  %v2636_v28 = vrot.slane %v2635_v11, 4  ;;  %v441_v36 = vshll.u32 %v46_v26, 16 }
  0xb9   :  { %v3324_v50 = vpop.f32.mrf.mxu3  ;;  %v2035_v51 = vpop.f32.mrf.mxu2  ;;  %v445_v37 = vshrl.u32 %v46_v26, 16 }
  0xba   :  { %v9482_v54 = vadd.f32 %v3324_v50, %v2184_v22  ;;  %v2185_v56 = vadd.f32 %v2032_v15, %v1536_v46  ;;  %v415_v7 = vrot.slane %v414_v61, 4  ;;  %v429_v15 = vrot.slane %v427_v2, 5 }
  0xbb   :  { %v2641_v43 = vsel %vm9045_vm4, %v2636_v28, %v2640_v4  ;;  %v2651_v46 = vsel %vm9045_vm4, %v2646_v33, %v2650_v29  ;;  %v9524_v52 = vrot.slane %v441_v36, 5  ;;  %v447_v53 = vrot.slane %v445_v37, 4 }
  0xbc   :  { %v1540_v0 = vpop.f32.mrf.mxu1  ;;  %v430_v32 = vsel %vm9045_vm4, %v425_v14, %v429_v15  ;;  %v3135_v1 = vunpack.c.l.b16 %v2651_v46  ;;  %v47_v14 = vld [vmem:[%s12261_s0 + $0x150] sm:$0xf]  ;;  %v48_v15 = vld [vmem:[%s12261_s0 + $0x154] sm:$0xf] }
  0xbd   :  { %v914_v42 = vunpack.c.l.b16 %v430_v32  ;;  %v448_v4 = vor.u32 %v447_v53, %v9524_v52  ;;  %v459_v32 = vshll.u32 %v47_v14, 16  ;;  %v465_v33 = vshll.u32 %v48_v15, 16 }
  0xbe   :  { %v469_v36 = vshrl.u32 %v48_v15, 16 }
  0xbf   :  { %v1110_v10 = vpop.f32.mrf.mxu0  ;;  %v449_v19 = vrot.slane %v448_v4, 4  ;;  %v467_v48 = vrot.slane %v465_v33, 5  ;;  %v8882_v33 = vld [vmem:[%s12261_s0 + $0x15c] sm:$0xff] }
  0xc0   :  { %v1539_v13 = vadd.f32 %v1538_v31, %v1110_v10  ;;  %v420_v31 = vsel %vm9045_vm4, %v415_v7, %v419_v44  ;;  %v8039_v44 = vld [vmem:[%s12261_s0 + $0x148] sm:$0xf] }
  0xc1   :  { %v3326_v17 = vpop.f32.mrf.mxu3  ;;  %v2037_v18 = vpop.f32.mrf.mxu2  ;;  %v913_v41 = vunpack.c.l.b16 %v420_v31  ;;  %v2662_v61 = vshll.u32 %v8039_v44, 16  ;;  %v2666_v62 = vshrl.u32 %v8039_v44, 16  ;;  %v456_v31 = vshrl.u32 %v47_v14, 16 }
  0xc2   :  { %v9495_v22 = vadd.f32 %v3326_v17, %v2185_v56  ;;  %7593 = vmatmul.msk.bf16.gmra.mxu0 %vm985_vm3, %v964_v6  ;;  %v2186_v24 = vadd.f32 %v2035_v51, %v1539_v13  ;;  %v437_v51 = vrot.slane %v435_v35, 5  ;;  %v2656_v56 = vshll.u32 %v8038_v39, 16  ;;  %v8040_v6 = vld [vmem:[%s12261_s0 + $0x14c] sm:$0x1] }
  0xc3   :  { %v965_v2 = vpack.c.b16 %v914_v42, %v913_v41  ;;  %v9535_v10 = vrot.slane %v2662_v61, 5  ;;  %v2668_v7 = vrot.slane %v2666_v62, 4  ;;  %v2677_v44 = vshrl.u32 %v8041_v34, 16  ;;  %v98_v61 = vld [vmem:[%s12261_s0 + $0x158] sm:$0x1] }
  0xc4   :  { %v1543_v30 = vpop.f32.mrf.mxu1  ;;  %v438_v3 = vor.u32 %v437_v51, %v434_v47  ;;  %v2658_v9 = vrot.slane %v2656_v56, 5  ;;  %v458_v46 = vrot.slane %v456_v31, 4  ;;  %v461_v47 = vrot.slane %v459_v32, 5 }
  0xc5   :  { %v2669_v29 = vor.u32 %v2668_v7, %v9535_v10  ;;  %v471_v51 = vrot.slane %v469_v36, 4  ;;  %v2679_v4 = vrot.slane %v2677_v44, 4  ;;  %v8043_v7 = vld [vmem:[%s12261_s0 + $0x164] sm:$0x1] }
  0xc6   :  { %8107 = vmatmul.msk.bf16.gmra.mxu3 %vm985_vm3, %v3185_v23  ;;  %7979 = vmatmul.msk.bf16.gmra.mxu2 %vm985_vm3, %v8880_v25  ;;  %v453_v23 = vrot.slane %v451_v5, 5  ;;  %v2659_v28 = vor.u32 %v2658_v9, %v2655_v8  ;;  %v475_v9 = vshll.u32 %v98_v61, 16 }
  0xc7   :  { %v1112_v40 = vpop.f32.mrf.mxu0  ;;  %7754 = vmatmul.msk.bf16.gmra.mxu1 %vm985_vm3, %v8848_v27  ;;  %v8881_v27 = vld [vmem:[%s12261_s0 + $0x144] sm:$0xff]  ;;  %v472_v8 = vor.u32 %v471_v51, %v467_v48 }
  0xc8   :  { %v1541_v45 = vadd.f32 %v1540_v0, %v1112_v40  ;;  %v3134_v0 = vunpack.c.l.b16 %v2641_v43  ;;  %v8042_v40 = vld [vmem:[%s12261_s0 + $0x160] sm:$0xf]  ;;  %v454_v41 = vsel %vm9045_vm4, %v449_v19, %v453_v23  ;;  %v2660_v42 = vrot.slane %v2659_v28, 4 }
  0xc9   :  { %v3329_v49 = vpop.f32.mrf.mxu3  ;;  %v2040_v50 = vpop.f32.mrf.mxu2  ;;  %v2670_v43 = vrot.slane %v2669_v29, 4  ;;  %v2690_v53 = vshrl.u32 %v8042_v40, 16  ;;  %v473_v23 = vrot.slane %v472_v8, 4  ;;  %v49_v29 = vld [vmem:[%s12261_s0 + $0x168] sm:$0xf] }
  0xca   :  { %v9526_v57 = vadd.f32 %v3329_v49, %v2186_v24  ;;  %v2187_v59 = vadd.f32 %v2037_v18, %v1541_v45  ;;  %v3186_v13 = vpack.c.b16 %v3135_v1, %v3134_v0  ;;  %v439_v18 = vrot.slane %v438_v3, 4  ;;  %v99_v8 = vld [vmem:[%s12261_s0 + $0x170] sm:$0x1] }
  0xcb   :  { %v2672_v24 = vshll.u32 %v8040_v6, 16  ;;  %v2680_v49 = vshll.u32 %v8041_v34, 16  ;;  %v916_v1 = vunpack.c.l.b16 %v454_v41  ;;  %v462_v3 = vor.u32 %v461_v47, %v458_v46  ;;  %v50_v34 = vld [vmem:[%s12261_s0 + $0x16c] sm:$0xf]  ;;  %v8044_v47 = vld [vmem:[%s12261_s0 + $0x174] sm:$0xf] }
  0xcc   :  { %v1545_v63 = vpop.f32.mrf.mxu1  ;;  %v444_v37 = vsel %vm9045_vm4, %v439_v18, %v9524_v52  ;;  %v2686_v52 = vshll.u32 %v8042_v40, 16  ;;  %v2696_v18 = vshll.u32 %v8043_v7, 16  ;;  %v483_v44 = vshll.u32 %v49_v29, 16 }
  0xcd   :  { %v2674_v39 = vrot.slane %v2672_v24, 5  ;;  %v915_v60 = vunpack.c.l.b16 %v444_v37  ;;  %v2682_v5 = vrot.slane %v2680_v49, 5  ;;  %v477_v24 = vrot.slane %v475_v9, 5 }
  0xce   :  { %v2698_v37 = vrot.slane %v2696_v18, 5  ;;  %v493_v46 = vshrl.u32 %v50_v34, 16 }
  0xcf   :  { %v1115_v11 = vpop.f32.mrf.mxu0  ;;  %v478_v41 = vsel %vm9045_vm4, %v473_v23, %v477_v24 }
  0xd0   :  { %v1544_v12 = vadd.f32 %v1543_v30, %v1115_v11  ;;  %v8849_v30 = vld [vmem:[%s12261_s0 + $0x138] sm:$0xff]  ;;  %v2688_v11 = vrot.slane %v2686_v52, 5 }
  0xd1   :  { %v3331_v16 = vpop.f32.mrf.mxu3  ;;  %v2042_v17 = vpop.f32.mrf.mxu2  ;;  %v8045_v52 = vld [vmem:[%s12261_s0 + $0x178] sm:$0xf] }
  0xd2   :  { %v9543_v25 = vadd.f32 %v3331_v16, %v2187_v59  ;;  %7594 = vmatmul.msk.bf16.gmra.mxu0 %vm985_vm3, %v965_v2  ;;  %v2188_v26 = vadd.f32 %v2040_v50, %v1544_v12  ;;  %v2665_v2 = vsel %vm9045_vm4, %v2660_v42, %v9535_v10  ;;  %v2692_v12 = vrot.slane %v2690_v53, 4 }
  0xd3   :  { %v3136_v14 = vunpack.c.l.b16 %v2665_v2  ;;  %v463_v10 = vrot.slane %v462_v3, 4  ;;  %v2704_v3 = vshll.u32 %v8044_v47, 16  ;;  %v2714_v9 = vshrl.u32 %v8045_v52, 16 }
  0xd4   :  { %v1548_v35 = vpop.f32.mrf.mxu1 }
  0xd5   :  { %v468_v40 = vsel %vm9045_vm4, %v463_v10, %v467_v48  ;;  %v8046_v10 = vld [vmem:[%s12261_s0 + $0x17c] sm:$0x1]  ;;  %v2706_v18 = vrot.slane %v2704_v3, 5  ;;  %v2716_v23 = vrot.slane %v2714_v9, 4 }
  0xd6   :  { %8108 = vmatmul.msk.bf16.gmra.mxu3 %vm985_vm3, %v3186_v13  ;;  %7980 = vmatmul.msk.bf16.gmra.mxu2 %vm985_vm3, %v8881_v27  ;;  %v966_v13 = vpack.c.b16 %v916_v1, %v915_v60  ;;  %v917_v48 = vunpack.c.l.b16 %v468_v40  ;;  %v2701_v60 = vshrl.u32 %v8044_v47, 16  ;;  %v485_v1 = vrot.slane %v483_v44, 5  ;;  %v8883_v40 = vld [vmem:[%s12261_s0 + $0x174] sm:$0xff]  ;;  %v8047_v47 = vld [vmem:[%s12261_s0 + $0x1a4] sm:$0xf] }
  0xd7   :  { %v1117_v45 = vpop.f32.mrf.mxu0  ;;  %7755 = vmatmul.msk.bf16.gmra.mxu1 %vm985_vm3, %v8849_v30 }
  0xd8   :  { %v1546_v50 = vadd.f32 %v1545_v63, %v1117_v45  ;;  %v2675_v63 = vsel %vm9045_vm4, %v2670_v43, %v2674_v39  ;;  %v480_v43 = vshrl.u32 %v49_v29, 16  ;;  %v489_v45 = vshll.u32 %v50_v34, 16  ;;  %v52_v29 = vld [vmem:[%s12261_s0 + $0x19c] sm:$0xf] }
  0xd9   :  { %v3334_v56 = vpop.f32.mrf.mxu3  ;;  %v2045_v59 = vpop.f32.mrf.mxu2  ;;  %v3137_v15 = vunpack.c.l.b16 %v2675_v63  ;;  %v495_v63 = vrot.slane %v493_v46, 4  ;;  %v513_v46 = vshll.u32 %v52_v29, 16 }
  0xda   :  { %v9570_v62 = vadd.f32 %v3334_v56, %v2188_v26  ;;  %v2189_v0 = vadd.f32 %v2042_v17, %v1546_v50  ;;  %v2683_v17 = vor.u32 %v2682_v5, %v2679_v4  ;;  %v2693_v26 = vor.u32 %v2692_v12, %v2688_v11 }
  0xdb   :  { %v3187_v31 = vpack.c.b16 %v3137_v15, %v3136_v14  ;;  %v918_v50 = vunpack.c.l.b16 %v478_v41  ;;  %v9612_v2 = vrot.slane %v489_v45, 5 }
  0xdc   :  { %v1550_v6 = vpop.f32.mrf.mxu1  ;;  %v2684_v36 = vrot.slane %v2683_v17, 4  ;;  %v2694_v42 = vrot.slane %v2693_v26, 4  ;;  %v2703_v17 = vrot.slane %v2701_v60, 4  ;;  %v2725_v60 = vshrl.u32 %v8047_v47, 16 }
  0xdd   :  { %v496_v15 = vor.u32 %v495_v63, %v9612_v2  ;;  %v2728_v63 = vshll.u32 %v8047_v47, 16 }
  0xde   :  { %v2689_v51 = vsel %vm9045_vm4, %v2684_v36, %v2688_v11  ;;  %v2699_v56 = vsel %vm9045_vm4, %v2694_v42, %v2698_v37  ;;  %v2720_v36 = vshll.u32 %v8046_v10, 16  ;;  %v2707_v41 = vor.u32 %v2706_v18, %v2703_v17 }
  0xdf   :  { %v1120_v16 = vpop.f32.mrf.mxu0  ;;  %v3138_v11 = vunpack.c.l.b16 %v2689_v51  ;;  %v3139_v12 = vunpack.c.l.b16 %v2699_v56  ;;  %v497_v34 = vrot.slane %v496_v15, 4  ;;  %v2727_v18 = vrot.slane %v2725_v60, 4 }
  0xe0   :  { %v1549_v19 = vadd.f32 %v1548_v35, %v1120_v16  ;;  %v8850_v35 = vld [vmem:[%s12261_s0 + $0x150] sm:$0xff]  ;;  %v499_v16 = vshll.u32 %v99_v8, 16  ;;  %v2722_v51 = vrot.slane %v2720_v36, 5  ;;  %v2708_v56 = vrot.slane %v2707_v41, 4 }
  0xe1   :  { %v3336_v27 = vpop.f32.mrf.mxu3  ;;  %v2047_v28 = vpop.f32.mrf.mxu2 }
  0xe2   :  { %v9583_v30 = vadd.f32 %v3336_v27, %v2189_v0  ;;  %7595 = vmatmul.msk.bf16.gmra.mxu0 %vm985_vm3, %v966_v13  ;;  %v2190_v32 = vadd.f32 %v2045_v59, %v1549_v19  ;;  %v482_v59 = vrot.slane %v480_v43, 4  ;;  %v967_v13 = vpack.c.b16 %v918_v50, %v917_v48  ;;  %v8851_v43 = vld [vmem:[%s12261_s0 + $0x168] sm:$0xff] }
  0xe3   :  { %v3188_v27 = vpack.c.b16 %v3139_v12, %v3138_v11  ;;  %v517_v48 = vshrl.u32 %v52_v29, 16 }
  0xe4   :  { %v1553_v39 = vpop.f32.mrf.mxu1  ;;  %v486_v14 = vor.u32 %v485_v1, %v482_v59 }
  0xe6   :  { %8109 = vmatmul.msk.bf16.gmra.mxu3 %vm985_vm3, %v3187_v31  ;;  %7981 = vmatmul.msk.bf16.gmra.mxu2 %vm985_vm3, %v8882_v33  ;;  %v487_v33 = vrot.slane %v486_v14, 4 }
  0xe7   :  { %v1122_v49 = vpop.f32.mrf.mxu0  ;;  %7756 = vmatmul.msk.bf16.gmra.mxu1 %vm985_vm3, %v8850_v35  ;;  %v501_v35 = vrot.slane %v499_v16, 5 }
  0xe8   :  { %v1551_v53 = vadd.f32 %v1550_v6, %v1122_v49  ;;  %v2710_v6 = vshll.u32 %v8045_v52, 16  ;;  %v492_v50 = vsel %vm9045_vm4, %v487_v33, %v9612_v2  ;;  %v8048_v52 = vld [vmem:[%s12261_s0 + $0x1a8] sm:$0xf]  ;;  %v515_v2 = vrot.slane %v513_v46, 5  ;;  %v53_v46 = vld [vmem:[%s12261_s0 + $0x1b0] sm:$0xf] }
  0xe9   :  { %v3339_v61 = vpop.f32.mrf.mxu3  ;;  %v2050_v0 = vpop.f32.mrf.mxu2  ;;  %v2734_v8 = vshll.u32 %v8048_v52, 16  ;;  %v919_v12 = vunpack.c.l.b16 %v492_v50 }
  0xea   :  { %v9614_v4 = vadd.f32 %v3339_v61, %v2190_v32  ;;  %v2191_v5 = vadd.f32 %v2047_v28, %v1551_v53  ;;  %v9623_v19 = vrot.slane %v2710_v6, 5  ;;  %v51_v28 = vld [vmem:[%s12261_s0 + $0x198] sm:$0xf]  ;;  %v502_v53 = vsel %vm9045_vm4, %v497_v34, %v501_v35 }
  0xeb   :  { %v504_v44 = vshrl.u32 %v51_v28, 16  ;;  %v507_v45 = vshll.u32 %v51_v28, 16  ;;  %v2738_v6 = vshrl.u32 %v8048_v52, 16  ;;  %v920_v16 = vunpack.c.l.b16 %v502_v53  ;;  %v8049_v28 = vld [vmem:[%s12261_s0 + $0x1ac] sm:$0x1]  ;;  %v8852_v52 = vld [vmem:[%s12261_s0 + $0x198] sm:$0xff] }
  0xec   :  { %v1555_v7 = vpop.f32.mrf.mxu1  ;;  %v2717_v42 = vor.u32 %v2716_v23, %v9623_v19  ;;  %v2713_v10 = vsel %vm9045_vm4, %v2708_v56, %v9623_v19  ;;  %v2730_v23 = vrot.slane %v2728_v63, 5  ;;  %v2736_v29 = vrot.slane %v2734_v8, 5  ;;  %v8050_v8 = vld [vmem:[%s12261_s0 + $0x1bc] sm:$0xf] }
  0xed   :  { %v509_v1 = vrot.slane %v507_v45, 5  ;;  %v3140_v33 = vunpack.c.l.b16 %v2713_v10  ;;  %v531_v63 = vshll.u32 %v53_v46, 16  ;;  %v2749_v10 = vshrl.u32 %v8050_v8, 16 }
  0xee   :  { %v2718_v59 = vrot.slane %v2717_v42, 4  ;;  %v2731_v36 = vor.u32 %v2730_v23, %v2727_v18 }
  0xef   :  { %v1125_v24 = vpop.f32.mrf.mxu0  ;;  %v533_v18 = vrot.slane %v531_v63, 5  ;;  %v8885_v63 = vld [vmem:[%s12261_s0 + $0x1bc] sm:$0xff] }
  0xf0   :  { %v1554_v26 = vadd.f32 %v1553_v39, %v1125_v24  ;;  %v2732_v53 = vrot.slane %v2731_v36, 4 }
  0xf1   :  { %v3341_v31 = vpop.f32.mrf.mxu3  ;;  %v2052_v32 = vpop.f32.mrf.mxu2 }
  0xf2   :  { %v9631_v37 = vadd.f32 %v3341_v31, %v2191_v5  ;;  %7596 = vmatmul.msk.bf16.gmra.mxu0 %vm985_vm3, %v967_v13  ;;  %v2192_v39 = vadd.f32 %v2050_v0, %v1554_v26  ;;  %v506_v0 = vrot.slane %v504_v44, 4  ;;  %v519_v5 = vrot.slane %v517_v48, 4  ;;  %v100_v13 = vld [vmem:[%s12261_s0 + $0x1a0] sm:$0x1] }
  0xf3   :  { %v2740_v31 = vrot.slane %v2738_v6, 4 }
  0xf4   :  { %v1558_v49 = vpop.f32.mrf.mxu1  ;;  %v510_v17 = vor.u32 %v509_v1, %v506_v0  ;;  %v520_v26 = vor.u32 %v519_v5, %v515_v2  ;;  %v528_v1 = vshrl.u32 %v53_v46, 16 }
  0xf6   :  { %8110 = vmatmul.msk.bf16.gmra.mxu3 %vm985_vm3, %v3188_v27  ;;  %7982 = vmatmul.msk.bf16.gmra.mxu2 %vm985_vm3, %v8883_v40  ;;  %v523_v27 = vshll.u32 %v100_v13, 16  ;;  %v511_v19 = vrot.slane %v510_v17, 4  ;;  %v521_v41 = vrot.slane %v520_v26, 4 }
  0xf7   :  { %v1127_v61 = vpop.f32.mrf.mxu0  ;;  %7757 = vmatmul.msk.bf16.gmra.mxu1 %vm985_vm3, %v8851_v43  ;;  %v2741_v43 = vor.u32 %v2740_v31, %v2736_v29  ;;  %v101_v31 = vld [vmem:[%s12261_s0 + $0x1b8] sm:$0x1] }
  0xf8   :  { %v1556_v3 = vadd.f32 %v1555_v7, %v1127_v61  ;;  %v2723_v7 = vsel %vm9045_vm4, %v2718_v59, %v2722_v51  ;;  %v525_v42 = vrot.slane %v523_v27, 5  ;;  %v8884_v51 = vld [vmem:[%s12261_s0 + $0x1a4] sm:$0xff]  ;;  %v516_v60 = vsel %vm9045_vm4, %v511_v19, %v515_v2 }
  0xf9   :  { %v3344_v9 = vpop.f32.mrf.mxu3  ;;  %v2055_v11 = vpop.f32.mrf.mxu2  ;;  %v3141_v34 = vunpack.c.l.b16 %v2723_v7  ;;  %v2742_v0 = vrot.slane %v2741_v43, 4  ;;  %v921_v2 = vunpack.c.l.b16 %v516_v60  ;;  %v2752_v27 = vshll.u32 %v8050_v8, 16  ;;  %v8853_v8 = vld [vmem:[%s12261_s0 + $0x1b0] sm:$0xff] }
  0xfa   :  { %v9658_v14 = vadd.f32 %v3344_v9, %v2192_v39  ;;  %v2193_v15 = vadd.f32 %v2052_v32, %v1556_v3  ;;  %v968_v32 = vpack.c.b16 %v920_v16, %v919_v12  ;;  %v2744_v39 = vshll.u32 %v8049_v28, 16  ;;  %v8051_v12 = vld [vmem:[%s12261_s0 + $0x1c0] sm:$0xf] }
  0xfb   :  { %v3189_v48 = vpack.c.b16 %v3141_v34, %v3140_v33  ;;  %v526_v61 = vsel %vm9045_vm4, %v521_v41, %v525_v42  ;;  %v530_v16 = vrot.slane %v528_v1, 4  ;;  %v8052_v41 = vld [vmem:[%s12261_s0 + $0x1c4] sm:$0x1]  ;;  %v2751_v42 = vrot.slane %v2749_v10, 4  ;;  %v8054_v10 = vld [vmem:[%s12261_s0 + $0x1d8] sm:$0xf] }
  0xfc   :  { %v1560_v24 = vpop.f32.mrf.mxu1  ;;  %v2746_v56 = vrot.slane %v2744_v39, 5  ;;  %v922_v9 = vunpack.c.l.b16 %v526_v61  ;;  %v2754_v43 = vrot.slane %v2752_v27, 5 }
  0xfd   :  { %v534_v36 = vor.u32 %v533_v18, %v530_v16 }
  0xfe   :  { %v969_v19 = vpack.c.b16 %v922_v9, %v921_v2 }
  0xff   :  { %v1130_v35 = vpop.f32.mrf.mxu0 }
 0x100   :  { %v1559_v40 = vadd.f32 %v1558_v49, %v1130_v35  ;;  %v54_v49 = vld [vmem:[%s12261_s0 + $0x1b4] sm:$0xf] }
 0x101   :  { %v3346_v44 = vpop.f32.mrf.mxu3  ;;  %v2057_v45 = vpop.f32.mrf.mxu2  ;;  %v537_v3 = vshll.u32 %v54_v49, 16  ;;  %v541_v5 = vshrl.u32 %v54_v49, 16  ;;  %v56_v49 = vld [vmem:[%s12261_s0 + $0x1cc] sm:$0xf] }
 0x102   :  { %v9671_v47 = vadd.f32 %v3346_v44, %v2193_v15  ;;  %7597 = vmatmul.msk.bf16.gmra.mxu0 %vm985_vm3, %v968_v32  ;;  %v2194_v50 = vadd.f32 %v2055_v11, %v1559_v40  ;;  %v2737_v11 = vsel %vm9045_vm4, %v2732_v53, %v2736_v29  ;;  %v2747_v15 = vsel %vm9045_vm4, %v2742_v0, %v2746_v56 }
 0x103   :  { %v9700_v23 = vrot.slane %v537_v3, 5  ;;  %v543_v26 = vrot.slane %v541_v5, 4  ;;  %v2762_v32 = vshrl.u32 %v8051_v12, 16  ;;  %v3142_v34 = vunpack.c.l.b16 %v2737_v11  ;;  %v8053_v11 = vld [vmem:[%s12261_s0 + $0x1d4] sm:$0xf] }
 0x104   :  { %v1563_v59 = vpop.f32.mrf.mxu1  ;;  %v3143_v35 = vunpack.c.l.b16 %v2747_v15  ;;  %v547_v40 = vshll.u32 %v101_v31, 16  ;;  %v535_v56 = vrot.slane %v534_v36, 4  ;;  %v2768_v0 = vshll.u32 %v8052_v41, 16  ;;  %v102_v41 = vld [vmem:[%s12261_s0 + $0x1d0] sm:$0x1] }
 0x105   :  { %v544_v39 = vor.u32 %v543_v26, %v9700_v23  ;;  %v2755_v3 = vor.u32 %v2754_v43, %v2751_v42  ;;  %v561_v9 = vshll.u32 %v56_v49, 16  ;;  %v2773_v26 = vshrl.u32 %v8053_v11, 16 }
 0x106   :  { %8111 = vmatmul.msk.bf16.gmra.mxu3 %vm985_vm3, %v3189_v48  ;;  %7983 = vmatmul.msk.bf16.gmra.mxu2 %vm985_vm3, %v8884_v51  ;;  %v55_v51 = vld [vmem:[%s12261_s0 + $0x1c8] sm:$0xf]  ;;  %v549_v61 = vrot.slane %v547_v40, 5  ;;  %v540_v15 = vsel %vm9045_vm4, %v535_v56, %v9700_v23  ;;  %v2770_v16 = vrot.slane %v2768_v0, 5  ;;  %v571_v56 = vshll.u32 %v102_v41, 16 }
 0x107   :  { %v1132_v6 = vpop.f32.mrf.mxu0  ;;  %7758 = vmatmul.msk.bf16.gmra.mxu1 %vm985_vm3, %v8852_v52  ;;  %v545_v60 = vrot.slane %v544_v39, 4  ;;  %v555_v2 = vshll.u32 %v55_v51, 16  ;;  %v563_v31 = vrot.slane %v561_v9, 5  ;;  %v923_v40 = vunpack.c.l.b16 %v540_v15 }
 0x108   :  { %v1561_v13 = vadd.f32 %v1560_v24, %v1132_v6  ;;  %v2758_v24 = vshll.u32 %v8051_v12, 16  ;;  %v552_v6 = vshrl.u32 %v55_v51, 16  ;;  %v573_v9 = vrot.slane %v571_v56, 5 }
 0x109   :  { %v3349_v7 = vpop.f32.mrf.mxu3  ;;  %v2060_v17 = vpop.f32.mrf.mxu2  ;;  %v557_v23 = vrot.slane %v555_v2, 5 }
 0x10a   :  { %v9702_v28 = vadd.f32 %v3349_v7, %v2194_v50  ;;  %v2195_v29 = vadd.f32 %v2057_v45, %v1561_v13  ;;  %v9711_v44 = vrot.slane %v2758_v24, 5  ;;  %v2764_v45 = vrot.slane %v2762_v32, 4 }
 0x10b   :  { %v3190_v50 = vpack.c.b16 %v3143_v35, %v3142_v34  ;;  %v565_v13 = vshrl.u32 %v56_v49, 16  ;;  %v550_v7 = vsel %vm9045_vm4, %v545_v60, %v549_v61  ;;  %v2776_v24 = vshll.u32 %v8053_v11, 16  ;;  %v8055_v60 = vld [vmem:[%s12261_s0 + $0x1dc] sm:$0x1] }
 0x10c   :  { %v1565_v33 = vpop.f32.mrf.mxu1  ;;  %v2765_v5 = vor.u32 %v2764_v45, %v9711_v44  ;;  %v2782_v35 = vshll.u32 %v8054_v10, 16  ;;  %v924_v45 = vunpack.c.l.b16 %v550_v7 }
 0x10d   :  { %v567_v34 = vrot.slane %v565_v13, 4  ;;  %v2778_v51 = vrot.slane %v2776_v24, 5 }
 0x10e   :  { %v2766_v18 = vrot.slane %v2765_v5, 4  ;;  %v2784_v61 = vrot.slane %v2782_v35, 5  ;;  %v970_v0 = vpack.c.b16 %v924_v45, %v923_v40  ;;  %v8056_v40 = vld [vmem:[%s12261_s0 + $0x1ec] sm:$0xf] }
 0x10f   :  { %v1135_v46 = vpop.f32.mrf.mxu0 }
 0x110   :  { %v1564_v48 = vadd.f32 %v1563_v59, %v1135_v46 }
 0x111   :  { %v3351_v52 = vpop.f32.mrf.mxu3  ;;  %v2062_v53 = vpop.f32.mrf.mxu2 }
 0x112   :  { %v9719_v1 = vadd.f32 %v3351_v52, %v2195_v29  ;;  %7598 = vmatmul.msk.bf16.gmra.mxu0 %vm985_vm3, %v969_v19  ;;  %v2196_v59 = vadd.f32 %v2060_v17, %v1564_v48  ;;  %v2756_v17 = vrot.slane %v2755_v3, 4  ;;  %v554_v29 = vrot.slane %v552_v6, 4 }
 0x113   :  { %v2786_v19 = vshrl.u32 %v8054_v10, 16  ;;  %v568_v52 = vor.u32 %v567_v34, %v563_v31 }
 0x114   :  { %v1568_v12 = vpop.f32.mrf.mxu1  ;;  %v2761_v46 = vsel %vm9045_vm4, %v2756_v17, %v9711_v44  ;;  %v558_v48 = vor.u32 %v557_v23, %v554_v29 }
 0x115   :  { %v569_v2 = vrot.slane %v568_v52, 4 }
 0x116   :  { %8112 = vmatmul.msk.bf16.gmra.mxu3 %vm985_vm3, %v3190_v50  ;;  %7984 = vmatmul.msk.bf16.gmra.mxu2 %vm985_vm3, %v8885_v63  ;;  %v2775_v50 = vrot.slane %v2773_v26, 4  ;;  %v559_v44 = vrot.slane %v558_v48, 4  ;;  %v8854_v26 = vld [vmem:[%s12261_s0 + $0x1c8] sm:$0xff] }
 0x117   :  { %v1137_v27 = vpop.f32.mrf.mxu0  ;;  %7759 = vmatmul.msk.bf16.gmra.mxu1 %vm985_vm3, %v8853_v8  ;;  %v2792_v8 = vshll.u32 %v8055_v60, 16 }
 0x118   :  { %v1566_v32 = vadd.f32 %v1565_v33, %v1137_v27  ;;  %v2771_v33 = vsel %vm9045_vm4, %v2766_v18, %v2770_v16  ;;  %v2779_v5 = vor.u32 %v2778_v51, %v2775_v50  ;;  %v57_v16 = vld [vmem:[%s12261_s0 + $0x1e0] sm:$0xf]  ;;  %v8886_v18 = vld [vmem:[%s12261_s0 + $0x1d4] sm:$0xff]  ;;  %v564_v24 = vsel %vm9045_vm4, %v559_v44, %v563_v31 }
 0x119   :  { %v3354_v36 = vpop.f32.mrf.mxu3  ;;  %v2065_v39 = vpop.f32.mrf.mxu2  ;;  %v3145_v63 = vunpack.c.l.b16 %v2771_v33  ;;  %v2794_v29 = vrot.slane %v2792_v8, 5  ;;  %v576_v35 = vshrl.u32 %v57_v16, 16  ;;  %v925_v31 = vunpack.c.l.b16 %v564_v24  ;;  %v60_v24 = vld [vmem:[%s12261_s0 + $0x1fc] sm:$0xf] }
 0x11a   :  { %v9746_v42 = vadd.f32 %v3354_v36, %v2196_v59  ;;  %v2197_v43 = vadd.f32 %v2062_v53, %v1566_v32  ;;  %v2788_v53 = vrot.slane %v2786_v19, 4  ;;  %v3144_v59 = vunpack.c.l.b16 %v2761_v46  ;;  %v8057_v46 = vld [vmem:[%s12261_s0 + $0x1f0] sm:$0xf] }
 0x11b   :  { %v2780_v27 = vrot.slane %v2779_v5, 4  ;;  %v574_v32 = vsel %vm9045_vm4, %v569_v2, %v573_v9  ;;  %v579_v19 = vshll.u32 %v57_v16, 16  ;;  %v578_v50 = vrot.slane %v576_v35, 4  ;;  %v8058_v16 = vld [vmem:[%s12261_s0 + $0x1f4] sm:$0x1] }
 0x11c   :  { %v1570_v49 = vpop.f32.mrf.mxu1  ;;  %v2789_v11 = vor.u32 %v2788_v53, %v2784_v61  ;;  %v3191_v7 = vpack.c.b16 %v3145_v63, %v3144_v59  ;;  %v2797_v51 = vshrl.u32 %v8056_v40, 16  ;;  %v2800_v59 = vshll.u32 %v8056_v40, 16 }
 0x11d   :  { %v2785_v45 = vsel %vm9045_vm4, %v2780_v27, %v2784_v61  ;;  %v581_v60 = vrot.slane %v579_v19, 5  ;;  %v2810_v44 = vshrl.u32 %v8057_v46, 16 }
 0x11e   :  { %v2790_v34 = vrot.slane %v2789_v11, 4  ;;  %v3146_v8 = vunpack.c.l.b16 %v2785_v45  ;;  %v8855_v45 = vld [vmem:[%s12261_s0 + $0x1e0] sm:$0xff] }
 0x11f   :  { %v1140_v3 = vpop.f32.mrf.mxu0  ;;  %v582_v9 = vor.u32 %v581_v60, %v578_v50  ;;  %v8059_v50 = vld [vmem:[%s12261_s0 + $0x204] sm:$0xf] }
 0x120   :  { %v1569_v6 = vadd.f32 %v1568_v12, %v1140_v3  ;;  %v58_v12 = vld [vmem:[%s12261_s0 + $0x1e4] sm:$0xf]  ;;  %v2795_v48 = vsel %vm9045_vm4, %v2790_v34, %v2794_v29  ;;  %v103_v3 = vld [vmem:[%s12261_s0 + $0x1e8] sm:$0x1]  ;;  %v59_v29 = vld [vmem:[%s12261_s0 + $0x1f8] sm:$0xf] }
 0x121   :  { %v3356_v13 = vpop.f32.mrf.mxu3  ;;  %v2067_v15 = vpop.f32.mrf.mxu2  ;;  %v585_v36 = vshll.u32 %v58_v12, 16  ;;  %v583_v35 = vrot.slane %v582_v9, 4 }
 0x122   :  { %v9759_v10 = vadd.f32 %v3356_v13, %v2197_v43  ;;  %7599 = vmatmul.msk.bf16.gmra.mxu0 %vm985_vm3, %v970_v0  ;;  %v2198_v17 = vadd.f32 %v2065_v39, %v1569_v6  ;;  %v589_v39 = vshrl.u32 %v58_v12, 16  ;;  %v926_v43 = vunpack.c.l.b16 %v574_v32 }
 0x123   :  { %v9788_v53 = vrot.slane %v585_v36, 5  ;;  %v3147_v6 = vunpack.c.l.b16 %v2795_v48  ;;  %v595_v13 = vshll.u32 %v103_v3, 16  ;;  %v609_v48 = vshll.u32 %v60_v24, 16 }
 0x124   :  { %v1573_v23 = vpop.f32.mrf.mxu1  ;;  %v591_v0 = vrot.slane %v589_v39, 4  ;;  %v971_v2 = vpack.c.b16 %v926_v43, %v925_v31  ;;  %v2816_v39 = vshll.u32 %v8058_v16, 16 }
 0x125   :  { %v3192_v27 = vpack.c.b16 %v3147_v6, %v3146_v8  ;;  %v597_v36 = vrot.slane %v595_v13, 5  ;;  %v611_v6 = vrot.slane %v609_v48, 5 }
 0x126   :  { %8113 = vmatmul.msk.bf16.gmra.mxu3 %vm985_vm3, %v3191_v7  ;;  %7985 = vmatmul.msk.bf16.gmra.mxu2 %vm985_vm3, %v8886_v18  ;;  %v592_v11 = vor.u32 %v591_v0, %v9788_v53  ;;  %v2799_v7 = vrot.slane %v2797_v51, 4  ;;  %v2812_v18 = vrot.slane %v2810_v44, 4  ;;  %v2818_v60 = vrot.slane %v2816_v39, 5  ;;  %v8060_v0 = vld [vmem:[%s12261_s0 + $0x208] sm:$0xf] }
 0x127   :  { %v1142_v41 = vpop.f32.mrf.mxu0  ;;  %7760 = vmatmul.msk.bf16.gmra.mxu1 %vm985_vm3, %v8854_v26  ;;  %v2830_v13 = vshll.u32 %v8060_v0, 16  ;;  %v2834_v16 = vshrl.u32 %v8060_v0, 16 }
 0x128   :  { %v1571_v33 = vadd.f32 %v1570_v49, %v1142_v41  ;;  %v2806_v49 = vshll.u32 %v8057_v46, 16  ;;  %v593_v19 = vrot.slane %v592_v11, 4  ;;  %v8887_v41 = vld [vmem:[%s12261_s0 + $0x1ec] sm:$0xff]  ;;  %v600_v46 = vshrl.u32 %v59_v29, 16 }
 0x129   :  { %v3359_v52 = vpop.f32.mrf.mxu3  ;;  %v2070_v56 = vpop.f32.mrf.mxu2 }
 0x12a   :  { %v9790_v63 = vadd.f32 %v3359_v52, %v2198_v17  ;;  %v2199_v61 = vadd.f32 %v2067_v15, %v1571_v33  ;;  %v2802_v15 = vrot.slane %v2800_v59, 5  ;;  %v9799_v17 = vrot.slane %v2806_v49, 5 }
 0x12b   :  { %v603_v33 = vshll.u32 %v59_v29, 16  ;;  %v613_v52 = vshrl.u32 %v60_v24, 16  ;;  %v598_v59 = vsel %vm9045_vm4, %v593_v19, %v597_v36  ;;  %v2821_v49 = vshrl.u32 %v8059_v50, 16 }
 0x12c   :  { %v1575_v5 = vpop.f32.mrf.mxu1  ;;  %v2803_v31 = vor.u32 %v2802_v15, %v2799_v7  ;;  %v2813_v43 = vor.u32 %v2812_v18, %v9799_v17  ;;  %v602_v8 = vrot.slane %v600_v46, 4  ;;  %v928_v29 = vunpack.c.l.b16 %v598_v59 }
 0x12d   :  { %v615_v11 = vrot.slane %v613_v52, 4 }
 0x12e   :  { %v2814_v3 = vrot.slane %v2813_v43, 4 }
 0x12f   :  { %v1145_v12 = vpop.f32.mrf.mxu0  ;;  %v616_v39 = vor.u32 %v615_v11, %v611_v6 }
 0x130   :  { %v1574_v26 = vadd.f32 %v1573_v23, %v1145_v12  ;;  %v104_v12 = vld [vmem:[%s12261_s0 + $0x200] sm:$0x1] }
 0x131   :  { %v3361_v32 = vpop.f32.mrf.mxu3  ;;  %v2072_v34 = vpop.f32.mrf.mxu2 }
 0x132   :  { %v9807_v40 = vadd.f32 %v3361_v32, %v2199_v61  ;;  %7600 = vmatmul.msk.bf16.gmra.mxu0 %vm985_vm3, %v971_v2  ;;  %v2200_v23 = vadd.f32 %v2070_v56, %v1574_v26  ;;  %v588_v56 = vsel %vm9045_vm4, %v583_v35, %v9788_v53  ;;  %v2804_v61 = vrot.slane %v2803_v31, 4 }
 0x133   :  { %v605_v53 = vrot.slane %v603_v33, 5  ;;  %v2824_v2 = vshll.u32 %v8059_v50, 16  ;;  %v927_v18 = vunpack.c.l.b16 %v588_v56  ;;  %v2823_v35 = vrot.slane %v2821_v49, 4 }
 0x134   :  { %v1578_v51 = vpop.f32.mrf.mxu1  ;;  %v2809_v24 = vsel %vm9045_vm4, %v2804_v61, %v9799_v17  ;;  %v2832_v31 = vrot.slane %v2830_v13, 5  ;;  %v617_v56 = vrot.slane %v616_v39, 4 }
 0x135   :  { %v606_v32 = vor.u32 %v605_v53, %v602_v8  ;;  %v2826_v19 = vrot.slane %v2824_v2, 5  ;;  %v972_v43 = vpack.c.b16 %v928_v29, %v927_v18  ;;  %v8888_v53 = vld [vmem:[%s12261_s0 + $0x204] sm:$0xff]  ;;  %v8856_v2 = vld [vmem:[%s12261_s0 + $0x1f8] sm:$0xff] }
 0x136   :  { %8114 = vmatmul.msk.bf16.gmra.mxu3 %vm985_vm3, %v3192_v27  ;;  %7986 = vmatmul.msk.bf16.gmra.mxu2 %vm985_vm3, %v8887_v41  ;;  %v619_v41 = vshll.u32 %v104_v12, 16 }
 0x137   :  { %v1147_v44 = vpop.f32.mrf.mxu0  ;;  %7761 = vmatmul.msk.bf16.gmra.mxu1 %vm985_vm3, %v8855_v45  ;;  %v3148_v45 = vunpack.c.l.b16 %v2809_v24  ;;  %v607_v17 = vrot.slane %v606_v32, 4  ;;  %v2827_v48 = vor.u32 %v2826_v19, %v2823_v35  ;;  %v8062_v24 = vld [vmem:[%s12261_s0 + $0x21c] sm:$0xf]  ;;  %v8063_v19 = vld [vmem:[%s12261_s0 + $0x220] sm:$0xf] }
 0x138   :  { %v1576_v9 = vadd.f32 %v1575_v5, %v1147_v44  ;;  %v2819_v5 = vsel %vm9045_vm4, %v2814_v3, %v2818_v60  ;;  %v621_v60 = vrot.slane %v619_v41, 5  ;;  %v61_v3 = vld [vmem:[%s12261_s0 + $0x210] sm:$0xf] }
 0x139   :  { %v3364_v7 = vpop.f32.mrf.mxu3  ;;  %v2075_v15 = vpop.f32.mrf.mxu2  ;;  %v3149_v46 = vunpack.c.l.b16 %v2819_v5  ;;  %v624_v18 = vshrl.u32 %v61_v3, 16  ;;  %v627_v12 = vshll.u32 %v61_v3, 16 }
 0x13a   :  { %v9834_v26 = vadd.f32 %v3364_v7, %v2200_v23  ;;  %v2201_v27 = vadd.f32 %v2072_v34, %v1576_v9  ;;  %v8061_v23 = vld [vmem:[%s12261_s0 + $0x20c] sm:$0x1]  ;;  %v2836_v34 = vrot.slane %v2834_v16, 4  ;;  %v2828_v9 = vrot.slane %v2827_v48, 4 }
 0x13b   :  { %v2840_v50 = vshll.u32 %v8061_v23, 16  ;;  %v3193_v44 = vpack.c.b16 %v3149_v46, %v3148_v45  ;;  %v612_v16 = vsel %vm9045_vm4, %v607_v17, %v611_v6  ;;  %v622_v7 = vsel %vm9045_vm4, %v617_v56, %v621_v60 }
 0x13c   :  { %v1580_v36 = vpop.f32.mrf.mxu1  ;;  %v2837_v0 = vor.u32 %v2836_v34, %v2832_v31  ;;  %v929_v6 = vunpack.c.l.b16 %v612_v16  ;;  %v930_v32 = vunpack.c.l.b16 %v622_v7  ;;  %v2833_v35 = vsel %vm9045_vm4, %v2828_v9, %v2832_v31 }
 0x13d   :  { %v2842_v11 = vrot.slane %v2840_v50, 5  ;;  %v626_v23 = vrot.slane %v624_v18, 4  ;;  %v2845_v34 = vshrl.u32 %v8062_v24, 16  ;;  %v629_v46 = vrot.slane %v627_v12, 5  ;;  %v63_v18 = vld [vmem:[%s12261_s0 + $0x228] sm:$0xf] }
 0x13e   :  { %v2848_v48 = vshll.u32 %v8062_v24, 16  ;;  %v2858_v56 = vshrl.u32 %v8063_v19, 16  ;;  %v973_v3 = vpack.c.b16 %v930_v32, %v929_v6  ;;  %v64_v12 = vld [vmem:[%s12261_s0 + $0x22c] sm:$0xf] }
 0x13f   :  { %v1150_v33 = vpop.f32.mrf.mxu0 }
 0x140   :  { %v1579_v52 = vadd.f32 %v1578_v51, %v1150_v33  ;;  %v62_v51 = vld [vmem:[%s12261_s0 + $0x214] sm:$0xf] }
 0x141   :  { %v3366_v59 = vpop.f32.mrf.mxu3  ;;  %v2077_v61 = vpop.f32.mrf.mxu2  ;;  %v637_v29 = vshrl.u32 %v62_v51, 16 }
 0x142   :  { %v9847_v49 = vadd.f32 %v3366_v59, %v2201_v27  ;;  %7601 = vmatmul.msk.bf16.gmra.mxu0 %vm985_vm3, %v972_v43  ;;  %v2202_v8 = vadd.f32 %v2075_v15, %v1579_v52  ;;  %v2838_v15 = vrot.slane %v2837_v0, 4  ;;  %v633_v27 = vshll.u32 %v62_v51, 16  ;;  %v105_v52 = vld [vmem:[%s12261_s0 + $0x218] sm:$0x1] }
 0x143   :  { %v639_v17 = vrot.slane %v637_v29, 4  ;;  %v3150_v0 = vunpack.c.l.b16 %v2833_v35  ;;  %v643_v51 = vshll.u32 %v105_v52, 16 }
 0x144   :  { %v1583_v13 = vpop.f32.mrf.mxu1  ;;  %v2843_v41 = vsel %vm9045_vm4, %v2838_v15, %v2842_v11  ;;  %v9876_v33 = vrot.slane %v633_v27, 5  ;;  %v2860_v11 = vrot.slane %v2858_v56, 4 }
 0x145   :  { %v3151_v59 = vunpack.c.l.b16 %v2843_v41  ;;  %v645_v6 = vrot.slane %v643_v51, 5 }
 0x146   :  { %8115 = vmatmul.msk.bf16.gmra.mxu3 %vm985_vm3, %v3193_v44  ;;  %7987 = vmatmul.msk.bf16.gmra.mxu2 %vm985_vm3, %v8888_v53  ;;  %v630_v44 = vor.u32 %v629_v46, %v626_v23  ;;  %v640_v53 = vor.u32 %v639_v17, %v9876_v33  ;;  %v8857_v23 = vld [vmem:[%s12261_s0 + $0x210] sm:$0xff]  ;;  %v657_v46 = vshll.u32 %v64_v12, 16 }
 0x147   :  { %v1152_v5 = vpop.f32.mrf.mxu0  ;;  %7762 = vmatmul.msk.bf16.gmra.mxu1 %vm985_vm3, %v8856_v2  ;;  %v2847_v2 = vrot.slane %v2845_v34, 4  ;;  %v3194_v15 = vpack.c.b16 %v3151_v59, %v3150_v0  ;;  %v648_v34 = vshrl.u32 %v63_v18, 16  ;;  %v8065_v17 = vld [vmem:[%s12261_s0 + $0x234] sm:$0xf] }
 0x148   :  { %v1581_v39 = vadd.f32 %v1580_v36, %v1152_v5  ;;  %v2854_v36 = vshll.u32 %v8063_v19, 16  ;;  %v631_v24 = vrot.slane %v630_v44, 4  ;;  %v641_v5 = vrot.slane %v640_v53, 4  ;;  %v8889_v19 = vld [vmem:[%s12261_s0 + $0x21c] sm:$0xff] }
 0x149   :  { %v3369_v43 = vpop.f32.mrf.mxu3  ;;  %v2080_v45 = vpop.f32.mrf.mxu2  ;;  %v650_v53 = vrot.slane %v648_v34, 4  ;;  %v659_v51 = vrot.slane %v657_v46, 5 }
 0x14a   :  { %v9878_v50 = vadd.f32 %v3369_v43, %v2202_v8  ;;  %v2203_v31 = vadd.f32 %v2077_v61, %v1581_v39  ;;  %v8064_v8 = vld [vmem:[%s12261_s0 + $0x224] sm:$0x1]  ;;  %v2850_v61 = vrot.slane %v2848_v48, 5  ;;  %v9887_v9 = vrot.slane %v2854_v36, 5  ;;  %v8066_v36 = vld [vmem:[%s12261_s0 + $0x238] sm:$0xf] }
 0x14b   :  { %v2864_v32 = vshll.u32 %v8064_v8, 16  ;;  %v651_v43 = vshll.u32 %v63_v18, 16  ;;  %v646_v56 = vsel %vm9045_vm4, %v641_v5, %v645_v6  ;;  %v2872_v8 = vshll.u32 %v8065_v17, 16 }
 0x14c   :  { %v1585_v60 = vpop.f32.mrf.mxu1  ;;  %v2851_v39 = vor.u32 %v2850_v61, %v2847_v2  ;;  %v2861_v41 = vor.u32 %v2860_v11, %v9887_v9  ;;  %v2878_v11 = vshll.u32 %v8066_v36, 16  ;;  %v932_v5 = vunpack.c.l.b16 %v646_v56 }
 0x14d   :  { %v2866_v52 = vrot.slane %v2864_v32, 5 }
 0x14e   :  { %v2852_v0 = vrot.slane %v2851_v39, 4  ;;  %v2862_v59 = vrot.slane %v2861_v41, 4  ;;  %v2874_v39 = vrot.slane %v2872_v8, 5 }
 0x14f   :  { %v1155_v16 = vpop.f32.mrf.mxu0 }
 0x150   :  { %v1584_v7 = vadd.f32 %v1583_v13, %v1155_v16  ;;  %v2882_v16 = vshrl.u32 %v8066_v36, 16  ;;  %v2857_v6 = vsel %vm9045_vm4, %v2852_v0, %v9887_v9 }
 0x151   :  { %v3371_v27 = vpop.f32.mrf.mxu3  ;;  %v2082_v29 = vpop.f32.mrf.mxu2 }
 0x152   :  { %v9895_v35 = vadd.f32 %v3371_v27, %v2203_v31  ;;  %7602 = vmatmul.msk.bf16.gmra.mxu0 %vm985_vm3, %v973_v3  ;;  %v2204_v13 = vadd.f32 %v2080_v45, %v1584_v7  ;;  %v661_v45 = vshrl.u32 %v64_v12, 16  ;;  %v636_v31 = vsel %vm9045_vm4, %v631_v24, %v9876_v33  ;;  %v106_v12 = vld [vmem:[%s12261_s0 + $0x230] sm:$0x1] }
 0x153   :  { %v2869_v3 = vshrl.u32 %v8065_v17, 16  ;;  %v653_v33 = vrot.slane %v651_v43, 5  ;;  %v931_v18 = vunpack.c.l.b16 %v636_v31  ;;  %v667_v34 = vshll.u32 %v106_v12, 16 }
 0x154   :  { %v1588_v48 = vpop.f32.mrf.mxu1  ;;  %v663_v61 = vrot.slane %v661_v45, 4  ;;  %v2880_v43 = vrot.slane %v2878_v11, 5  ;;  %v3152_v17 = vunpack.c.l.b16 %v2857_v6  ;;  %v8890_v11 = vld [vmem:[%s12261_s0 + $0x234] sm:$0xff] }
 0x155   :  { %v654_v32 = vor.u32 %v653_v33, %v650_v53  ;;  %v974_v46 = vpack.c.b16 %v932_v5, %v931_v18  ;;  %v65_v33 = vld [vmem:[%s12261_s0 + $0x240] sm:$0xf] }
 0x156   :  { %8116 = vmatmul.msk.bf16.gmra.mxu3 %vm985_vm3, %v3194_v15  ;;  %7988 = vmatmul.msk.bf16.gmra.mxu2 %vm985_vm3, %v8889_v19  ;;  %v2871_v19 = vrot.slane %v2869_v3, 4  ;;  %v672_v6 = vshrl.u32 %v65_v33, 16 }
 0x157   :  { %v1157_v44 = vpop.f32.mrf.mxu0  ;;  %7763 = vmatmul.msk.bf16.gmra.mxu1 %vm985_vm3, %v8857_v23  ;;  %v664_v23 = vor.u32 %v663_v61, %v659_v51  ;;  %v655_v9 = vrot.slane %v654_v32, 4 }
 0x158   :  { %v1586_v2 = vadd.f32 %v1585_v60, %v1157_v44  ;;  %v2867_v60 = vsel %vm9045_vm4, %v2862_v59, %v2866_v52  ;;  %v2875_v36 = vor.u32 %v2874_v39, %v2871_v19  ;;  %v669_v59 = vrot.slane %v667_v34, 5  ;;  %v8068_v39 = vld [vmem:[%s12261_s0 + $0x24c] sm:$0xf] }
 0x159   :  { %v3374_v7 = vpop.f32.mrf.mxu3  ;;  %v2085_v15 = vpop.f32.mrf.mxu2  ;;  %v3153_v45 = vunpack.c.l.b16 %v2867_v60  ;;  %v665_v0 = vrot.slane %v664_v23, 4  ;;  %v675_v60 = vshll.u32 %v65_v33, 16 }
 0x15a   :  { %v9922_v27 = vadd.f32 %v3374_v7, %v2204_v13  ;;  %v2205_v24 = vadd.f32 %v2082_v29, %v1586_v2  ;;  %v8067_v13 = vld [vmem:[%s12261_s0 + $0x23c] sm:$0x1]  ;;  %v2884_v29 = vrot.slane %v2882_v16, 4  ;;  %v8858_v16 = vld [vmem:[%s12261_s0 + $0x228] sm:$0xff]  ;;  %v2876_v7 = vrot.slane %v2875_v36, 4 }
 0x15b   :  { %v2888_v56 = vshll.u32 %v8067_v13, 16  ;;  %v3195_v2 = vpack.c.b16 %v3153_v45, %v3152_v17  ;;  %v674_v45 = vrot.slane %v672_v6, 4 }
 0x15c   :  { %v1590_v41 = vpop.f32.mrf.mxu1  ;;  %v2885_v3 = vor.u32 %v2884_v29, %v2880_v43  ;;  %v2881_v13 = vsel %vm9045_vm4, %v2876_v7, %v2880_v43  ;;  %v8069_v29 = vld [vmem:[%s12261_s0 + $0x250] sm:$0xf] }
 0x15d   :  { %v2890_v18 = vrot.slane %v2888_v56, 5  ;;  %v677_v56 = vrot.slane %v675_v60, 5  ;;  %v2906_v33 = vshrl.u32 %v8069_v29, 16 }
 0x15e   :  { %v2886_v5 = vrot.slane %v2885_v3, 4 }
 0x15f   :  { %v1160_v31 = vpop.f32.mrf.mxu0  ;;  %v678_v7 = vor.u32 %v677_v56, %v674_v45  ;;  %v2908_v6 = vrot.slane %v2906_v33, 4 }
 0x160   :  { %v1589_v52 = vadd.f32 %v1588_v48, %v1160_v31  ;;  %v66_v48 = vld [vmem:[%s12261_s0 + $0x244] sm:$0xf]  ;;  %v2891_v17 = vsel %vm9045_vm4, %v2886_v5, %v2890_v18  ;;  %v2893_v31 = vshrl.u32 %v8068_v39, 16 }
 0x161   :  { %v3376_v44 = vpop.f32.mrf.mxu3  ;;  %v2087_v53 = vpop.f32.mrf.mxu2  ;;  %v681_v32 = vshll.u32 %v66_v48, 16  ;;  %v685_v19 = vshrl.u32 %v66_v48, 16  ;;  %v3155_v48 = vunpack.c.l.b16 %v2891_v17 }
 0x162   :  { %v9935_v8 = vadd.f32 %v3376_v44, %v2205_v24  ;;  %7603 = vmatmul.msk.bf16.gmra.mxu0 %vm985_vm3, %v974_v46  ;;  %v2206_v61 = vadd.f32 %v2085_v15, %v1589_v52  ;;  %v660_v24 = vsel %vm9045_vm4, %v655_v9, %v659_v51  ;;  %v670_v15 = vsel %vm9045_vm4, %v665_v0, %v669_v59  ;;  %v107_v44 = vld [vmem:[%s12261_s0 + $0x248] sm:$0x1] }
 0x163   :  { %v933_v51 = vunpack.c.l.b16 %v660_v24  ;;  %v934_v34 = vunpack.c.l.b16 %v670_v15  ;;  %v9964_v52 = vrot.slane %v681_v32, 5  ;;  %v687_v0 = vrot.slane %v685_v19, 4 }
 0x164   :  { %v1593_v12 = vpop.f32.mrf.mxu1  ;;  %v2896_v59 = vshll.u32 %v8068_v39, 16  ;;  %v691_v24 = vshll.u32 %v107_v44, 16  ;;  %v2895_v15 = vrot.slane %v2893_v31, 4  ;;  %v67_v39 = vld [vmem:[%s12261_s0 + $0x258] sm:$0xf]  ;;  %v8891_v31 = vld [vmem:[%s12261_s0 + $0x24c] sm:$0xff] }
 0x165   :  { %v688_v18 = vor.u32 %v687_v0, %v9964_v52  ;;  %v8859_v0 = vld [vmem:[%s12261_s0 + $0x240] sm:$0xff]  ;;  %v699_v44 = vshll.u32 %v67_v39, 16 }
 0x166   :  { %8117 = vmatmul.msk.bf16.gmra.mxu3 %vm985_vm3, %v3195_v2  ;;  %7989 = vmatmul.msk.bf16.gmra.mxu2 %vm985_vm3, %v8890_v11  ;;  %v3154_v11 = vunpack.c.l.b16 %v2881_v13  ;;  %v679_v13 = vrot.slane %v678_v7, 4 }
 0x167   :  { %v1162_v23 = vpop.f32.mrf.mxu0  ;;  %7764 = vmatmul.msk.bf16.gmra.mxu1 %vm985_vm3, %v8858_v16  ;;  %v975_v16 = vpack.c.b16 %v934_v34, %v933_v51 }
 0x168   :  { %v1591_v46 = vadd.f32 %v1590_v41, %v1162_v23  ;;  %v2902_v41 = vshll.u32 %v8069_v29, 16  ;;  %v3196_v19 = vpack.c.b16 %v3155_v48, %v3154_v11  ;;  %v68_v23 = vld [vmem:[%s12261_s0 + $0x25c] sm:$0xf]  ;;  %v689_v29 = vrot.slane %v688_v18, 4 }
 0x169   :  { %v3379_v9 = vpop.f32.mrf.mxu3  ;;  %v2090_v36 = vpop.f32.mrf.mxu2  ;;  %v684_v11 = vsel %vm9045_vm4, %v679_v13, %v9964_v52  ;;  %v701_v52 = vrot.slane %v699_v44, 5 }
 0x16a   :  { %v9966_v3 = vadd.f32 %v3379_v9, %v2206_v61  ;;  %v2207_v43 = vadd.f32 %v2087_v53, %v1591_v46  ;;  %v8070_v61 = vld [vmem:[%s12261_s0 + $0x254] sm:$0x1]  ;;  %v2898_v53 = vrot.slane %v2896_v59, 5  ;;  %v9975_v5 = vrot.slane %v2902_v41, 5 }
 0x16b   :  { %v693_v46 = vrot.slane %v691_v24, 5  ;;  %v2912_v17 = vshll.u32 %v8070_v61, 16  ;;  %v696_v59 = vshrl.u32 %v67_v39, 16  ;;  %v705_v41 = vshll.u32 %v68_v23, 16 }
 0x16c   :  { %12266 = vst [vmem:[#allocation2_spill] sm:$0xff] %v9966_v3  ;;  %v1595_v2 = vpop.f32.mrf.mxu1  ;;  %v2899_v9 = vor.u32 %v2898_v53, %v2895_v15  ;;  %v2909_v56 = vor.u32 %v2908_v6, %v9975_v5 }
 0x16d   :  { %v2914_v48 = vrot.slane %v2912_v17, 5  ;;  %v694_v7 = vsel %vm9045_vm4, %v689_v29, %v693_v46  ;;  %v698_v53 = vrot.slane %v696_v59, 4  ;;  %v707_v6 = vrot.slane %v705_v41, 5  ;;  %v108_v29 = vld [vmem:[%s12261_s0 + $0x260] sm:$0x1] }
 0x16e   :  { %v2900_v18 = vrot.slane %v2899_v9, 4  ;;  %v2910_v24 = vrot.slane %v2909_v56, 4  ;;  %v935_v17 = vunpack.c.l.b16 %v684_v11  ;;  %v936_v9 = vunpack.c.l.b16 %v694_v7 }
 0x16f   :  { %v1165_v60 = vpop.f32.mrf.mxu0 }
 0x170   :  { %v1594_v32 = vadd.f32 %v1593_v12, %v1165_v60  ;;  %v2905_v56 = vsel %vm9045_vm4, %v2900_v18, %v9975_v5 }
 0x171   :  { %v3381_v51 = vpop.f32.mrf.mxu3  ;;  %v2092_v34 = vpop.f32.mrf.mxu2  ;;  %v3156_v7 = vunpack.c.l.b16 %v2905_v56 }
 0x172   :  { %v9983_v45 = vadd.f32 %v3381_v51, %v2207_v43  ;;  %7604 = vmatmul.msk.bf16.gmra.mxu0 %vm985_vm3, %v975_v16  ;;  %v2208_v12 = vadd.f32 %v2090_v36, %v1594_v32  ;;  %v8071_v43 = vld [vmem:[%s12261_s0 + $0x264] sm:$0xf]  ;;  %v709_v36 = vshrl.u32 %v68_v23, 16  ;;  %v8072_v16 = vld [vmem:[%s12261_s0 + $0x268] sm:$0xf] }
 0x173   :  { %v2917_v61 = vshrl.u32 %v8071_v43, 16  ;;  %v2920_v60 = vshll.u32 %v8071_v43, 16  ;;  %v2926_v23 = vshll.u32 %v8072_v16, 16  ;;  %v2930_v51 = vshrl.u32 %v8072_v16, 16 }
 0x174   :  { %12267 = vst [vmem:[#allocation3_spill] sm:$0xff] %v9983_v45  ;;  %v1598_v33 = vpop.f32.mrf.mxu1  ;;  %v711_v39 = vrot.slane %v709_v36, 4  ;;  %v715_v36 = vshll.u32 %v108_v29, 16  ;;  %v976_v16 = vpack.c.b16 %v936_v9, %v935_v17  ;;  %v8892_v17 = vld [vmem:[%s12261_s0 + $0x264] sm:$0xff]  ;;  %v8860_v9 = vld [vmem:[%s12261_s0 + $0x258] sm:$0xff] }
 0x175   :  { %v2919_v59 = vrot.slane %v2917_v61, 4  ;;  %v2922_v44 = vrot.slane %v2920_v60, 5  ;;  %v2928_v11 = vrot.slane %v2926_v23, 5 }
 0x176   :  { %8118 = vmatmul.msk.bf16.gmra.mxu3 %vm985_vm3, %v3196_v19  ;;  %7990 = vmatmul.msk.bf16.gmra.mxu2 %vm985_vm3, %v8891_v31  ;;  %v712_v43 = vor.u32 %v711_v39, %v707_v6  ;;  %v717_v61 = vrot.slane %v715_v36, 5  ;;  %v69_v39 = vld [vmem:[%s12261_s0 + $0x270] sm:$0xf] }
 0x177   :  { %v1167_v15 = vpop.f32.mrf.mxu0  ;;  %7765 = vmatmul.msk.bf16.gmra.mxu1 %vm985_vm3, %v8859_v0  ;;  %v702_v0 = vor.u32 %v701_v52, %v698_v53  ;;  %v2923_v18 = vor.u32 %v2922_v44, %v2919_v59  ;;  %v720_v44 = vshrl.u32 %v69_v39, 16 }
 0x178   :  { %v1596_v32 = vadd.f32 %v1595_v2, %v1167_v15  ;;  %v2915_v2 = vsel %vm9045_vm4, %v2910_v24, %v2914_v48  ;;  %v713_v24 = vrot.slane %v712_v43, 4  ;;  %v723_v43 = vshll.u32 %v69_v39, 16 }
 0x179   :  { %v3384_v19 = vpop.f32.mrf.mxu3  ;;  %v2095_v13 = vpop.f32.mrf.mxu2  ;;  %v3157_v15 = vunpack.c.l.b16 %v2915_v2  ;;  %v703_v5 = vrot.slane %v702_v0, 4  ;;  %v2924_v56 = vrot.slane %v2923_v18, 4 }
 0x17a   :  { %v10010_v46 = vadd.f32 %v3384_v19, %v2208_v12  ;;  %v2209_v31 = vadd.f32 %v2092_v34, %v1596_v32  ;;  %v8073_v12 = vld [vmem:[%s12261_s0 + $0x26c] sm:$0x1]  ;;  %v2932_v34 = vrot.slane %v2930_v51, 4 }
 0x17b   :  { %v2936_v19 = vshll.u32 %v8073_v12, 16  ;;  %v3197_v23 = vpack.c.b16 %v3157_v15, %v3156_v7  ;;  %v708_v0 = vsel %vm9045_vm4, %v703_v5, %v707_v6  ;;  %v2929_v15 = vsel %vm9045_vm4, %v2924_v56, %v2928_v11 }
 0x17c   :  { %12268 = vst [vmem:[#allocation4_spill] sm:$0xff] %v10010_v46  ;;  %v1600_v41 = vpop.f32.mrf.mxu1  ;;  %v2933_v53 = vor.u32 %v2932_v34, %v2928_v11  ;;  %v8074_v34 = vld [vmem:[%s12261_s0 + $0x27c] sm:$0xf]  ;;  %v937_v6 = vunpack.c.l.b16 %v708_v0 }
 0x17d   :  { %v2938_v2 = vrot.slane %v2936_v19, 5  ;;  %v722_v19 = vrot.slane %v720_v44, 4 }
 0x17e   :  { %v2934_v59 = vrot.slane %v2933_v53, 4  ;;  %v725_v53 = vrot.slane %v723_v43, 5 }
 0x17f   :  { %v1170_v32 = vpop.f32.mrf.mxu0 }
 0x180   :  { %v1599_v48 = vadd.f32 %v1598_v33, %v1170_v32  ;;  %v70_v33 = vld [vmem:[%s12261_s0 + $0x274] sm:$0xf]  ;;  %v8075_v32 = vld [vmem:[%s12261_s0 + $0x280] sm:$0xf]  ;;  %v2939_v18 = vsel %vm9045_vm4, %v2934_v59, %v2938_v2  ;;  %v3158_v2 = vunpack.c.l.b16 %v2929_v15  ;;  %v726_v59 = vor.u32 %v725_v53, %v722_v19 }
 0x181   :  { %v3386_v52 = vpop.f32.mrf.mxu3  ;;  %v2097_v60 = vpop.f32.mrf.mxu2  ;;  %v729_v36 = vshll.u32 %v70_v33, 16  ;;  %v733_v12 = vshrl.u32 %v70_v33, 16  ;;  %v109_v33 = vld [vmem:[%s12261_s0 + $0x278] sm:$0x1]  ;;  %v3159_v0 = vunpack.c.l.b16 %v2939_v18 }
 0x182   :  { %v10023_v29 = vadd.f32 %v3386_v52, %v2209_v31  ;;  %7605 = vmatmul.msk.bf16.gmra.mxu0 %vm985_vm3, %v976_v16  ;;  %v2210_v51 = vadd.f32 %v2095_v13, %v1599_v48  ;;  %v718_v13 = vsel %vm9045_vm4, %v713_v24, %v717_v61  ;;  %v2941_v48 = vshrl.u32 %v8074_v34, 16 }
 0x183   :  { %v938_v7 = vunpack.c.l.b16 %v718_v13  ;;  %v10052_v52 = vrot.slane %v729_v36, 5  ;;  %v735_v39 = vrot.slane %v733_v12, 4  ;;  %v739_v43 = vshll.u32 %v109_v33, 16 }
 0x184   :  { %12269 = vst [vmem:[#allocation5_spill] sm:$0xff] %v10023_v29  ;;  %v1603_v31 = vpop.f32.mrf.mxu1  ;;  %v2943_v36 = vrot.slane %v2941_v48, 4  ;;  %v727_v19 = vrot.slane %v726_v59, 4 }
 0x185   :  { %v977_v13 = vpack.c.b16 %v938_v7, %v937_v6  ;;  %v736_v44 = vor.u32 %v735_v39, %v10052_v52  ;;  %v71_v6 = vld [vmem:[%s12261_s0 + $0x288] sm:$0xf]  ;;  %v72_v7 = vld [vmem:[%s12261_s0 + $0x28c] sm:$0xf]  ;;  %v741_v48 = vrot.slane %v739_v43, 5 }
 0x186   :  { %8119 = vmatmul.msk.bf16.gmra.mxu3 %vm985_vm3, %v3197_v23  ;;  %7991 = vmatmul.msk.bf16.gmra.mxu2 %vm985_vm3, %v8892_v17  ;;  %v2944_v23 = vshll.u32 %v8074_v34, 16  ;;  %v753_v59 = vshll.u32 %v72_v7, 16 }
 0x187   :  { %v1172_v16 = vpop.f32.mrf.mxu0  ;;  %7766 = vmatmul.msk.bf16.gmra.mxu1 %vm985_vm3, %v8860_v9  ;;  %v2954_v9 = vshrl.u32 %v8075_v32, 16 }
 0x188   :  { %v1601_v5 = vadd.f32 %v1600_v41, %v1172_v16  ;;  %v2950_v41 = vshll.u32 %v8075_v32, 16  ;;  %v3198_v32 = vpack.c.b16 %v3159_v0, %v3158_v2  ;;  %v744_v2 = vshrl.u32 %v71_v6, 16 }
 0x189   :  { %v3389_v24 = vpop.f32.mrf.mxu3  ;;  %v2100_v61 = vpop.f32.mrf.mxu2  ;;  %v2956_v34 = vrot.slane %v2954_v9, 4  ;;  %v8861_v9 = vld [vmem:[%s12261_s0 + $0x270] sm:$0xff]  ;;  %v747_v0 = vshll.u32 %v71_v6, 16 }
 0x18a   :  { %v10054_v17 = vadd.f32 %v3389_v24, %v2210_v51  ;;  %v2211_v11 = vadd.f32 %v2097_v60, %v1601_v5  ;;  %v8076_v51 = vld [vmem:[%s12261_s0 + $0x284] sm:$0x1]  ;;  %v2946_v60 = vrot.slane %v2944_v23, 5  ;;  %v10063_v12 = vrot.slane %v2950_v41, 5  ;;  %v8893_v23 = vld [vmem:[%s12261_s0 + $0x27c] sm:$0xff] }
 0x18b   :  { %v737_v24 = vrot.slane %v736_v44, 4  ;;  %v2960_v53 = vshll.u32 %v8076_v51, 16  ;;  %v732_v44 = vsel %vm9045_vm4, %v727_v19, %v10052_v52  ;;  %v8078_v51 = vld [vmem:[%s12261_s0 + $0x298] sm:$0xf]  ;;  %v746_v6 = vrot.slane %v744_v2, 4 }
 0x18c   :  { %12270 = vst [vmem:[#allocation6_spill] sm:$0xff] %v10054_v17  ;;  %v1605_v56 = vpop.f32.mrf.mxu1  ;;  %v2947_v33 = vor.u32 %v2946_v60, %v2943_v36  ;;  %v2957_v41 = vor.u32 %v2956_v34, %v10063_v12  ;;  %v749_v52 = vrot.slane %v747_v0, 5  ;;  %v2978_v17 = vshrl.u32 %v8078_v51, 16 }
 0x18d   :  { %v2962_v43 = vrot.slane %v2960_v53, 5  ;;  %v742_v36 = vsel %vm9045_vm4, %v737_v24, %v741_v48  ;;  %v110_v24 = vld [vmem:[%s12261_s0 + $0x290] sm:$0x1] }
 0x18e   :  { %v2948_v60 = vrot.slane %v2947_v33, 4  ;;  %v2958_v34 = vrot.slane %v2957_v41, 4  ;;  %v940_v41 = vunpack.c.l.b16 %v742_v36  ;;  %v750_v2 = vor.u32 %v749_v52, %v746_v6 }
 0x18f   :  { %v1175_v16 = vpop.f32.mrf.mxu0 }
 0x190   :  { %v1604_v5 = vadd.f32 %v1603_v31, %v1175_v16 }
 0x191   :  { %v3391_v15 = vpop.f32.mrf.mxu3  ;;  %v2102_v18 = vpop.f32.mrf.mxu2 }
 0x192   :  { %v10071_v39 = vadd.f32 %v3391_v15, %v2211_v11  ;;  %7606 = vmatmul.msk.bf16.gmra.mxu0 %vm985_vm3, %v977_v13  ;;  %v2212_v31 = vadd.f32 %v2100_v61, %v1604_v5  ;;  %v8077_v11 = vld [vmem:[%s12261_s0 + $0x294] sm:$0xf]  ;;  %v757_v61 = vshrl.u32 %v72_v7, 16  ;;  %v755_v7 = vrot.slane %v753_v59, 5 }
 0x193   :  { %v2965_v16 = vshrl.u32 %v8077_v11, 16  ;;  %v2968_v15 = vshll.u32 %v8077_v11, 16 }
 0x194   :  { %12271 = vst [vmem:[#allocation7_spill] sm:$0xff] %v10071_v39  ;;  %v1608_v13 = vpop.f32.mrf.mxu1  ;;  %v759_v53 = vrot.slane %v757_v61, 4  ;;  %v2974_v39 = vshll.u32 %v8078_v51, 16 }
 0x195   :  { %v2967_v0 = vrot.slane %v2965_v16, 4  ;;  %v2970_v59 = vrot.slane %v2968_v15, 5 }
 0x196   :  { %8120 = vmatmul.msk.bf16.gmra.mxu3 %vm985_vm3, %v3198_v32  ;;  %7992 = vmatmul.msk.bf16.gmra.mxu2 %vm985_vm3, %v8893_v23  ;;  %v939_v23 = vunpack.c.l.b16 %v732_v44  ;;  %v760_v61 = vor.u32 %v759_v53, %v755_v7  ;;  %v763_v44 = vshll.u32 %v110_v24, 16  ;;  %v2976_v51 = vrot.slane %v2974_v39, 5  ;;  %v73_v53 = vld [vmem:[%s12261_s0 + $0x2a0] sm:$0xf] }
 0x197   :  { %v1177_v5 = vpop.f32.mrf.mxu0  ;;  %7767 = vmatmul.msk.bf16.gmra.mxu1 %vm985_vm3, %v8861_v9  ;;  %v2953_v9 = vsel %vm9045_vm4, %v2948_v60, %v10063_v12  ;;  %v751_v12 = vrot.slane %v750_v2, 4  ;;  %v2971_v60 = vor.u32 %v2970_v59, %v2967_v0  ;;  %v768_v59 = vshrl.u32 %v73_v53, 16 }
 0x198   :  { %v1606_v19 = vadd.f32 %v1605_v56, %v1177_v5  ;;  %v2963_v56 = vsel %vm9045_vm4, %v2958_v34, %v2962_v43  ;;  %v978_v36 = vpack.c.b16 %v940_v41, %v939_v23  ;;  %v3160_v5 = vunpack.c.l.b16 %v2953_v9  ;;  %v8894_v23 = vld [vmem:[%s12261_s0 + $0x294] sm:$0xff]  ;;  %v8862_v41 = vld [vmem:[%s12261_s0 + $0x288] sm:$0xff] }
 0x199   :  { %v3394_v32 = vpop.f32.mrf.mxu3  ;;  %v2105_v29 = vpop.f32.mrf.mxu2  ;;  %v761_v34 = vrot.slane %v760_v61, 4  ;;  %v765_v16 = vrot.slane %v763_v44, 5  ;;  %v2972_v9 = vrot.slane %v2971_v60, 4  ;;  %v756_v2 = vsel %vm9045_vm4, %v751_v12, %v755_v7 }
 0x19a   :  { %v10098_v48 = vadd.f32 %v3394_v32, %v2212_v31  ;;  %v2213_v33 = vadd.f32 %v2102_v18, %v1606_v19  ;;  %v8079_v31 = vld [vmem:[%s12261_s0 + $0x29c] sm:$0x1]  ;;  %v2980_v18 = vrot.slane %v2978_v17, 4  ;;  %v3161_v19 = vunpack.c.l.b16 %v2963_v56 }
 0x19b   :  { %v771_v61 = vshll.u32 %v73_v53, 16  ;;  %v941_v7 = vunpack.c.l.b16 %v756_v2  ;;  %v770_v60 = vrot.slane %v768_v59, 4 }
 0x19c   :  { %12272 = vst [vmem:[#allocation8_spill] sm:$0xff] %v10098_v48  ;;  %v1610_v11 = vpop.f32.mrf.mxu1  ;;  %v2984_v48 = vshll.u32 %v8079_v31, 16  ;;  %v2981_v6 = vor.u32 %v2980_v18, %v2976_v51  ;;  %v3199_v17 = vpack.c.b16 %v3161_v19, %v3160_v5  ;;  %v8080_v18 = vld [vmem:[%s12261_s0 + $0x2ac] sm:$0xf]  ;;  %v2977_v5 = vsel %vm9045_vm4, %v2972_v9, %v2976_v51  ;;  %v8081_v19 = vld [vmem:[%s12261_s0 + $0x2b0] sm:$0xf] }
 0x19e   :  { %v2986_v56 = vrot.slane %v2984_v48, 5  ;;  %v2982_v0 = vrot.slane %v2981_v6, 4  ;;  %v773_v6 = vrot.slane %v771_v61, 5 }
 0x19f   :  { %v1180_v32 = vpop.f32.mrf.mxu0 }
 0x1a0   :  { %v1609_v43 = vadd.f32 %v1608_v13, %v1180_v32  ;;  %v74_v13 = vld [vmem:[%s12261_s0 + $0x2a4] sm:$0xf]  ;;  %v2987_v12 = vsel %vm9045_vm4, %v2982_v0, %v2986_v56  ;;  %v3162_v56 = vunpack.c.l.b16 %v2977_v5  ;;  %v774_v0 = vor.u32 %v773_v6, %v770_v60 }
 0x1a1   :  { %v3396_v52 = vpop.f32.mrf.mxu3  ;;  %v2107_v15 = vpop.f32.mrf.mxu2  ;;  %v777_v44 = vshll.u32 %v74_v13, 16  ;;  %v781_v31 = vshrl.u32 %v74_v13, 16  ;;  %v111_v13 = vld [vmem:[%s12261_s0 + $0x2a8] sm:$0x1]  ;;  %v3163_v2 = vunpack.c.l.b16 %v2987_v12 }
 0x1a2   :  { %v10111_v24 = vadd.f32 %v3396_v52, %v2213_v33  ;;  %7607 = vmatmul.msk.bf16.gmra.mxu0 %vm985_vm3, %v978_v36  ;;  %v2214_v39 = vadd.f32 %v2105_v29, %v1609_v43  ;;  %v766_v29 = vsel %vm9045_vm4, %v761_v34, %v765_v16  ;;  %v2989_v43 = vshrl.u32 %v8080_v18, 16 }
 0x1a3   :  { %v942_v36 = vunpack.c.l.b16 %v766_v29  ;;  %v10140_v52 = vrot.slane %v777_v44, 5  ;;  %v783_v53 = vrot.slane %v781_v31, 4  ;;  %v787_v61 = vshll.u32 %v111_v13, 16 }
 0x1a4   :  { %12273 = vst [vmem:[#allocation9_spill] sm:$0xff] %v10111_v24  ;;  %v1613_v33 = vpop.f32.mrf.mxu1  ;;  %v2991_v44 = vrot.slane %v2989_v43, 4  ;;  %v775_v60 = vrot.slane %v774_v0, 4 }
 0x1a5   :  { %v979_v29 = vpack.c.b16 %v942_v36, %v941_v7  ;;  %v784_v59 = vor.u32 %v783_v53, %v10140_v52  ;;  %v75_v7 = vld [vmem:[%s12261_s0 + $0x2b8] sm:$0xf]  ;;  %v76_v36 = vld [vmem:[%s12261_s0 + $0x2bc] sm:$0xf]  ;;  %v789_v43 = vrot.slane %v787_v61, 5 }
 0x1a6   :  { %8121 = vmatmul.msk.bf16.gmra.mxu3 %vm985_vm3, %v3199_v17  ;;  %7993 = vmatmul.msk.bf16.gmra.mxu2 %vm985_vm3, %v8894_v23  ;;  %v2992_v17 = vshll.u32 %v8080_v18, 16  ;;  %v801_v0 = vshll.u32 %v76_v36, 16 }
 0x1a7   :  { %v1182_v48 = vpop.f32.mrf.mxu0  ;;  %7768 = vmatmul.msk.bf16.gmra.mxu1 %vm985_vm3, %v8862_v41  ;;  %v3002_v41 = vshrl.u32 %v8081_v19, 16 }
 0x1a8   :  { %v1611_v32 = vadd.f32 %v1610_v11, %v1182_v48  ;;  %v2998_v11 = vshll.u32 %v8081_v19, 16  ;;  %v3200_v19 = vpack.c.b16 %v3163_v2, %v3162_v56  ;;  %v792_v56 = vshrl.u32 %v75_v7, 16 }
 0x1a9   :  { %v3399_v34 = vpop.f32.mrf.mxu3  ;;  %v2110_v16 = vpop.f32.mrf.mxu2  ;;  %v3004_v18 = vrot.slane %v3002_v41, 4  ;;  %v8863_v41 = vld [vmem:[%s12261_s0 + $0x2a0] sm:$0xff]  ;;  %v795_v2 = vshll.u32 %v75_v7, 16 }
 0x1aa   :  { %v10142_v23 = vadd.f32 %v3399_v34, %v2214_v39  ;;  %v2215_v51 = vadd.f32 %v2107_v15, %v1611_v32  ;;  %v8082_v39 = vld [vmem:[%s12261_s0 + $0x2b4] sm:$0x1]  ;;  %v2994_v15 = vrot.slane %v2992_v17, 5  ;;  %v10151_v31 = vrot.slane %v2998_v11, 5  ;;  %v8895_v17 = vld [vmem:[%s12261_s0 + $0x2ac] sm:$0xff] }
 0x1ab   :  { %v785_v34 = vrot.slane %v784_v59, 4  ;;  %v3008_v6 = vshll.u32 %v8082_v39, 16  ;;  %v780_v59 = vsel %vm9045_vm4, %v775_v60, %v10140_v52  ;;  %v8084_v39 = vld [vmem:[%s12261_s0 + $0x2c8] sm:$0xf]  ;;  %v794_v7 = vrot.slane %v792_v56, 4 }
 0x1ac   :  { %12274 = vst [vmem:[#allocation10_spill] sm:$0xff] %v10142_v23  ;;  %v1615_v9 = vpop.f32.mrf.mxu1  ;;  %v2995_v13 = vor.u32 %v2994_v15, %v2991_v44  ;;  %v3005_v11 = vor.u32 %v3004_v18, %v10151_v31  ;;  %v797_v52 = vrot.slane %v795_v2, 5  ;;  %v3026_v23 = vshrl.u32 %v8084_v39, 16 }
 0x1ad   :  { %v3010_v61 = vrot.slane %v3008_v6, 5  ;;  %v790_v44 = vsel %vm9045_vm4, %v785_v34, %v789_v43  ;;  %v112_v34 = vld [vmem:[%s12261_s0 + $0x2c0] sm:$0x1] }
 0x1ae   :  { %v2996_v15 = vrot.slane %v2995_v13, 4  ;;  %v3006_v18 = vrot.slane %v3005_v11, 4  ;;  %v944_v11 = vunpack.c.l.b16 %v790_v44  ;;  %v798_v56 = vor.u32 %v797_v52, %v794_v7 }
 0x1af   :  { %v1185_v48 = vpop.f32.mrf.mxu0 }
 0x1b0   :  { %v1614_v32 = vadd.f32 %v1613_v33, %v1185_v48 }
 0x1b1   :  { %v3401_v5 = vpop.f32.mrf.mxu3  ;;  %v2112_v12 = vpop.f32.mrf.mxu2 }
 0x1b2   :  { %v10159_v53 = vadd.f32 %v3401_v5, %v2215_v51  ;;  %7608 = vmatmul.msk.bf16.gmra.mxu0 %vm985_vm3, %v979_v29  ;;  %v2216_v33 = vadd.f32 %v2110_v16, %v1614_v32  ;;  %v8083_v51 = vld [vmem:[%s12261_s0 + $0x2c4] sm:$0xf]  ;;  %v805_v16 = vshrl.u32 %v76_v36, 16  ;;  %v803_v36 = vrot.slane %v801_v0, 5 }
 0x1b3   :  { %v3013_v48 = vshrl.u32 %v8083_v51, 16  ;;  %v3016_v5 = vshll.u32 %v8083_v51, 16 }
 0x1b4   :  { %12275 = vst [vmem:[#allocation11_spill] sm:$0xff] %v10159_v53  ;;  %v1618_v29 = vpop.f32.mrf.mxu1  ;;  %v807_v6 = vrot.slane %v805_v16, 4  ;;  %v3022_v53 = vshll.u32 %v8084_v39, 16 }
 0x1b5   :  { %v3015_v2 = vrot.slane %v3013_v48, 4  ;;  %v3018_v0 = vrot.slane %v3016_v5, 5 }
 0x1b6   :  { %8122 = vmatmul.msk.bf16.gmra.mxu3 %vm985_vm3, %v3200_v19  ;;  %7994 = vmatmul.msk.bf16.gmra.mxu2 %vm985_vm3, %v8895_v17  ;;  %v943_v17 = vunpack.c.l.b16 %v780_v59  ;;  %v808_v16 = vor.u32 %v807_v6, %v803_v36  ;;  %v811_v59 = vshll.u32 %v112_v34, 16  ;;  %v3024_v39 = vrot.slane %v3022_v53, 5  ;;  %v77_v6 = vld [vmem:[%s12261_s0 + $0x2d0] sm:$0xf] }
 0x1b7   :  { %v1187_v32 = vpop.f32.mrf.mxu0  ;;  %7769 = vmatmul.msk.bf16.gmra.mxu1 %vm985_vm3, %v8863_v41  ;;  %v3001_v41 = vsel %vm9045_vm4, %v2996_v15, %v10151_v31  ;;  %v799_v31 = vrot.slane %v798_v56, 4  ;;  %v3019_v15 = vor.u32 %v3018_v0, %v3015_v2  ;;  %v816_v0 = vshrl.u32 %v77_v6, 16 }
 0x1b8   :  { %v1616_v60 = vadd.f32 %v1615_v9, %v1187_v32  ;;  %v3011_v9 = vsel %vm9045_vm4, %v3006_v18, %v3010_v61  ;;  %v980_v44 = vpack.c.b16 %v944_v11, %v943_v17  ;;  %v3164_v32 = vunpack.c.l.b16 %v3001_v41  ;;  %v8896_v17 = vld [vmem:[%s12261_s0 + $0x2c4] sm:$0xff]  ;;  %v8864_v11 = vld [vmem:[%s12261_s0 + $0x2b8] sm:$0xff] }
 0x1b9   :  { %v3404_v19 = vpop.f32.mrf.mxu3  ;;  %v2115_v24 = vpop.f32.mrf.mxu2  ;;  %v809_v18 = vrot.slane %v808_v16, 4  ;;  %v813_v48 = vrot.slane %v811_v59, 5  ;;  %v3020_v41 = vrot.slane %v3019_v15, 4  ;;  %v804_v56 = vsel %vm9045_vm4, %v799_v31, %v803_v36 }
 0x1ba   :  { %v10186_v43 = vadd.f32 %v3404_v19, %v2216_v33  ;;  %v2217_v13 = vadd.f32 %v2112_v12, %v1616_v60  ;;  %v8085_v33 = vld [vmem:[%s12261_s0 + $0x2cc] sm:$0x1]  ;;  %v3028_v12 = vrot.slane %v3026_v23, 4  ;;  %v3165_v60 = vunpack.c.l.b16 %v3011_v9 }
 0x1bb   :  { %v819_v16 = vshll.u32 %v77_v6, 16  ;;  %v945_v36 = vunpack.c.l.b16 %v804_v56  ;;  %v818_v15 = vrot.slane %v816_v0, 4 }
 0x1bc   :  { %12276 = vst [vmem:[#allocation12_spill] sm:$0xff] %v10186_v43  ;;  %v1620_v51 = vpop.f32.mrf.mxu1  ;;  %v3032_v43 = vshll.u32 %v8085_v33, 16  ;;  %v3029_v7 = vor.u32 %v3028_v12, %v3024_v39  ;;  %v3201_v23 = vpack.c.b16 %v3165_v60, %v3164_v32  ;;  %v8086_v12 = vld [vmem:[%s12261_s0 + $0x2dc] sm:$0xf]  ;;  %v3025_v32 = vsel %vm9045_vm4, %v3020_v41, %v3024_v39  ;;  %v8087_v60 = vld [vmem:[%s12261_s0 + $0x2e0] sm:$0xf] }
 0x1be   :  { %v3034_v9 = vrot.slane %v3032_v43, 5  ;;  %v3030_v2 = vrot.slane %v3029_v7, 4  ;;  %v821_v7 = vrot.slane %v819_v16, 5 }
 0x1bf   :  { %v1190_v19 = vpop.f32.mrf.mxu0 }
 0x1c0   :  { %v1619_v61 = vadd.f32 %v1618_v29, %v1190_v19  ;;  %v78_v29 = vld [vmem:[%s12261_s0 + $0x2d4] sm:$0xf]  ;;  %v3035_v31 = vsel %vm9045_vm4, %v3030_v2, %v3034_v9  ;;  %v3166_v9 = vunpack.c.l.b16 %v3025_v32  ;;  %v822_v2 = vor.u32 %v821_v7, %v818_v15 }
 0x1c1   :  { %v3406_v52 = vpop.f32.mrf.mxu3  ;;  %v2117_v5 = vpop.f32.mrf.mxu2  ;;  %v825_v59 = vshll.u32 %v78_v29, 16  ;;  %v829_v33 = vshrl.u32 %v78_v29, 16  ;;  %v113_v29 = vld [vmem:[%s12261_s0 + $0x2d8] sm:$0x1]  ;;  %v3167_v56 = vunpack.c.l.b16 %v3035_v31 }
 0x1c2   :  { %v10199_v34 = vadd.f32 %v3406_v52, %v2217_v13  ;;  %7609 = vmatmul.msk.bf16.gmra.mxu0 %vm985_vm3, %v980_v44  ;;  %v2218_v53 = vadd.f32 %v2115_v24, %v1619_v61  ;;  %v814_v24 = vsel %vm9045_vm4, %v809_v18, %v813_v48  ;;  %v3037_v61 = vshrl.u32 %v8086_v12, 16 }
 0x1c3   :  { %v946_v44 = vunpack.c.l.b16 %v814_v24  ;;  %v10228_v52 = vrot.slane %v825_v59, 5  ;;  %v831_v6 = vrot.slane %v829_v33, 4  ;;  %v835_v16 = vshll.u32 %v113_v29, 16 }
 0x1c4   :  { %12277 = vst [vmem:[#allocation13_spill] sm:$0xff] %v10199_v34  ;;  %v1623_v13 = vpop.f32.mrf.mxu1  ;;  %v3039_v59 = vrot.slane %v3037_v61, 4  ;;  %v823_v15 = vrot.slane %v822_v2, 4 }
 0x1c5   :  { %v981_v24 = vpack.c.b16 %v946_v44, %v945_v36  ;;  %v832_v0 = vor.u32 %v831_v6, %v10228_v52  ;;  %v79_v36 = vld [vmem:[%s12261_s0 + $0x2e8] sm:$0xf]  ;;  %v80_v44 = vld [vmem:[%s12261_s0 + $0x2ec] sm:$0xf]  ;;  %v837_v61 = vrot.slane %v835_v16, 5 }
 0x1c6   :  { %8123 = vmatmul.msk.bf16.gmra.mxu3 %vm985_vm3, %v3201_v23  ;;  %7995 = vmatmul.msk.bf16.gmra.mxu2 %vm985_vm3, %v8896_v17  ;;  %v3040_v23 = vshll.u32 %v8086_v12, 16  ;;  %v849_v2 = vshll.u32 %v80_v44, 16 }
 0x1c7   :  { %v1192_v43 = vpop.f32.mrf.mxu0  ;;  %7770 = vmatmul.msk.bf16.gmra.mxu1 %vm985_vm3, %v8864_v11  ;;  %v3050_v11 = vshrl.u32 %v8087_v60, 16 }
 0x1c8   :  { %v1621_v19 = vadd.f32 %v1620_v51, %v1192_v43  ;;  %v3046_v51 = vshll.u32 %v8087_v60, 16  ;;  %v3202_v60 = vpack.c.b16 %v3167_v56, %v3166_v9  ;;  %v840_v9 = vshrl.u32 %v79_v36, 16 }
 0x1c9   :  { %v3409_v18 = vpop.f32.mrf.mxu3  ;;  %v2120_v48 = vpop.f32.mrf.mxu2  ;;  %v3052_v12 = vrot.slane %v3050_v11, 4  ;;  %v8865_v11 = vld [vmem:[%s12261_s0 + $0x2d0] sm:$0xff]  ;;  %v843_v56 = vshll.u32 %v79_v36, 16 }
 0x1ca   :  { %v10230_v17 = vadd.f32 %v3409_v18, %v2218_v53  ;;  %v2219_v39 = vadd.f32 %v2117_v5, %v1621_v19  ;;  %v8088_v53 = vld [vmem:[%s12261_s0 + $0x2e4] sm:$0x1]  ;;  %v3042_v5 = vrot.slane %v3040_v23, 5  ;;  %v10239_v33 = vrot.slane %v3046_v51, 5  ;;  %v8897_v23 = vld [vmem:[%s12261_s0 + $0x2dc] sm:$0xff] }
 0x1cb   :  { %v833_v18 = vrot.slane %v832_v0, 4  ;;  %v3056_v7 = vshll.u32 %v8088_v53, 16  ;;  %v828_v0 = vsel %vm9045_vm4, %v823_v15, %v10228_v52  ;;  %v8090_v53 = vld [vmem:[%s12261_s0 + $0x2f8] sm:$0xf]  ;;  %v842_v36 = vrot.slane %v840_v9, 4 }
 0x1cc   :  { %12278 = vst [vmem:[#allocation14_spill] sm:$0xff] %v10230_v17  ;;  %v1625_v41 = vpop.f32.mrf.mxu1  ;;  %v3043_v29 = vor.u32 %v3042_v5, %v3039_v59  ;;  %v3053_v51 = vor.u32 %v3052_v12, %v10239_v33  ;;  %v845_v52 = vrot.slane %v843_v56, 5  ;;  %v3074_v17 = vshrl.u32 %v8090_v53, 16 }
 0x1cd   :  { %v3058_v16 = vrot.slane %v3056_v7, 5  ;;  %v838_v59 = vsel %vm9045_vm4, %v833_v18, %v837_v61  ;;  %v114_v18 = vld [vmem:[%s12261_s0 + $0x2f0] sm:$0x1] }
 0x1ce   :  { %v3044_v5 = vrot.slane %v3043_v29, 4  ;;  %v3054_v12 = vrot.slane %v3053_v51, 4  ;;  %v948_v51 = vunpack.c.l.b16 %v838_v59  ;;  %v846_v9 = vor.u32 %v845_v52, %v842_v36 }
 0x1cf   :  { %v1195_v43 = vpop.f32.mrf.mxu0 }
 0x1d0   :  { %v1624_v19 = vadd.f32 %v1623_v13, %v1195_v43 }
 0x1d1   :  { %v3411_v32 = vpop.f32.mrf.mxu3  ;;  %v2122_v31 = vpop.f32.mrf.mxu2 }
 0x1d2   :  { %v10247_v6 = vadd.f32 %v3411_v32, %v2219_v39  ;;  %7610 = vmatmul.msk.bf16.gmra.mxu0 %vm985_vm3, %v981_v24  ;;  %v2220_v13 = vadd.f32 %v2120_v48, %v1624_v19  ;;  %v8089_v39 = vld [vmem:[%s12261_s0 + $0x2f4] sm:$0xf]  ;;  %v853_v48 = vshrl.u32 %v80_v44, 16  ;;  %v851_v44 = vrot.slane %v849_v2, 5 }
 0x1d3   :  { %v3061_v43 = vshrl.u32 %v8089_v39, 16  ;;  %v3064_v32 = vshll.u32 %v8089_v39, 16 }
 0x1d4   :  { %12279 = vst [vmem:[#allocation15_spill] sm:$0xff] %v10247_v6  ;;  %v1628_v24 = vpop.f32.mrf.mxu1  ;;  %v855_v7 = vrot.slane %v853_v48, 4  ;;  %v3070_v6 = vshll.u32 %v8090_v53, 16 }
 0x1d5   :  { %v3063_v56 = vrot.slane %v3061_v43, 4  ;;  %v3066_v2 = vrot.slane %v3064_v32, 5 }
 0x1d6   :  { %8124 = vmatmul.msk.bf16.gmra.mxu3 %vm985_vm3, %v3202_v60  ;;  %7996 = vmatmul.msk.bf16.gmra.mxu2 %vm985_vm3, %v8897_v23  ;;  %v947_v23 = vunpack.c.l.b16 %v828_v0  ;;  %v856_v48 = vor.u32 %v855_v7, %v851_v44  ;;  %v859_v0 = vshll.u32 %v114_v18, 16  ;;  %v3072_v53 = vrot.slane %v3070_v6, 5  ;;  %v81_v7 = vld [vmem:[%s12261_s0 + $0x300] sm:$0xf] }
 0x1d7   :  { %v1197_v19 = vpop.f32.mrf.mxu0  ;;  %7771 = vmatmul.msk.bf16.gmra.mxu1 %vm985_vm3, %v8865_v11  ;;  %v3049_v11 = vsel %vm9045_vm4, %v3044_v5, %v10239_v33  ;;  %v847_v33 = vrot.slane %v846_v9, 4  ;;  %v3067_v5 = vor.u32 %v3066_v2, %v3063_v56  ;;  %v864_v2 = vshrl.u32 %v81_v7, 16 }
 0x1d8   :  { %v1626_v15 = vadd.f32 %v1625_v41, %v1197_v19  ;;  %v3059_v41 = vsel %vm9045_vm4, %v3054_v12, %v3058_v16  ;;  %v982_v59 = vpack.c.b16 %v948_v51, %v947_v23  ;;  %v3168_v19 = vunpack.c.l.b16 %v3049_v11  ;;  %v8898_v23 = vld [vmem:[%s12261_s0 + $0x2f4] sm:$0xff] }
 0x1d9   :  { %v3414_v60 = vpop.f32.mrf.mxu3  ;;  %v2125_v34 = vpop.f32.mrf.mxu2  ;;  %v857_v12 = vrot.slane %v856_v48, 4  ;;  %v861_v43 = vrot.slane %v859_v0, 5  ;;  %v3068_v51 = vrot.slane %v3067_v5, 4  ;;  %v852_v9 = vsel %vm9045_vm4, %v847_v33, %v851_v44  ;;  %v8092_v0 = vld [vmem:[%s12261_s0 + $0x30c] sm:$0xf] }
 0x1da   :  { %v10274_v61 = vadd.f32 %v3414_v60, %v2220_v13  ;;  %v2221_v29 = vadd.f32 %v2122_v31, %v1626_v15  ;;  %v8091_v13 = vld [vmem:[%s12261_s0 + $0x2fc] sm:$0x1]  ;;  %v3076_v31 = vrot.slane %v3074_v17, 4  ;;  %v3169_v15 = vunpack.c.l.b16 %v3059_v41  ;;  %v82_v41 = vld [vmem:[%s12261_s0 + $0x304] sm:$0xf] }
 0x1db   :  { %v867_v48 = vshll.u32 %v81_v7, 16  ;;  %v8093_v44 = vld [vmem:[%s12261_s0 + $0x310] sm:$0xf]  ;;  %v866_v5 = vrot.slane %v864_v2, 4  ;;  %v3088_v7 = vshll.u32 %v8092_v0, 16 }
 0x1dc   :  { %12280 = vst [vmem:[#allocation16_spill] sm:$0xff] %v10274_v61  ;;  %v1630_v39 = vpop.f32.mrf.mxu1  ;;  %v3080_v61 = vshll.u32 %v8091_v13, 16  ;;  %v3077_v36 = vor.u32 %v3076_v31, %v3072_v53  ;;  %v3203_v17 = vpack.c.b16 %v3169_v15, %v3168_v19  ;;  %v877_v13 = vshrl.u32 %v82_v41, 16 }
 0x1dd   :  { %v3073_v15 = vsel %vm9045_vm4, %v3068_v51, %v3072_v53  ;;  %v8354_v53 = vld [vmem:[%s12261_s0 + $0x1c] sm:$0xf]  ;;  %v3090_v46 = vrot.slane %v3088_v7, 5 }
 0x1de   :  { %v3082_v11 = vrot.slane %v3080_v61, 5  ;;  %v3078_v56 = vrot.slane %v3077_v36, 4  ;;  %v873_v61 = vshll.u32 %v82_v41, 16  ;;  %v3170_v41 = vunpack.c.l.b16 %v3073_v15  ;;  %v8094_v15 = vld [vmem:[%s12261_s0 + $0x314] sm:$0x1] }
 0x1df   :  { %v1200_v60 = vpop.f32.mrf.mxu0 }
 0x1e0   :  { %v1629_v16 = vadd.f32 %v1628_v24, %v1200_v60  ;;  %v8866_v24 = vld [vmem:[%s12261_s0 + $0x2e8] sm:$0xff]  ;;  %v3083_v33 = vsel %vm9045_vm4, %v3078_v56, %v3082_v11  ;;  %v875_v51 = vrot.slane %v873_v61, 5  ;;  %v879_v11 = vrot.slane %v877_v13, 4 }
 0x1e1   :  { %v3416_v52 = vpop.f32.mrf.mxu3  ;;  %v2127_v32 = vpop.f32.mrf.mxu2 }
 0x1e2   :  { %v10287_v18 = vadd.f32 %v3416_v52, %v2221_v29  ;;  %7611 = vmatmul.msk.bf16.gmra.mxu0 %vm985_vm3, %v982_v59  ;;  %v2222_v6 = vadd.f32 %v2125_v34, %v1629_v16  ;;  %v862_v34 = vsel %vm9045_vm4, %v857_v12, %v861_v43  ;;  %v949_v59 = vunpack.c.l.b16 %v852_v9  ;;  %v8353_v12 = vld [vmem:[%s12261_s0 + $0x18] sm:$0xf]  ;;  %v115_v9 = vld [vmem:[%s12261_s0 + $0x308] sm:$0x1] }
 0x1e3   :  { %v950_v19 = vunpack.c.l.b16 %v862_v34  ;;  %v3085_v16 = vshrl.u32 %v8092_v0, 16  ;;  %v869_v52 = vrot.slane %v867_v48, 5  ;;  %v4197_v34 = vshrl.u32 %v8353_v12, 16 }
 0x1e4   :  { %12281 = vst [vmem:[#allocation17_spill] sm:$0xff] %v10287_v18  ;;  %v1633_v29 = vpop.f32.mrf.mxu1  ;;  %v4200_v56 = vshll.u32 %v8353_v12, 16  ;;  %v3171_v48 = vunpack.c.l.b16 %v3083_v33  ;;  %v880_v61 = vor.u32 %v879_v11, %v875_v51  ;;  %v883_v13 = vshll.u32 %v115_v9, 16 }
 0x1e5   :  { %v3087_v0 = vrot.slane %v3085_v16, 4  ;;  %v870_v18 = vor.u32 %v869_v52, %v866_v5 }
 0x1e6   :  { %8125 = vmatmul.msk.bf16.gmra.mxu3 %vm985_vm3, %v3203_v17  ;;  %7997 = vmatmul.msk.bf16.gmra.mxu2 %vm985_vm3, %v8898_v23  ;;  %v3094_v17 = vshll.u32 %v8093_v44, 16  ;;  %v3098_v23 = vshrl.u32 %v8093_v44, 16  ;;  %v4206_v44 = vshll.u32 %v8354_v53, 16  ;;  %v4202_v12 = vrot.slane %v4200_v56, 5 }
 0x1e7   :  { %v1202_v31 = vpop.f32.mrf.mxu0  ;;  %7772 = vmatmul.msk.bf16.gmra.mxu1 %vm985_vm3, %v8866_v24  ;;  %v3204_v33 = vpack.c.b16 %v3171_v48, %v3170_v41  ;;  %v871_v52 = vrot.slane %v870_v18, 4  ;;  %v3091_v7 = vor.u32 %v3090_v46, %v3087_v0  ;;  %v881_v41 = vrot.slane %v880_v61, 4  ;;  %v8867_v46 = vld [vmem:[%s12261_s0 + $0x300] sm:$0xff] }
 0x1e8   :  { %v1631_v60 = vadd.f32 %v1630_v39, %v1202_v31  ;;  %v4210_v31 = vshrl.u32 %v8354_v53, 16  ;;  %v10327_v45 = vrot.slane %v3094_v17, 5  ;;  %v4208_v16 = vrot.slane %v4206_v44, 5 }
 0x1e9   :  { %v3419_v43 = vpop.f32.mrf.mxu3  ;;  %v2130_v36 = vpop.f32.mrf.mxu2  ;;  %v885_v9 = vrot.slane %v883_v13, 5  ;;  %v3092_v0 = vrot.slane %v3091_v7, 4 }
 0x1ea   :  { %v10322_v39 = vadd.f32 %v3419_v43, %v2222_v6  ;;  %v2223_v24 = vadd.f32 %v2127_v32, %v1631_v60  ;;  %v3100_v6 = vrot.slane %v3098_v23, 4  ;;  %v983_v32 = vpack.c.b16 %v950_v19, %v949_v59  ;;  %v8355_v19 = vld [vmem:[%s12261_s0 + $0x20] sm:$0x1] }
 0x1eb   :  { %v4199_v43 = vrot.slane %v4197_v34, 4  ;;  %v4212_v3 = vrot.slane %v4210_v31, 4  ;;  %v3104_v59 = vshll.u32 %v8094_v15, 16  ;;  %v4216_v48 = vshll.u32 %v8355_v19, 16  ;;  %v8708_v15 = vld [vmem:[%s12261_s0 + $0x28] sm:$0xf] }
 0x1ec   :  { %12282 = vst [vmem:[#allocation18_spill] sm:$0xff] %v10322_v39  ;;  %v1635_v2 = vpop.f32.mrf.mxu1  ;;  %v3101_v17 = vor.u32 %v3100_v6, %v10327_v45 }
 0x1ed   :  { %v4203_v18 = vor.u32 %v4202_v12, %v4199_v43  ;;  %v4213_v56 = vor.u32 %v4212_v3, %v4208_v16  ;;  %v3106_v44 = vrot.slane %v3104_v59, 5  ;;  %v8707_v3 = vld [vmem:[%s12261_s0 + $0x24] sm:$0xf]  ;;  %v4218_v13 = vrot.slane %v4216_v48, 5 }
 0x1ee   :  { %v6052_v59 = vshrl.u32 %v8707_v3, 16  ;;  %v6055_v19 = vshll.u32 %v8707_v3, 16 }
 0x1ef   :  { %v1205_v60 = vpop.f32.mrf.mxu0  ;;  %v4204_v6 = vrot.slane %v4203_v18, 4  ;;  %v4214_v61 = vrot.slane %v4213_v56, 4 }
 0x1f0   :  { %v1634_v39 = vadd.f32 %v1633_v29, %v1205_v60  ;;  %v8899_v29 = vld [vmem:[%s12261_s0 + $0x30c] sm:$0xff] }
 0x1f1   :  { %v3421_v53 = vpop.f32.mrf.mxu3  ;;  %v2132_v5 = vpop.f32.mrf.mxu2 }
 0x1f2   :  { %v10336_v23 = vadd.f32 %v3421_v53, %v2223_v24  ;;  %7612 = vmatmul.msk.bf16.gmra.mxu0 %vm985_vm3, %v983_v32  ;;  %v2224_v11 = vadd.f32 %v2130_v36, %v1634_v39  ;;  %v3102_v24 = vrot.slane %v3101_v17, 4  ;;  %v876_v36 = vsel %vm9045_vm4, %v871_v52, %v875_v51  ;;  %v8356_v51 = vld [vmem:[%s12261_s0 + $0x30] sm:$0xf]  ;;  %v8357_v52 = vld [vmem:[%s12261_s0 + $0x34] sm:$0xf] }
 0x1f3   :  { %v886_v39 = vsel %vm9045_vm4, %v881_v41, %v885_v9  ;;  %v951_v12 = vunpack.c.l.b16 %v876_v36  ;;  %v3097_v53 = vsel %vm9045_vm4, %v3092_v0, %v10327_v45  ;;  %v6061_v41 = vshll.u32 %v8708_v15, 16 }
 0x1f4   :  { %v1638_v34 = vpop.f32.mrf.mxu1  ;;  %v6065_v9 = vshrl.u32 %v8708_v15, 16  ;;  %v4219_v45 = vsel %vm9045_vm4, %v4214_v61, %v4218_v13  ;;  %v4224_v56 = vshll.u32 %v8356_v51, 16  ;;  %v4230_v48 = vshll.u32 %v8357_v52, 16 }
 0x1f5   :  { %v4234_v0 = vshrl.u32 %v8357_v52, 16  ;;  %v4967_v3 = vunpack.c.l.b16 %v4219_v45 }
 0x1f6   :  { %8126 = vmatmul.msk.bf16.gmra.mxu3 %vm985_vm3, %v3204_v33  ;;  %7998 = vmatmul.msk.bf16.gmra.mxu2 %vm985_vm3, %v8899_v29  ;;  %v952_v33 = vunpack.c.l.b16 %v886_v39  ;;  %v4209_v29 = vsel %vm9045_vm4, %v4204_v6, %v4208_v16  ;;  %v6057_v39 = vrot.slane %v6055_v19, 5  ;;  %v6067_v16 = vrot.slane %v6065_v9, 4 }
 0x1f7   :  { %v1207_v31 = vpop.f32.mrf.mxu0  ;;  %7773 = vmatmul.msk.bf16.gmra.mxu1 %vm985_vm3, %v8867_v46  ;;  %v4221_v46 = vshrl.u32 %v8356_v51, 16  ;;  %v4966_v36 = vunpack.c.l.b16 %v4209_v29  ;;  %v4226_v61 = vrot.slane %v4224_v56, 5  ;;  %v4232_v13 = vrot.slane %v4230_v48, 5 }
 0x1f8   :  { %v1636_v32 = vadd.f32 %v1635_v2, %v1207_v31  ;;  %v3107_v2 = vsel %vm9045_vm4, %v3102_v24, %v3106_v44  ;;  %v984_v24 = vpack.c.b16 %v952_v33, %v951_v12  ;;  %v3172_v44 = vunpack.c.l.b16 %v3097_v53  ;;  %v8358_v33 = vld [vmem:[%s12261_s0 + $0x38] sm:$0x1] }
 0x1f9   :  { %v3424_v60 = vpop.f32.mrf.mxu3  ;;  %v2135_v43 = vpop.f32.mrf.mxu2  ;;  %v4223_v6 = vrot.slane %v4221_v46, 4  ;;  %v4236_v51 = vrot.slane %v4234_v0, 4  ;;  %v5030_v19 = vpack.c.b16 %v4967_v3, %v4966_v36  ;;  %v4240_v48 = vshll.u32 %v8358_v33, 16  ;;  %v8359_v3 = vld [vmem:[%s12261_s0 + $0x48] sm:$0xf] }
 0x1fa   :  { %v10369_v7 = vadd.f32 %v3424_v60, %v2224_v11  ;;  %v2225_v17 = vadd.f32 %v2132_v5, %v1636_v32  ;;  %v3173_v11 = vunpack.c.l.b16 %v3107_v2  ;;  %v6054_v5 = vrot.slane %v6052_v59, 4  ;;  %v8709_v60 = vld [vmem:[%s12261_s0 + $0x2c] sm:$0x1] }
 0x1fb   :  { %v6063_v32 = vrot.slane %v6061_v41, 5  ;;  %v6071_v9 = vshll.u32 %v8709_v60, 16  ;;  %v4227_v45 = vor.u32 %v4226_v61, %v4223_v6  ;;  %v4237_v56 = vor.u32 %v4236_v51, %v4232_v13 }
 0x1fc   :  { %v1640_v18 = vpop.f32.mrf.mxu1  ;;  %v3205_v2 = vpack.c.b16 %v3173_v11, %v3172_v44  ;;  %v6058_v29 = vor.u32 %v6057_v39, %v6054_v5 }
 0x1fd   :  { %v6068_v41 = vor.u32 %v6067_v16, %v6063_v32  ;;  %v6073_v11 = vrot.slane %v6071_v9, 5  ;;  %v4228_v5 = vrot.slane %v4227_v45, 4  ;;  %v4238_v39 = vrot.slane %v4237_v56, 4 }
 0x1ff   :  { %v1210_v31 = vpop.f32.mrf.mxu0  ;;  %v6069_v44 = vrot.slane %v6068_v41, 4  ;;  %v4233_v9 = vsel %vm9045_vm4, %v4228_v5, %v4232_v13  ;;  %v8712_v13 = vld [vmem:[%s12261_s0 + $0x44] sm:$0x1] }
 0x200   :  { %v1639_v15 = vadd.f32 %v1638_v34, %v1210_v31  ;;  %v8932_v34 = vld [vmem:[%s12261_s0 + $0x24] sm:$0xff]  ;;  %v4242_v31 = vrot.slane %v4240_v48, 5 }
 0x201   :  { %v3426_v52 = vpop.f32.mrf.mxu3  ;;  %v2137_v12 = vpop.f32.mrf.mxu2 }
 0x202   :  { %v10381_v53 = vadd.f32 %v3426_v52, %v2225_v17  ;;  %7613 = vmatmul.msk.bf16.gmra.mxu0 %vm985_vm3, %v984_v24  ;;  %v2226_v59 = vadd.f32 %v2135_v43, %v1639_v15  ;;  %v8710_v43 = vld [vmem:[%s12261_s0 + $0x3c] sm:$0xf]  ;;  %v8711_v17 = vld [vmem:[%s12261_s0 + $0x40] sm:$0xf]  ;;  %v6059_v24 = vrot.slane %v6058_v29, 4  ;;  %v4248_v29 = vshll.u32 %v8359_v3, 16 }
 0x203   :  { %v6076_v15 = vshrl.u32 %v8710_v43, 16  ;;  %v6079_v60 = vshll.u32 %v8710_v43, 16  ;;  %v6085_v61 = vshll.u32 %v8711_v17, 16  ;;  %v6089_v51 = vshrl.u32 %v8711_v17, 16  ;;  %v8360_v52 = vld [vmem:[%s12261_s0 + $0x4c] sm:$0xf] }
 0x204   :  { %v1643_v46 = vpop.f32.mrf.mxu1  ;;  %v4243_v45 = vsel %vm9045_vm4, %v4238_v39, %v4242_v31  ;;  %v4254_v56 = vshll.u32 %v8360_v52, 16  ;;  %v4258_v48 = vshrl.u32 %v8360_v52, 16  ;;  %v4250_v39 = vrot.slane %v4248_v29, 5 }
 0x205   :  { %v6081_v43 = vrot.slane %v6079_v60, 5  ;;  %v6091_v17 = vrot.slane %v6089_v51, 4  ;;  %v6095_v52 = vshll.u32 %v8712_v13, 16 }
 0x206   :  { %8127 = vmatmul.msk.bf16.gmra.mxu3 %vm985_vm3, %v3205_v2  ;;  %8675 = vmatmul.msk.bf16.vlgmr.msrb.gmra.mxu2 %vm985_vm3, %v8932_v34  ;;  %v6064_v2 = vsel %vm9045_vm4, %v6059_v24, %v6063_v32  ;;  %v6074_v34 = vsel %vm9045_vm4, %v6069_v44, %v6073_v11  ;;  %v8900_v32 = vld [vmem:[%s12261_s0 + $0x18] sm:$0xff]  ;;  %v4968_v11 = vunpack.c.l.b16 %v4233_v9 }
 0x207   :  { %v1212_v0 = vpop.f32.mrf.mxu0  ;;  %8450 = vmatmul.msk.bf16.vlgmr.msrb.gmra.mxu1 %vm985_vm3, %v5030_v19  ;;  %v4245_v19 = vshrl.u32 %v8359_v3, 16  ;;  %v6822_v24 = vunpack.c.l.b16 %v6074_v34  ;;  %v4256_v3 = vrot.slane %v4254_v56, 5  ;;  %v6097_v13 = vrot.slane %v6095_v52, 5 }
 0x208   :  { %v1641_v36 = vadd.f32 %v1640_v18, %v1212_v0  ;;  %v6821_v0 = vunpack.c.l.b16 %v6064_v2  ;;  %v8361_v2 = vld [vmem:[%s12261_s0 + $0x50] sm:$0x1] }
 0x209   :  { %v3429_v16 = vpop.f32.mrf.mxu3  ;;  %v2140_v6 = vpop.f32.mrf.mxu2  ;;  %v4247_v5 = vrot.slane %v4245_v19, 4 }
 0x20a   :  { %v10402_v33 = vadd.f32 %v3429_v16, %v2226_v59  ;;  %v2227_v18 = vadd.f32 %v2137_v12, %v1641_v36  ;;  %v6078_v59 = vrot.slane %v6076_v15, 4  ;;  %v10412_v12 = vrot.slane %v6085_v61, 5 }
 0x20b   :  { %v4969_v36 = vunpack.c.l.b16 %v4243_v45  ;;  %v4260_v16 = vrot.slane %v4258_v48, 4  ;;  %v6885_v9 = vpack.c.b16 %v6822_v24, %v6821_v0  ;;  %v4251_v45 = vor.u32 %v4250_v39, %v4247_v5 }
 0x20c   :  { %v1645_v41 = vpop.f32.mrf.mxu1  ;;  %v6082_v61 = vor.u32 %v6081_v43, %v6078_v59  ;;  %v6092_v51 = vor.u32 %v6091_v17, %v10412_v12  ;;  %v4264_v59 = vshll.u32 %v8361_v2, 16 }
 0x20d   :  { %v5031_v29 = vpack.c.b16 %v4969_v36, %v4968_v11  ;;  %v4261_v48 = vor.u32 %v4260_v16, %v4256_v3  ;;  %v8714_v11 = vld [vmem:[%s12261_s0 + $0x58] sm:$0xf]  ;;  %v8362_v36 = vld [vmem:[%s12261_s0 + $0x60] sm:$0xf] }
 0x20e   :  { %v6083_v43 = vrot.slane %v6082_v61, 4  ;;  %v6093_v17 = vrot.slane %v6092_v51, 4 }
 0x20f   :  { %v1215_v44 = vpop.f32.mrf.mxu0  ;;  %v4262_v24 = vrot.slane %v4261_v48, 4  ;;  %v4272_v48 = vshll.u32 %v8362_v36, 16 }
 0x210   :  { %v1644_v31 = vadd.f32 %v1643_v46, %v1215_v44  ;;  %v8933_v46 = vld [vmem:[%s12261_s0 + $0x3c] sm:$0xff]  ;;  %v4266_v44 = vrot.slane %v4264_v59, 5  ;;  %v6098_v16 = vsel %vm9045_vm4, %v6093_v17, %v6097_v13 }
 0x211   :  { %v3431_v15 = vpop.f32.mrf.mxu3  ;;  %v2142_v60 = vpop.f32.mrf.mxu2 }
 0x212   :  { %v10424_v34 = vadd.f32 %v3431_v15, %v2227_v18  ;;  %8321 = vmatmul.msk.bf16.vlgmr.msrb.gmra.mxu0 %vm985_vm3, %v8900_v32  ;;  %v2228_v19 = vadd.f32 %v2140_v6, %v1644_v31  ;;  %v4252_v6 = vrot.slane %v4251_v45, 4  ;;  %v8713_v32 = vld [vmem:[%s12261_s0 + $0x54] sm:$0xf]  ;;  %v6088_v31 = vsel %vm9045_vm4, %v6083_v43, %v10412_v12 }
 0x213   :  { %v6100_v51 = vshrl.u32 %v8713_v32, 16  ;;  %v6103_v52 = vshll.u32 %v8713_v32, 16  ;;  %v4267_v12 = vsel %vm9045_vm4, %v4262_v24, %v4266_v44  ;;  %v6823_v17 = vunpack.c.l.b16 %v6088_v31  ;;  %v8715_v24 = vld [vmem:[%s12261_s0 + $0x5c] sm:$0x1] }
 0x214   :  { %12283 = vst [vmem:[#allocation19_spill] sm:$0xff] %v10424_v34  ;;  %v1648_v56 = vpop.f32.mrf.mxu1  ;;  %v4257_v2 = vsel %vm9045_vm4, %v4252_v6, %v4256_v3  ;;  %v4971_v6 = vunpack.c.l.b16 %v4267_v12  ;;  %v4274_v44 = vrot.slane %v4272_v48, 5  ;;  %v6119_v12 = vshll.u32 %v8715_v24, 16 }
 0x215   :  { %v4970_v13 = vunpack.c.l.b16 %v4257_v2  ;;  %v6105_v32 = vrot.slane %v6103_v52, 5 }
 0x216   :  { %8804 = vmatmul.msk.bf16.vlgmr.msrb.gmra.mxu3 %vm985_vm3, %v6885_v9  ;;  %8676 = vmatmul.msk.bf16.gmra.mxu2 %vm985_vm3, %v8933_v46  ;;  %v6109_v9 = vshll.u32 %v8714_v11, 16  ;;  %v6113_v46 = vshrl.u32 %v8714_v11, 16 }
 0x217   :  { %v1217_v18 = vpop.f32.mrf.mxu0  ;;  %8451 = vmatmul.msk.bf16.gmra.mxu1 %vm985_vm3, %v5031_v29  ;;  %v4269_v29 = vshrl.u32 %v8362_v36, 16 }
 0x218   :  { %v1646_v0 = vadd.f32 %v1645_v41, %v1217_v18  ;;  %v8363_v41 = vld [vmem:[%s12261_s0 + $0x64] sm:$0xf]  ;;  %v6102_v18 = vrot.slane %v6100_v51, 4  ;;  %v6115_v11 = vrot.slane %v6113_v46, 4 }
 0x219   :  { %v3434_v5 = vpop.f32.mrf.mxu3  ;;  %v2145_v39 = vpop.f32.mrf.mxu2  ;;  %v4278_v59 = vshll.u32 %v8363_v41, 16  ;;  %v4282_v43 = vshrl.u32 %v8363_v41, 16 }
 0x21a   :  { %v10450_v15 = vadd.f32 %v3434_v5, %v2228_v19  ;;  %v2229_v61 = vadd.f32 %v2142_v60, %v1646_v0  ;;  %v8901_v60 = vld [vmem:[%s12261_s0 + $0x30] sm:$0xff]  ;;  %v6824_v19 = vunpack.c.l.b16 %v6098_v16  ;;  %v6111_v0 = vrot.slane %v6109_v9, 5  ;;  %v8364_v16 = vld [vmem:[%s12261_s0 + $0x68] sm:$0x1] }
 0x21b   :  { %v4271_v5 = vrot.slane %v4269_v29, 4  ;;  %v4280_v36 = vrot.slane %v4278_v59, 5  ;;  %v4284_v31 = vrot.slane %v4282_v43, 4  ;;  %v5032_v9 = vpack.c.b16 %v4971_v6, %v4970_v13 }
 0x21c   :  { %12284 = vst [vmem:[#allocation20_spill] sm:$0xff] %v10450_v15  ;;  %v1650_v45 = vpop.f32.mrf.mxu1  ;;  %v6886_v52 = vpack.c.b16 %v6824_v19, %v6823_v17  ;;  %v6106_v46 = vor.u32 %v6105_v32, %v6102_v18  ;;  %v6116_v29 = vor.u32 %v6115_v11, %v6111_v0  ;;  %v6121_v19 = vrot.slane %v6119_v12, 5  ;;  %v8365_v11 = vld [vmem:[%s12261_s0 + $0x78] sm:$0xf] }
 0x21d   :  { %v4275_v59 = vor.u32 %v4274_v44, %v4271_v5  ;;  %v4285_v43 = vor.u32 %v4284_v31, %v4280_v36  ;;  %v4296_v12 = vshll.u32 %v8365_v11, 16 }
 0x21e   :  { %v6107_v17 = vrot.slane %v6106_v46, 4 }
 0x21f   :  { %v1220_v3 = vpop.f32.mrf.mxu0  ;;  %v4276_v18 = vrot.slane %v4275_v59, 4  ;;  %v4286_v32 = vrot.slane %v4285_v43, 4 }
 0x220   :  { %v1649_v15 = vadd.f32 %v1648_v56, %v1220_v3  ;;  %v8934_v56 = vld [vmem:[%s12261_s0 + $0x54] sm:$0xff]  ;;  %v4288_v3 = vshll.u32 %v8364_v16, 16 }
 0x221   :  { %v3436_v41 = vpop.f32.mrf.mxu3  ;;  %v2147_v34 = vpop.f32.mrf.mxu2  ;;  %v4281_v43 = vsel %vm9045_vm4, %v4276_v18, %v4280_v36 }
 0x222   :  { %v10465_v51 = vadd.f32 %v3436_v41, %v2229_v61  ;;  %8322 = vmatmul.msk.bf16.gmra.mxu0 %vm985_vm3, %v8901_v60  ;;  %v2230_v2 = vadd.f32 %v2145_v39, %v1649_v15  ;;  %v8716_v39 = vld [vmem:[%s12261_s0 + $0x6c] sm:$0xf]  ;;  %v8717_v15 = vld [vmem:[%s12261_s0 + $0x70] sm:$0xf]  ;;  %v6117_v60 = vrot.slane %v6116_v29, 4  ;;  %v4290_v6 = vrot.slane %v4288_v3, 5 }
 0x223   :  { %v6124_v44 = vshrl.u32 %v8716_v39, 16  ;;  %v6127_v31 = vshll.u32 %v8716_v39, 16  ;;  %v6133_v41 = vshll.u32 %v8717_v15, 16  ;;  %v6137_v16 = vshrl.u32 %v8717_v15, 16 }
 0x224   :  { %12285 = vst [vmem:[#allocation21_spill] sm:$0xff] %v10465_v51  ;;  %v1653_v48 = vpop.f32.mrf.mxu1  ;;  %v6122_v46 = vsel %vm9045_vm4, %v6117_v60, %v6121_v19  ;;  %v4293_v29 = vshrl.u32 %v8365_v11, 16  ;;  %v4291_v3 = vsel %vm9045_vm4, %v4286_v32, %v4290_v6  ;;  %v8718_v19 = vld [vmem:[%s12261_s0 + $0x74] sm:$0x1]  ;;  %v4972_v18 = vunpack.c.l.b16 %v4281_v43 }
 0x225   :  { %v6826_v60 = vunpack.c.l.b16 %v6122_v46  ;;  %v4973_v11 = vunpack.c.l.b16 %v4291_v3  ;;  %v4298_v6 = vrot.slane %v4296_v12, 5  ;;  %v6143_v51 = vshll.u32 %v8718_v19, 16 }
 0x226   :  { %8805 = vmatmul.msk.bf16.gmra.mxu3 %vm985_vm3, %v6886_v52  ;;  %8677 = vmatmul.msk.bf16.gmra.mxu2 %vm985_vm3, %v8934_v56  ;;  %v8366_v52 = vld [vmem:[%s12261_s0 + $0x7c] sm:$0xf]  ;;  %v4295_v32 = vrot.slane %v4293_v29, 4 }
 0x227   :  { %v1222_v61 = vpop.f32.mrf.mxu0  ;;  %8452 = vmatmul.msk.bf16.gmra.mxu1 %vm985_vm3, %v5032_v9  ;;  %v6112_v9 = vsel %vm9045_vm4, %v6107_v17, %v6111_v0  ;;  %v4302_v39 = vshll.u32 %v8366_v52, 16  ;;  %v4306_v15 = vshrl.u32 %v8366_v52, 16  ;;  %v8902_v0 = vld [vmem:[%s12261_s0 + $0x48] sm:$0xff]  ;;  %v5033_v29 = vpack.c.b16 %v4973_v11, %v4972_v18 }
 0x228   :  { %v1651_v13 = vadd.f32 %v1650_v45, %v1222_v61  ;;  %v6129_v61 = vrot.slane %v6127_v31, 5  ;;  %v6825_v17 = vunpack.c.l.b16 %v6112_v9  ;;  %v8367_v9 = vld [vmem:[%s12261_s0 + $0x80] sm:$0x1]  ;;  %v4299_v12 = vor.u32 %v4298_v6, %v4295_v32 }
 0x229   :  { %v3439_v5 = vpop.f32.mrf.mxu3  ;;  %v2150_v24 = vpop.f32.mrf.mxu2  ;;  %v4308_v31 = vrot.slane %v4306_v15, 4  ;;  %v6145_v19 = vrot.slane %v6143_v51, 5  ;;  %v8368_v51 = vld [vmem:[%s12261_s0 + $0x90] sm:$0xf] }
 0x22a   :  { %v10486_v56 = vadd.f32 %v3439_v5, %v2230_v2  ;;  %v2231_v45 = vadd.f32 %v2147_v34, %v1651_v13  ;;  %v6126_v2 = vrot.slane %v6124_v44, 4  ;;  %v6135_v34 = vrot.slane %v6133_v41, 5 }
 0x22b   :  { %v6139_v13 = vrot.slane %v6137_v16, 4  ;;  %v4304_v44 = vrot.slane %v4302_v39, 5  ;;  %v6887_v43 = vpack.c.b16 %v6826_v60, %v6825_v17 }
 0x22c   :  { %12286 = vst [vmem:[#allocation22_spill] sm:$0xff] %v10486_v56  ;;  %v1655_v59 = vpop.f32.mrf.mxu1  ;;  %v6130_v52 = vor.u32 %v6129_v61, %v6126_v2  ;;  %v4312_v2 = vshll.u32 %v8367_v9, 16 }
 0x22d   :  { %v6140_v56 = vor.u32 %v6139_v13, %v6135_v34  ;;  %v4309_v15 = vor.u32 %v4308_v31, %v4304_v44 }
 0x22e   :  { %v6131_v61 = vrot.slane %v6130_v52, 4 }
 0x22f   :  { %v1225_v36 = vpop.f32.mrf.mxu0  ;;  %v6141_v13 = vrot.slane %v6140_v56, 4  ;;  %v4310_v60 = vrot.slane %v4309_v15, 4  ;;  %v8720_v56 = vld [vmem:[%s12261_s0 + $0x88] sm:$0xf]  ;;  %v4320_v15 = vshll.u32 %v8368_v51, 16 }
 0x230   :  { %v1654_v5 = vadd.f32 %v1653_v48, %v1225_v36  ;;  %v8935_v48 = vld [vmem:[%s12261_s0 + $0x6c] sm:$0xff]  ;;  %v4314_v36 = vrot.slane %v4312_v2, 5  ;;  %v6136_v32 = vsel %vm9045_vm4, %v6131_v61, %v6135_v34 }
 0x231   :  { %v3441_v41 = vpop.f32.mrf.mxu3  ;;  %v2152_v16 = vpop.f32.mrf.mxu2  ;;  %v6146_v6 = vsel %vm9045_vm4, %v6141_v13, %v6145_v19  ;;  %v6827_v13 = vunpack.c.l.b16 %v6136_v32 }
 0x232   :  { %v10505_v46 = vadd.f32 %v3441_v41, %v2231_v45  ;;  %8323 = vmatmul.msk.bf16.gmra.mxu0 %vm985_vm3, %v8902_v0  ;;  %v2232_v3 = vadd.f32 %v2150_v24, %v1654_v5  ;;  %v4300_v24 = vrot.slane %v4299_v12, 4  ;;  %v8719_v0 = vld [vmem:[%s12261_s0 + $0x84] sm:$0xf]  ;;  %v4315_v34 = vsel %vm9045_vm4, %v4310_v60, %v4314_v36  ;;  %v8721_v60 = vld [vmem:[%s12261_s0 + $0x8c] sm:$0x1] }
 0x233   :  { %v6148_v41 = vshrl.u32 %v8719_v0, 16  ;;  %v6151_v52 = vshll.u32 %v8719_v0, 16  ;;  %v4322_v36 = vrot.slane %v4320_v15, 5 }
 0x234   :  { %12287 = vst [vmem:[#allocation23_spill] sm:$0xff] %v10505_v46  ;;  %v1658_v39 = vpop.f32.mrf.mxu1  ;;  %v4305_v9 = vsel %vm9045_vm4, %v4300_v24, %v4304_v44  ;;  %v4975_v24 = vunpack.c.l.b16 %v4315_v34  ;;  %v6167_v34 = vshll.u32 %v8721_v60, 16 }
 0x235   :  { %v4974_v19 = vunpack.c.l.b16 %v4305_v9  ;;  %v6153_v0 = vrot.slane %v6151_v52, 5 }
 0x236   :  { %8806 = vmatmul.msk.bf16.gmra.mxu3 %vm985_vm3, %v6887_v43  ;;  %8678 = vmatmul.msk.bf16.gmra.mxu2 %vm985_vm3, %v8935_v48  ;;  %v6157_v43 = vshll.u32 %v8720_v56, 16  ;;  %v6161_v48 = vshrl.u32 %v8720_v56, 16 }
 0x237   :  { %v1227_v45 = vpop.f32.mrf.mxu0  ;;  %8453 = vmatmul.msk.bf16.gmra.mxu1 %vm985_vm3, %v5033_v29  ;;  %v4317_v29 = vshrl.u32 %v8368_v51, 16 }
 0x238   :  { %v1656_v17 = vadd.f32 %v1655_v59, %v1227_v45  ;;  %v8369_v59 = vld [vmem:[%s12261_s0 + $0x94] sm:$0xf]  ;;  %v6150_v45 = vrot.slane %v6148_v41, 4  ;;  %v6163_v56 = vrot.slane %v6161_v48, 4 }
 0x239   :  { %v3444_v18 = vpop.f32.mrf.mxu3  ;;  %v2155_v11 = vpop.f32.mrf.mxu2  ;;  %v4326_v2 = vshll.u32 %v8369_v59, 16  ;;  %v4330_v61 = vshrl.u32 %v8369_v59, 16 }
 0x23a   :  { %v10530_v5 = vadd.f32 %v3444_v18, %v2232_v3  ;;  %v2233_v31 = vadd.f32 %v2152_v16, %v1656_v17  ;;  %v8903_v16 = vld [vmem:[%s12261_s0 + $0x60] sm:$0xff]  ;;  %v6828_v3 = vunpack.c.l.b16 %v6146_v6  ;;  %v6159_v17 = vrot.slane %v6157_v43, 5  ;;  %v8370_v6 = vld [vmem:[%s12261_s0 + $0x98] sm:$0x1] }
 0x23b   :  { %v4319_v18 = vrot.slane %v4317_v29, 4  ;;  %v4328_v51 = vrot.slane %v4326_v2, 5  ;;  %v4332_v32 = vrot.slane %v4330_v61, 4  ;;  %v5034_v43 = vpack.c.b16 %v4975_v24, %v4974_v19 }
 0x23c   :  { %12288 = vst [vmem:[#allocation24_spill] sm:$0xff] %v10530_v5  ;;  %v1660_v12 = vpop.f32.mrf.mxu1  ;;  %v6888_v52 = vpack.c.b16 %v6828_v3, %v6827_v13  ;;  %v6154_v48 = vor.u32 %v6153_v0, %v6150_v45  ;;  %v6164_v29 = vor.u32 %v6163_v56, %v6159_v17  ;;  %v6169_v3 = vrot.slane %v6167_v34, 5  ;;  %v8371_v56 = vld [vmem:[%s12261_s0 + $0xa8] sm:$0xf] }
 0x23d   :  { %v4323_v2 = vor.u32 %v4322_v36, %v4319_v18  ;;  %v4333_v61 = vor.u32 %v4332_v32, %v4328_v51  ;;  %v4344_v34 = vshll.u32 %v8371_v56, 16 }
 0x23e   :  { %v6155_v13 = vrot.slane %v6154_v48, 4 }
 0x23f   :  { %v1230_v44 = vpop.f32.mrf.mxu0  ;;  %v4324_v45 = vrot.slane %v4323_v2, 4  ;;  %v4334_v0 = vrot.slane %v4333_v61, 4 }
 0x240   :  { %v1659_v5 = vadd.f32 %v1658_v39, %v1230_v44  ;;  %v8936_v39 = vld [vmem:[%s12261_s0 + $0x84] sm:$0xff]  ;;  %v4336_v44 = vshll.u32 %v8370_v6, 16 }
 0x241   :  { %v3446_v59 = vpop.f32.mrf.mxu3  ;;  %v2157_v46 = vpop.f32.mrf.mxu2  ;;  %v4329_v61 = vsel %vm9045_vm4, %v4324_v45, %v4328_v51 }
 0x242   :  { %v10545_v41 = vadd.f32 %v3446_v59, %v2233_v31  ;;  %8324 = vmatmul.msk.bf16.gmra.mxu0 %vm985_vm3, %v8903_v16  ;;  %v2234_v9 = vadd.f32 %v2155_v11, %v1659_v5  ;;  %v8722_v11 = vld [vmem:[%s12261_s0 + $0x9c] sm:$0xf]  ;;  %v8723_v5 = vld [vmem:[%s12261_s0 + $0xa0] sm:$0xf]  ;;  %v6165_v16 = vrot.slane %v6164_v29, 4  ;;  %v4338_v24 = vrot.slane %v4336_v44, 5 }
 0x243   :  { %v6172_v36 = vshrl.u32 %v8722_v11, 16  ;;  %v6175_v32 = vshll.u32 %v8722_v11, 16  ;;  %v6181_v59 = vshll.u32 %v8723_v5, 16  ;;  %v6185_v6 = vshrl.u32 %v8723_v5, 16 }
 0x244   :  { %12289 = vst [vmem:[#allocation25_spill] sm:$0xff] %v10545_v41  ;;  %v1663_v15 = vpop.f32.mrf.mxu1  ;;  %v6170_v48 = vsel %vm9045_vm4, %v6165_v16, %v6169_v3  ;;  %v4341_v29 = vshrl.u32 %v8371_v56, 16  ;;  %v4339_v44 = vsel %vm9045_vm4, %v4334_v0, %v4338_v24  ;;  %v8724_v3 = vld [vmem:[%s12261_s0 + $0xa4] sm:$0x1]  ;;  %v4976_v45 = vunpack.c.l.b16 %v4329_v61 }
 0x245   :  { %v6830_v16 = vunpack.c.l.b16 %v6170_v48  ;;  %v4977_v56 = vunpack.c.l.b16 %v4339_v44  ;;  %v4346_v24 = vrot.slane %v4344_v34, 5  ;;  %v6191_v41 = vshll.u32 %v8724_v3, 16 }
 0x246   :  { %8807 = vmatmul.msk.bf16.gmra.mxu3 %vm985_vm3, %v6888_v52  ;;  %8679 = vmatmul.msk.bf16.gmra.mxu2 %vm985_vm3, %v8936_v39  ;;  %v8372_v52 = vld [vmem:[%s12261_s0 + $0xac] sm:$0xf]  ;;  %v4343_v0 = vrot.slane %v4341_v29, 4 }
 0x247   :  { %v1232_v31 = vpop.f32.mrf.mxu0  ;;  %8454 = vmatmul.msk.bf16.gmra.mxu1 %vm985_vm3, %v5034_v43  ;;  %v6160_v43 = vsel %vm9045_vm4, %v6155_v13, %v6159_v17  ;;  %v4350_v11 = vshll.u32 %v8372_v52, 16  ;;  %v4354_v5 = vshrl.u32 %v8372_v52, 16  ;;  %v8904_v17 = vld [vmem:[%s12261_s0 + $0x78] sm:$0xff]  ;;  %v5035_v29 = vpack.c.b16 %v4977_v56, %v4976_v45 }
 0x248   :  { %v1661_v19 = vadd.f32 %v1660_v12, %v1232_v31  ;;  %v6177_v31 = vrot.slane %v6175_v32, 5  ;;  %v6829_v13 = vunpack.c.l.b16 %v6160_v43  ;;  %v8373_v43 = vld [vmem:[%s12261_s0 + $0xb0] sm:$0x1]  ;;  %v4347_v34 = vor.u32 %v4346_v24, %v4343_v0 }
 0x249   :  { %v3449_v18 = vpop.f32.mrf.mxu3  ;;  %v2160_v60 = vpop.f32.mrf.mxu2  ;;  %v4356_v32 = vrot.slane %v4354_v5, 4  ;;  %v6193_v3 = vrot.slane %v6191_v41, 5  ;;  %v8374_v41 = vld [vmem:[%s12261_s0 + $0xc0] sm:$0xf] }
 0x24a   :  { %v10566_v39 = vadd.f32 %v3449_v18, %v2234_v9  ;;  %v2235_v12 = vadd.f32 %v2157_v46, %v1661_v19  ;;  %v6174_v9 = vrot.slane %v6172_v36, 4  ;;  %v6183_v46 = vrot.slane %v6181_v59, 5 }
 0x24b   :  { %v6187_v19 = vrot.slane %v6185_v6, 4  ;;  %v4352_v36 = vrot.slane %v4350_v11, 5  ;;  %v6889_v61 = vpack.c.b16 %v6830_v16, %v6829_v13 }
 0x24c   :  { %12290 = vst [vmem:[#allocation26_spill] sm:$0xff] %v10566_v39  ;;  %v1665_v2 = vpop.f32.mrf.mxu1  ;;  %v6178_v52 = vor.u32 %v6177_v31, %v6174_v9  ;;  %v4360_v9 = vshll.u32 %v8373_v43, 16 }
 0x24d   :  { %v6188_v39 = vor.u32 %v6187_v19, %v6183_v46  ;;  %v4357_v5 = vor.u32 %v4356_v32, %v4352_v36 }
 0x24e   :  { %v6179_v31 = vrot.slane %v6178_v52, 4 }
 0x24f   :  { %v1235_v51 = vpop.f32.mrf.mxu0  ;;  %v6189_v19 = vrot.slane %v6188_v39, 4  ;;  %v4358_v16 = vrot.slane %v4357_v5, 4  ;;  %v8726_v39 = vld [vmem:[%s12261_s0 + $0xb8] sm:$0xf]  ;;  %v4368_v5 = vshll.u32 %v8374_v41, 16 }
 0x250   :  { %v1664_v18 = vadd.f32 %v1663_v15, %v1235_v51  ;;  %v8937_v15 = vld [vmem:[%s12261_s0 + $0x9c] sm:$0xff]  ;;  %v4362_v51 = vrot.slane %v4360_v9, 5  ;;  %v6184_v0 = vsel %vm9045_vm4, %v6179_v31, %v6183_v46 }
 0x251   :  { %v3451_v59 = vpop.f32.mrf.mxu3  ;;  %v2162_v6 = vpop.f32.mrf.mxu2  ;;  %v6194_v24 = vsel %vm9045_vm4, %v6189_v19, %v6193_v3  ;;  %v6831_v19 = vunpack.c.l.b16 %v6184_v0 }
 0x252   :  { %v10585_v48 = vadd.f32 %v3451_v59, %v2235_v12  ;;  %8325 = vmatmul.msk.bf16.gmra.mxu0 %vm985_vm3, %v8904_v17  ;;  %v2236_v44 = vadd.f32 %v2160_v60, %v1664_v18  ;;  %v4348_v60 = vrot.slane %v4347_v34, 4  ;;  %v8725_v17 = vld [vmem:[%s12261_s0 + $0xb4] sm:$0xf]  ;;  %v4363_v46 = vsel %vm9045_vm4, %v4358_v16, %v4362_v51  ;;  %v8727_v16 = vld [vmem:[%s12261_s0 + $0xbc] sm:$0x1] }
 0x253   :  { %v6196_v59 = vshrl.u32 %v8725_v17, 16  ;;  %v6199_v52 = vshll.u32 %v8725_v17, 16  ;;  %v4370_v51 = vrot.slane %v4368_v5, 5 }
 0x254   :  { %12291 = vst [vmem:[#allocation27_spill] sm:$0xff] %v10585_v48  ;;  %v1668_v11 = vpop.f32.mrf.mxu1  ;;  %v4353_v43 = vsel %vm9045_vm4, %v4348_v60, %v4352_v36  ;;  %v4979_v60 = vunpack.c.l.b16 %v4363_v46  ;;  %v6215_v46 = vshll.u32 %v8727_v16, 16 }
 0x255   :  { %v4978_v3 = vunpack.c.l.b16 %v4353_v43  ;;  %v6201_v17 = vrot.slane %v6199_v52, 5 }
 0x256   :  { %8808 = vmatmul.msk.bf16.gmra.mxu3 %vm985_vm3, %v6889_v61  ;;  %8680 = vmatmul.msk.bf16.gmra.mxu2 %vm985_vm3, %v8937_v15  ;;  %v6205_v61 = vshll.u32 %v8726_v39, 16  ;;  %v6209_v15 = vshrl.u32 %v8726_v39, 16 }
 0x257   :  { %v1237_v12 = vpop.f32.mrf.mxu0  ;;  %8455 = vmatmul.msk.bf16.gmra.mxu1 %vm985_vm3, %v5035_v29  ;;  %v4365_v29 = vshrl.u32 %v8374_v41, 16 }
 0x258   :  { %v1666_v13 = vadd.f32 %v1665_v2, %v1237_v12  ;;  %v8375_v2 = vld [vmem:[%s12261_s0 + $0xc4] sm:$0xf]  ;;  %v6198_v12 = vrot.slane %v6196_v59, 4  ;;  %v6211_v39 = vrot.slane %v6209_v15, 4 }
 0x259   :  { %v3454_v45 = vpop.f32.mrf.mxu3  ;;  %v2165_v56 = vpop.f32.mrf.mxu2  ;;  %v4374_v9 = vshll.u32 %v8375_v2, 16  ;;  %v4378_v31 = vshrl.u32 %v8375_v2, 16 }
 0x25a   :  { %v10610_v18 = vadd.f32 %v3454_v45, %v2236_v44  ;;  %v2237_v32 = vadd.f32 %v2162_v6, %v1666_v13  ;;  %v8905_v6 = vld [vmem:[%s12261_s0 + $0x90] sm:$0xff]  ;;  %v6832_v44 = vunpack.c.l.b16 %v6194_v24  ;;  %v6207_v13 = vrot.slane %v6205_v61, 5  ;;  %v8376_v24 = vld [vmem:[%s12261_s0 + $0xc8] sm:$0x1] }
 0x25b   :  { %v4367_v45 = vrot.slane %v4365_v29, 4  ;;  %v4376_v41 = vrot.slane %v4374_v9, 5  ;;  %v4380_v0 = vrot.slane %v4378_v31, 4  ;;  %v5036_v61 = vpack.c.b16 %v4979_v60, %v4978_v3 }
 0x25c   :  { %12292 = vst [vmem:[#allocation28_spill] sm:$0xff] %v10610_v18  ;;  %v1670_v34 = vpop.f32.mrf.mxu1  ;;  %v6890_v52 = vpack.c.b16 %v6832_v44, %v6831_v19  ;;  %v6202_v15 = vor.u32 %v6201_v17, %v6198_v12  ;;  %v6212_v29 = vor.u32 %v6211_v39, %v6207_v13  ;;  %v6217_v44 = vrot.slane %v6215_v46, 5  ;;  %v8377_v39 = vld [vmem:[%s12261_s0 + $0xd8] sm:$0xf] }
 0x25d   :  { %v4371_v9 = vor.u32 %v4370_v51, %v4367_v45  ;;  %v4381_v31 = vor.u32 %v4380_v0, %v4376_v41  ;;  %v4392_v46 = vshll.u32 %v8377_v39, 16 }
 0x25e   :  { %v6203_v19 = vrot.slane %v6202_v15, 4 }
 0x25f   :  { %v1240_v36 = vpop.f32.mrf.mxu0  ;;  %v4372_v12 = vrot.slane %v4371_v9, 4  ;;  %v4382_v17 = vrot.slane %v4381_v31, 4 }
 0x260   :  { %v1669_v18 = vadd.f32 %v1668_v11, %v1240_v36  ;;  %v8938_v11 = vld [vmem:[%s12261_s0 + $0xb4] sm:$0xff]  ;;  %v4384_v36 = vshll.u32 %v8376_v24, 16 }
 0x261   :  { %v3456_v2 = vpop.f32.mrf.mxu3  ;;  %v2167_v48 = vpop.f32.mrf.mxu2  ;;  %v4377_v31 = vsel %vm9045_vm4, %v4372_v12, %v4376_v41 }
 0x262   :  { %v10625_v59 = vadd.f32 %v3456_v2, %v2237_v32  ;;  %8326 = vmatmul.msk.bf16.gmra.mxu0 %vm985_vm3, %v8905_v6  ;;  %v2238_v43 = vadd.f32 %v2165_v56, %v1669_v18  ;;  %v8728_v56 = vld [vmem:[%s12261_s0 + $0xcc] sm:$0xf]  ;;  %v8729_v18 = vld [vmem:[%s12261_s0 + $0xd0] sm:$0xf]  ;;  %v6213_v6 = vrot.slane %v6212_v29, 4  ;;  %v4386_v60 = vrot.slane %v4384_v36, 5 }
 0x263   :  { %v6220_v51 = vshrl.u32 %v8728_v56, 16  ;;  %v6223_v0 = vshll.u32 %v8728_v56, 16  ;;  %v6229_v2 = vshll.u32 %v8729_v18, 16  ;;  %v6233_v24 = vshrl.u32 %v8729_v18, 16 }
 0x264   :  { %12293 = vst [vmem:[#allocation29_spill] sm:$0xff] %v10625_v59  ;;  %v1673_v5 = vpop.f32.mrf.mxu1  ;;  %v6218_v15 = vsel %vm9045_vm4, %v6213_v6, %v6217_v44  ;;  %v4389_v29 = vshrl.u32 %v8377_v39, 16  ;;  %v4387_v36 = vsel %vm9045_vm4, %v4382_v17, %v4386_v60  ;;  %v8730_v44 = vld [vmem:[%s12261_s0 + $0xd4] sm:$0x1]  ;;  %v4980_v12 = vunpack.c.l.b16 %v4377_v31 }
 0x265   :  { %v6834_v6 = vunpack.c.l.b16 %v6218_v15  ;;  %v4981_v39 = vunpack.c.l.b16 %v4387_v36  ;;  %v4394_v60 = vrot.slane %v4392_v46, 5  ;;  %v6239_v59 = vshll.u32 %v8730_v44, 16 }
 0x266   :  { %8809 = vmatmul.msk.bf16.gmra.mxu3 %vm985_vm3, %v6890_v52  ;;  %8681 = vmatmul.msk.bf16.gmra.mxu2 %vm985_vm3, %v8938_v11  ;;  %v8378_v52 = vld [vmem:[%s12261_s0 + $0xdc] sm:$0xf]  ;;  %v4391_v17 = vrot.slane %v4389_v29, 4 }
 0x267   :  { %v1242_v32 = vpop.f32.mrf.mxu0  ;;  %8456 = vmatmul.msk.bf16.gmra.mxu1 %vm985_vm3, %v5036_v61  ;;  %v6208_v61 = vsel %vm9045_vm4, %v6203_v19, %v6207_v13  ;;  %v4398_v56 = vshll.u32 %v8378_v52, 16  ;;  %v4402_v18 = vshrl.u32 %v8378_v52, 16  ;;  %v8906_v13 = vld [vmem:[%s12261_s0 + $0xa8] sm:$0xff]  ;;  %v5037_v29 = vpack.c.b16 %v4981_v39, %v4980_v12 }
 0x268   :  { %v1671_v3 = vadd.f32 %v1670_v34, %v1242_v32  ;;  %v6225_v32 = vrot.slane %v6223_v0, 5  ;;  %v6833_v19 = vunpack.c.l.b16 %v6208_v61  ;;  %v8379_v61 = vld [vmem:[%s12261_s0 + $0xe0] sm:$0x1]  ;;  %v4395_v46 = vor.u32 %v4394_v60, %v4391_v17 }
 0x269   :  { %v3459_v45 = vpop.f32.mrf.mxu3  ;;  %v2170_v16 = vpop.f32.mrf.mxu2  ;;  %v4404_v0 = vrot.slane %v4402_v18, 4  ;;  %v6241_v44 = vrot.slane %v6239_v59, 5  ;;  %v8380_v59 = vld [vmem:[%s12261_s0 + $0xf0] sm:$0xf] }
 0x26a   :  { %v10646_v11 = vadd.f32 %v3459_v45, %v2238_v43  ;;  %v2239_v34 = vadd.f32 %v2167_v48, %v1671_v3  ;;  %v6222_v43 = vrot.slane %v6220_v51, 4  ;;  %v6231_v48 = vrot.slane %v6229_v2, 5 }
 0x26b   :  { %v6235_v3 = vrot.slane %v6233_v24, 4  ;;  %v4400_v51 = vrot.slane %v4398_v56, 5  ;;  %v6891_v31 = vpack.c.b16 %v6834_v6, %v6833_v19 }
 0x26c   :  { %12294 = vst [vmem:[#allocation30_spill] sm:$0xff] %v10646_v11  ;;  %v1675_v9 = vpop.f32.mrf.mxu1  ;;  %v6226_v52 = vor.u32 %v6225_v32, %v6222_v43  ;;  %v4408_v43 = vshll.u32 %v8379_v61, 16 }
 0x26d   :  { %v6236_v11 = vor.u32 %v6235_v3, %v6231_v48  ;;  %v4405_v18 = vor.u32 %v4404_v0, %v4400_v51 }
 0x26e   :  { %v6227_v32 = vrot.slane %v6226_v52, 4 }
 0x26f   :  { %v1245_v41 = vpop.f32.mrf.mxu0  ;;  %v6237_v3 = vrot.slane %v6236_v11, 4  ;;  %v4406_v6 = vrot.slane %v4405_v18, 4  ;;  %v8732_v11 = vld [vmem:[%s12261_s0 + $0xe8] sm:$0xf]  ;;  %v4416_v18 = vshll.u32 %v8380_v59, 16 }
 0x270   :  { %v1674_v45 = vadd.f32 %v1673_v5, %v1245_v41  ;;  %v8939_v5 = vld [vmem:[%s12261_s0 + $0xcc] sm:$0xff]  ;;  %v4410_v41 = vrot.slane %v4408_v43, 5  ;;  %v6232_v17 = vsel %vm9045_vm4, %v6227_v32, %v6231_v48 }
 0x271   :  { %v3461_v2 = vpop.f32.mrf.mxu3  ;;  %v2172_v24 = vpop.f32.mrf.mxu2  ;;  %v6242_v60 = vsel %vm9045_vm4, %v6237_v3, %v6241_v44  ;;  %v6835_v3 = vunpack.c.l.b16 %v6232_v17 }
 0x272   :  { %v10665_v15 = vadd.f32 %v3461_v2, %v2239_v34  ;;  %8327 = vmatmul.msk.bf16.gmra.mxu0 %vm985_vm3, %v8906_v13  ;;  %v2240_v36 = vadd.f32 %v2170_v16, %v1674_v45  ;;  %v4396_v16 = vrot.slane %v4395_v46, 4  ;;  %v8731_v13 = vld [vmem:[%s12261_s0 + $0xe4] sm:$0xf]  ;;  %v4411_v48 = vsel %vm9045_vm4, %v4406_v6, %v4410_v41  ;;  %v8733_v6 = vld [vmem:[%s12261_s0 + $0xec] sm:$0x1] }
 0x273   :  { %v6244_v2 = vshrl.u32 %v8731_v13, 16  ;;  %v6247_v52 = vshll.u32 %v8731_v13, 16  ;;  %v4418_v41 = vrot.slane %v4416_v18, 5 }
 0x274   :  { %12295 = vst [vmem:[#allocation31_spill] sm:$0xff] %v10665_v15  ;;  %v1678_v56 = vpop.f32.mrf.mxu1  ;;  %v4401_v61 = vsel %vm9045_vm4, %v4396_v16, %v4400_v51  ;;  %v4983_v16 = vunpack.c.l.b16 %v4411_v48  ;;  %v6263_v48 = vshll.u32 %v8733_v6, 16 }
 0x275   :  { %v4982_v44 = vunpack.c.l.b16 %v4401_v61  ;;  %v6249_v13 = vrot.slane %v6247_v52, 5 }
 0x276   :  { %8810 = vmatmul.msk.bf16.gmra.mxu3 %vm985_vm3, %v6891_v31  ;;  %8682 = vmatmul.msk.bf16.gmra.mxu2 %vm985_vm3, %v8939_v5  ;;  %v6253_v31 = vshll.u32 %v8732_v11, 16  ;;  %v6257_v5 = vshrl.u32 %v8732_v11, 16 }
 0x277   :  { %v1247_v34 = vpop.f32.mrf.mxu0  ;;  %8457 = vmatmul.msk.bf16.gmra.mxu1 %vm985_vm3, %v5037_v29  ;;  %v4413_v29 = vshrl.u32 %v8380_v59, 16 }
 0x278   :  { %v1676_v19 = vadd.f32 %v1675_v9, %v1247_v34  ;;  %v8381_v9 = vld [vmem:[%s12261_s0 + $0xf4] sm:$0xf]  ;;  %v6246_v34 = vrot.slane %v6244_v2, 4  ;;  %v6259_v11 = vrot.slane %v6257_v5, 4 }
 0x279   :  { %v3464_v12 = vpop.f32.mrf.mxu3  ;;  %v2175_v39 = vpop.f32.mrf.mxu2  ;;  %v4422_v43 = vshll.u32 %v8381_v9, 16  ;;  %v4426_v32 = vshrl.u32 %v8381_v9, 16 }
 0x27a   :  { %v10690_v45 = vadd.f32 %v3464_v12, %v2240_v36  ;;  %v2241_v0 = vadd.f32 %v2172_v24, %v1676_v19  ;;  %v8907_v24 = vld [vmem:[%s12261_s0 + $0xc0] sm:$0xff]  ;;  %v6836_v36 = vunpack.c.l.b16 %v6242_v60  ;;  %v6255_v19 = vrot.slane %v6253_v31, 5  ;;  %v8382_v60 = vld [vmem:[%s12261_s0 + $0xf8] sm:$0x1] }
 0x27b   :  { %v4415_v12 = vrot.slane %v4413_v29, 4  ;;  %v4424_v59 = vrot.slane %v4422_v43, 5  ;;  %v4428_v17 = vrot.slane %v4426_v32, 4  ;;  %v5038_v31 = vpack.c.b16 %v4983_v16, %v4982_v44 }
 0x27c   :  { %12296 = vst [vmem:[#allocation32_spill] sm:$0xff] %v10690_v45  ;;  %v1680_v46 = vpop.f32.mrf.mxu1  ;;  %v6892_v52 = vpack.c.b16 %v6836_v36, %v6835_v3  ;;  %v6250_v5 = vor.u32 %v6249_v13, %v6246_v34  ;;  %v6260_v29 = vor.u32 %v6259_v11, %v6255_v19  ;;  %v6265_v36 = vrot.slane %v6263_v48, 5  ;;  %v8383_v11 = vld [vmem:[%s12261_s0 + $0x108] sm:$0xf] }
 0x27d   :  { %v4419_v43 = vor.u32 %v4418_v41, %v4415_v12  ;;  %v4429_v32 = vor.u32 %v4428_v17, %v4424_v59  ;;  %v4440_v48 = vshll.u32 %v8383_v11, 16 }
 0x27e   :  { %v6251_v3 = vrot.slane %v6250_v5, 4 }
 0x27f   :  { %v1250_v51 = vpop.f32.mrf.mxu0  ;;  %v4420_v34 = vrot.slane %v4419_v43, 4  ;;  %v4430_v13 = vrot.slane %v4429_v32, 4 }
 0x280   :  { %v1679_v45 = vadd.f32 %v1678_v56, %v1250_v51  ;;  %v8940_v56 = vld [vmem:[%s12261_s0 + $0xe4] sm:$0xff]  ;;  %v4432_v51 = vshll.u32 %v8382_v60, 16 }
 0x281   :  { %v3466_v9 = vpop.f32.mrf.mxu3  ;;  %v2177_v15 = vpop.f32.mrf.mxu2  ;;  %v4425_v32 = vsel %vm9045_vm4, %v4420_v34, %v4424_v59  ;;  %v8736_v59 = vld [vmem:[%s12261_s0 + $0x104] sm:$0x1] }
 0x282   :  { %v10705_v2 = vadd.f32 %v3466_v9, %v2241_v0  ;;  %8328 = vmatmul.msk.bf16.gmra.mxu0 %vm985_vm3, %v8907_v24  ;;  %v2242_v61 = vadd.f32 %v2175_v39, %v1679_v45  ;;  %v8734_v39 = vld [vmem:[%s12261_s0 + $0xfc] sm:$0xf]  ;;  %v8735_v45 = vld [vmem:[%s12261_s0 + $0x100] sm:$0xf]  ;;  %v6261_v24 = vrot.slane %v6260_v29, 4  ;;  %v4434_v16 = vrot.slane %v4432_v51, 5 }
 0x283   :  { %v6268_v41 = vshrl.u32 %v8734_v39, 16  ;;  %v6271_v17 = vshll.u32 %v8734_v39, 16  ;;  %v6277_v9 = vshll.u32 %v8735_v45, 16  ;;  %v6281_v60 = vshrl.u32 %v8735_v45, 16 }
 0x284   :  { %12297 = vst [vmem:[#allocation33_spill] sm:$0xff] %v10705_v2  ;;  %v5170_v18 = vpop.f32.mrf.mxu1  ;;  %v6266_v5 = vsel %vm9045_vm4, %v6261_v24, %v6265_v36  ;;  %v4437_v29 = vshrl.u32 %v8383_v11, 16  ;;  %v4435_v51 = vsel %vm9045_vm4, %v4430_v13, %v4434_v16  ;;  %v4984_v34 = vunpack.c.l.b16 %v4425_v32 }
 0x285   :  { %v6270_v45 = vrot.slane %v6268_v41, 4  ;;  %v6838_v36 = vunpack.c.l.b16 %v6266_v5  ;;  %v4985_v13 = vunpack.c.l.b16 %v4435_v51  ;;  %v4442_v11 = vrot.slane %v4440_v48, 5  ;;  %v8385_v41 = vld [vmem:[%s12261_s0 + $0x110] sm:$0x1] }
 0x286   :  { %8811 = vmatmul.msk.bf16.gmra.mxu3 %vm985_vm3, %v6892_v52  ;;  %8683 = vmatmul.msk.bf16.gmra.mxu2 %vm985_vm3, %v8940_v56  ;;  %v8384_v52 = vld [vmem:[%s12261_s0 + $0x10c] sm:$0xf]  ;;  %v4439_v16 = vrot.slane %v4437_v29, 4 }
 0x287   :  { %v1252_v0 = vpop.f32.mrf.mxu0  ;;  %8458 = vmatmul.msk.bf16.gmra.mxu1 %vm985_vm3, %v5038_v31  ;;  %v6256_v31 = vsel %vm9045_vm4, %v6251_v3, %v6255_v19  ;;  %v4446_v39 = vshll.u32 %v8384_v52, 16  ;;  %v6283_v19 = vrot.slane %v6281_v60, 4  ;;  %v8908_v3 = vld [vmem:[%s12261_s0 + $0xd8] sm:$0xff]  ;;  %v5039_v48 = vpack.c.b16 %v4985_v13, %v4984_v34 }
 0x288   :  { %v1681_v44 = vadd.f32 %v1680_v46, %v1252_v0  ;;  %v10738_v0 = vrot.slane %v6277_v9, 5  ;;  %v6837_v24 = vunpack.c.l.b16 %v6256_v31  ;;  %v4443_v51 = vor.u32 %v4442_v11, %v4439_v16 }
 0x289   :  { %v3469_v12 = vpop.f32.mrf.mxu3  ;;  %v5731_v6 = vpop.f32.mrf.mxu2 }
 0x28a   :  { %v10726_v56 = vadd.f32 %v3469_v12, %v2242_v61  ;;  %v2243_v46 = vadd.f32 %v2177_v15, %v1681_v44  ;;  %v4450_v61 = vshrl.u32 %v8384_v52, 16  ;;  %v6273_v15 = vrot.slane %v6271_v17, 5 }
 0x28b   :  { %v10750_v17 = vrot.slane %v4446_v39, 5  ;;  %v6284_v5 = vor.u32 %v6283_v19, %v10738_v0  ;;  %v6893_v29 = vpack.c.b16 %v6838_v36, %v6837_v24  ;;  %v4456_v39 = vshll.u32 %v8385_v41, 16  ;;  %v10773_v24 = vld [vmem:[%s12262_s2] ss:$0 sm:$0xff] }
 0x28c   :  { %12298 = vst [vmem:[#allocation34_spill] sm:$0xff] %v10726_v56  ;;  %v10732_v43 = vpop.f32.mrf.mxu1  ;;  %v4452_v9 = vrot.slane %v4450_v61, 4  ;;  %v6274_v31 = vor.u32 %v6273_v15, %v6270_v45  ;;  %v6287_v56 = vshll.u32 %v8736_v59, 16 }
 0x28d   :  { %v6285_v19 = vrot.slane %v6284_v5, 4 }
 0x28e   :  { %v4453_v45 = vor.u32 %v4452_v9, %v10750_v17  ;;  %v6275_v15 = vrot.slane %v6274_v31, 4  ;;  %v6289_v59 = vrot.slane %v6287_v56, 5  ;;  %v4444_v56 = vrot.slane %v4443_v51, 4 }
 0x28f   :  { %v3876_v44 = vpop.f32.mrf.mxu0 }
 0x290   :  { %v4036_v12 = vadd.f32 %v3876_v44, %v9395_v58  ;;  %v8941_v58 = vld [vmem:[%s12261_s0 + $0xfc] sm:$0xff]  ;;  %v4458_v44 = vrot.slane %v4456_v39, 5  ;;  %v4454_v13 = vrot.slane %v4453_v45, 4  ;;  %v6290_v31 = vsel %vm9045_vm4, %v6285_v19, %v6289_v59 }
 0x291   :  { %v3471_v60 = vpop.f32.mrf.mxu3  ;;  %v5733_v52 = vpop.f32.mrf.mxu2  ;;  %v4449_v51 = vsel %vm9045_vm4, %v4444_v56, %v10750_v17 }
 0x292   :  { %v10753_v2 = vadd.f32 %v3471_v60, %v2243_v46  ;;  %v5330_v32 = vadd.f32 %v5170_v18, %v4036_v12  ;;  %8329 = vmatmul.msk.bf16.gmra.mxu0 %vm985_vm3, %v8908_v3  ;;  %v8737_v18 = vld [vmem:[%s12261_s0 + $0x114] sm:$0xf]  ;;  %v8738_v3 = vld [vmem:[%s12261_s0 + $0x118] sm:$0xf]  ;;  %v8387_v12 = vld [vmem:[%s12261_s0 + $0x124] sm:$0xf]  ;;  %v6280_v60 = vsel %vm9045_vm4, %v6275_v15, %v10738_v0  ;;  %v4459_v0 = vsel %vm9045_vm4, %v4454_v13, %v4458_v44 }
 0x293   :  { %v6292_v16 = vshrl.u32 %v8737_v18, 16  ;;  %v6295_v11 = vshll.u32 %v8737_v18, 16  ;;  %v6301_v5 = vshll.u32 %v8738_v3, 16  ;;  %v4470_v39 = vshll.u32 %v8387_v12, 16 }
 0x294   :  { %12299 = vst [vmem:[#allocation35_spill] sm:$0xff] %v10753_v2  ;;  %v10759_v61 = vpop.f32.mrf.mxu1  ;;  %v5891_v46 = vadd.f32 %v5731_v6, %v5330_v32  ;;  %v8386_v6 = vld [vmem:[%s12261_s0 + $0x120] sm:$0xf]  ;;  %v6305_v32 = vshrl.u32 %v8738_v3, 16  ;;  %v4474_v45 = vshrl.u32 %v8387_v12, 16  ;;  %v6839_v59 = vunpack.c.l.b16 %v6280_v60 }
 0x295   :  { %v6294_v15 = vrot.slane %v6292_v16, 4  ;;  %v6297_v19 = vrot.slane %v6295_v11, 5  ;;  %v10800_v3 = vrot.slane %v6301_v5, 5  ;;  %v4986_v13 = vunpack.c.l.b16 %v4449_v51 }
 0x296   :  { %8812 = vmatmul.msk.bf16.gmra.mxu3 %vm985_vm3, %v6893_v29  ;;  %8684 = vmatmul.msk.bf16.gmra.mxu2 %vm985_vm3, %v8941_v58  ;;  %v4461_v58 = vshrl.u32 %v8386_v6, 16  ;;  %v6307_v17 = vrot.slane %v6305_v32, 4  ;;  %v4987_v16 = vunpack.c.l.b16 %v4459_v0  ;;  %v10805_v11 = vrot.slane %v4470_v39, 5 }
 0x297   :  { %v3878_v36 = vpop.f32.mrf.mxu0  ;;  %8459 = vmatmul.msk.bf16.gmra.mxu1 %vm985_vm3, %v5039_v48  ;;  %v4464_v48 = vshll.u32 %v8386_v6, 16 }
 0x298   :  { %v4037_v34 = vadd.f32 %v3878_v36, %v9404_v21  ;;  %v4463_v12 = vrot.slane %v4461_v58, 4  ;;  %v6308_v58 = vor.u32 %v6307_v17, %v10800_v3  ;;  %v8740_v17 = vld [vmem:[%s12261_s0 + $0x12c] sm:$0xf] }
 0x299   :  { %v7025_v41 = vpop.f32.mrf.mxu3  ;;  %v5736_v9 = vpop.f32.mrf.mxu2 }
 0x29a   :  { %v7185_v29 = vadd.f32 %v7025_v41, %v5891_v46  ;;  %v5331_v21 = vadd.f32 %v10732_v43, %v4037_v34  ;;  %v8909_v43 = vld [vmem:[%s12261_s0 + $0xf0] sm:$0xff]  ;;  %v6840_v46 = vunpack.c.l.b16 %v6290_v31  ;;  %v8739_v34 = vld [vmem:[%s12261_s0 + $0x11c] sm:$0x1]  ;;  %v4466_v41 = vrot.slane %v4464_v48, 5 }
 0x29b   :  { %v6298_v31 = vor.u32 %v6297_v19, %v6294_v15  ;;  %v6311_v48 = vshll.u32 %v8739_v34, 16 }
 0x29c   :  { %v7253_v18 = vadd.f32 %v10773_v24, %v7185_v29  ;;  %v10793_v36 = vpop.f32.mrf.mxu1  ;;  %v5892_v6 = vadd.f32 %v5733_v52, %v5331_v21  ;;  %v4476_v29 = vrot.slane %v4474_v45, 4  ;;  %v8388_v52 = vld [vmem:[%s12261_s0 + $0x128] sm:$0x1]  ;;  %v6894_v32 = vpack.c.b16 %v6840_v46, %v6839_v59 }
 0x29d   :  { %v4467_v45 = vor.u32 %v4466_v41, %v4463_v12  ;;  %v4480_v19 = vshll.u32 %v8388_v52, 16  ;;  %v6313_v46 = vrot.slane %v6311_v48, 5  ;;  %v8741_v12 = vld [vmem:[%s12261_s0 + $0x130] sm:$0xf] }
 0x29e   :  { %v7317_v56 = vmul.f32 0.01, %v7253_v18  ;;  %v4477_v15 = vor.u32 %v4476_v29, %v10805_v11  ;;  %v6325_v48 = vshll.u32 %v8741_v12, 16 }
 0x29f   :  { %v3881_v44 = vpop.f32.mrf.mxu0  ;;  %v4468_v34 = vrot.slane %v4467_v45, 4  ;;  %v6329_v45 = vshrl.u32 %v8741_v12, 16 }
 0x2a0   :  { %v7381_v2 = vmax.f32 %v7253_v18, %v7317_v56  ;;  %v4038_v60 = vadd.f32 %v3881_v44, %v9438_v55  ;;  %v8942_v55 = vld [vmem:[%s12261_s0 + $0x114] sm:$0xff]  ;;  %v5040_v18 = vpack.c.b16 %v4987_v16, %v4986_v13  ;;  %v4478_v44 = vrot.slane %v4477_v15, 4 }
 0x2a1   :  { %v7027_v5 = vpop.f32.mrf.mxu3  ;;  %v5738_v21 = vpop.f32.mrf.mxu2  ;;  %v4482_v13 = vrot.slane %v4480_v19, 5 }
 0x2a2   :  { %v7445_v51 = vpack.c.bf16 %v7381_v2, %v7381_v2  ;;  %v7186_v0 = vadd.f32 %v7027_v5, %v5892_v6  ;;  %v5332_v39 = vadd.f32 %v10759_v61, %v4038_v60  ;;  %8330 = vmatmul.msk.bf16.gmra.mxu0 %vm985_vm3, %v8909_v43  ;;  %v6299_v61 = vrot.slane %v6298_v31, 4 }
 0x2a3   :  { %v6309_v43 = vrot.slane %v6308_v58, 4  ;;  %v6319_v58 = vshll.u32 %v8740_v17, 16 }
 0x2a4   :  { %7510 = vst.msk [vmem:[%s12263_s3] sm:$0xf] %vm7509_vm5, %v7445_v51  ;;  %v7254_v2 = vadd.f32 %v10773_v24, %v7186_v0  ;;  %v10823_v59 = vpop.f32.mrf.mxu1  ;;  %v5893_v6 = vadd.f32 %v5736_v9, %v5332_v39  ;;  %v6304_v60 = vsel %vm9045_vm4, %v6299_v61, %v10800_v3  ;;  %v8389_v9 = vld [vmem:[%s12261_s0 + $0x138] sm:$0xf]  ;;  %v4473_v39 = vsel %vm9045_vm4, %v4468_v34, %v10805_v11  ;;  %v8910_v34 = vld [vmem:[%s12261_s0 + $0x108] sm:$0xff] }
 0x2a5   :  { %v6314_v5 = vsel %vm9045_vm4, %v6309_v43, %v6313_v46  ;;  %v4488_v15 = vshll.u32 %v8389_v9, 16  ;;  %v6841_v43 = vunpack.c.l.b16 %v6304_v60  ;;  %v4988_v12 = vunpack.c.l.b16 %v4473_v39 }
 0x2a6   :  { %v7318_v56 = vmul.f32 0.01, %v7254_v2  ;;  %8813 = vmatmul.msk.bf16.gmra.mxu3 %vm985_vm3, %v6894_v32  ;;  %8685 = vmatmul.msk.bf16.gmra.mxu2 %vm985_vm3, %v8942_v55  ;;  %v6316_v32 = vshrl.u32 %v8740_v17, 16  ;;  %v4483_v55 = vsel %vm9045_vm4, %v4478_v44, %v4482_v13  ;;  %v6842_v46 = vunpack.c.l.b16 %v6314_v5  ;;  %v8742_v44 = vld [vmem:[%s12261_s0 + $0x134] sm:$0x1] }
 0x2a7   :  { %v3883_v41 = vpop.f32.mrf.mxu0  ;;  %8460 = vmatmul.msk.bf16.gmra.mxu1 %vm985_vm3, %v5040_v18  ;;  %v4485_v18 = vshrl.u32 %v8389_v9, 16  ;;  %v6321_v17 = vrot.slane %v6319_v58, 5  ;;  %v4490_v9 = vrot.slane %v4488_v15, 5 }
 0x2a8   :  { %v7382_v16 = vmax.f32 %v7254_v2, %v7318_v56  ;;  %v4039_v29 = vadd.f32 %v3883_v41, %v9455_v20  ;;  %v8390_v20 = vld [vmem:[%s12261_s0 + $0x13c] sm:$0xf]  ;;  %v6318_v11 = vrot.slane %v6316_v32, 4  ;;  %v4989_v41 = vunpack.c.l.b16 %v4483_v55 }
 0x2a9   :  { %v7030_v31 = vpop.f32.mrf.mxu3  ;;  %v5741_v52 = vpop.f32.mrf.mxu2  ;;  %v4498_v61 = vshrl.u32 %v8390_v20, 16  ;;  %v4487_v60 = vrot.slane %v4485_v18, 4 }
 0x2aa   :  { %v7446_v51 = vpack.c.bf16 %v7382_v16, %v7382_v16  ;;  %v7187_v0 = vadd.f32 %v7030_v31, %v5893_v6  ;;  %v5333_v3 = vadd.f32 %v10793_v36, %v4039_v29  ;;  %v4494_v36 = vshll.u32 %v8390_v20, 16 }
 0x2ab   :  { %v10865_v16 = vrot.slane %v6325_v48, 5  ;;  %v6331_v29 = vrot.slane %v6329_v45, 4  ;;  %v4500_v58 = vrot.slane %v4498_v61, 4  ;;  %v6895_v45 = vpack.c.b16 %v6842_v46, %v6841_v43  ;;  %v8743_v46 = vld [vmem:[%s12261_s0 + $0x144] sm:$0xf] }
 0x2ac   :  { %7511 = vst.msk [vmem:[%s12263_s3 + $0x4] sm:$0xf] %vm7509_vm5, %v7446_v51  ;;  %v7255_v19 = vadd.f32 %v10773_v24, %v7187_v0  ;;  %v10857_v2 = vpop.f32.mrf.mxu1  ;;  %v5894_v6 = vadd.f32 %v5738_v21, %v5333_v3  ;;  %v8391_v21 = vld [vmem:[%s12261_s0 + $0x140] sm:$0x1]  ;;  %v10871_v32 = vrot.slane %v4494_v36, 5  ;;  %v6322_v0 = vor.u32 %v6321_v17, %v6318_v11 }
 0x2ad   :  { %v6335_v3 = vshll.u32 %v8742_v44, 16  ;;  %v5041_v18 = vpack.c.b16 %v4989_v41, %v4988_v12  ;;  %v6332_v15 = vor.u32 %v6331_v29, %v10865_v16  ;;  %v4504_v36 = vshll.u32 %v8391_v21, 16  ;;  %v8392_v12 = vld [vmem:[%s12261_s0 + $0x150] sm:$0xf]  ;;  %v8393_v21 = vld [vmem:[%s12261_s0 + $0x154] sm:$0xf] }
 0x2ae   :  { %v7319_v56 = vmul.f32 0.01, %v7255_v19  ;;  %v4501_v43 = vor.u32 %v4500_v58, %v10871_v32  ;;  %v6323_v11 = vrot.slane %v6322_v0, 4 }
 0x2af   :  { %v3886_v13 = vpop.f32.mrf.mxu0  ;;  %v6337_v17 = vrot.slane %v6335_v3, 5  ;;  %v6333_v44 = vrot.slane %v6332_v15, 4  ;;  %v4506_v29 = vrot.slane %v4504_v36, 5  ;;  %v4522_v36 = vshrl.u32 %v8393_v21, 16 }
 0x2b0   :  { %v7383_v31 = vmax.f32 %v7255_v19, %v7319_v56  ;;  %v4040_v5 = vadd.f32 %v3886_v13, %v9482_v54  ;;  %v8943_v54 = vld [vmem:[%s12261_s0 + $0x12c] sm:$0xff]  ;;  %v4491_v19 = vor.u32 %v4490_v9, %v4487_v60  ;;  %v6340_v60 = vshrl.u32 %v8743_v46, 16 }
 0x2b1   :  { %v7032_v20 = vpop.f32.mrf.mxu3  ;;  %v5743_v51 = vpop.f32.mrf.mxu2 }
 0x2b2   :  { %v7447_v39 = vpack.c.bf16 %v7383_v31, %v7383_v31  ;;  %v7188_v48 = vadd.f32 %v7032_v20, %v5894_v6  ;;  %v5334_v55 = vadd.f32 %v10823_v59, %v4040_v5  ;;  %8331 = vmatmul.msk.bf16.gmra.mxu0 %vm985_vm3, %v8910_v34  ;;  %v8744_v34 = vld [vmem:[%s12261_s0 + $0x148] sm:$0xf]  ;;  %v4492_v13 = vrot.slane %v4491_v19, 4 }
 0x2b3   :  { %v4502_v31 = vrot.slane %v4501_v43, 4  ;;  %v6343_v5 = vshll.u32 %v8743_v46, 16  ;;  %v6349_v0 = vshll.u32 %v8744_v34, 16  ;;  %v6353_v3 = vshrl.u32 %v8744_v34, 16 }
 0x2b4   :  { %7512 = vst.msk [vmem:[%s12263_s3 + $0x8] sm:$0xf] %vm7509_vm5, %v7447_v39  ;;  %v7256_v61 = vadd.f32 %v10773_v24, %v7188_v48  ;;  %v10884_v59 = vpop.f32.mrf.mxu1  ;;  %v5895_v6 = vadd.f32 %v5741_v52, %v5334_v55  ;;  %v4509_v39 = vshrl.u32 %v8392_v12, 16  ;;  %v4512_v48 = vshll.u32 %v8392_v12, 16  ;;  %v8911_v12 = vld [vmem:[%s12261_s0 + $0x120] sm:$0xff] }
 0x2b5   :  { %v4497_v15 = vsel %vm9045_vm4, %v4492_v13, %v10871_v32  ;;  %v4518_v19 = vshll.u32 %v8393_v21, 16  ;;  %v6342_v43 = vrot.slane %v6340_v60, 4  ;;  %v6345_v46 = vrot.slane %v6343_v5, 5  ;;  %v8745_v13 = vld [vmem:[%s12261_s0 + $0x14c] sm:$0x1] }
 0x2b6   :  { %v7320_v56 = vmul.f32 0.01, %v7256_v61  ;;  %8814 = vmatmul.msk.bf16.gmra.mxu3 %vm985_vm3, %v6895_v45  ;;  %8686 = vmatmul.msk.bf16.gmra.mxu2 %vm985_vm3, %v8943_v54  ;;  %v4511_v32 = vrot.slane %v4509_v39, 4  ;;  %v4990_v60 = vunpack.c.l.b16 %v4497_v15 }
 0x2b7   :  { %v3888_v41 = vpop.f32.mrf.mxu0  ;;  %8461 = vmatmul.msk.bf16.gmra.mxu1 %vm985_vm3, %v5041_v18  ;;  %v6338_v18 = vsel %vm9045_vm4, %v6333_v44, %v6337_v17  ;;  %v6355_v17 = vrot.slane %v6353_v3, 4 }
 0x2b8   :  { %v7384_v9 = vmax.f32 %v7256_v61, %v7320_v56  ;;  %v4041_v52 = vadd.f32 %v3888_v41, %v9495_v22  ;;  %v6328_v22 = vsel %vm9045_vm4, %v6323_v11, %v10865_v16  ;;  %v4507_v16 = vsel %vm9045_vm4, %v4502_v31, %v4506_v29 }
 0x2b9   :  { %v7035_v58 = vpop.f32.mrf.mxu3  ;;  %v5746_v20 = vpop.f32.mrf.mxu2  ;;  %v10921_v11 = vrot.slane %v6349_v0, 5  ;;  %v4514_v56 = vrot.slane %v4512_v48, 5  ;;  %v6843_v41 = vunpack.c.l.b16 %v6328_v22  ;;  %v6844_v44 = vunpack.c.l.b16 %v6338_v18 }
 0x2ba   :  { %v7448_v55 = vpack.c.bf16 %v7384_v9, %v7384_v9  ;;  %v7189_v45 = vadd.f32 %v7035_v58, %v5895_v6  ;;  %v5335_v54 = vadd.f32 %v10857_v2, %v4041_v52  ;;  %v4991_v9 = vunpack.c.l.b16 %v4507_v16  ;;  %v8394_v58 = vld [vmem:[%s12261_s0 + $0x158] sm:$0x1] }
 0x2bb   :  { %v10929_v52 = vrot.slane %v4518_v19, 5  ;;  %v4524_v31 = vrot.slane %v4522_v36, 4  ;;  %v6356_v39 = vor.u32 %v6355_v17, %v10921_v11  ;;  %v6359_v48 = vshll.u32 %v8745_v13, 16 }
 0x2bc   :  { %7513 = vst.msk [vmem:[%s12263_s3 + $0xc] sm:$0xf] %vm7509_vm5, %v7448_v55  ;;  %v7257_v2 = vadd.f32 %v10773_v24, %v7189_v45  ;;  %v10917_v61 = vpop.f32.mrf.mxu1  ;;  %v5896_v34 = vadd.f32 %v5743_v51, %v5335_v54  ;;  %v6346_v51 = vor.u32 %v6345_v46, %v6342_v43  ;;  %v4515_v55 = vor.u32 %v4514_v56, %v4511_v32 }
 0x2bd   :  { %v6896_v18 = vpack.c.b16 %v6844_v44, %v6843_v41  ;;  %v5042_v15 = vpack.c.b16 %v4991_v9, %v4990_v60  ;;  %v4525_v19 = vor.u32 %v4524_v31, %v10929_v52  ;;  %v4528_v36 = vshll.u32 %v8394_v58, 16  ;;  %v8747_v44 = vld [vmem:[%s12261_s0 + $0x160] sm:$0xf]  ;;  %v8395_v60 = vld [vmem:[%s12261_s0 + $0x168] sm:$0xf] }
 0x2be   :  { %v7321_v6 = vmul.f32 0.01, %v7257_v2  ;;  %v6357_v43 = vrot.slane %v6356_v39, 4  ;;  %v6361_v46 = vrot.slane %v6359_v48, 5  ;;  %v4516_v17 = vrot.slane %v4515_v55, 4 }
 0x2bf   :  { %v3891_v29 = vpop.f32.mrf.mxu0  ;;  %v4530_v41 = vrot.slane %v4528_v36, 5  ;;  %v6373_v48 = vshll.u32 %v8747_v44, 16 }
 0x2c0   :  { %v7385_v5 = vmax.f32 %v7257_v2, %v7321_v6  ;;  %v4042_v21 = vadd.f32 %v3891_v29, %v9526_v57  ;;  %v8944_v57 = vld [vmem:[%s12261_s0 + $0x144] sm:$0xff]  ;;  %v8746_v6 = vld [vmem:[%s12261_s0 + $0x15c] sm:$0xf] }
 0x2c1   :  { %v7037_v0 = vpop.f32.mrf.mxu3  ;;  %v5748_v3 = vpop.f32.mrf.mxu2  ;;  %v6367_v58 = vshll.u32 %v8746_v6, 16 }
 0x2c2   :  { %v7449_v45 = vpack.c.bf16 %v7385_v5, %v7385_v5  ;;  %v7190_v54 = vadd.f32 %v7037_v0, %v5896_v34  ;;  %v5336_v22 = vadd.f32 %v10884_v59, %v4042_v21  ;;  %8332 = vmatmul.msk.bf16.gmra.mxu0 %vm985_vm3, %v8911_v12  ;;  %v6347_v59 = vrot.slane %v6346_v51, 4 }
 0x2c3   :  { %v4526_v12 = vrot.slane %v4525_v19, 4  ;;  %v6362_v5 = vsel %vm9045_vm4, %v6357_v43, %v6361_v46  ;;  %v4521_v21 = vsel %vm9045_vm4, %v4516_v17, %v10929_v52  ;;  %v6364_v51 = vshrl.u32 %v8746_v6, 16  ;;  %v8912_v46 = vld [vmem:[%s12261_s0 + $0x138] sm:$0xff] }
 0x2c4   :  { %7514 = vst.msk [vmem:[%s12263_s3 + $0x10] sm:$0xf] %vm7509_vm5, %v7449_v45  ;;  %v7258_v2 = vadd.f32 %v10773_v24, %v7190_v54  ;;  %v10947_v16 = vpop.f32.mrf.mxu1  ;;  %v5897_v56 = vadd.f32 %v5746_v20, %v5336_v22  ;;  %v6352_v20 = vsel %vm9045_vm4, %v6347_v59, %v10921_v11  ;;  %v6377_v45 = vshrl.u32 %v8747_v44, 16 }
 0x2c5   :  { %v4531_v55 = vsel %vm9045_vm4, %v4526_v12, %v4530_v41  ;;  %v4533_v54 = vshrl.u32 %v8395_v60, 16  ;;  %v4536_v22 = vshll.u32 %v8395_v60, 16  ;;  %v6845_v19 = vunpack.c.l.b16 %v6352_v20 }
 0x2c6   :  { %v7322_v32 = vmul.f32 0.01, %v7258_v2  ;;  %8815 = vmatmul.msk.bf16.gmra.mxu3 %vm985_vm3, %v6896_v18  ;;  %8687 = vmatmul.msk.bf16.gmra.mxu2 %vm985_vm3, %v8944_v57  ;;  %v6366_v36 = vrot.slane %v6364_v51, 4  ;;  %v4992_v17 = vunpack.c.l.b16 %v4521_v21  ;;  %v6379_v12 = vrot.slane %v6377_v45, 4 }
 0x2c7   :  { %v3893_v34 = vpop.f32.mrf.mxu0  ;;  %8462 = vmatmul.msk.bf16.gmra.mxu1 %vm985_vm3, %v5042_v15  ;;  %v4535_v41 = vrot.slane %v4533_v54, 4  ;;  %v4538_v44 = vrot.slane %v4536_v22, 5 }
 0x2c8   :  { %v7386_v13 = vmax.f32 %v7258_v2, %v7322_v32  ;;  %v4043_v29 = vadd.f32 %v3893_v34, %v9543_v25  ;;  %v8396_v25 = vld [vmem:[%s12261_s0 + $0x16c] sm:$0xf]  ;;  %v6369_v2 = vrot.slane %v6367_v58, 5  ;;  %v4993_v32 = vunpack.c.l.b16 %v4531_v55 }
 0x2c9   :  { %v7040_v9 = vpop.f32.mrf.mxu3  ;;  %v5751_v31 = vpop.f32.mrf.mxu2  ;;  %v4542_v57 = vshll.u32 %v8396_v25, 16  ;;  %v4546_v15 = vshrl.u32 %v8396_v25, 16  ;;  %v10989_v34 = vrot.slane %v6373_v48, 5  ;;  %v4539_v55 = vor.u32 %v4538_v44, %v4535_v41  ;;  %v8399_v41 = vld [vmem:[%s12261_s0 + $0x184] sm:$0xf] }
 0x2ca   :  { %v7450_v11 = vpack.c.bf16 %v7386_v13, %v7386_v13  ;;  %v7191_v0 = vadd.f32 %v7040_v9, %v5897_v56  ;;  %v5337_v39 = vadd.f32 %v10917_v61, %v4043_v29  ;;  %v6846_v61 = vunpack.c.l.b16 %v6362_v5  ;;  %v8748_v56 = vld [vmem:[%s12261_s0 + $0x164] sm:$0x1] }
 0x2cb   :  { %v10995_v20 = vrot.slane %v4542_v57, 5  ;;  %v4548_v60 = vrot.slane %v4546_v15, 4  ;;  %v6370_v21 = vor.u32 %v6369_v2, %v6366_v36  ;;  %v6383_v51 = vshll.u32 %v8748_v56, 16  ;;  %v8750_v36 = vld [vmem:[%s12261_s0 + $0x178] sm:$0xf] }
 0x2cc   :  { %7515 = vst.msk [vmem:[%s12263_s3 + $0x14] sm:$0xf] %vm7509_vm5, %v7450_v11  ;;  %v7259_v52 = vadd.f32 %v10773_v24, %v7191_v0  ;;  %v10981_v18 = vpop.f32.mrf.mxu1  ;;  %v5898_v43 = vadd.f32 %v5748_v3, %v5337_v39  ;;  %v8397_v3 = vld [vmem:[%s12261_s0 + $0x170] sm:$0x1]  ;;  %v6897_v0 = vpack.c.b16 %v6846_v61, %v6845_v19  ;;  %v5043_v39 = vpack.c.b16 %v4993_v32, %v4992_v17  ;;  %v8398_v2 = vld [vmem:[%s12261_s0 + $0x180] sm:$0xf] }
 0x2cd   :  { %v6380_v48 = vor.u32 %v6379_v12, %v10989_v34  ;;  %v4552_v45 = vshll.u32 %v8397_v3, 16  ;;  %v4549_v22 = vor.u32 %v4548_v60, %v10995_v20  ;;  %v6371_v57 = vrot.slane %v6370_v21, 4 }
 0x2ce   :  { %v7323_v59 = vmul.f32 0.01, %v7259_v52  ;;  %v6385_v15 = vrot.slane %v6383_v51, 5  ;;  %v6401_v3 = vshrl.u32 %v8750_v36, 16  ;;  %v4557_v60 = vshrl.u32 %v8398_v2, 16 }
 0x2cf   :  { %v3896_v6 = vpop.f32.mrf.mxu0  ;;  %v4554_v17 = vrot.slane %v4552_v45, 5 }
 0x2d0   :  { %v7387_v13 = vmax.f32 %v7259_v52, %v7323_v59  ;;  %v4044_v29 = vadd.f32 %v3896_v6, %v9570_v62  ;;  %v8945_v62 = vld [vmem:[%s12261_s0 + $0x15c] sm:$0xff]  ;;  %v8749_v52 = vld [vmem:[%s12261_s0 + $0x174] sm:$0xf]  ;;  %v4550_v6 = vrot.slane %v4549_v22, 4 }
 0x2d1   :  { %v7042_v9 = vpop.f32.mrf.mxu3  ;;  %v5753_v5 = vpop.f32.mrf.mxu2  ;;  %v6388_v32 = vshrl.u32 %v8749_v52, 16  ;;  %v6391_v12 = vshll.u32 %v8749_v52, 16 }
 0x2d2   :  { %v7451_v58 = vpack.c.bf16 %v7387_v13, %v7387_v13  ;;  %v7192_v25 = vadd.f32 %v7042_v9, %v5898_v43  ;;  %v5338_v11 = vadd.f32 %v10947_v16, %v4044_v29  ;;  %8333 = vmatmul.msk.bf16.gmra.mxu0 %vm985_vm3, %v8912_v46  ;;  %v6381_v43 = vrot.slane %v6380_v48, 4 }
 0x2d3   :  { %v4540_v46 = vrot.slane %v4539_v55, 4  ;;  %v6397_v29 = vshll.u32 %v8750_v36, 16  ;;  %v4560_v9 = vshll.u32 %v8398_v2, 16  ;;  %v6390_v48 = vrot.slane %v6388_v32, 4  ;;  %v8751_v36 = vld [vmem:[%s12261_s0 + $0x17c] sm:$0x1] }
 0x2d4   :  { %7516 = vst.msk [vmem:[%s12263_s3 + $0x18] sm:$0xf] %vm7509_vm5, %v7451_v58  ;;  %v7260_v54 = vadd.f32 %v10773_v24, %v7192_v25  ;;  %v11008_v16 = vpop.f32.mrf.mxu1  ;;  %v5899_v61 = vadd.f32 %v5751_v31, %v5338_v11  ;;  %v6386_v25 = vsel %vm9045_vm4, %v6381_v43, %v6385_v15  ;;  %v6393_v55 = vrot.slane %v6391_v12, 5  ;;  %v8913_v15 = vld [vmem:[%s12261_s0 + $0x150] sm:$0xff] }
 0x2d5   :  { %v4545_v11 = vsel %vm9045_vm4, %v4540_v46, %v10995_v20  ;;  %v11045_v45 = vrot.slane %v6397_v29, 5  ;;  %v4559_v20 = vrot.slane %v4557_v60, 4  ;;  %v4562_v22 = vrot.slane %v4560_v9, 5 }
 0x2d6   :  { %v7324_v19 = vmul.f32 0.01, %v7260_v54  ;;  %8816 = vmatmul.msk.bf16.gmra.mxu3 %vm985_vm3, %v6897_v0  ;;  %8688 = vmatmul.msk.bf16.gmra.mxu2 %vm985_vm3, %v8945_v62  ;;  %v4566_v0 = vshll.u32 %v8399_v41, 16  ;;  %v4570_v62 = vshrl.u32 %v8399_v41, 16 }
 0x2d7   :  { %v3898_v59 = vpop.f32.mrf.mxu0  ;;  %8463 = vmatmul.msk.bf16.gmra.mxu1 %vm985_vm3, %v5043_v39  ;;  %v4563_v29 = vor.u32 %v4562_v22, %v4559_v20 }
 0x2d8   :  { %v7388_v56 = vmax.f32 %v7260_v54, %v7324_v19  ;;  %v4045_v31 = vadd.f32 %v3898_v59, %v9583_v30  ;;  %v6376_v30 = vsel %vm9045_vm4, %v6371_v57, %v10989_v34  ;;  %v4555_v34 = vsel %vm9045_vm4, %v4550_v6, %v4554_v17 }
 0x2d9   :  { %v7045_v44 = vpop.f32.mrf.mxu3  ;;  %v5756_v13 = vpop.f32.mrf.mxu2  ;;  %v6403_v54 = vrot.slane %v6401_v3, 4  ;;  %v6847_v19 = vunpack.c.l.b16 %v6376_v30  ;;  %v4994_v59 = vunpack.c.l.b16 %v4545_v11  ;;  %v4995_v43 = vunpack.c.l.b16 %v4555_v34 }
 0x2da   :  { %v7452_v21 = vpack.c.bf16 %v7388_v56, %v7388_v56  ;;  %v7193_v51 = vadd.f32 %v7045_v44, %v5899_v61  ;;  %v5339_v58 = vadd.f32 %v10981_v18, %v4045_v31  ;;  %v6848_v61 = vunpack.c.l.b16 %v6386_v25  ;;  %v8400_v31 = vld [vmem:[%s12261_s0 + $0x188] sm:$0x1] }
 0x2db   :  { %v11053_v46 = vrot.slane %v4566_v0, 5  ;;  %v4572_v17 = vrot.slane %v4570_v62, 4  ;;  %v6404_v41 = vor.u32 %v6403_v54, %v11045_v45  ;;  %v6407_v44 = vshll.u32 %v8751_v36, 16 }
 0x2dc   :  { %7517 = vst.msk [vmem:[%s12263_s3 + $0x1c] sm:$0xf] %vm7509_vm5, %v7452_v21  ;;  %v7261_v18 = vadd.f32 %v10773_v24, %v7193_v51  ;;  %v11041_v39 = vpop.f32.mrf.mxu1  ;;  %v5900_v57 = vadd.f32 %v5753_v5, %v5339_v58  ;;  %v6394_v5 = vor.u32 %v6393_v55, %v6390_v48  ;;  %v6898_v21 = vpack.c.b16 %v6848_v61, %v6847_v19  ;;  %v8752_v55 = vld [vmem:[%s12261_s0 + $0x18c] sm:$0xf]  ;;  %v8401_v19 = vld [vmem:[%s12261_s0 + $0x1b0] sm:$0xf] }
 0x2dd   :  { %v5044_v51 = vpack.c.b16 %v4995_v43, %v4994_v59  ;;  %v4573_v58 = vor.u32 %v4572_v17, %v11053_v46  ;;  %v4576_v30 = vshll.u32 %v8400_v31, 16  ;;  %v6405_v0 = vrot.slane %v6404_v41, 4 }
 0x2de   :  { %v7325_v52 = vmul.f32 0.01, %v7261_v18  ;;  %v6409_v62 = vrot.slane %v6407_v44, 5  ;;  %v6412_v43 = vshrl.u32 %v8752_v55, 16  ;;  %v6415_v17 = vshll.u32 %v8752_v55, 16 }
 0x2df   :  { %v3901_v2 = vpop.f32.mrf.mxu0  ;;  %v4574_v20 = vrot.slane %v4573_v58, 4  ;;  %v4578_v22 = vrot.slane %v4576_v30, 5  ;;  %v4581_v41 = vshrl.u32 %v8401_v19, 16  ;;  %v4584_v44 = vshll.u32 %v8401_v19, 16  ;;  %v8914_v30 = vld [vmem:[%s12261_s0 + $0x168] sm:$0xff] }
 0x2e0   :  { %v7389_v32 = vmax.f32 %v7261_v18, %v7325_v52  ;;  %v4046_v56 = vadd.f32 %v3901_v2, %v9614_v4  ;;  %v8946_v4 = vld [vmem:[%s12261_s0 + $0x174] sm:$0xff]  ;;  %v4564_v18 = vrot.slane %v4563_v29, 4  ;;  %v8753_v52 = vld [vmem:[%s12261_s0 + $0x190] sm:$0xf]  ;;  %v6410_v2 = vsel %vm9045_vm4, %v6405_v0, %v6409_v62 }
 0x2e1   :  { %v7047_v6 = vpop.f32.mrf.mxu3  ;;  %v5758_v12 = vpop.f32.mrf.mxu2  ;;  %v4579_v31 = vsel %vm9045_vm4, %v4574_v20, %v4578_v22  ;;  %v8754_v0 = vld [vmem:[%s12261_s0 + $0x194] sm:$0x1]  ;;  %v4586_v55 = vrot.slane %v4584_v44, 5 }
 0x2e2   :  { %v7453_v3 = vpack.c.bf16 %v7389_v32, %v7389_v32  ;;  %v7194_v60 = vadd.f32 %v7047_v6, %v5900_v57  ;;  %v5340_v9 = vadd.f32 %v11008_v16, %v4046_v56  ;;  %8334 = vmatmul.msk.bf16.gmra.mxu0 %vm985_vm3, %v8913_v15  ;;  %v6395_v16 = vrot.slane %v6394_v5, 4 }
 0x2e3   :  { %v4569_v59 = vsel %vm9045_vm4, %v4564_v18, %v11053_v46  ;;  %v6421_v5 = vshll.u32 %v8753_v52, 16  ;;  %v6425_v6 = vshrl.u32 %v8753_v52, 16  ;;  %v6431_v19 = vshll.u32 %v8754_v0, 16 }
 0x2e4   :  { %7518 = vst.msk [vmem:[%s12263_s3 + $0x20] sm:$0xf] %vm7509_vm5, %v7453_v3  ;;  %v7262_v25 = vadd.f32 %v10773_v24, %v7194_v60  ;;  %v11071_v11 = vpop.f32.mrf.mxu1  ;;  %v5901_v48 = vadd.f32 %v5756_v13, %v5340_v9  ;;  %v6400_v13 = vsel %vm9045_vm4, %v6395_v16, %v11045_v45  ;;  %v4997_v16 = vunpack.c.l.b16 %v4579_v31  ;;  %v8755_v31 = vld [vmem:[%s12261_s0 + $0x1bc] sm:$0xf] }
 0x2e5   :  { %v6849_v9 = vunpack.c.l.b16 %v6400_v13  ;;  %v11113_v18 = vrot.slane %v6421_v5, 5 }
 0x2e6   :  { %v7326_v34 = vmul.f32 0.01, %v7262_v25  ;;  %8817 = vmatmul.msk.bf16.gmra.mxu3 %vm985_vm3, %v6898_v21  ;;  %8689 = vmatmul.msk.bf16.gmra.mxu2 %vm985_vm3, %v8946_v4  ;;  %v6414_v21 = vrot.slane %v6412_v43, 4  ;;  %v6417_v4 = vrot.slane %v6415_v17, 5 }
 0x2e7   :  { %v3903_v54 = vpop.f32.mrf.mxu0  ;;  %8464 = vmatmul.msk.bf16.gmra.mxu1 %vm985_vm3, %v5044_v51 }
 0x2e8   :  { %v7390_v57 = vmax.f32 %v7262_v25, %v7326_v34  ;;  %v4047_v15 = vadd.f32 %v3903_v54, %v9631_v37  ;;  %v8402_v37 = vld [vmem:[%s12261_s0 + $0x1b4] sm:$0xf]  ;;  %v4996_v25 = vunpack.c.l.b16 %v4569_v59  ;;  %v6427_v34 = vrot.slane %v6425_v6, 4 }
 0x2e9   :  { %v7050_v61 = vpop.f32.mrf.mxu3  ;;  %v5761_v36 = vpop.f32.mrf.mxu2  ;;  %v4590_v3 = vshll.u32 %v8402_v37, 16  ;;  %v4594_v60 = vshrl.u32 %v8402_v37, 16  ;;  %v6418_v13 = vor.u32 %v6417_v4, %v6414_v21 }
 0x2ea   :  { %v7454_v45 = vpack.c.bf16 %v7390_v57, %v7390_v57  ;;  %v7195_v32 = vadd.f32 %v7050_v61, %v5901_v48  ;;  %v5341_v56 = vadd.f32 %v11041_v39, %v4047_v15  ;;  %v6850_v39 = vunpack.c.l.b16 %v6410_v2 }
 0x2eb   :  { %v4583_v48 = vrot.slane %v4581_v41, 4  ;;  %v11119_v22 = vrot.slane %v4590_v3, 5  ;;  %v4596_v52 = vrot.slane %v4594_v60, 4  ;;  %v5045_v17 = vpack.c.b16 %v4997_v16, %v4996_v25  ;;  %v8756_v3 = vld [vmem:[%s12261_s0 + $0x1c0] sm:$0xf] }
 0x2ec   :  { %7519 = vst.msk [vmem:[%s12263_s3 + $0x24] sm:$0xf] %vm7509_vm5, %v7454_v45  ;;  %v7263_v46 = vadd.f32 %v10773_v24, %v7195_v32  ;;  %v11105_v29 = vpop.f32.mrf.mxu1  ;;  %v5902_v58 = vadd.f32 %v5758_v12, %v5341_v56  ;;  %v8403_v12 = vld [vmem:[%s12261_s0 + $0x1b8] sm:$0x1]  ;;  %v6899_v43 = vpack.c.b16 %v6850_v39, %v6849_v9  ;;  %v6428_v37 = vor.u32 %v6427_v34, %v11113_v18  ;;  %v8404_v60 = vld [vmem:[%s12261_s0 + $0x1c8] sm:$0xf] }
 0x2ed   :  { %v4587_v45 = vor.u32 %v4586_v55, %v4583_v48  ;;  %v4600_v32 = vshll.u32 %v8403_v12, 16  ;;  %v4597_v5 = vor.u32 %v4596_v52, %v11119_v22  ;;  %v6419_v6 = vrot.slane %v6418_v13, 4  ;;  %v8405_v16 = vld [vmem:[%s12261_s0 + $0x1cc] sm:$0xf] }
 0x2ee   :  { %v7327_v51 = vmul.f32 0.01, %v7263_v46  ;;  %v6433_v41 = vrot.slane %v6431_v19, 5  ;;  %v6429_v39 = vrot.slane %v6428_v37, 4  ;;  %v6439_v25 = vshll.u32 %v8755_v31, 16 }
 0x2ef   :  { %v3906_v62 = vpop.f32.mrf.mxu0  ;;  %v4588_v21 = vrot.slane %v4587_v45, 4  ;;  %v4602_v4 = vrot.slane %v4600_v32, 5  ;;  %v6445_v34 = vshll.u32 %v8756_v3, 16  ;;  %v6449_v48 = vshrl.u32 %v8756_v3, 16 }
 0x2f0   :  { %v7391_v54 = vmax.f32 %v7263_v46, %v7327_v51  ;;  %v4048_v20 = vadd.f32 %v3906_v62, %v9658_v14  ;;  %v8947_v14 = vld [vmem:[%s12261_s0 + $0x18c] sm:$0xff]  ;;  %v6436_v51 = vshrl.u32 %v8755_v31, 16  ;;  %v4605_v55 = vshrl.u32 %v8404_v60, 16  ;;  %v8757_v31 = vld [vmem:[%s12261_s0 + $0x1c4] sm:$0x1] }
 0x2f1   :  { %v7052_v57 = vpop.f32.mrf.mxu3  ;;  %v5763_v15 = vpop.f32.mrf.mxu2  ;;  %v4593_v13 = vsel %vm9045_vm4, %v4588_v21, %v11119_v22  ;;  %v4614_v19 = vshll.u32 %v8405_v16, 16 }
 0x2f2   :  { %v7455_v61 = vpack.c.bf16 %v7391_v54, %v7391_v54  ;;  %v7196_v2 = vadd.f32 %v7052_v57, %v5902_v58  ;;  %v5342_v59 = vadd.f32 %v11071_v11, %v4048_v20  ;;  %8335 = vmatmul.msk.bf16.gmra.mxu0 %vm985_vm3, %v8914_v30  ;;  %v4598_v30 = vrot.slane %v4597_v5, 4 }
 0x2f3   :  { %v4608_v54 = vshll.u32 %v8404_v60, 16  ;;  %v6434_v57 = vsel %vm9045_vm4, %v6429_v39, %v6433_v41  ;;  %v4607_v22 = vrot.slane %v4605_v55, 4  ;;  %v4998_v41 = vunpack.c.l.b16 %v4593_v13  ;;  %v8406_v39 = vld [vmem:[%s12261_s0 + $0x1d0] sm:$0x1] }
 0x2f4   :  { %7520 = vst.msk [vmem:[%s12263_s3 + $0x28] sm:$0xf] %vm7509_vm5, %v7455_v61  ;;  %v7264_v56 = vadd.f32 %v10773_v24, %v7196_v2  ;;  %v11132_v11 = vpop.f32.mrf.mxu1  ;;  %v5903_v46 = vadd.f32 %v5761_v36, %v5342_v59  ;;  %v4618_v61 = vshrl.u32 %v8405_v16, 16  ;;  %v6438_v59 = vrot.slane %v6436_v51, 4 }
 0x2f5   :  { %v4610_v37 = vrot.slane %v4608_v54, 5  ;;  %v4624_v55 = vshll.u32 %v8406_v39, 16 }
 0x2f6   :  { %v7328_v44 = vmul.f32 0.01, %v7264_v56  ;;  %8818 = vmatmul.msk.bf16.gmra.mxu3 %vm985_vm3, %v6899_v43  ;;  %8690 = vmatmul.msk.bf16.gmra.mxu2 %vm985_vm3, %v8947_v14  ;;  %v6441_v43 = vrot.slane %v6439_v25, 5  ;;  %v11169_v14 = vrot.slane %v6445_v34, 5  ;;  %v4620_v3 = vrot.slane %v4618_v61, 4 }
 0x2f7   :  { %v3908_v9 = vpop.f32.mrf.mxu0  ;;  %8465 = vmatmul.msk.bf16.gmra.mxu1 %vm985_vm3, %v5045_v17  ;;  %v6451_v17 = vrot.slane %v6449_v48, 4  ;;  %v8758_v61 = vld [vmem:[%s12261_s0 + $0x1d4] sm:$0xf] }
 0x2f8   :  { %v7392_v58 = vmax.f32 %v7264_v56, %v7328_v44  ;;  %v4049_v36 = vadd.f32 %v3908_v9, %v9671_v47  ;;  %v6424_v47 = vsel %vm9045_vm4, %v6419_v6, %v11113_v18  ;;  %v4603_v18 = vsel %vm9045_vm4, %v4598_v30, %v4602_v4  ;;  %v8915_v56 = vld [vmem:[%s12261_s0 + $0x180] sm:$0xff] }
 0x2f9   :  { %v7055_v0 = vpop.f32.mrf.mxu3  ;;  %v5766_v62 = vpop.f32.mrf.mxu2  ;;  %v6851_v5 = vunpack.c.l.b16 %v6424_v47  ;;  %v4999_v44 = vunpack.c.l.b16 %v4603_v18  ;;  %v6452_v51 = vor.u32 %v6451_v17, %v11169_v14 }
 0x2fa   :  { %v7456_v20 = vpack.c.bf16 %v7392_v58, %v7392_v58  ;;  %v7197_v12 = vadd.f32 %v7055_v0, %v5903_v46  ;;  %v5343_v52 = vadd.f32 %v11105_v29, %v4049_v36  ;;  %v11177_v46 = vrot.slane %v4614_v19, 5 }
 0x2fb   :  { %v6455_v58 = vshll.u32 %v8757_v31, 16  ;;  %v4611_v36 = vor.u32 %v4610_v37, %v4607_v22  ;;  %v5046_v34 = vpack.c.b16 %v4999_v44, %v4998_v41  ;;  %v8407_v37 = vld [vmem:[%s12261_s0 + $0x1e0] sm:$0xf]  ;;  %v6463_v31 = vshll.u32 %v8758_v61, 16 }
 0x2fc   :  { %7521 = vst.msk [vmem:[%s12263_s3 + $0x2c] sm:$0xf] %vm7509_vm5, %v7456_v20  ;;  %v7265_v29 = vadd.f32 %v10773_v24, %v7197_v12  ;;  %v11165_v2 = vpop.f32.mrf.mxu1  ;;  %v5904_v32 = vadd.f32 %v5763_v15, %v5343_v52  ;;  %v6852_v24 = vunpack.c.l.b16 %v6434_v57  ;;  %v6442_v15 = vor.u32 %v6441_v43, %v6438_v59  ;;  %v8759_v43 = vld [vmem:[%s12261_s0 + $0x1d8] sm:$0xf] }
 0x2fd   :  { %v4621_v48 = vor.u32 %v4620_v3, %v11177_v46  ;;  %v6453_v52 = vrot.slane %v6452_v51, 4  ;;  %v6457_v47 = vrot.slane %v6455_v58, 5  ;;  %v4612_v57 = vrot.slane %v4611_v36, 4 }
 0x2fe   :  { %v7329_v45 = vmul.f32 0.01, %v7265_v29  ;;  %v6900_v0 = vpack.c.b16 %v6852_v24, %v6851_v5  ;;  %v6443_v12 = vrot.slane %v6442_v15, 4  ;;  %v4626_v59 = vrot.slane %v4624_v55, 5 }
 0x2ff   :  { %v3911_v6 = vpop.f32.mrf.mxu0  ;;  %v4622_v18 = vrot.slane %v4621_v48, 4  ;;  %v4617_v5 = vsel %vm9045_vm4, %v4612_v57, %v11177_v46  ;;  %v6460_v24 = vshrl.u32 %v8758_v61, 16  ;;  %v6469_v44 = vshll.u32 %v8759_v43, 16  ;;  %v8760_v48 = vld [vmem:[%s12261_s0 + $0x1dc] sm:$0x1] }
 0x300   :  { %v7393_v60 = vmax.f32 %v7265_v29, %v7329_v45  ;;  %v4050_v9 = vadd.f32 %v3911_v6, %v9702_v28  ;;  %v8948_v28 = vld [vmem:[%s12261_s0 + $0x1bc] sm:$0xff]  ;;  %v4632_v15 = vshll.u32 %v8407_v37, 16 }
 0x301   :  { %v7057_v21 = vpop.f32.mrf.mxu3  ;;  %v5768_v4 = vpop.f32.mrf.mxu2  ;;  %v4627_v3 = vsel %vm9045_vm4, %v4622_v18, %v4626_v59  ;;  %v6462_v36 = vrot.slane %v6460_v24, 4 }
 0x302   :  { %v7457_v30 = vpack.c.bf16 %v7393_v60, %v7393_v60  ;;  %v7198_v25 = vadd.f32 %v7057_v21, %v5904_v32  ;;  %v5344_v16 = vadd.f32 %v11132_v11, %v4050_v9  ;;  %8336 = vmatmul.msk.bf16.gmra.mxu0 %vm985_vm3, %v8915_v56  ;;  %v11197_v11 = vld [vmem:[%s12262_s2] ss:$0 sm:$0xff]  ;;  %v6458_v56 = vsel %vm9045_vm4, %v6453_v52, %v6457_v47 }
 0x303   :  { %v6473_v60 = vshrl.u32 %v8759_v43, 16  ;;  %v4629_v9 = vshrl.u32 %v8407_v37, 16  ;;  %v4634_v47 = vrot.slane %v4632_v15, 5  ;;  %v6479_v43 = vshll.u32 %v8760_v48, 16 }
 0x304   :  { %7522 = vst.msk [vmem:[%s12263_s3 + $0x30] sm:$0xf] %vm7509_vm5, %v7457_v30  ;;  %v7266_v54 = vadd.f32 %v11197_v11, %v7198_v25  ;;  %v11200_v20 = vpop.f32.mrf.mxu1  ;;  %v5905_v19 = vadd.f32 %v5766_v62, %v5344_v16  ;;  %v6448_v62 = vsel %vm9045_vm4, %v6443_v12, %v11169_v14  ;;  %v6465_v30 = vrot.slane %v6463_v31, 5 }
 0x305   :  { %v6853_v58 = vunpack.c.l.b16 %v6448_v62  ;;  %v6475_v12 = vrot.slane %v6473_v60, 4  ;;  %v4631_v52 = vrot.slane %v4629_v9, 4  ;;  %v8762_v60 = vld [vmem:[%s12261_s0 + $0x1f0] sm:$0xf]  ;;  %v8410_v9 = vld [vmem:[%s12261_s0 + $0x1f8] sm:$0xf] }
 0x306   :  { %v7330_v13 = vmul.f32 0.01, %v7266_v54  ;;  %8819 = vmatmul.msk.bf16.gmra.mxu3 %vm985_vm3, %v6900_v0  ;;  %8691 = vmatmul.msk.bf16.gmra.mxu2 %vm985_vm3, %v8948_v28  ;;  %v8916_v0 = vld [vmem:[%s12261_s0 + $0x1b0] sm:$0xff]  ;;  %v5000_v28 = vunpack.c.l.b16 %v4617_v5  ;;  %v6466_v59 = vor.u32 %v6465_v30, %v6462_v36  ;;  %v4653_v48 = vshrl.u32 %v8410_v9, 16 }
 0x307   :  { %v3913_v29 = vpop.f32.mrf.mxu0  ;;  %8466 = vmatmul.msk.bf16.gmra.mxu1 %vm985_vm3, %v5046_v34  ;;  %v5001_v34 = vunpack.c.l.b16 %v4627_v3  ;;  %v4635_v5 = vor.u32 %v4634_v47, %v4631_v52 }
 0x308   :  { %v7394_v17 = vmax.f32 %v7266_v54, %v7330_v13  ;;  %v4051_v22 = vadd.f32 %v3913_v29, %v9719_v1  ;;  %v8408_v1 = vld [vmem:[%s12261_s0 + $0x1e4] sm:$0xf]  ;;  %v11242_v54 = vrot.slane %v6469_v44, 5 }
 0x309   :  { %v7060_v45 = vpop.f32.mrf.mxu3  ;;  %v5771_v32 = vpop.f32.mrf.mxu2  ;;  %v4638_v21 = vshll.u32 %v8408_v1, 16  ;;  %v4642_v51 = vshrl.u32 %v8408_v1, 16 }
 0x30a   :  { %v7458_v14 = vpack.c.bf16 %v7394_v17, %v7394_v17  ;;  %v7199_v6 = vadd.f32 %v7060_v45, %v5905_v19  ;;  %v5345_v41 = vadd.f32 %v11165_v2, %v4051_v22  ;;  %v6854_v2 = vunpack.c.l.b16 %v6458_v56 }
 0x30b   :  { %v11248_v19 = vrot.slane %v4638_v21, 5  ;;  %v4644_v61 = vrot.slane %v4642_v51, 4  ;;  %v5047_v45 = vpack.c.b16 %v5001_v34, %v5000_v28  ;;  %v6476_v56 = vor.u32 %v6475_v12, %v11242_v54 }
 0x30c   :  { %7523 = vst.msk [vmem:[%s12263_s3 + $0x34] sm:$0xf] %vm7509_vm5, %v7458_v14  ;;  %v7267_v46 = vadd.f32 %v11197_v11, %v7199_v6  ;;  %v11234_v39 = vpop.f32.mrf.mxu1  ;;  %v5906_v16 = vadd.f32 %v5768_v4, %v5345_v41  ;;  %v8409_v4 = vld [vmem:[%s12261_s0 + $0x1e8] sm:$0x1]  ;;  %v6901_v37 = vpack.c.b16 %v6854_v2, %v6853_v58  ;;  %v8761_v14 = vld [vmem:[%s12261_s0 + $0x1ec] sm:$0xf] }
 0x30d   :  { %v4648_v24 = vshll.u32 %v8409_v4, 16  ;;  %v4645_v1 = vor.u32 %v4644_v61, %v11248_v19  ;;  %v6467_v6 = vrot.slane %v6466_v59, 4  ;;  %v6481_v41 = vrot.slane %v6479_v43, 5 }
 0x30e   :  { %v7331_v25 = vmul.f32 0.01, %v7267_v46  ;;  %v4636_v21 = vrot.slane %v4635_v5, 4  ;;  %v6484_v58 = vshrl.u32 %v8761_v14, 16  ;;  %v6487_v30 = vshll.u32 %v8761_v14, 16 }
 0x30f   :  { %v3916_v55 = vpop.f32.mrf.mxu0  ;;  %v4650_v51 = vrot.slane %v4648_v24, 5  ;;  %v4646_v36 = vrot.slane %v4645_v1, 4  ;;  %v6493_v28 = vshll.u32 %v8762_v60, 16  ;;  %v6497_v34 = vshrl.u32 %v8762_v60, 16  ;;  %v8763_v24 = vld [vmem:[%s12261_s0 + $0x1f4] sm:$0x1] }
 0x310   :  { %v7395_v57 = vmax.f32 %v7267_v46, %v7331_v25  ;;  %v4052_v13 = vadd.f32 %v3916_v55, %v9746_v42  ;;  %v8949_v42 = vld [vmem:[%s12261_s0 + $0x1d4] sm:$0xff]  ;;  %v6477_v46 = vrot.slane %v6476_v56, 4  ;;  %v8411_v25 = vld [vmem:[%s12261_s0 + $0x1fc] sm:$0xf]  ;;  %v4656_v55 = vshll.u32 %v8410_v9, 16 }
 0x311   :  { %v7062_v29 = vpop.f32.mrf.mxu3  ;;  %v5773_v18 = vpop.f32.mrf.mxu2  ;;  %v4662_v4 = vshll.u32 %v8411_v25, 16  ;;  %v4666_v61 = vshrl.u32 %v8411_v25, 16  ;;  %v6486_v59 = vrot.slane %v6484_v58, 4  ;;  %v6489_v43 = vrot.slane %v6487_v30, 5  ;;  %v8412_v60 = vld [vmem:[%s12261_s0 + $0x200] sm:$0x1] }
 0x312   :  { %v7459_v17 = vpack.c.bf16 %v7395_v57, %v7395_v57  ;;  %v7200_v22 = vadd.f32 %v7062_v29, %v5906_v16  ;;  %v5346_v62 = vadd.f32 %v11200_v20, %v4052_v13  ;;  %8337 = vmatmul.msk.bf16.gmra.mxu0 %vm985_vm3, %v8916_v0  ;;  %v6482_v57 = vsel %vm9045_vm4, %v6477_v46, %v6481_v41 }
 0x313   :  { %v4641_v13 = vsel %vm9045_vm4, %v4636_v21, %v11248_v19  ;;  %v4655_v19 = vrot.slane %v4653_v48, 4  ;;  %v6856_v5 = vunpack.c.l.b16 %v6482_v57  ;;  %v4668_v41 = vrot.slane %v4666_v61, 4  ;;  %v8765_v61 = vld [vmem:[%s12261_s0 + $0x208] sm:$0xf] }
 0x314   :  { %7524 = vst.msk [vmem:[%s12263_s3 + $0x38] sm:$0xf] %vm7509_vm5, %v7459_v17  ;;  %v7268_v31 = vadd.f32 %v11197_v11, %v7200_v22  ;;  %v11261_v20 = vpop.f32.mrf.mxu1  ;;  %v5907_v3 = vadd.f32 %v5771_v32, %v5346_v62  ;;  %v11298_v17 = vrot.slane %v6493_v28, 5  ;;  %v6499_v22 = vrot.slane %v6497_v34, 4 }
 0x315   :  { %v4658_v62 = vrot.slane %v4656_v55, 5  ;;  %v5002_v1 = vunpack.c.l.b16 %v4641_v13  ;;  %v6503_v21 = vshll.u32 %v8763_v24, 16 }
 0x316   :  { %v7332_v44 = vmul.f32 0.01, %v7268_v31  ;;  %8820 = vmatmul.msk.bf16.gmra.mxu3 %vm985_vm3, %v6901_v37  ;;  %8692 = vmatmul.msk.bf16.gmra.mxu2 %vm985_vm3, %v8949_v42  ;;  %v6500_v46 = vor.u32 %v6499_v22, %v11298_v17 }
 0x317   :  { %v3918_v15 = vpop.f32.mrf.mxu0  ;;  %8467 = vmatmul.msk.bf16.gmra.mxu1 %vm985_vm3, %v5047_v45  ;;  %v8917_v45 = vld [vmem:[%s12261_s0 + $0x1c8] sm:$0xff]  ;;  %v6505_v55 = vrot.slane %v6503_v21, 5 }
 0x318   :  { %v7396_v2 = vmax.f32 %v7268_v31, %v7332_v44  ;;  %v4053_v32 = vadd.f32 %v3918_v15, %v9759_v10  ;;  %v6472_v10 = vsel %vm9045_vm4, %v6467_v6, %v11242_v54  ;;  %v4651_v54 = vsel %vm9045_vm4, %v4646_v36, %v4650_v51 }
 0x319   :  { %v7065_v16 = vpop.f32.mrf.mxu3  ;;  %v5776_v0 = vpop.f32.mrf.mxu2  ;;  %v6855_v56 = vunpack.c.l.b16 %v6472_v10  ;;  %v5003_v14 = vunpack.c.l.b16 %v4651_v54  ;;  %v11306_v6 = vrot.slane %v4662_v4, 5  ;;  %v4659_v51 = vor.u32 %v4658_v62, %v4655_v19  ;;  %v8764_v10 = vld [vmem:[%s12261_s0 + $0x204] sm:$0xf] }
 0x31a   :  { %v7460_v12 = vpack.c.bf16 %v7396_v2, %v7396_v2  ;;  %v7201_v52 = vadd.f32 %v7065_v16, %v5907_v3  ;;  %v5347_v47 = vadd.f32 %v11234_v39, %v4053_v32  ;;  %v4672_v16 = vshll.u32 %v8412_v60, 16 }
 0x31b   :  { %v6902_v36 = vpack.c.b16 %v6856_v5, %v6855_v56  ;;  %v5048_v30 = vpack.c.b16 %v5003_v14, %v5002_v1  ;;  %v4669_v25 = vor.u32 %v4668_v41, %v11306_v6  ;;  %v6501_v48 = vrot.slane %v6500_v46, 4 }
 0x31c   :  { %7525 = vst.msk [vmem:[%s12263_s3 + $0x3c] sm:$0xf] %vm7509_vm5, %v7460_v12  ;;  %v7269_v39 = vadd.f32 %v11197_v11, %v7201_v52  ;;  %v11294_v29 = vpop.f32.mrf.mxu1  ;;  %v5908_v42 = vadd.f32 %v5773_v18, %v5347_v47  ;;  %v6490_v18 = vor.u32 %v6489_v43, %v6486_v59  ;;  %v4660_v12 = vrot.slane %v4659_v51, 4  ;;  %v8413_v59 = vld [vmem:[%s12261_s0 + $0x210] sm:$0xf]  ;;  %v8918_v51 = vld [vmem:[%s12261_s0 + $0x1e0] sm:$0xff] }
 0x31d   :  { %v4670_v13 = vrot.slane %v4669_v25, 4  ;;  %v4674_v4 = vrot.slane %v4672_v16, 5  ;;  %v6506_v19 = vsel %vm9045_vm4, %v6501_v48, %v6505_v55  ;;  %v6517_v5 = vshll.u32 %v8765_v61, 16 }
 0x31e   :  { %v7333_v37 = vmul.f32 0.01, %v7269_v39  ;;  %v4665_v62 = vsel %vm9045_vm4, %v4660_v12, %v11306_v6  ;;  %v4677_v1 = vshrl.u32 %v8413_v59, 16  ;;  %v4680_v14 = vshll.u32 %v8413_v59, 16 }
 0x31f   :  { %v3921_v31 = vpop.f32.mrf.mxu0  ;;  %v4675_v24 = vsel %vm9045_vm4, %v4670_v13, %v4674_v4 }
 0x320   :  { %v7397_v44 = vmax.f32 %v7269_v39, %v7333_v37  ;;  %v4054_v3 = vadd.f32 %v3921_v31, %v9790_v63  ;;  %v8950_v63 = vld [vmem:[%s12261_s0 + $0x1ec] sm:$0xff]  ;;  %v6508_v37 = vshrl.u32 %v8764_v10, 16  ;;  %v6521_v31 = vshrl.u32 %v8765_v61, 16 }
 0x321   :  { %v7067_v9 = vpop.f32.mrf.mxu3  ;;  %v5778_v15 = vpop.f32.mrf.mxu2  ;;  %v4679_v25 = vrot.slane %v4677_v1, 4  ;;  %v4682_v16 = vrot.slane %v4680_v14, 5 }
 0x322   :  { %v7461_v58 = vpack.c.bf16 %v7397_v44, %v7397_v44  ;;  %v7202_v2 = vadd.f32 %v7067_v9, %v5908_v42  ;;  %v5348_v32 = vadd.f32 %v11261_v20, %v4054_v3  ;;  %8338 = vmatmul.msk.bf16.gmra.mxu0 %vm985_vm3, %v8917_v45  ;;  %v6491_v20 = vrot.slane %v6490_v18, 4 }
 0x323   :  { %v6511_v42 = vshll.u32 %v8764_v10, 16  ;;  %v6510_v60 = vrot.slane %v6508_v37, 4 }
 0x324   :  { %7526 = vst.msk [vmem:[%s12263_s3 + $0x40] sm:$0xf] %vm7509_vm5, %v7461_v58  ;;  %v7270_v28 = vadd.f32 %v11197_v11, %v7202_v2  ;;  %v11324_v34 = vpop.f32.mrf.mxu1  ;;  %v5909_v47 = vadd.f32 %v5776_v0, %v5348_v32  ;;  %v6496_v0 = vsel %vm9045_vm4, %v6491_v20, %v11298_v17  ;;  %v5004_v58 = vunpack.c.l.b16 %v4665_v62  ;;  %v8766_v32 = vld [vmem:[%s12261_s0 + $0x20c] sm:$0x1]  ;;  %v8767_v62 = vld [vmem:[%s12261_s0 + $0x21c] sm:$0xf] }
 0x325   :  { %v6857_v18 = vunpack.c.l.b16 %v6496_v0  ;;  %v6513_v9 = vrot.slane %v6511_v42, 5  ;;  %v5005_v2 = vunpack.c.l.b16 %v4675_v24  ;;  %v6527_v10 = vshll.u32 %v8766_v32, 16 }
 0x326   :  { %v7334_v52 = vmul.f32 0.01, %v7270_v28  ;;  %8821 = vmatmul.msk.bf16.gmra.mxu3 %vm985_vm3, %v6902_v36  ;;  %8693 = vmatmul.msk.bf16.gmra.mxu2 %vm985_vm3, %v8950_v63  ;;  %v11366_v63 = vrot.slane %v6517_v5, 5  ;;  %v4683_v0 = vor.u32 %v4682_v16, %v4679_v25  ;;  %v6532_v14 = vshrl.u32 %v8767_v62, 16 }
 0x327   :  { %v3923_v57 = vpop.f32.mrf.mxu0  ;;  %8468 = vmatmul.msk.bf16.gmra.mxu1 %vm985_vm3, %v5048_v30  ;;  %v6523_v30 = vrot.slane %v6521_v31, 4  ;;  %v6529_v42 = vrot.slane %v6527_v10, 5 }
 0x328   :  { %v7398_v39 = vmax.f32 %v7270_v28, %v7334_v52  ;;  %v4055_v54 = vadd.f32 %v3923_v57, %v9807_v40  ;;  %v8414_v40 = vld [vmem:[%s12261_s0 + $0x214] sm:$0xf]  ;;  %v4684_v31 = vrot.slane %v4683_v0, 4 }
 0x329   :  { %v7070_v43 = vpop.f32.mrf.mxu3  ;;  %v5781_v22 = vpop.f32.mrf.mxu2  ;;  %v4686_v44 = vshll.u32 %v8414_v40, 16  ;;  %v4690_v3 = vshrl.u32 %v8414_v40, 16 }
 0x32a   :  { %v7462_v17 = vpack.c.bf16 %v7398_v39, %v7398_v39  ;;  %v7203_v45 = vadd.f32 %v7070_v43, %v5909_v47  ;;  %v5349_v56 = vadd.f32 %v11294_v29, %v4055_v54  ;;  %v6858_v29 = vunpack.c.l.b16 %v6506_v19 }
 0x32b   :  { %v11372_v48 = vrot.slane %v4686_v44, 5  ;;  %v4692_v55 = vrot.slane %v4690_v3, 4  ;;  %v6514_v47 = vor.u32 %v6513_v9, %v6510_v60  ;;  %v5049_v39 = vpack.c.b16 %v5005_v2, %v5004_v58 }
 0x32c   :  { %7527 = vst.msk [vmem:[%s12263_s3 + $0x44] sm:$0xf] %vm7509_vm5, %v7462_v17  ;;  %v7271_v6 = vadd.f32 %v11197_v11, %v7203_v45  ;;  %v11358_v41 = vpop.f32.mrf.mxu1  ;;  %v5910_v21 = vadd.f32 %v5778_v15, %v5349_v56  ;;  %v8415_v15 = vld [vmem:[%s12261_s0 + $0x218] sm:$0x1]  ;;  %v6903_v61 = vpack.c.b16 %v6858_v29, %v6857_v18  ;;  %v6524_v54 = vor.u32 %v6523_v30, %v11366_v63  ;;  %v8768_v45 = vld [vmem:[%s12261_s0 + $0x220] sm:$0xf] }
 0x32d   :  { %v4696_v59 = vshll.u32 %v8415_v15, 16  ;;  %v4693_v19 = vor.u32 %v4692_v55, %v11372_v48  ;;  %v6515_v37 = vrot.slane %v6514_v47, 4  ;;  %v8416_v56 = vld [vmem:[%s12261_s0 + $0x228] sm:$0xf]  ;;  %v6535_v3 = vshll.u32 %v8767_v62, 16 }
 0x32e   :  { %v7335_v46 = vmul.f32 0.01, %v7271_v6  ;;  %v6525_v24 = vrot.slane %v6524_v54, 4  ;;  %v8417_v18 = vld [vmem:[%s12261_s0 + $0x22c] sm:$0xf]  ;;  %v6541_v9 = vshll.u32 %v8768_v45, 16  ;;  %v4689_v30 = vsel %vm9045_vm4, %v4684_v31, %v11372_v48 }
 0x32f   :  { %v3926_v36 = vpop.f32.mrf.mxu0  ;;  %v4698_v1 = vrot.slane %v4696_v59, 5  ;;  %v4694_v44 = vrot.slane %v4693_v19, 4  ;;  %v4710_v25 = vshll.u32 %v8417_v18, 16  ;;  %v4714_v16 = vshrl.u32 %v8417_v18, 16 }
 0x330   :  { %v7399_v28 = vmax.f32 %v7271_v6, %v7335_v46  ;;  %v4056_v20 = vadd.f32 %v3926_v36, %v9834_v26  ;;  %v8951_v26 = vld [vmem:[%s12261_s0 + $0x204] sm:$0xff]  ;;  %v6545_v46 = vshrl.u32 %v8768_v45, 16  ;;  %v6530_v36 = vsel %vm9045_vm4, %v6525_v24, %v6529_v42 }
 0x331   :  { %v7072_v12 = vpop.f32.mrf.mxu3  ;;  %v5783_v52 = vpop.f32.mrf.mxu2  ;;  %v6537_v15 = vrot.slane %v6535_v3, 5  ;;  %v11422_v55 = vrot.slane %v6541_v9, 5  ;;  %v5006_v54 = vunpack.c.l.b16 %v4689_v30  ;;  %v11430_v59 = vrot.slane %v4710_v25, 5  ;;  %v8419_v25 = vld [vmem:[%s12261_s0 + $0x240] sm:$0xf] }
 0x332   :  { %v7463_v57 = vpack.c.bf16 %v7399_v28, %v7399_v28  ;;  %v7204_v13 = vadd.f32 %v7072_v12, %v5910_v21  ;;  %v5350_v4 = vadd.f32 %v11324_v34, %v4056_v20  ;;  %8339 = vmatmul.msk.bf16.gmra.mxu0 %vm985_vm3, %v8918_v51  ;;  %v4701_v21 = vshrl.u32 %v8416_v56, 16 }
 0x333   :  { %v4704_v51 = vshll.u32 %v8416_v56, 16  ;;  %v6534_v20 = vrot.slane %v6532_v14, 4  ;;  %v6547_v12 = vrot.slane %v6545_v46, 4 }
 0x334   :  { %7528 = vst.msk [vmem:[%s12263_s3 + $0x48] sm:$0xf] %vm7509_vm5, %v7463_v57  ;;  %v7272_v43 = vadd.f32 %v11197_v11, %v7204_v13  ;;  %v11385_v34 = vpop.f32.mrf.mxu1  ;;  %v5911_v17 = vadd.f32 %v5781_v22, %v5350_v4  ;;  %v4703_v48 = vrot.slane %v4701_v21, 4  ;;  %v8919_v13 = vld [vmem:[%s12261_s0 + $0x1f8] sm:$0xff] }
 0x335   :  { %v4706_v47 = vrot.slane %v4704_v51, 5  ;;  %v8770_v51 = vld [vmem:[%s12261_s0 + $0x234] sm:$0xf] }
 0x336   :  { %v7336_v40 = vmul.f32 0.01, %v7272_v43  ;;  %8822 = vmatmul.msk.bf16.gmra.mxu3 %vm985_vm3, %v6903_v61  ;;  %8694 = vmatmul.msk.bf16.gmra.mxu2 %vm985_vm3, %v8951_v26  ;;  %v6860_v61 = vunpack.c.l.b16 %v6530_v36  ;;  %v8769_v26 = vld [vmem:[%s12261_s0 + $0x224] sm:$0x1] }
 0x337   :  { %v3928_v5 = vpop.f32.mrf.mxu0  ;;  %8469 = vmatmul.msk.bf16.gmra.mxu1 %vm985_vm3, %v5049_v39  ;;  %v6551_v45 = vshll.u32 %v8769_v26, 16  ;;  %v4707_v56 = vor.u32 %v4706_v47, %v4703_v48 }
 0x338   :  { %v7400_v6 = vmax.f32 %v7272_v43, %v7336_v40  ;;  %v4057_v22 = vadd.f32 %v3928_v5, %v9847_v49  ;;  %v6520_v49 = vsel %vm9045_vm4, %v6515_v37, %v11366_v63  ;;  %v4699_v63 = vsel %vm9045_vm4, %v4694_v44, %v4698_v1  ;;  %v8418_v37 = vld [vmem:[%s12261_s0 + $0x230] sm:$0x1] }
 0x339   :  { %v7075_v29 = vpop.f32.mrf.mxu3  ;;  %v5786_v60 = vpop.f32.mrf.mxu2  ;;  %v6859_v4 = vunpack.c.l.b16 %v6520_v49  ;;  %v5007_v0 = vunpack.c.l.b16 %v4699_v63  ;;  %v4716_v43 = vrot.slane %v4714_v16, 4  ;;  %v4708_v9 = vrot.slane %v4707_v56, 4  ;;  %v8771_v49 = vld [vmem:[%s12261_s0 + $0x238] sm:$0xf] }
 0x33a   :  { %v7464_v58 = vpack.c.bf16 %v7400_v6, %v7400_v6  ;;  %v7205_v2 = vadd.f32 %v7075_v29, %v5911_v17  ;;  %v5351_v32 = vadd.f32 %v11358_v41, %v4057_v22  ;;  %v6548_v17 = vor.u32 %v6547_v12, %v11422_v55 }
 0x33b   :  { %v6904_v1 = vpack.c.b16 %v6860_v61, %v6859_v4  ;;  %v5050_v14 = vpack.c.b16 %v5007_v0, %v5006_v54  ;;  %v4717_v6 = vor.u32 %v4716_v43, %v11430_v59  ;;  %v4720_v22 = vshll.u32 %v8418_v37, 16  ;;  %v8920_v37 = vld [vmem:[%s12261_s0 + $0x210] sm:$0xff] }
 0x33c   :  { %7529 = vst.msk [vmem:[%s12263_s3 + $0x4c] sm:$0xf] %vm7509_vm5, %v7464_v58  ;;  %v7273_v41 = vadd.f32 %v11197_v11, %v7205_v2  ;;  %v11418_v28 = vpop.f32.mrf.mxu1  ;;  %v5912_v57 = vadd.f32 %v5783_v52, %v5351_v32  ;;  %v6538_v52 = vor.u32 %v6537_v15, %v6534_v20  ;;  %v6549_v18 = vrot.slane %v6548_v17, 4 }
 0x33d   :  { %v6553_v29 = vrot.slane %v6551_v45, 5  ;;  %v4718_v2 = vrot.slane %v4717_v6, 4  ;;  %v4722_v32 = vrot.slane %v4720_v22, 5  ;;  %v4713_v20 = vsel %vm9045_vm4, %v4708_v9, %v11430_v59  ;;  %v8772_v45 = vld [vmem:[%s12261_s0 + $0x23c] sm:$0x1] }
 0x33e   :  { %v7337_v10 = vmul.f32 0.01, %v7273_v41  ;;  %v6556_v15 = vshrl.u32 %v8770_v51, 16  ;;  %v6559_v12 = vshll.u32 %v8770_v51, 16  ;;  %v4725_v4 = vshrl.u32 %v8419_v25, 16 }
 0x33f   :  { %v3931_v39 = vpop.f32.mrf.mxu0  ;;  %v6554_v63 = vsel %vm9045_vm4, %v6549_v18, %v6553_v29  ;;  %v4728_v61 = vshll.u32 %v8419_v25, 16  ;;  %v6575_v29 = vshll.u32 %v8772_v45, 16 }
 0x340   :  { %v7401_v19 = vmax.f32 %v7273_v41, %v7337_v10  ;;  %v4058_v62 = vadd.f32 %v3931_v39, %v9878_v50  ;;  %v8952_v50 = vld [vmem:[%s12261_s0 + $0x21c] sm:$0xff]  ;;  %v6565_v10 = vshll.u32 %v8771_v49, 16  ;;  %v6558_v43 = vrot.slane %v6556_v15, 4  ;;  %v8774_v15 = vld [vmem:[%s12261_s0 + $0x250] sm:$0xf] }
 0x341   :  { %v7077_v42 = vpop.f32.mrf.mxu3  ;;  %v5788_v40 = vpop.f32.mrf.mxu2 }
 0x342   :  { %v7465_v5 = vpack.c.bf16 %v7401_v19, %v7401_v19  ;;  %v7206_v24 = vadd.f32 %v7077_v42, %v5912_v57  ;;  %v5352_v31 = vadd.f32 %v11385_v34, %v4058_v62  ;;  %8340 = vmatmul.msk.bf16.gmra.mxu0 %vm985_vm3, %v8919_v13  ;;  %v6539_v34 = vrot.slane %v6538_v52, 4 }
 0x343   :  { %v4723_v57 = vsel %vm9045_vm4, %v4718_v2, %v4722_v32  ;;  %v6569_v13 = vshrl.u32 %v8771_v49, 16  ;;  %v6561_v19 = vrot.slane %v6559_v12, 5  ;;  %v5008_v42 = vunpack.c.l.b16 %v4713_v20  ;;  %v8422_v12 = vld [vmem:[%s12261_s0 + $0x258] sm:$0xf] }
 0x344   :  { %7530 = vst.msk [vmem:[%s12263_s3 + $0x50] sm:$0xf] %vm7509_vm5, %v7465_v5  ;;  %v7274_v44 = vadd.f32 %v11197_v11, %v7206_v24  ;;  %v11448_v3 = vpop.f32.mrf.mxu1  ;;  %v5913_v21 = vadd.f32 %v5786_v60, %v5352_v31  ;;  %v6544_v60 = vsel %vm9045_vm4, %v6539_v34, %v11422_v55  ;;  %v5009_v17 = vunpack.c.l.b16 %v4723_v57 }
 0x345   :  { %v6861_v59 = vunpack.c.l.b16 %v6544_v60  ;;  %v11490_v5 = vrot.slane %v6565_v10, 5  ;;  %v6571_v24 = vrot.slane %v6569_v13, 4  ;;  %v4727_v31 = vrot.slane %v4725_v4, 4  ;;  %v8773_v60 = vld [vmem:[%s12261_s0 + $0x24c] sm:$0xf] }
 0x346   :  { %v7338_v46 = vmul.f32 0.01, %v7274_v44  ;;  %8823 = vmatmul.msk.bf16.gmra.mxu3 %vm985_vm3, %v6904_v1  ;;  %8695 = vmatmul.msk.bf16.gmra.mxu2 %vm985_vm3, %v8952_v50  ;;  %v4730_v1 = vrot.slane %v4728_v61, 5  ;;  %v6562_v18 = vor.u32 %v6561_v19, %v6558_v43  ;;  %v6580_v10 = vshrl.u32 %v8773_v60, 16  ;;  %v8423_v61 = vld [vmem:[%s12261_s0 + $0x25c] sm:$0xf] }
 0x347   :  { %v3933_v58 = vpop.f32.mrf.mxu0  ;;  %8470 = vmatmul.msk.bf16.gmra.mxu1 %vm985_vm3, %v5050_v14  ;;  %v6572_v2 = vor.u32 %v6571_v24, %v11490_v5  ;;  %v6583_v4 = vshll.u32 %v8773_v60, 16  ;;  %v4752_v43 = vshll.u32 %v8422_v12, 16  ;;  %v4762_v45 = vshrl.u32 %v8423_v61, 16 }
 0x348   :  { %v7402_v36 = vmax.f32 %v7274_v44, %v7338_v46  ;;  %v4059_v30 = vadd.f32 %v3933_v58, %v9895_v35  ;;  %v8420_v35 = vld [vmem:[%s12261_s0 + $0x244] sm:$0xf]  ;;  %v5051_v58 = vpack.c.b16 %v5009_v17, %v5008_v42  ;;  %v4731_v32 = vor.u32 %v4730_v1, %v4727_v31 }
 0x349   :  { %v7080_v16 = vpop.f32.mrf.mxu3  ;;  %v5791_v41 = vpop.f32.mrf.mxu2  ;;  %v4734_v54 = vshll.u32 %v8420_v35, 16  ;;  %v4738_v0 = vshrl.u32 %v8420_v35, 16  ;;  %v6563_v25 = vrot.slane %v6562_v18, 4  ;;  %v4758_v17 = vshll.u32 %v8423_v61, 16 }
 0x34a   :  { %v7466_v55 = vpack.c.bf16 %v7402_v36, %v7402_v36  ;;  %v7207_v48 = vadd.f32 %v7080_v16, %v5913_v21  ;;  %v5353_v47 = vadd.f32 %v11418_v28, %v4059_v30  ;;  %v6862_v28 = vunpack.c.l.b16 %v6554_v63 }
 0x34b   :  { %v11496_v6 = vrot.slane %v4734_v54, 5  ;;  %v4740_v22 = vrot.slane %v4738_v0, 4  ;;  %v6577_v16 = vrot.slane %v6575_v29, 5  ;;  %v6589_v0 = vshll.u32 %v8774_v15, 16 }
 0x34c   :  { %7531 = vst.msk [vmem:[%s12263_s3 + $0x54] sm:$0xf] %vm7509_vm5, %v7466_v55  ;;  %v7275_v26 = vadd.f32 %v11197_v11, %v7207_v48  ;;  %v11482_v39 = vpop.f32.mrf.mxu1  ;;  %v5914_v52 = vadd.f32 %v5788_v40, %v5353_v47  ;;  %v8421_v40 = vld [vmem:[%s12261_s0 + $0x248] sm:$0x1]  ;;  %v6905_v51 = vpack.c.b16 %v6862_v28, %v6861_v59  ;;  %v6573_v55 = vrot.slane %v6572_v2, 4 }
 0x34d   :  { %v4744_v49 = vshll.u32 %v8421_v40, 16  ;;  %v4741_v30 = vor.u32 %v4740_v22, %v11496_v6  ;;  %v4732_v48 = vrot.slane %v4731_v32, 4  ;;  %v6593_v59 = vshrl.u32 %v8774_v15, 16  ;;  %v12300_v32 = vld [vmem:[#allocation2_spill] sm:$0xff] }
 0x34e   :  { %v7339_v62 = vmul.f32 0.01, %v7275_v26  ;;  %v4749_v28 = vshrl.u32 %v8422_v12, 16  ;;  %v6582_v24 = vrot.slane %v6580_v10, 4  ;;  %v6585_v31 = vrot.slane %v6583_v4, 5 }
 0x34f   :  { %v3936_v56 = vpop.f32.mrf.mxu0  ;;  %v4746_v47 = vrot.slane %v4744_v49, 5  ;;  %v4742_v13 = vrot.slane %v4741_v30, 4  ;;  %v4737_v42 = vsel %vm9045_vm4, %v4732_v48, %v11496_v6  ;;  %v11546_v1 = vrot.slane %v6589_v0, 5 }
 0x350   :  { %v7403_v50 = vmax.f32 %v7275_v26, %v7339_v62  ;;  %v4060_v14 = vadd.f32 %v3936_v56, %v9922_v27  ;;  %v8953_v27 = vld [vmem:[%s12261_s0 + $0x234] sm:$0xff]  ;;  %v4754_v40 = vrot.slane %v4752_v43, 5 }
 0x351   :  { %v7082_v44 = vpop.f32.mrf.mxu3  ;;  %v5793_v34 = vpop.f32.mrf.mxu2 }
 0x352   :  { %v7467_v9 = vpack.c.bf16 %v7403_v50, %v7403_v50  ;;  %v7208_v46 = vadd.f32 %v7082_v44, %v5914_v52  ;;  %v5354_v21 = vadd.f32 %v11448_v3, %v4060_v14  ;;  %8341 = vmatmul.msk.bf16.gmra.mxu0 %vm985_vm3, %v8920_v37  ;;  %v6578_v37 = vsel %vm9045_vm4, %v6573_v55, %v6577_v16  ;;  %v8921_v44 = vld [vmem:[%s12261_s0 + $0x228] sm:$0xff] }
 0x353   :  { %v6595_v50 = vrot.slane %v6593_v59, 4  ;;  %v4751_v14 = vrot.slane %v4749_v28, 4  ;;  %v6864_v29 = vunpack.c.l.b16 %v6578_v37  ;;  %v8954_v55 = vld [vmem:[%s12261_s0 + $0x24c] sm:$0xff]  ;;  %v8776_v59 = vld [vmem:[%s12261_s0 + $0x264] sm:$0xf] }
 0x354   :  { %7532 = vst.msk [vmem:[%s12263_s3 + $0x58] sm:$0xf] %vm7509_vm5, %v7467_v9  ;;  %v7276_v36 = vadd.f32 %v11197_v11, %v7208_v46  ;;  %v11509_v3 = vpop.f32.mrf.mxu1  ;;  %v5915_v20 = vadd.f32 %v5791_v41, %v5354_v21  ;;  %v8775_v9 = vld [vmem:[%s12261_s0 + $0x254] sm:$0x1]  ;;  %v5010_v21 = vunpack.c.l.b16 %v4737_v42  ;;  %v8425_v42 = vld [vmem:[%s12261_s0 + $0x270] sm:$0xf] }
 0x355   :  { %v6599_v16 = vshll.u32 %v8775_v9, 16 }
 0x356   :  { %v7340_v63 = vmul.f32 0.01, %v7276_v36  ;;  %8824 = vmatmul.msk.bf16.gmra.mxu3 %vm985_vm3, %v6905_v51  ;;  %8696 = vmatmul.msk.bf16.gmra.mxu2 %vm985_vm3, %v8953_v27  ;;  %v11554_v27 = vrot.slane %v4758_v17, 5 }
 0x357   :  { %v3938_v35 = vpop.f32.mrf.mxu0  ;;  %8471 = vmatmul.msk.bf16.gmra.mxu1 %vm985_vm3, %v5051_v58  ;;  %v4764_v58 = vrot.slane %v4762_v45, 4  ;;  %v6601_v4 = vrot.slane %v6599_v16, 5 }
 0x358   :  { %v7404_v57 = vmax.f32 %v7276_v36, %v7340_v63  ;;  %v4061_v41 = vadd.f32 %v3938_v35, %v9935_v8  ;;  %v6568_v8 = vsel %vm9045_vm4, %v6563_v25, %v11490_v5  ;;  %v4747_v5 = vsel %vm9045_vm4, %v4742_v13, %v4746_v47  ;;  %v8424_v36 = vld [vmem:[%s12261_s0 + $0x260] sm:$0x1] }
 0x359   :  { %v7085_v26 = vpop.f32.mrf.mxu3  ;;  %v5796_v54 = vpop.f32.mrf.mxu2  ;;  %v6863_v18 = vunpack.c.l.b16 %v6568_v8  ;;  %v5011_v51 = vunpack.c.l.b16 %v4747_v5  ;;  %v6596_v25 = vor.u32 %v6595_v50, %v11546_v1  ;;  %v4755_v63 = vor.u32 %v4754_v40, %v4751_v14  ;;  %v12301_v8 = vld [vmem:[#allocation3_spill] sm:$0xff] }
 0x35a   :  { %v7468_v19 = vpack.c.bf16 %v7404_v57, %v7404_v57  ;;  %v7209_v62 = vadd.f32 %v7085_v26, %v5915_v20  ;;  %v5355_v52 = vadd.f32 %v11482_v39, %v4061_v41  ;;  %v4765_v47 = vor.u32 %v4764_v58, %v11554_v27 }
 0x35b   :  { %v6906_v35 = vpack.c.b16 %v6864_v29, %v6863_v18  ;;  %v5052_v48 = vpack.c.b16 %v5011_v51, %v5010_v21  ;;  %v4768_v10 = vshll.u32 %v8424_v36, 16  ;;  %v6597_v13 = vrot.slane %v6596_v25, 4 }
 0x35c   :  { %7533 = vst.msk [vmem:[%s12263_s3 + $0x5c] sm:$0xf] %vm7509_vm5, %v7468_v19  ;;  %v7277_v39 = vadd.f32 %v11197_v11, %v7209_v62  ;;  %v11542_v56 = vpop.f32.mrf.mxu1  ;;  %v5916_v22 = vadd.f32 %v5793_v34, %v5355_v52  ;;  %v6586_v34 = vor.u32 %v6585_v31, %v6582_v24  ;;  %v4756_v61 = vrot.slane %v4755_v63, 4  ;;  %v8777_v62 = vld [vmem:[%s12261_s0 + $0x268] sm:$0xf] }
 0x35d   :  { %v4766_v43 = vrot.slane %v4765_v47, 4  ;;  %v4770_v19 = vrot.slane %v4768_v10, 5  ;;  %v6604_v24 = vshrl.u32 %v8776_v59, 16  ;;  %v6607_v31 = vshll.u32 %v8776_v59, 16  ;;  %v8955_v59 = vld [vmem:[%s12261_s0 + $0x264] sm:$0xff] }
 0x35e   :  { %v7341_v6 = vmul.f32 0.01, %v7277_v39  ;;  %v4761_v5 = vsel %vm9045_vm4, %v4756_v61, %v11554_v27  ;;  %v4773_v18 = vshrl.u32 %v8425_v42, 16  ;;  %v4776_v29 = vshll.u32 %v8425_v42, 16 }
 0x35f   :  { %v3941_v46 = vpop.f32.mrf.mxu0  ;;  %v6606_v58 = vrot.slane %v6604_v24, 4  ;;  %v5012_v36 = vunpack.c.l.b16 %v4761_v5  ;;  %v8780_v24 = vld [vmem:[%s12261_s0 + $0x280] sm:$0xf] }
 0x360   :  { %v7405_v2 = vmax.f32 %v7277_v39, %v7341_v6  ;;  %v4062_v49 = vadd.f32 %v3941_v46, %v12300_v32  ;;  %v6602_v39 = vsel %vm9045_vm4, %v6597_v13, %v6601_v4  ;;  %v6613_v6 = vshll.u32 %v8777_v62, 16 }
 0x361   :  { %v7087_v30 = vpop.f32.mrf.mxu3  ;;  %v5798_v60 = vpop.f32.mrf.mxu2 }
 0x362   :  { %v7469_v20 = vpack.c.bf16 %v7405_v2, %v7405_v2  ;;  %v7210_v15 = vadd.f32 %v7087_v30, %v5916_v22  ;;  %v5356_v12 = vadd.f32 %v11509_v3, %v4062_v49  ;;  %8342 = vmatmul.msk.bf16.gmra.mxu0 %vm985_vm3, %v8921_v44  ;;  %v6587_v3 = vrot.slane %v6586_v34, 4  ;;  %v8922_v34 = vld [vmem:[%s12261_s0 + $0x240] sm:$0xff] }
 0x363   :  { %v4771_v22 = vsel %vm9045_vm4, %v4766_v43, %v4770_v19  ;;  %v6617_v44 = vshrl.u32 %v8777_v62, 16  ;;  %v6609_v2 = vrot.slane %v6607_v31, 5  ;;  %v11616_v16 = vrot.slane %v6613_v6, 5  ;;  %v8428_v31 = vld [vmem:[%s12261_s0 + $0x288] sm:$0xf] }
 0x364   :  { %7534 = vst.msk [vmem:[%s12263_s3 + $0x60] sm:$0xf] %vm7509_vm5, %v7469_v20  ;;  %v7278_v57 = vadd.f32 %v11197_v11, %v7210_v15  ;;  %v11572_v41 = vpop.f32.mrf.mxu1  ;;  %v5917_v0 = vadd.f32 %v5796_v54, %v5356_v12  ;;  %v6592_v54 = vsel %vm9045_vm4, %v6587_v3, %v11546_v1  ;;  %v8426_v1 = vld [vmem:[%s12261_s0 + $0x274] sm:$0xf]  ;;  %v5013_v30 = vunpack.c.l.b16 %v4771_v22 }
 0x365   :  { %v4782_v21 = vshll.u32 %v8426_v1, 16  ;;  %v4786_v51 = vshrl.u32 %v8426_v1, 16  ;;  %v6865_v27 = vunpack.c.l.b16 %v6592_v54  ;;  %v6619_v63 = vrot.slane %v6617_v44, 4  ;;  %v8779_v54 = vld [vmem:[%s12261_s0 + $0x27c] sm:$0xf] }
 0x366   :  { %v7342_v26 = vmul.f32 0.01, %v7278_v57  ;;  %8825 = vmatmul.msk.bf16.gmra.mxu3 %vm985_vm3, %v6906_v35  ;;  %8697 = vmatmul.msk.bf16.gmra.mxu2 %vm985_vm3, %v8954_v55  ;;  %v4775_v20 = vrot.slane %v4773_v18, 4  ;;  %v4778_v15 = vrot.slane %v4776_v29, 5  ;;  %v12302_v35 = vld [vmem:[#allocation4_spill] sm:$0xff]  ;;  %v6610_v3 = vor.u32 %v6609_v2, %v6606_v58  ;;  %v12303_v44 = vld [vmem:[#allocation5_spill] sm:$0xff] }
 0x367   :  { %v3943_v28 = vpop.f32.mrf.mxu0  ;;  %8472 = vmatmul.msk.bf16.gmra.mxu1 %vm985_vm3, %v5052_v48  ;;  %v11622_v48 = vrot.slane %v4782_v21, 5  ;;  %v4788_v47 = vrot.slane %v4786_v51, 4  ;;  %v6620_v43 = vor.u32 %v6619_v63, %v11616_v16  ;;  %v6628_v6 = vshrl.u32 %v8779_v54, 16 }
 0x368   :  { %v7406_v52 = vmax.f32 %v7278_v57, %v7342_v26  ;;  %v4063_v37 = vadd.f32 %v3943_v28, %v12301_v8  ;;  %v5053_v28 = vpack.c.b16 %v5013_v30, %v5012_v36  ;;  %v4779_v19 = vor.u32 %v4778_v15, %v4775_v20 }
 0x369   :  { %v7090_v17 = vpop.f32.mrf.mxu3  ;;  %v11590_v45 = vpop.f32.mrf.mxu2  ;;  %v6611_v42 = vrot.slane %v6610_v3, 4  ;;  %v6631_v29 = vshll.u32 %v8779_v54, 16  ;;  %v4797_v58 = vshrl.u32 %v8428_v31, 16  ;;  %v4800_v2 = vshll.u32 %v8428_v31, 16  ;;  %v8923_v3 = vld [vmem:[%s12261_s0 + $0x258] sm:$0xff] }
 0x36a   :  { %v7470_v50 = vpack.c.bf16 %v7406_v52, %v7406_v52  ;;  %v7211_v14 = vadd.f32 %v7090_v17, %v5917_v0  ;;  %v5357_v40 = vadd.f32 %v11542_v56, %v4063_v37  ;;  %v6866_v56 = vunpack.c.l.b16 %v6602_v39 }
 0x36b   :  { %v4789_v37 = vor.u32 %v4788_v47, %v11622_v48  ;;  %v6616_v36 = vsel %vm9045_vm4, %v6611_v42, %v11616_v16  ;;  %v6630_v15 = vrot.slane %v6628_v6, 4 }
 0x36c   :  { %7535 = vst.msk [vmem:[%s12263_s3 + $0x64] sm:$0xf] %vm7509_vm5, %v7470_v50  ;;  %v7279_v9 = vadd.f32 %v11197_v11, %v7211_v14  ;;  %v11608_v46 = vpop.f32.mrf.mxu1  ;;  %v5918_v49 = vadd.f32 %v5798_v60, %v5357_v40  ;;  %v8778_v11 = vld [vmem:[%s12261_s0 + $0x26c] sm:$0x1]  ;;  %v8427_v60 = vld [vmem:[%s12261_s0 + $0x278] sm:$0x1]  ;;  %v6907_v0 = vpack.c.b16 %v6866_v56, %v6865_v27 }
 0x36d   :  { %v6623_v13 = vshll.u32 %v8778_v11, 16  ;;  %v4792_v62 = vshll.u32 %v8427_v60, 16  ;;  %v6621_v50 = vrot.slane %v6620_v43, 4  ;;  %v4780_v14 = vrot.slane %v4779_v19, 4 }
 0x36e   :  { %v7343_v32 = vmul.f32 0.01, %v7279_v9  ;;  %v4790_v18 = vrot.slane %v4789_v37, 4  ;;  %v6637_v27 = vshll.u32 %v8780_v24, 16  ;;  %v6641_v56 = vshrl.u32 %v8780_v24, 16 }
 0x36f   :  { %v3946_v25 = vpop.f32.mrf.mxu0  ;;  %v6625_v17 = vrot.slane %v6623_v13, 5  ;;  %v4794_v40 = vrot.slane %v4792_v62, 5  ;;  %v4785_v11 = vsel %vm9045_vm4, %v4780_v14, %v11622_v48  ;;  %v4799_v60 = vrot.slane %v4797_v58, 4  ;;  %v12304_v62 = vld [vmem:[#allocation6_spill] sm:$0xff]  ;;  %v8430_v37 = vld [vmem:[%s12261_s0 + $0x290] sm:$0x1] }
 0x370   :  { %v7407_v12 = vmax.f32 %v7279_v9, %v7343_v32  ;;  %v4064_v55 = vadd.f32 %v3946_v25, %v12302_v35  ;;  %v8429_v9 = vld [vmem:[%s12261_s0 + $0x28c] sm:$0xf]  ;;  %v11680_v35 = vrot.slane %v6637_v27, 5  ;;  %v4802_v48 = vrot.slane %v4800_v2, 5  ;;  %v8956_v14 = vld [vmem:[%s12261_s0 + $0x27c] sm:$0xff] }
 0x371   :  { %v7092_v10 = vpop.f32.mrf.mxu3  ;;  %v11624_v57 = vpop.f32.mrf.mxu2  ;;  %v6626_v30 = vsel %vm9045_vm4, %v6621_v50, %v6625_v17  ;;  %v4806_v25 = vshll.u32 %v8429_v9, 16  ;;  %v4810_v63 = vshrl.u32 %v8429_v9, 16  ;;  %v4795_v16 = vsel %vm9045_vm4, %v4790_v18, %v4794_v40 }
 0x372   :  { %v7471_v4 = vpack.c.bf16 %v7407_v12, %v7407_v12  ;;  %v7212_v61 = vadd.f32 %v7092_v10, %v5918_v49  ;;  %v5358_v26 = vadd.f32 %v11572_v41, %v4064_v55  ;;  %8343 = vmatmul.msk.bf16.gmra.mxu0 %vm985_vm3, %v8922_v34  ;;  %v11639_v41 = vld [vmem:[%s12262_s2] ss:$0 sm:$0xff]  ;;  %v6633_v12 = vrot.slane %v6631_v29, 5 }
 0x373   :  { %v6643_v55 = vrot.slane %v6641_v56, 4  ;;  %v6867_v13 = vunpack.c.l.b16 %v6616_v36  ;;  %v4812_v43 = vrot.slane %v4810_v63, 4  ;;  %v8782_v56 = vld [vmem:[%s12261_s0 + $0x294] sm:$0xf]  ;;  %v12305_v36 = vld [vmem:[#allocation7_spill] sm:$0xff] }
 0x374   :  { %7536 = vst.msk [vmem:[%s12263_s3 + $0x68] sm:$0xf] %vm7509_vm5, %v7471_v4  ;;  %v7280_v52 = vadd.f32 %v11639_v41, %v7212_v61  ;;  %v11642_v8 = vpop.f32.mrf.mxu1  ;;  %v5919_v5 = vadd.f32 %v11590_v45, %v5358_v26  ;;  %v6868_v4 = vunpack.c.l.b16 %v6626_v30  ;;  %v8781_v61 = vld [vmem:[%s12261_s0 + $0x284] sm:$0x1] }
 0x375   :  { %v6644_v17 = vor.u32 %v6643_v55, %v11680_v35  ;;  %v8432_v55 = vld [vmem:[%s12261_s0 + $0x2a4] sm:$0xf] }
 0x376   :  { %v7344_v39 = vmul.f32 0.01, %v7280_v52  ;;  %8826 = vmatmul.msk.bf16.gmra.mxu3 %vm985_vm3, %v6907_v0  ;;  %8698 = vmatmul.msk.bf16.gmra.mxu2 %vm985_vm3, %v8955_v59  ;;  %v5014_v0 = vunpack.c.l.b16 %v4785_v11  ;;  %v5015_v59 = vunpack.c.l.b16 %v4795_v16  ;;  %v6908_v50 = vpack.c.b16 %v6868_v4, %v6867_v13  ;;  %v8431_v11 = vld [vmem:[%s12261_s0 + $0x2a0] sm:$0xf] }
 0x377   :  { %v3948_v1 = vpop.f32.mrf.mxu0  ;;  %8473 = vmatmul.msk.bf16.gmra.mxu1 %vm985_vm3, %v5053_v28  ;;  %v11689_v28 = vrot.slane %v4806_v25, 5  ;;  %v6645_v18 = vrot.slane %v6644_v17, 4  ;;  %v4821_v13 = vshrl.u32 %v8431_v11, 16  ;;  %v4824_v4 = vshll.u32 %v8431_v11, 16  ;;  %v8784_v17 = vld [vmem:[%s12261_s0 + $0x29c] sm:$0x1] }
 0x378   :  { %v7408_v22 = vmax.f32 %v7280_v52, %v7344_v39  ;;  %v4065_v45 = vadd.f32 %v3948_v1, %v12303_v44  ;;  %v6647_v39 = vshll.u32 %v8781_v61, 16  ;;  %v5054_v40 = vpack.c.b16 %v5015_v59, %v5014_v0 }
 0x379   :  { %v7095_v21 = vpop.f32.mrf.mxu3  ;;  %v5806_v51 = vpop.f32.mrf.mxu2  ;;  %v4813_v6 = vor.u32 %v4812_v43, %v11689_v28  ;;  %v4830_v0 = vshll.u32 %v8432_v55, 16  ;;  %v4834_v59 = vshrl.u32 %v8432_v55, 16 }
 0x37a   :  { %v7472_v32 = vpack.c.bf16 %v7408_v22, %v7408_v22  ;;  %v7213_v49 = vadd.f32 %v7095_v21, %v5919_v5  ;;  %v5359_v34 = vadd.f32 %v11608_v46, %v4065_v45  ;;  %v4803_v5 = vor.u32 %v4802_v48, %v4799_v60 }
 0x37b   :  { %v4816_v22 = vshll.u32 %v8430_v37, 16  ;;  %v6649_v29 = vrot.slane %v6647_v39, 5  ;;  %v4814_v2 = vrot.slane %v4813_v6, 4  ;;  %v11755_v6 = vrot.slane %v4830_v0, 5 }
 0x37c   :  { %7537 = vst.msk [vmem:[%s12263_s3 + $0x6c] sm:$0xf] %vm7509_vm5, %v7472_v32  ;;  %v7281_v46 = vadd.f32 %v11639_v41, %v7213_v49  ;;  %v11676_v20 = vpop.f32.mrf.mxu1  ;;  %v5920_v10 = vadd.f32 %v11624_v57, %v5359_v34  ;;  %v6634_v57 = vor.u32 %v6633_v12, %v6630_v15  ;;  %v4804_v9 = vrot.slane %v4803_v5, 4  ;;  %v8783_v49 = vld [vmem:[%s12261_s0 + $0x298] sm:$0xf] }
 0x37d   :  { %v4818_v32 = vrot.slane %v4816_v22, 5  ;;  %v6652_v15 = vshrl.u32 %v8782_v56, 16  ;;  %v6655_v12 = vshll.u32 %v8782_v56, 16  ;;  %v4836_v22 = vrot.slane %v4834_v59, 4 }
 0x37e   :  { %v7345_v47 = vmul.f32 0.01, %v7281_v46  ;;  %v4809_v16 = vsel %vm9045_vm4, %v4804_v9, %v11689_v28 }
 0x37f   :  { %v3951_v26 = vpop.f32.mrf.mxu0  ;;  %v6654_v43 = vrot.slane %v6652_v15, 4  ;;  %v5016_v37 = vunpack.c.l.b16 %v4809_v16  ;;  %v8786_v15 = vld [vmem:[%s12261_s0 + $0x2b0] sm:$0xf] }
 0x380   :  { %v7409_v19 = vmax.f32 %v7281_v46, %v7345_v47  ;;  %v4066_v52 = vadd.f32 %v3951_v26, %v12304_v62  ;;  %v6650_v46 = vsel %vm9045_vm4, %v6645_v18, %v6649_v29  ;;  %v6661_v47 = vshll.u32 %v8783_v49, 16 }
 0x381   :  { %v7097_v54 = vpop.f32.mrf.mxu3  ;;  %v5808_v42 = vpop.f32.mrf.mxu2  ;;  %v6671_v29 = vshll.u32 %v8784_v17, 16 }
 0x382   :  { %v7473_v24 = vpack.c.bf16 %v7409_v19, %v7409_v19  ;;  %v7214_v31 = vadd.f32 %v7097_v54, %v5920_v10  ;;  %v5360_v1 = vadd.f32 %v11642_v8, %v4066_v52  ;;  %8344 = vmatmul.msk.bf16.gmra.mxu0 %vm985_vm3, %v8923_v3  ;;  %v6635_v8 = vrot.slane %v6634_v57, 4  ;;  %v8924_v57 = vld [vmem:[%s12261_s0 + $0x270] sm:$0xff] }
 0x383   :  { %v4819_v10 = vsel %vm9045_vm4, %v4814_v2, %v4818_v32  ;;  %v6665_v3 = vshrl.u32 %v8783_v49, 16  ;;  %v6657_v19 = vrot.slane %v6655_v12, 5  ;;  %v11749_v5 = vrot.slane %v6661_v47, 5  ;;  %v8434_v12 = vld [vmem:[%s12261_s0 + $0x2b8] sm:$0xf] }
 0x384   :  { %7538 = vst.msk [vmem:[%s12263_s3 + $0x70] sm:$0xf] %vm7509_vm5, %v7473_v24  ;;  %v7282_v44 = vadd.f32 %v11639_v41, %v7214_v31  ;;  %v11707_v45 = vpop.f32.mrf.mxu1  ;;  %v5921_v27 = vadd.f32 %v5806_v51, %v5360_v1  ;;  %v6640_v51 = vsel %vm9045_vm4, %v6635_v8, %v11680_v35  ;;  %v5017_v54 = vunpack.c.l.b16 %v4819_v10 }
 0x385   :  { %v6869_v28 = vunpack.c.l.b16 %v6640_v51  ;;  %v6667_v24 = vrot.slane %v6665_v3, 4  ;;  %v4823_v31 = vrot.slane %v4821_v13, 4  ;;  %v4826_v1 = vrot.slane %v4824_v4, 5  ;;  %v8785_v51 = vld [vmem:[%s12261_s0 + $0x2ac] sm:$0xf]  ;;  %v12307_v3 = vld [vmem:[#allocation9_spill] sm:$0xff] }
 0x386   :  { %v7346_v21 = vmul.f32 0.01, %v7282_v44  ;;  %8827 = vmatmul.msk.bf16.gmra.mxu3 %vm985_vm3, %v6908_v50  ;;  %8699 = vmatmul.msk.bf16.gmra.mxu2 %vm985_vm3, %v8956_v14  ;;  %v12306_v14 = vld [vmem:[#allocation8_spill] sm:$0xff]  ;;  %v6658_v18 = vor.u32 %v6657_v19, %v6654_v43  ;;  %v5055_v2 = vpack.c.b16 %v5017_v54, %v5016_v37  ;;  %v6676_v47 = vshrl.u32 %v8785_v51, 16 }
 0x387   :  { %v3953_v58 = vpop.f32.mrf.mxu0  ;;  %8474 = vmatmul.msk.bf16.gmra.mxu1 %vm985_vm3, %v5054_v40  ;;  %v6668_v32 = vor.u32 %v6667_v24, %v11749_v5  ;;  %v4827_v49 = vor.u32 %v4826_v1, %v4823_v31  ;;  %v6679_v4 = vshll.u32 %v8785_v51, 16  ;;  %v4845_v43 = vshrl.u32 %v8434_v12, 16 }
 0x388   :  { %v7410_v34 = vmax.f32 %v7282_v44, %v7346_v21  ;;  %v4067_v30 = vadd.f32 %v3953_v58, %v12305_v36  ;;  %v8957_v58 = vld [vmem:[%s12261_s0 + $0x294] sm:$0xff]  ;;  %v6659_v11 = vrot.slane %v6658_v18, 4  ;;  %v4848_v19 = vshll.u32 %v8434_v12, 16  ;;  %v8925_v18 = vld [vmem:[%s12261_s0 + $0x288] sm:$0xff] }
 0x389   :  { %v7100_v25 = vpop.f32.mrf.mxu3  ;;  %v5811_v63 = vpop.f32.mrf.mxu2  ;;  %v6678_v1 = vrot.slane %v6676_v47, 4 }
 0x38a   :  { %v7474_v35 = vpack.c.bf16 %v7410_v34, %v7410_v34  ;;  %v7215_v60 = vadd.f32 %v7100_v25, %v5921_v27  ;;  %v5361_v48 = vadd.f32 %v11676_v20, %v4067_v30  ;;  %v6870_v20 = vunpack.c.l.b16 %v6650_v46 }
 0x38b   :  { %v4837_v30 = vor.u32 %v4836_v22, %v11755_v6  ;;  %v6673_v25 = vrot.slane %v6671_v29, 5  ;;  %v6664_v37 = vsel %vm9045_vm4, %v6659_v11, %v11749_v5 }
 0x38c   :  { %7539 = vst.msk [vmem:[%s12263_s3 + $0x74] sm:$0xf] %vm7509_vm5, %v7474_v35  ;;  %v7283_v61 = vadd.f32 %v11639_v41, %v7215_v60  ;;  %v11741_v26 = vpop.f32.mrf.mxu1  ;;  %v5922_v52 = vadd.f32 %v5808_v42, %v5361_v48  ;;  %v8433_v42 = vld [vmem:[%s12261_s0 + $0x2a8] sm:$0x1]  ;;  %v6909_v56 = vpack.c.b16 %v6870_v20, %v6869_v28  ;;  %v6669_v35 = vrot.slane %v6668_v32, 4 }
 0x38d   :  { %v4840_v34 = vshll.u32 %v8433_v42, 16  ;;  %v4828_v60 = vrot.slane %v4827_v49, 4  ;;  %v4838_v13 = vrot.slane %v4837_v30, 4  ;;  %v6685_v28 = vshll.u32 %v8786_v15, 16  ;;  %v8436_v30 = vld [vmem:[%s12261_s0 + $0x2c0] sm:$0x1] }
 0x38e   :  { %v7347_v62 = vmul.f32 0.01, %v7283_v61  ;;  %v6689_v20 = vshrl.u32 %v8786_v15, 16  ;;  %v6674_v54 = vsel %vm9045_vm4, %v6669_v35, %v6673_v25  ;;  %v4847_v42 = vrot.slane %v4845_v43, 4 }
 0x38f   :  { %v3956_v39 = vpop.f32.mrf.mxu0  ;;  %v4842_v48 = vrot.slane %v4840_v34, 5  ;;  %v4833_v17 = vsel %vm9045_vm4, %v4828_v60, %v11755_v6  ;;  %v4850_v6 = vrot.slane %v4848_v19, 5  ;;  %v6871_v29 = vunpack.c.l.b16 %v6664_v37  ;;  %v12308_v34 = vld [vmem:[#allocation10_spill] sm:$0xff]  ;;  %v8958_v60 = vld [vmem:[%s12261_s0 + $0x2ac] sm:$0xff] }
 0x390   :  { %v7411_v50 = vmax.f32 %v7283_v61, %v7347_v62  ;;  %v4068_v40 = vadd.f32 %v3956_v39, %v12306_v14  ;;  %v8435_v61 = vld [vmem:[%s12261_s0 + $0x2bc] sm:$0xf]  ;;  %v11805_v14 = vrot.slane %v6685_v28, 5  ;;  %v12309_v37 = vld [vmem:[#allocation11_spill] sm:$0xff] }
 0x391   :  { %v7102_v44 = vpop.f32.mrf.mxu3  ;;  %v5813_v8 = vpop.f32.mrf.mxu2  ;;  %v4854_v39 = vshll.u32 %v8435_v61, 16  ;;  %v4858_v24 = vshrl.u32 %v8435_v61, 16  ;;  %v4843_v5 = vsel %vm9045_vm4, %v4838_v13, %v4842_v48 }
 0x392   :  { %v7475_v9 = vpack.c.bf16 %v7411_v50, %v7411_v50  ;;  %v7216_v21 = vadd.f32 %v7102_v44, %v5922_v52  ;;  %v5362_v27 = vadd.f32 %v11707_v45, %v4068_v40  ;;  %8345 = vmatmul.msk.bf16.gmra.mxu0 %vm985_vm3, %v8924_v57  ;;  %v6681_v50 = vrot.slane %v6679_v4, 5 }
 0x393   :  { %v6691_v40 = vrot.slane %v6689_v20, 4  ;;  %v4860_v32 = vrot.slane %v4858_v24, 4  ;;  %v8788_v20 = vld [vmem:[%s12261_s0 + $0x2c4] sm:$0xf] }
 0x394   :  { %7540 = vst.msk [vmem:[%s12263_s3 + $0x78] sm:$0xf] %vm7509_vm5, %v7475_v9  ;;  %v7284_v36 = vadd.f32 %v11639_v41, %v7216_v21  ;;  %v11768_v45 = vpop.f32.mrf.mxu1  ;;  %v5923_v16 = vadd.f32 %v5811_v63, %v5362_v27  ;;  %v6872_v9 = vunpack.c.l.b16 %v6674_v54  ;;  %v8787_v21 = vld [vmem:[%s12261_s0 + $0x2b4] sm:$0x1] }
 0x395   :  { %v6692_v25 = vor.u32 %v6691_v40, %v11805_v14  ;;  %v8438_v40 = vld [vmem:[%s12261_s0 + $0x2d4] sm:$0xf] }
 0x396   :  { %v7348_v46 = vmul.f32 0.01, %v7284_v36  ;;  %8828 = vmatmul.msk.bf16.gmra.mxu3 %vm985_vm3, %v6909_v56  ;;  %8700 = vmatmul.msk.bf16.gmra.mxu2 %vm985_vm3, %v8957_v58  ;;  %v5018_v56 = vunpack.c.l.b16 %v4833_v17  ;;  %v5019_v58 = vunpack.c.l.b16 %v4843_v5  ;;  %v6910_v35 = vpack.c.b16 %v6872_v9, %v6871_v29  ;;  %v8437_v17 = vld [vmem:[%s12261_s0 + $0x2d0] sm:$0xf] }
 0x397   :  { %v3958_v55 = vpop.f32.mrf.mxu0  ;;  %8475 = vmatmul.msk.bf16.gmra.mxu1 %vm985_vm3, %v5055_v2  ;;  %v11813_v2 = vrot.slane %v4854_v39, 5  ;;  %v6693_v13 = vrot.slane %v6692_v25, 4  ;;  %v4869_v29 = vshrl.u32 %v8437_v17, 16  ;;  %v4872_v9 = vshll.u32 %v8437_v17, 16  ;;  %v8790_v25 = vld [vmem:[%s12261_s0 + $0x2cc] sm:$0x1] }
 0x398   :  { %v7412_v10 = vmax.f32 %v7284_v36, %v7348_v46  ;;  %v4069_v63 = vadd.f32 %v3958_v55, %v12307_v3  ;;  %v6695_v46 = vshll.u32 %v8787_v21, 16  ;;  %v5056_v48 = vpack.c.b16 %v5019_v58, %v5018_v56 }
 0x399   :  { %v7105_v0 = vpop.f32.mrf.mxu3  ;;  %v5816_v59 = vpop.f32.mrf.mxu2  ;;  %v4861_v47 = vor.u32 %v4860_v32, %v11813_v2  ;;  %v4878_v56 = vshll.u32 %v8438_v40, 16  ;;  %v4882_v58 = vshrl.u32 %v8438_v40, 16 }
 0x39a   :  { %v7476_v62 = vpack.c.bf16 %v7412_v10, %v7412_v10  ;;  %v7217_v52 = vadd.f32 %v7105_v0, %v5923_v16  ;;  %v5363_v57 = vadd.f32 %v11741_v26, %v4069_v63  ;;  %v4851_v16 = vor.u32 %v4850_v6, %v4847_v42 }
 0x39b   :  { %v4864_v10 = vshll.u32 %v8436_v30, 16  ;;  %v6697_v4 = vrot.slane %v6695_v46, 5  ;;  %v4862_v19 = vrot.slane %v4861_v47, 4  ;;  %v11879_v47 = vrot.slane %v4878_v56, 5 }
 0x39c   :  { %7541 = vst.msk [vmem:[%s12263_s3 + $0x7c] sm:$0xf] %vm7509_vm5, %v7476_v62  ;;  %v7285_v26 = vadd.f32 %v11639_v41, %v7217_v52  ;;  %v11801_v31 = vpop.f32.mrf.mxu1  ;;  %v5924_v44 = vadd.f32 %v5813_v8, %v5363_v57  ;;  %v6682_v8 = vor.u32 %v6681_v50, %v6678_v1  ;;  %v4852_v61 = vrot.slane %v4851_v16, 4  ;;  %v8789_v52 = vld [vmem:[%s12261_s0 + $0x2c8] sm:$0xf] }
 0x39d   :  { %v4866_v62 = vrot.slane %v4864_v10, 5  ;;  %v6700_v1 = vshrl.u32 %v8788_v20, 16  ;;  %v6703_v50 = vshll.u32 %v8788_v20, 16  ;;  %v4884_v10 = vrot.slane %v4882_v58, 4 }
 0x39e   :  { %v7349_v22 = vmul.f32 0.01, %v7285_v26  ;;  %v4857_v5 = vsel %vm9045_vm4, %v4852_v61, %v11813_v2 }
 0x39f   :  { %v3961_v27 = vpop.f32.mrf.mxu0  ;;  %v6702_v32 = vrot.slane %v6700_v1, 4  ;;  %v5020_v30 = vunpack.c.l.b16 %v4857_v5  ;;  %v8792_v1 = vld [vmem:[%s12261_s0 + $0x2e0] sm:$0xf] }
 0x3a0   :  { %v7413_v49 = vmax.f32 %v7285_v26, %v7349_v22  ;;  %v4070_v36 = vadd.f32 %v3961_v27, %v12308_v34  ;;  %v6698_v26 = vsel %vm9045_vm4, %v6693_v13, %v6697_v4  ;;  %v6709_v22 = vshll.u32 %v8789_v52, 16 }
 0x3a1   :  { %v7107_v51 = vpop.f32.mrf.mxu3  ;;  %v5818_v11 = vpop.f32.mrf.mxu2  ;;  %v6719_v4 = vshll.u32 %v8790_v25, 16 }
 0x3a2   :  { %v7477_v15 = vpack.c.bf16 %v7413_v49, %v7413_v49  ;;  %v7218_v12 = vadd.f32 %v7107_v51, %v5924_v44  ;;  %v5364_v55 = vadd.f32 %v11768_v45, %v4070_v36  ;;  %8346 = vmatmul.msk.bf16.gmra.mxu0 %vm985_vm3, %v8925_v18  ;;  %v6683_v45 = vrot.slane %v6682_v8, 4  ;;  %v8926_v8 = vld [vmem:[%s12261_s0 + $0x2a0] sm:$0xff] }
 0x3a3   :  { %v4867_v44 = vsel %vm9045_vm4, %v4862_v19, %v4866_v62  ;;  %v6713_v18 = vshrl.u32 %v8789_v52, 16  ;;  %v6705_v49 = vrot.slane %v6703_v50, 5  ;;  %v11873_v16 = vrot.slane %v6709_v22, 5  ;;  %v8440_v50 = vld [vmem:[%s12261_s0 + $0x2e8] sm:$0xf] }
 0x3a4   :  { %7542 = vst.msk [vmem:[%s12263_s3 + $0x80] sm:$0xf] %vm7509_vm5, %v7477_v15  ;;  %v7286_v3 = vadd.f32 %v11639_v41, %v7218_v12  ;;  %v11831_v63 = vpop.f32.mrf.mxu1  ;;  %v5925_v28 = vadd.f32 %v5816_v59, %v5364_v55  ;;  %v6688_v59 = vsel %vm9045_vm4, %v6683_v45, %v11805_v14  ;;  %v5021_v51 = vunpack.c.l.b16 %v4867_v44 }
 0x3a5   :  { %v6873_v2 = vunpack.c.l.b16 %v6688_v59  ;;  %v6715_v15 = vrot.slane %v6713_v18, 4  ;;  %v4871_v12 = vrot.slane %v4869_v29, 4  ;;  %v4874_v55 = vrot.slane %v4872_v9, 5  ;;  %v8791_v59 = vld [vmem:[%s12261_s0 + $0x2dc] sm:$0xf] }
 0x3a6   :  { %v7350_v0 = vmul.f32 0.01, %v7286_v3  ;;  %8829 = vmatmul.msk.bf16.gmra.mxu3 %vm985_vm3, %v6910_v35  ;;  %8701 = vmatmul.msk.bf16.gmra.mxu2 %vm985_vm3, %v8958_v60  ;;  %v12310_v60 = vld [vmem:[#allocation12_spill] sm:$0xff]  ;;  %v6706_v13 = vor.u32 %v6705_v49, %v6702_v32  ;;  %v5057_v19 = vpack.c.b16 %v5021_v51, %v5020_v30  ;;  %v6724_v22 = vshrl.u32 %v8791_v59, 16  ;;  %v12311_v18 = vld [vmem:[#allocation13_spill] sm:$0xff] }
 0x3a7   :  { %v3963_v43 = vpop.f32.mrf.mxu0  ;;  %8476 = vmatmul.msk.bf16.gmra.mxu1 %vm985_vm3, %v5056_v48  ;;  %v6716_v62 = vor.u32 %v6715_v15, %v11873_v16  ;;  %v4875_v52 = vor.u32 %v4874_v55, %v4871_v12  ;;  %v6727_v9 = vshll.u32 %v8791_v59, 16  ;;  %v4893_v32 = vshrl.u32 %v8440_v50, 16 }
 0x3a8   :  { %v7414_v57 = vmax.f32 %v7286_v3, %v7350_v0  ;;  %v4071_v54 = vadd.f32 %v3963_v43, %v12309_v37  ;;  %v8959_v43 = vld [vmem:[%s12261_s0 + $0x2c4] sm:$0xff]  ;;  %v6707_v17 = vrot.slane %v6706_v13, 4  ;;  %v4896_v49 = vshll.u32 %v8440_v50, 16  ;;  %v8927_v13 = vld [vmem:[%s12261_s0 + $0x2b8] sm:$0xff] }
 0x3a9   :  { %v7110_v39 = vpop.f32.mrf.mxu3  ;;  %v5821_v24 = vpop.f32.mrf.mxu2  ;;  %v6726_v55 = vrot.slane %v6724_v22, 4 }
 0x3aa   :  { %v7478_v14 = vpack.c.bf16 %v7414_v57, %v7414_v57  ;;  %v7219_v42 = vadd.f32 %v7110_v39, %v5925_v28  ;;  %v5365_v6 = vadd.f32 %v11801_v31, %v4071_v54  ;;  %v6874_v31 = vunpack.c.l.b16 %v6698_v26 }
 0x3ab   :  { %v4885_v54 = vor.u32 %v4884_v10, %v11879_v47  ;;  %v6721_v39 = vrot.slane %v6719_v4, 5  ;;  %v6712_v30 = vsel %vm9045_vm4, %v6707_v17, %v11873_v16 }
 0x3ac   :  { %7543 = vst.msk [vmem:[%s12263_s3 + $0x84] sm:$0xf] %vm7509_vm5, %v7478_v14  ;;  %v7287_v21 = vadd.f32 %v11639_v41, %v7219_v42  ;;  %v11865_v27 = vpop.f32.mrf.mxu1  ;;  %v5926_v36 = vadd.f32 %v5818_v11, %v5365_v6  ;;  %v8439_v11 = vld [vmem:[%s12261_s0 + $0x2d8] sm:$0x1]  ;;  %v6911_v20 = vpack.c.b16 %v6874_v31, %v6873_v2  ;;  %v6717_v14 = vrot.slane %v6716_v62, 4 }
 0x3ad   :  { %v4888_v57 = vshll.u32 %v8439_v11, 16  ;;  %v4876_v42 = vrot.slane %v4875_v52, 4  ;;  %v4886_v29 = vrot.slane %v4885_v54, 4  ;;  %v6733_v2 = vshll.u32 %v8792_v1, 16  ;;  %v8442_v54 = vld [vmem:[%s12261_s0 + $0x2f0] sm:$0x1] }
 0x3ae   :  { %v7351_v34 = vmul.f32 0.01, %v7287_v21  ;;  %v6737_v31 = vshrl.u32 %v8792_v1, 16  ;;  %v6722_v51 = vsel %vm9045_vm4, %v6717_v14, %v6721_v39  ;;  %v4895_v11 = vrot.slane %v4893_v32, 4 }
 0x3af   :  { %v3966_v46 = vpop.f32.mrf.mxu0  ;;  %v4890_v6 = vrot.slane %v4888_v57, 5  ;;  %v4881_v25 = vsel %vm9045_vm4, %v4876_v42, %v11879_v47  ;;  %v4898_v47 = vrot.slane %v4896_v49, 5  ;;  %v6875_v4 = vunpack.c.l.b16 %v6712_v30  ;;  %v12312_v57 = vld [vmem:[#allocation14_spill] sm:$0xff]  ;;  %v12313_v30 = vld [vmem:[#allocation15_spill] sm:$0xff] }
 0x3b0   :  { %v7415_v35 = vmax.f32 %v7287_v21, %v7351_v34  ;;  %v4072_v48 = vadd.f32 %v3966_v46, %v12310_v60  ;;  %v8441_v21 = vld [vmem:[%s12261_s0 + $0x2ec] sm:$0xf]  ;;  %v11929_v60 = vrot.slane %v6733_v2, 5  ;;  %v8960_v42 = vld [vmem:[%s12261_s0 + $0x2dc] sm:$0xff] }
 0x3b1   :  { %v7112_v3 = vpop.f32.mrf.mxu3  ;;  %v5823_v45 = vpop.f32.mrf.mxu2  ;;  %v4902_v46 = vshll.u32 %v8441_v21, 16  ;;  %v4906_v15 = vshrl.u32 %v8441_v21, 16  ;;  %v4891_v16 = vsel %vm9045_vm4, %v4886_v29, %v4890_v6 }
 0x3b2   :  { %v7479_v61 = vpack.c.bf16 %v7415_v35, %v7415_v35  ;;  %v7220_v0 = vadd.f32 %v7112_v3, %v5926_v36  ;;  %v5366_v28 = vadd.f32 %v11831_v63, %v4072_v48  ;;  %8347 = vmatmul.msk.bf16.gmra.mxu0 %vm985_vm3, %v8926_v8  ;;  %v6729_v35 = vrot.slane %v6727_v9, 5 }
 0x3b3   :  { %v6739_v48 = vrot.slane %v6737_v31, 4  ;;  %v4908_v62 = vrot.slane %v4906_v15, 4  ;;  %v8794_v31 = vld [vmem:[%s12261_s0 + $0x2f4] sm:$0xf] }
 0x3b4   :  { %7544 = vst.msk [vmem:[%s12263_s3 + $0x88] sm:$0xf] %vm7509_vm5, %v7479_v61  ;;  %v7288_v37 = vadd.f32 %v11639_v41, %v7220_v0  ;;  %v11892_v63 = vpop.f32.mrf.mxu1  ;;  %v5927_v5 = vadd.f32 %v5821_v24, %v5366_v28  ;;  %v6876_v61 = vunpack.c.l.b16 %v6722_v51  ;;  %v8793_v0 = vld [vmem:[%s12261_s0 + $0x2e4] sm:$0x1] }
 0x3b5   :  { %v6740_v39 = vor.u32 %v6739_v48, %v11929_v60  ;;  %v8444_v48 = vld [vmem:[%s12261_s0 + $0x304] sm:$0xf] }
 0x3b6   :  { %v7352_v26 = vmul.f32 0.01, %v7288_v37  ;;  %8830 = vmatmul.msk.bf16.gmra.mxu3 %vm985_vm3, %v6911_v20  ;;  %8702 = vmatmul.msk.bf16.gmra.mxu2 %vm985_vm3, %v8959_v43  ;;  %v5022_v20 = vunpack.c.l.b16 %v4881_v25  ;;  %v5023_v43 = vunpack.c.l.b16 %v4891_v16  ;;  %v6912_v14 = vpack.c.b16 %v6876_v61, %v6875_v4  ;;  %v8443_v25 = vld [vmem:[%s12261_s0 + $0x300] sm:$0xf] }
 0x3b7   :  { %v3968_v40 = vpop.f32.mrf.mxu0  ;;  %8477 = vmatmul.msk.bf16.gmra.mxu1 %vm985_vm3, %v5057_v19  ;;  %v11937_v19 = vrot.slane %v4902_v46, 5  ;;  %v6741_v29 = vrot.slane %v6740_v39, 4  ;;  %v4917_v4 = vshrl.u32 %v8443_v25, 16  ;;  %v4920_v61 = vshll.u32 %v8443_v25, 16 }
 0x3b8   :  { %v7416_v44 = vmax.f32 %v7288_v37, %v7352_v26  ;;  %v4073_v24 = vadd.f32 %v3968_v40, %v12311_v18  ;;  %v6743_v26 = vshll.u32 %v8793_v0, 16  ;;  %v5058_v6 = vpack.c.b16 %v5023_v43, %v5022_v20 }
 0x3b9   :  { %v7115_v56 = vpop.f32.mrf.mxu3  ;;  %v5826_v58 = vpop.f32.mrf.mxu2  ;;  %v4909_v22 = vor.u32 %v4908_v62, %v11937_v19  ;;  %v4926_v20 = vshll.u32 %v8444_v48, 16  ;;  %v4930_v43 = vshrl.u32 %v8444_v48, 16 }
 0x3ba   :  { %v7480_v34 = vpack.c.bf16 %v7416_v44, %v7416_v44  ;;  %v7221_v36 = vadd.f32 %v7115_v56, %v5927_v5  ;;  %v5367_v8 = vadd.f32 %v11865_v27, %v4073_v24  ;;  %v4899_v5 = vor.u32 %v4898_v47, %v4895_v11 }
 0x3bb   :  { %v4912_v44 = vshll.u32 %v8442_v54, 16  ;;  %v6745_v9 = vrot.slane %v6743_v26, 5  ;;  %v4910_v49 = vrot.slane %v4909_v22, 4  ;;  %v4932_v22 = vrot.slane %v4930_v43, 4 }
 0x3bc   :  { %7545 = vst.msk [vmem:[%s12263_s3 + $0x8c] sm:$0xf] %vm7509_vm5, %v7480_v34  ;;  %v7289_v27 = vadd.f32 %v11639_v41, %v7221_v36  ;;  %v11925_v12 = vpop.f32.mrf.mxu1  ;;  %v5928_v3 = vadd.f32 %v5823_v45, %v5367_v8  ;;  %v6730_v45 = vor.u32 %v6729_v35, %v6726_v55  ;;  %v4900_v21 = vrot.slane %v4899_v5, 4  ;;  %v8795_v36 = vld [vmem:[%s12261_s0 + $0x2f8] sm:$0xf] }
 0x3bd   :  { %v4914_v34 = vrot.slane %v4912_v44, 5  ;;  %v6748_v55 = vshrl.u32 %v8794_v31, 16  ;;  %v6751_v35 = vshll.u32 %v8794_v31, 16  ;;  %v8961_v31 = vld [vmem:[%s12261_s0 + $0x2f4] sm:$0xff] }
 0x3be   :  { %v7353_v10 = vmul.f32 0.01, %v7289_v27  ;;  %v4905_v16 = vsel %vm9045_vm4, %v4900_v21, %v11937_v19 }
 0x3bf   :  { %v3971_v28 = vpop.f32.mrf.mxu0  ;;  %v6750_v62 = vrot.slane %v6748_v55, 4  ;;  %v5024_v54 = vunpack.c.l.b16 %v4905_v16  ;;  %v8798_v16 = vld [vmem:[%s12261_s0 + $0x310] sm:$0xf] }
 0x3c0   :  { %v7417_v52 = vmax.f32 %v7289_v27, %v7353_v10  ;;  %v4074_v37 = vadd.f32 %v3971_v28, %v12312_v57  ;;  %v6746_v27 = vsel %vm9045_vm4, %v6741_v29, %v6745_v9  ;;  %v6757_v10 = vshll.u32 %v8795_v36, 16  ;;  %v8445_v29 = vld [vmem:[%s12261_s0 + $0x308] sm:$0x1] }
 0x3c1   :  { %v7117_v59 = vpop.f32.mrf.mxu3  ;;  %v5828_v17 = vpop.f32.mrf.mxu2  ;;  %v6781_v43 = vshll.u32 %v8798_v16, 16 }
 0x3c2   :  { %v7481_v1 = vpack.c.bf16 %v7417_v52, %v7417_v52  ;;  %v7222_v50 = vadd.f32 %v7117_v59, %v5928_v3  ;;  %v5368_v40 = vadd.f32 %v11892_v63, %v4074_v37  ;;  %8348 = vmatmul.msk.bf16.gmra.mxu0 %vm985_vm3, %v8927_v13  ;;  %v6731_v63 = vrot.slane %v6730_v45, 4  ;;  %v8928_v45 = vld [vmem:[%s12261_s0 + $0x2d0] sm:$0xff] }
 0x3c3   :  { %v4915_v3 = vsel %vm9045_vm4, %v4910_v49, %v4914_v34  ;;  %v6761_v13 = vshrl.u32 %v8795_v36, 16  ;;  %v6753_v52 = vrot.slane %v6751_v35, 5  ;;  %v11994_v26 = vrot.slane %v6757_v10, 5 }
 0x3c4   :  { %7546 = vst.msk [vmem:[%s12263_s3 + $0x90] sm:$0xf] %vm7509_vm5, %v7481_v1  ;;  %v7290_v18 = vadd.f32 %v11639_v41, %v7222_v50  ;;  %v11955_v24 = vpop.f32.mrf.mxu1  ;;  %v5929_v2 = vadd.f32 %v5826_v58, %v5368_v40  ;;  %v6736_v58 = vsel %vm9045_vm4, %v6731_v63, %v11929_v60  ;;  %v5025_v59 = vunpack.c.l.b16 %v4915_v3 }
 0x3c5   :  { %v6877_v19 = vunpack.c.l.b16 %v6736_v58  ;;  %v6763_v5 = vrot.slane %v6761_v13, 4  ;;  %v4919_v1 = vrot.slane %v4917_v4, 4  ;;  %v4922_v50 = vrot.slane %v4920_v61, 5  ;;  %v8446_v13 = vld [vmem:[%s12261_s0 + $0x318] sm:$0xf] }
 0x3c6   :  { %v7354_v56 = vmul.f32 0.01, %v7290_v18  ;;  %8831 = vmatmul.msk.bf16.gmra.mxu3 %vm985_vm3, %v6912_v14  ;;  %8703 = vmatmul.msk.bf16.gmra.mxu2 %vm985_vm3, %v8960_v42  ;;  %v12314_v14 = vld [vmem:[#allocation16_spill] sm:$0xff]  ;;  %v6754_v63 = vor.u32 %v6753_v52, %v6750_v62 }
 0x3c7   :  { %v3973_v32 = vpop.f32.mrf.mxu0  ;;  %8478 = vmatmul.msk.bf16.gmra.mxu1 %vm985_vm3, %v5058_v6  ;;  %v8796_v6 = vld [vmem:[%s12261_s0 + $0x2fc] sm:$0x1]  ;;  %v6764_v49 = vor.u32 %v6763_v5, %v11994_v26  ;;  %v4923_v36 = vor.u32 %v4922_v50, %v4919_v1 }
 0x3c8   :  { %v7418_v8 = vmax.f32 %v7290_v18, %v7354_v56  ;;  %v4075_v51 = vadd.f32 %v3973_v32, %v12313_v30  ;;  %v5059_v32 = vpack.c.b16 %v5025_v59, %v5024_v54  ;;  %v6767_v34 = vshll.u32 %v8796_v6, 16 }
 0x3c9   :  { %v7120_v46 = vpop.f32.mrf.mxu3  ;;  %v5831_v15 = vpop.f32.mrf.mxu2  ;;  %v6755_v58 = vrot.slane %v6754_v63, 4  ;;  %v6765_v35 = vrot.slane %v6764_v49, 4  ;;  %v4941_v59 = vshrl.u32 %v8446_v13, 16  ;;  %v12316_v49 = vld [vmem:[#allocation18_spill] sm:$0xff] }
 0x3ca   :  { %v7482_v60 = vpack.c.bf16 %v7418_v8, %v7418_v8  ;;  %v7223_v11 = vadd.f32 %v7120_v46, %v5929_v2  ;;  %v5369_v47 = vadd.f32 %v11925_v12, %v4075_v51  ;;  %v6878_v12 = vunpack.c.l.b16 %v6746_v27  ;;  %v8797_v27 = vld [vmem:[%s12261_s0 + $0x30c] sm:$0xf] }
 0x3cb   :  { %v4936_v51 = vshll.u32 %v8445_v29, 16  ;;  %v6769_v48 = vrot.slane %v6767_v34, 5  ;;  %v8799_v29 = vld [vmem:[%s12261_s0 + $0x314] sm:$0x1] }
 0x3cc   :  { %7547 = vst.msk [vmem:[%s12263_s3 + $0x94] sm:$0xf] %vm7509_vm5, %v7482_v60  ;;  %v7291_v0 = vadd.f32 %v11639_v41, %v7223_v11  ;;  %v11989_v28 = vpop.f32.mrf.mxu1  ;;  %v5930_v37 = vadd.f32 %v5828_v17, %v5369_v47  ;;  %v12000_v17 = vrot.slane %v4926_v20, 5  ;;  %v6913_v2 = vpack.c.b16 %v6878_v12, %v6877_v19  ;;  %v12315_v47 = vld [vmem:[#allocation17_spill] sm:$0xff] }
 0x3cd   :  { %v4924_v60 = vrot.slane %v4923_v36, 4  ;;  %v4938_v3 = vrot.slane %v4936_v51, 5  ;;  %v6775_v20 = vshll.u32 %v8797_v27, 16  ;;  %v6785_v19 = vshrl.u32 %v8798_v16, 16  ;;  %v8447_v12 = vld [vmem:[%s12261_s0 + $0x31c] sm:$0xf] }
 0x3ce   :  { %v7355_v57 = vmul.f32 0.01, %v7291_v0  ;;  %v4933_v30 = vor.u32 %v4932_v22, %v12000_v17  ;;  %v4950_v1 = vshll.u32 %v8447_v12, 16  ;;  %v4954_v50 = vshrl.u32 %v8447_v12, 16 }
 0x3cf   :  { %v3976_v39 = vpop.f32.mrf.mxu0  ;;  %v4929_v54 = vsel %vm9045_vm4, %v4924_v60, %v12000_v17  ;;  %v6787_v6 = vrot.slane %v6785_v19, 4  ;;  %v8800_v19 = vld [vmem:[%s12261_s0 + $0x324] sm:$0xf] }
 0x3d0   :  { %v7419_v40 = vmax.f32 %v7291_v0, %v7355_v57  ;;  %v4076_v42 = vadd.f32 %v3976_v39, %v12314_v14  ;;  %v6772_v0 = vshrl.u32 %v8797_v27, 16  ;;  %v4944_v39 = vshll.u32 %v8446_v13, 16 }
 0x3d1   :  { %v7122_v44 = vpop.f32.mrf.mxu3  ;;  %v5833_v18 = vpop.f32.mrf.mxu2  ;;  %v6777_v14 = vrot.slane %v6775_v20, 5  ;;  %v4952_v36 = vrot.slane %v4950_v1, 5 }
 0x3d2   :  { %v7483_v9 = vpack.c.bf16 %v7419_v40, %v7419_v40  ;;  %v7224_v21 = vadd.f32 %v7122_v44, %v5930_v37  ;;  %v5370_v56 = vadd.f32 %v11955_v24, %v4076_v42  ;;  %8349 = vmatmul.msk.bf16.gmra.mxu0 %vm985_vm3, %v8928_v45  ;;  %v6760_v37 = vsel %vm9045_vm4, %v6755_v58, %v11994_v26  ;;  %v8929_v44 = vld [vmem:[%s12261_s0 + $0x2e8] sm:$0xff] }
 0x3d3   :  { %v6770_v45 = vsel %vm9045_vm4, %v6765_v35, %v6769_v48  ;;  %v6774_v40 = vrot.slane %v6772_v0, 4  ;;  %v12055_v42 = vrot.slane %v6781_v43, 5  ;;  %v6879_v63 = vunpack.c.l.b16 %v6760_v37  ;;  %v8962_v48 = vld [vmem:[%s12261_s0 + $0x30c] sm:$0xff] }
 0x3d4   :  { %7548 = vst.msk [vmem:[%s12263_s3 + $0x98] sm:$0xf] %vm7509_vm5, %v7483_v9  ;;  %v7292_v8 = vadd.f32 %v11639_v41, %v7224_v21  ;;  %v12016_v24 = vpop.f32.mrf.mxu1  ;;  %v5931_v46 = vadd.f32 %v5831_v15, %v5370_v56  ;;  %v4934_v15 = vrot.slane %v4933_v30, 4  ;;  %v5026_v21 = vunpack.c.l.b16 %v4929_v54  ;;  %v8801_v54 = vld [vmem:[%s12261_s0 + $0x328] sm:$0xf] }
 0x3d5   :  { %v6778_v51 = vor.u32 %v6777_v14, %v6774_v40  ;;  %v6788_v58 = vor.u32 %v6787_v6, %v12055_v42  ;;  %v6799_v40 = vshll.u32 %v8800_v19, 16  ;;  %v6805_v14 = vshll.u32 %v8801_v54, 16 }
 0x3d6   :  { %v7356_v25 = vmul.f32 0.01, %v7292_v8  ;;  %8832 = vmatmul.msk.bf16.gmra.mxu3 %vm985_vm3, %v6913_v2  ;;  %8704 = vmatmul.msk.bf16.gmra.mxu2 %vm985_vm3, %v8961_v31  ;;  %v4939_v26 = vsel %vm9045_vm4, %v4934_v15, %v4938_v3  ;;  %v4943_v2 = vrot.slane %v4941_v59, 4  ;;  %v4946_v31 = vrot.slane %v4944_v39, 5 }
 0x3d7   :  { %v3978_v55 = vpop.f32.mrf.mxu0  ;;  %8479 = vmatmul.msk.bf16.gmra.mxu1 %vm985_vm3, %v5059_v32  ;;  %v5027_v56 = vunpack.c.l.b16 %v4939_v26  ;;  %v6779_v13 = vrot.slane %v6778_v51, 4  ;;  %v6796_v26 = vshrl.u32 %v8800_v19, 16  ;;  %v6809_v6 = vshrl.u32 %v8801_v54, 16 }
 0x3d8   :  { %v7420_v11 = vmax.f32 %v7292_v8, %v7356_v25  ;;  %v4077_v10 = vadd.f32 %v3978_v55, %v12315_v47  ;;  %v6791_v25 = vshll.u32 %v8799_v29, 16  ;;  %v12080_v47 = vld [vmem:[%s12262_s2] ss:$0 sm:$0xff] }
 0x3d9   :  { %v7125_v4 = vpop.f32.mrf.mxu3  ;;  %v12032_v61 = vpop.f32.mrf.mxu2  ;;  %v5060_v60 = vpack.c.b16 %v5027_v56, %v5026_v21  ;;  %v6784_v39 = vsel %vm9045_vm4, %v6779_v13, %v12055_v42  ;;  %v6798_v21 = vrot.slane %v6796_v26, 4  ;;  %v6801_v56 = vrot.slane %v6799_v40, 5 }
 0x3da   :  { %v7484_v62 = vpack.c.bf16 %v7420_v11, %v7420_v11  ;;  %v7225_v52 = vadd.f32 %v7125_v4, %v5931_v46  ;;  %v5371_v57 = vadd.f32 %v11989_v28, %v4077_v10  ;;  %v8448_v46 = vld [vmem:[%s12261_s0 + $0x320] sm:$0x1]  ;;  %v4947_v11 = vor.u32 %v4946_v31, %v4943_v2 }
 0x3db   :  { %v4960_v3 = vshll.u32 %v8448_v46, 16  ;;  %v6789_v4 = vrot.slane %v6788_v58, 4  ;;  %v6793_v0 = vrot.slane %v6791_v25, 5 }
 0x3dc   :  { %7549 = vst.msk [vmem:[%s12263_s3 + $0x9c] sm:$0xf] %vm7509_vm5, %v7484_v62  ;;  %v7293_v28 = vadd.f32 %v11639_v41, %v7225_v52  ;;  %v12051_v5 = vpop.f32.mrf.mxu1  ;;  %v5932_v22 = vadd.f32 %v5833_v18, %v5371_v57  ;;  %v6880_v41 = vunpack.c.l.b16 %v6770_v45  ;;  %v4956_v18 = vrot.slane %v4954_v50, 4 }
 0x3dd   :  { %v4948_v62 = vrot.slane %v4947_v11, 4  ;;  %v4962_v45 = vrot.slane %v4960_v3, 5 }
 0x3de   :  { %v7357_v17 = vmul.f32 0.01, %v7293_v28  ;;  %v6914_v35 = vpack.c.b16 %v6880_v41, %v6879_v63  ;;  %v4957_v15 = vor.u32 %v4956_v18, %v4952_v36  ;;  %v6881_v63 = vunpack.c.l.b16 %v6784_v39 }
 0x3df   :  { %v3981_v9 = vpop.f32.mrf.mxu0  ;;  %v4953_v42 = vsel %vm9045_vm4, %v4948_v62, %v4952_v36 }
 0x3e0   :  { %v7421_v32 = vmax.f32 %v7293_v28, %v7357_v17  ;;  %v4078_v34 = vadd.f32 %v3981_v9, %v12316_v49  ;;  %v4958_v37 = vrot.slane %v4957_v15, 4  ;;  %v6794_v28 = vsel %vm9045_vm4, %v6789_v4, %v6793_v0  ;;  %v8930_v9 = vld [vmem:[%s12261_s0 + $0x300] sm:$0xff] }
 0x3e1   :  { %v7127_v8 = vpop.f32.mrf.mxu3  ;;  %v5838_v30 = vpop.f32.mrf.mxu2  ;;  %v6882_v41 = vunpack.c.l.b16 %v6794_v28  ;;  %v5028_v31 = vunpack.c.l.b16 %v4953_v42  ;;  %v6807_v49 = vrot.slane %v6805_v14, 5 }
 0x3e2   :  { %v7485_v27 = vpack.c.bf16 %v7421_v32, %v7421_v32  ;;  %v7226_v16 = vadd.f32 %v7127_v8, %v5932_v22  ;;  %v5372_v55 = vadd.f32 %v12016_v24, %v4078_v34  ;;  %8350 = vmatmul.msk.bf16.gmra.mxu0 %vm985_vm3, %v8929_v44  ;;  %v4963_v44 = vsel %vm9045_vm4, %v4958_v37, %v4962_v45  ;;  %v8802_v8 = vld [vmem:[%s12261_s0 + $0x32c] sm:$0x1] }
 0x3e3   :  { %v5029_v32 = vunpack.c.l.b16 %v4963_v44  ;;  %v6811_v34 = vrot.slane %v6809_v6, 4 }
 0x3e4   :  { %7550 = vst.msk [vmem:[%s12263_s3 + $0xa0] sm:$0xf] %vm7509_vm5, %v7485_v27  ;;  %v7294_v24 = vadd.f32 %v12080_v47, %v7226_v16  ;;  %v5280_v10 = vpop.f32.mrf.mxu1  ;;  %v5933_v43 = vadd.f32 %v12032_v61, %v5372_v55  ;;  %v6915_v27 = vpack.c.b16 %v6882_v41, %v6881_v63  ;;  %v8963_v16 = vld [vmem:[%s12261_s0 + $0x324] sm:$0xff] }
 0x3e5   :  { %v5061_v55 = vpack.c.b16 %v5029_v32, %v5028_v31 }
 0x3e6   :  { %v7358_v20 = vmul.f32 0.01, %v7294_v24  ;;  %8833 = vmatmul.msk.bf16.gmra.mxu3 %vm985_vm3, %v6914_v35  ;;  %8705 = vmatmul.msk.bf16.gmra.mxu2 %vm985_vm3, %v8962_v48  ;;  %v6802_v35 = vor.u32 %v6801_v56, %v6798_v21  ;;  %v6812_v48 = vor.u32 %v6811_v34, %v6807_v49 }
 0x3e7   :  { %v3983_v12 = vpop.f32.mrf.mxu0  ;;  %8480 = vmatmul.msk.bf16.gmra.mxu1 %vm985_vm3, %v5060_v60 }
 0x3e8   :  { %v7422_v52 = vmax.f32 %v7294_v24, %v7358_v20  ;;  %v4079_v57 = vadd.f32 %v3983_v12, %v10336_v23  ;;  %v6803_v3 = vrot.slane %v6802_v35, 4  ;;  %v6813_v13 = vrot.slane %v6812_v48, 4 }
 0x3e9   :  { %v7130_v61 = vpop.f32.mrf.mxu3  ;;  %v5841_v59 = vpop.f32.mrf.mxu2 }
 0x3ea   :  { %v7486_v1 = vpack.c.bf16 %v7422_v52, %v7422_v52  ;;  %v7227_v50 = vadd.f32 %v7130_v61, %v5933_v43  ;;  %v5373_v23 = vadd.f32 %v12051_v5, %v4079_v57  ;;  %v6808_v57 = vsel %vm9045_vm4, %v6803_v3, %v6807_v49 }
 0x3eb   :  { %v6883_v39 = vunpack.c.l.b16 %v6808_v57  ;;  %v12320_v57 = vld [vmem:[#allocation22_spill] sm:$0xff] }
 0x3ec   :  { %7551 = vst.msk [vmem:[%s12263_s3 + $0xa4] sm:$0xf] %vm7509_vm5, %v7486_v1  ;;  %v7295_v17 = vadd.f32 %v12080_v47, %v7227_v50  ;;  %v5282_v22 = vpop.f32.mrf.mxu1  ;;  %v5934_v29 = vadd.f32 %v5838_v30, %v5373_v23 }
 0x3ee   :  { %v7359_v5 = vmul.f32 0.01, %v7295_v17 }
 0x3ef   :  { %v3986_v2 = vpop.f32.mrf.mxu0 }
 0x3f0   :  { %v7423_v18 = vmax.f32 %v7295_v17, %v7359_v5  ;;  %v4080_v36 = vadd.f32 %v3986_v2, %v10369_v7  ;;  %v6815_v7 = vshll.u32 %v8802_v8, 16  ;;  %v12317_v5 = vld [vmem:[#allocation19_spill] sm:$0xff] }
 0x3f1   :  { %v7132_v51 = vpop.f32.mrf.mxu3  ;;  %v5843_v30 = vpop.f32.mrf.mxu2 }
 0x3f2   :  { %v7487_v58 = vpack.c.bf16 %v7423_v18, %v7423_v18  ;;  %v7228_v25 = vadd.f32 %v7132_v51, %v5934_v29  ;;  %v5374_v46 = vadd.f32 %v5280_v10, %v4080_v36  ;;  %8351 = vmatmul.msk.bf16.gmra.mxu0 %vm985_vm3, %v8930_v9  ;;  %v6817_v4 = vrot.slane %v6815_v7, 5  ;;  %v12318_v51 = vld [vmem:[#allocation20_spill] sm:$0xff] }
 0x3f4   :  { %7552 = vst.msk [vmem:[%s12263_s3 + $0xa8] sm:$0xf] %vm7509_vm5, %v7487_v58  ;;  %v7296_v60 = vadd.f32 %v12080_v47, %v7228_v25  ;;  %v5285_v11 = vpop.f32.mrf.mxu1  ;;  %v5935_v10 = vadd.f32 %v5841_v59, %v5374_v46  ;;  %v6818_v37 = vsel %vm9045_vm4, %v6813_v13, %v6817_v4  ;;  %v8931_v59 = vld [vmem:[%s12261_s0 + $0x318] sm:$0xff] }
 0x3f5   :  { %v6884_v28 = vunpack.c.l.b16 %v6818_v37 }
 0x3f6   :  { %v7360_v24 = vmul.f32 0.01, %v7296_v60  ;;  %8834 = vmatmul.msk.bf16.gmra.mxu3 %vm985_vm3, %v6915_v27  ;;  %8706 = vmatmul.msk.bf16.gmra.mxu2 %vm985_vm3, %v8963_v16 }
 0x3f7   :  { %v3988_v15 = vpop.f32.mrf.mxu0  ;;  %8481 = vmatmul.msk.bf16.gmra.mxu1 %vm985_vm3, %v5061_v55  ;;  %v6916_v17 = vpack.c.b16 %v6884_v28, %v6883_v39 }
 0x3f8   :  { %v7424_v0 = vmax.f32 %v7296_v60, %v7360_v24  ;;  %v4081_v20 = vadd.f32 %v3988_v15, %v10381_v53  ;;  %v12319_v24 = vld [vmem:[#allocation21_spill] sm:$0xff] }
 0x3f9   :  { %v7135_v43 = vpop.f32.mrf.mxu3  ;;  %v5846_v19 = vpop.f32.mrf.mxu2 }
 0x3fa   :  { %v7488_v12 = vpack.c.bf16 %v7424_v0, %v7424_v0  ;;  %v7229_v62 = vadd.f32 %v7135_v43, %v5935_v10  ;;  %v5375_v52 = vadd.f32 %v5282_v22, %v4081_v20 }
 0x3fc   :  { %7553 = vst.msk [vmem:[%s12263_s3 + $0xac] sm:$0xf] %vm7509_vm5, %v7488_v12  ;;  %v7297_v45 = vadd.f32 %v12080_v47, %v7229_v62  ;;  %v5287_v54 = vpop.f32.mrf.mxu1  ;;  %v5936_v61 = vadd.f32 %v5843_v30, %v5375_v52 }
 0x3fe   :  { %v7361_v53 = vmul.f32 0.01, %v7297_v45 }
 0x3ff   :  { %v3991_v26 = vpop.f32.mrf.mxu0 }
 0x400   :  { %v7425_v1 = vmax.f32 %v7297_v45, %v7361_v53  ;;  %v4082_v38 = vadd.f32 %v3991_v26, %v10402_v33 }
 0x401   :  { %v7137_v50 = vpop.f32.mrf.mxu3  ;;  %v5848_v23 = vpop.f32.mrf.mxu2 }
 0x402   :  { %v7489_v40 = vpack.c.bf16 %v7425_v1, %v7425_v1  ;;  %v7230_v14 = vadd.f32 %v7137_v50, %v5936_v61  ;;  %v5376_v6 = vadd.f32 %v5285_v11, %v4082_v38  ;;  %8352 = vmatmul.msk.bf16.gmra.mxu0 %vm985_vm3, %v8931_v59 }
 0x404   :  { %7554 = vst.msk [vmem:[%s12263_s3 + $0xb0] sm:$0xf] %vm7509_vm5, %v7489_v40  ;;  %v7298_v22 = vadd.f32 %v12080_v47, %v7230_v14  ;;  %v5290_v42 = vpop.f32.mrf.mxu1  ;;  %v5937_v33 = vadd.f32 %v5846_v19, %v5376_v6 }
 0x406   :  { %v7362_v44 = vmul.f32 0.01, %v7298_v22  ;;  %8835 = vmatmul.msk.bf16.gmra.mxu3 %vm985_vm3, %v6916_v17 }
 0x407   :  { %v3993_v63 = vpop.f32.mrf.mxu0 }
 0x408   :  { %v7426_v41 = vmax.f32 %v7298_v22, %v7362_v44  ;;  %v4083_v29 = vadd.f32 %v3993_v63, %v12317_v5 }
 0x409   :  { %v7140_v9 = vpop.f32.mrf.mxu3  ;;  %v5851_v21 = vpop.f32.mrf.mxu2 }
 0x40a   :  { %v7490_v56 = vpack.c.bf16 %v7426_v41, %v7426_v41  ;;  %v7231_v2 = vadd.f32 %v7140_v9, %v5937_v33  ;;  %v5377_v31 = vadd.f32 %v5287_v54, %v4083_v29  ;;  %v12322_v9 = vld [vmem:[#allocation24_spill] sm:$0xff] }
 0x40c   :  { %7555 = vst.msk [vmem:[%s12263_s3 + $0xb4] sm:$0xf] %vm7509_vm5, %v7490_v56  ;;  %v7299_v32 = vadd.f32 %v12080_v47, %v7231_v2  ;;  %v5292_v49 = vpop.f32.mrf.mxu1  ;;  %v5938_v18 = vadd.f32 %v5848_v23, %v5377_v31  ;;  %v12321_v23 = vld [vmem:[#allocation23_spill] sm:$0xff] }
 0x40e   :  { %v7363_v34 = vmul.f32 0.01, %v7299_v32 }
 0x40f   :  { %v3996_v36 = vpop.f32.mrf.mxu0 }
 0x410   :  { %v7427_v8 = vmax.f32 %v7299_v32, %v7363_v34  ;;  %v4084_v30 = vadd.f32 %v3996_v36, %v12318_v51 }
 0x411   :  { %v7142_v58 = vpop.f32.mrf.mxu3  ;;  %v5853_v25 = vpop.f32.mrf.mxu2 }
 0x412   :  { %v7491_v46 = vpack.c.bf16 %v7427_v8, %v7427_v8  ;;  %v7232_v27 = vadd.f32 %v7142_v58, %v5938_v18  ;;  %v5378_v16 = vadd.f32 %v5290_v42, %v4084_v30  ;;  %v12323_v58 = vld [vmem:[#allocation25_spill] sm:$0xff] }
 0x414   :  { %7556 = vst.msk [vmem:[%s12263_s3 + $0xb8] sm:$0xf] %vm7509_vm5, %v7491_v46  ;;  %v7300_v55 = vadd.f32 %v12080_v47, %v7232_v27  ;;  %v5295_v35 = vpop.f32.mrf.mxu1  ;;  %v5939_v7 = vadd.f32 %v5851_v21, %v5378_v16 }
 0x416   :  { %v7364_v48 = vmul.f32 0.01, %v7300_v55 }
 0x417   :  { %v3998_v60 = vpop.f32.mrf.mxu0 }
 0x418   :  { %v7428_v11 = vmax.f32 %v7300_v55, %v7364_v48  ;;  %v4085_v10 = vadd.f32 %v3998_v60, %v12319_v24 }
 0x419   :  { %v7145_v15 = vpop.f32.mrf.mxu3  ;;  %v5856_v3 = vpop.f32.mrf.mxu2 }
 0x41a   :  { %v7492_v13 = vpack.c.bf16 %v7428_v11, %v7428_v11  ;;  %v7233_v4 = vadd.f32 %v7145_v15, %v5939_v7  ;;  %v5379_v0 = vadd.f32 %v5292_v49, %v4085_v10  ;;  %v12324_v15 = vld [vmem:[#allocation26_spill] sm:$0xff] }
 0x41c   :  { %7557 = vst.msk [vmem:[%s12263_s3 + $0xbc] sm:$0xf] %vm7509_vm5, %v7492_v13  ;;  %v7301_v20 = vadd.f32 %v12080_v47, %v7233_v4  ;;  %v5297_v43 = vpop.f32.mrf.mxu1  ;;  %v5940_v12 = vadd.f32 %v5853_v25, %v5379_v0 }
 0x41e   :  { %v7365_v19 = vmul.f32 0.01, %v7301_v20 }
 0x41f   :  { %v4001_v62 = vpop.f32.mrf.mxu0 }
 0x420   :  { %v7429_v52 = vmax.f32 %v7301_v20, %v7365_v19  ;;  %v4086_v37 = vadd.f32 %v4001_v62, %v12320_v57 }
 0x421   :  { %v7147_v45 = vpop.f32.mrf.mxu3  ;;  %v5858_v54 = vpop.f32.mrf.mxu2 }
 0x422   :  { %v7493_v53 = vpack.c.bf16 %v7429_v52, %v7429_v52  ;;  %v7234_v61 = vadd.f32 %v7147_v45, %v5940_v12  ;;  %v5380_v59 = vadd.f32 %v5295_v35, %v4086_v37  ;;  %v12325_v45 = vld [vmem:[#allocation27_spill] sm:$0xff] }
 0x424   :  { %7558 = vst.msk [vmem:[%s12263_s3 + $0xc0] sm:$0xf] %vm7509_vm5, %v7493_v53  ;;  %v7302_v39 = vadd.f32 %v12080_v47, %v7234_v61  ;;  %v5300_v28 = vpop.f32.mrf.mxu1  ;;  %v5941_v1 = vadd.f32 %v5856_v3, %v5380_v59 }
 0x426   :  { %v7366_v26 = vmul.f32 0.01, %v7302_v39 }
 0x427   :  { %v4003_v38 = vpop.f32.mrf.mxu0 }
 0x428   :  { %v7430_v50 = vmax.f32 %v7302_v39, %v7366_v26  ;;  %v4087_v40 = vadd.f32 %v4003_v38, %v12321_v23 }
 0x429   :  { %v7150_v14 = vpop.f32.mrf.mxu3  ;;  %v5861_v6 = vpop.f32.mrf.mxu2 }
 0x42a   :  { %v7494_v17 = vpack.c.bf16 %v7430_v50, %v7430_v50  ;;  %v7235_v22 = vadd.f32 %v7150_v14, %v5941_v1  ;;  %v5381_v42 = vadd.f32 %v5297_v43, %v4087_v40  ;;  %v12326_v14 = vld [vmem:[#allocation28_spill] sm:$0xff] }
 0x42c   :  { %7559 = vst.msk [vmem:[%s12263_s3 + $0xc4] sm:$0xf] %vm7509_vm5, %v7494_v17  ;;  %v7303_v44 = vadd.f32 %v12080_v47, %v7235_v22  ;;  %v5302_v33 = vpop.f32.mrf.mxu1  ;;  %v5942_v41 = vadd.f32 %v5858_v54, %v5381_v42 }
 0x42e   :  { %v7367_v63 = vmul.f32 0.01, %v7303_v44 }
 0x42f   :  { %v4006_v5 = vpop.f32.mrf.mxu0 }
 0x430   :  { %v7431_v29 = vmax.f32 %v7303_v44, %v7367_v63  ;;  %v4088_v21 = vadd.f32 %v4006_v5, %v12322_v9 }
 0x431   :  { %v7152_v56 = vpop.f32.mrf.mxu3  ;;  %v5863_v2 = vpop.f32.mrf.mxu2 }
 0x432   :  { %v7495_v31 = vpack.c.bf16 %v7431_v29, %v7431_v29  ;;  %v7236_v32 = vadd.f32 %v7152_v56, %v5942_v41  ;;  %v5382_v49 = vadd.f32 %v5300_v28, %v4088_v21  ;;  %v12327_v56 = vld [vmem:[#allocation29_spill] sm:$0xff] }
 0x434   :  { %7560 = vst.msk [vmem:[%s12263_s3 + $0xc8] sm:$0xf] %vm7509_vm5, %v7495_v31  ;;  %v7304_v34 = vadd.f32 %v12080_v47, %v7236_v32  ;;  %v5305_v18 = vpop.f32.mrf.mxu1  ;;  %v5943_v8 = vadd.f32 %v5861_v6, %v5382_v49 }
 0x436   :  { %v7368_v36 = vmul.f32 0.01, %v7304_v34 }
 0x437   :  { %v4008_v51 = vpop.f32.mrf.mxu0 }
 0x438   :  { %v7432_v30 = vmax.f32 %v7304_v34, %v7368_v36  ;;  %v4089_v25 = vadd.f32 %v4008_v51, %v12323_v58 }
 0x439   :  { %v7155_v46 = vpop.f32.mrf.mxu3  ;;  %v5866_v27 = vpop.f32.mrf.mxu2 }
 0x43a   :  { %v7496_v16 = vpack.c.bf16 %v7432_v30, %v7432_v30  ;;  %v7237_v55 = vadd.f32 %v7155_v46, %v5943_v8  ;;  %v5383_v35 = vadd.f32 %v5302_v33, %v4089_v25  ;;  %v12328_v25 = vld [vmem:[#allocation30_spill] sm:$0xff] }
 0x43c   :  { %7561 = vst.msk [vmem:[%s12263_s3 + $0xcc] sm:$0xf] %vm7509_vm5, %v7496_v16  ;;  %v7305_v48 = vadd.f32 %v12080_v47, %v7237_v55  ;;  %v5307_v7 = vpop.f32.mrf.mxu1  ;;  %v5944_v11 = vadd.f32 %v5863_v2, %v5383_v35 }
 0x43e   :  { %v7369_v60 = vmul.f32 0.01, %v7305_v48 }
 0x43f   :  { %v4011_v24 = vpop.f32.mrf.mxu0 }
 0x440   :  { %v7433_v10 = vmax.f32 %v7305_v48, %v7369_v60  ;;  %v4090_v3 = vadd.f32 %v4011_v24, %v12324_v15 }
 0x441   :  { %v7157_v13 = vpop.f32.mrf.mxu3  ;;  %v5868_v4 = vpop.f32.mrf.mxu2 }
 0x442   :  { %v7497_v0 = vpack.c.bf16 %v7433_v10, %v7433_v10  ;;  %v7238_v20 = vadd.f32 %v7157_v13, %v5944_v11  ;;  %v5384_v43 = vadd.f32 %v5305_v18, %v4090_v3  ;;  %v12329_v3 = vld [vmem:[#allocation31_spill] sm:$0xff] }
 0x444   :  { %7562 = vst.msk [vmem:[%s12263_s3 + $0xd0] sm:$0xf] %vm7509_vm5, %v7497_v0  ;;  %v7306_v19 = vadd.f32 %v12080_v47, %v7238_v20  ;;  %v5310_v12 = vpop.f32.mrf.mxu1  ;;  %v5945_v52 = vadd.f32 %v5866_v27, %v5384_v43 }
 0x446   :  { %v7370_v62 = vmul.f32 0.01, %v7306_v19 }
 0x447   :  { %v4013_v57 = vpop.f32.mrf.mxu0 }
 0x448   :  { %v7434_v37 = vmax.f32 %v7306_v19, %v7370_v62  ;;  %v4091_v54 = vadd.f32 %v4013_v57, %v12325_v45 }
 0x449   :  { %v7160_v53 = vpop.f32.mrf.mxu3  ;;  %v5871_v61 = vpop.f32.mrf.mxu2 }
 0x44a   :  { %v7498_v59 = vpack.c.bf16 %v7434_v37, %v7434_v37  ;;  %v7239_v39 = vadd.f32 %v7160_v53, %v5945_v52  ;;  %v5385_v28 = vadd.f32 %v5307_v7, %v4091_v54  ;;  %v12330_v54 = vld [vmem:[#allocation32_spill] sm:$0xff] }
 0x44c   :  { %7563 = vst.msk [vmem:[%s12263_s3 + $0xd4] sm:$0xf] %vm7509_vm5, %v7498_v59  ;;  %v7307_v26 = vadd.f32 %v12080_v47, %v7239_v39  ;;  %v5312_v1 = vpop.f32.mrf.mxu1  ;;  %v5946_v50 = vadd.f32 %v5868_v4, %v5385_v28 }
 0x44e   :  { %v7371_v38 = vmul.f32 0.01, %v7307_v26 }
 0x44f   :  { %v4016_v23 = vpop.f32.mrf.mxu0 }
 0x450   :  { %v7435_v40 = vmax.f32 %v7307_v26, %v7371_v38  ;;  %v4092_v6 = vadd.f32 %v4016_v23, %v12326_v14  ;;  %v12331_v14 = vld [vmem:[#allocation33_spill] sm:$0xff] }
 0x451   :  { %v7162_v17 = vpop.f32.mrf.mxu3  ;;  %v5873_v22 = vpop.f32.mrf.mxu2 }
 0x452   :  { %v7499_v42 = vpack.c.bf16 %v7435_v40, %v7435_v40  ;;  %v7240_v44 = vadd.f32 %v7162_v17, %v5946_v50  ;;  %v5386_v33 = vadd.f32 %v5310_v12, %v4092_v6 }
 0x454   :  { %7564 = vst.msk [vmem:[%s12263_s3 + $0xd8] sm:$0xf] %vm7509_vm5, %v7499_v42  ;;  %v7308_v63 = vadd.f32 %v12080_v47, %v7240_v44  ;;  %v5947_v5 = vadd.f32 %v5871_v61, %v5386_v33  ;;  %v5315_v9 = vpop.f32.mrf.mxu1 }
 0x456   :  { %v7372_v41 = vmul.f32 0.01, %v7308_v63 }
 0x457   :  { %v4018_v29 = vpop.f32.mrf.mxu0 }
 0x458   :  { %v7436_v21 = vmax.f32 %v7308_v63, %v7372_v41  ;;  %v4093_v2 = vadd.f32 %v4018_v29, %v12327_v56  ;;  %v12332_v56 = vld [vmem:[#allocation34_spill] sm:$0xff] }
 0x459   :  { %v7165_v31 = vpop.f32.mrf.mxu3  ;;  %v5876_v18 = vpop.f32.mrf.mxu2 }
 0x45a   :  { %v7500_v32 = vpack.c.bf16 %v7436_v21, %v7436_v21  ;;  %v7241_v49 = vadd.f32 %v7165_v31, %v5947_v5  ;;  %v5387_v34 = vadd.f32 %v5312_v1, %v4093_v2 }
 0x45c   :  { %7565 = vst.msk [vmem:[%s12263_s3 + $0xdc] sm:$0xf] %vm7509_vm5, %v7500_v32  ;;  %v7309_v36 = vadd.f32 %v12080_v47, %v7241_v49  ;;  %v5948_v51 = vadd.f32 %v5873_v22, %v5387_v34  ;;  %v5317_v16 = vpop.f32.mrf.mxu1 }
 0x45e   :  { %v7373_v8 = vmul.f32 0.01, %v7309_v36 }
 0x45f   :  { %v4021_v30 = vpop.f32.mrf.mxu0 }
 0x460   :  { %v7437_v58 = vmax.f32 %v7309_v36, %v7373_v8  ;;  %v4094_v46 = vadd.f32 %v4021_v30, %v12328_v25  ;;  %v12333_v25 = vld [vmem:[#allocation35_spill] sm:$0xff] }
 0x461   :  { %v7167_v27 = vpop.f32.mrf.mxu3  ;;  %v5878_v60 = vpop.f32.mrf.mxu2 }
 0x462   :  { %v7501_v55 = vpack.c.bf16 %v7437_v58, %v7437_v58  ;;  %v7242_v35 = vadd.f32 %v7167_v27, %v5948_v51  ;;  %v5388_v48 = vadd.f32 %v5315_v9, %v4094_v46 }
 0x464   :  { %7566 = vst.msk [vmem:[%s12263_s3 + $0xe0] sm:$0xf] %vm7509_vm5, %v7501_v55  ;;  %v7310_v7 = vadd.f32 %v12080_v47, %v7242_v35  ;;  %v5949_v24 = vadd.f32 %v5876_v18, %v5388_v48  ;;  %v5320_v19 = vpop.f32.mrf.mxu1 }
 0x466   :  { %v7374_v11 = vmul.f32 0.01, %v7310_v7 }
 0x467   :  { %v4023_v10 = vpop.f32.mrf.mxu0 }
 0x468   :  { %v7438_v15 = vmax.f32 %v7310_v7, %v7374_v11  ;;  %v4095_v13 = vadd.f32 %v4023_v10, %v12329_v3 }
 0x469   :  { %v7170_v4 = vpop.f32.mrf.mxu3  ;;  %v5881_v57 = vpop.f32.mrf.mxu2 }
 0x46a   :  { %v7502_v0 = vpack.c.bf16 %v7438_v15, %v7438_v15  ;;  %v7243_v20 = vadd.f32 %v7170_v4, %v5949_v24  ;;  %v5389_v43 = vadd.f32 %v5317_v16, %v4095_v13 }
 0x46c   :  { %7567 = vst.msk [vmem:[%s12263_s3 + $0xe4] sm:$0xf] %vm7509_vm5, %v7502_v0  ;;  %v7311_v12 = vadd.f32 %v12080_v47, %v7243_v20  ;;  %v5950_v52 = vadd.f32 %v5878_v60, %v5389_v43  ;;  %v5322_v1 = vpop.f32.mrf.mxu1 }
 0x46e   :  { %v7375_v62 = vmul.f32 0.01, %v7311_v12 }
 0x46f   :  { %v4026_v37 = vpop.f32.mrf.mxu0 }
 0x470   :  { %v7439_v45 = vmax.f32 %v7311_v12, %v7375_v62  ;;  %v4096_v53 = vadd.f32 %v4026_v37, %v12330_v54 }
 0x471   :  { %v7172_v61 = vpop.f32.mrf.mxu3  ;;  %v5883_v17 = vpop.f32.mrf.mxu2 }
 0x472   :  { %v7503_v59 = vpack.c.bf16 %v7439_v45, %v7439_v45  ;;  %v7244_v39 = vadd.f32 %v7172_v61, %v5950_v52  ;;  %v5390_v28 = vadd.f32 %v5320_v19, %v4096_v53 }
 0x474   :  { %7568 = vst.msk [vmem:[%s12263_s3 + $0xe8] sm:$0xf] %vm7509_vm5, %v7503_v59  ;;  %v7312_v26 = vadd.f32 %v12080_v47, %v7244_v39  ;;  %v5951_v50 = vadd.f32 %v5881_v57, %v5390_v28  ;;  %v5325_v29 = vpop.f32.mrf.mxu1 }
 0x476   :  { %v7376_v38 = vmul.f32 0.01, %v7312_v26 }
 0x477   :  { %v4028_v23 = vpop.f32.mrf.mxu0 }
 0x478   :  { %v7440_v40 = vmax.f32 %v7312_v26, %v7376_v38  ;;  %v4097_v6 = vadd.f32 %v4028_v23, %v12331_v14 }
 0x479   :  { %v7175_v22 = vpop.f32.mrf.mxu3  ;;  %v5886_v18 = vpop.f32.mrf.mxu2 }
 0x47a   :  { %v7504_v42 = vpack.c.bf16 %v7440_v40, %v7440_v40  ;;  %v7245_v44 = vadd.f32 %v7175_v22, %v5951_v50  ;;  %v5391_v33 = vadd.f32 %v5322_v1, %v4097_v6 }
 0x47c   :  { %7569 = vst.msk [vmem:[%s12263_s3 + $0xec] sm:$0xf] %vm7509_vm5, %v7504_v42  ;;  %v7313_v63 = vadd.f32 %v12080_v47, %v7245_v44  ;;  %v5952_v5 = vadd.f32 %v5883_v17, %v5391_v33  ;;  %v5327_v27 = vpop.f32.mrf.mxu1 }
 0x47e   :  { %v7377_v41 = vmul.f32 0.01, %v7313_v63 }
 0x47f   :  { %v4031_v9 = vpop.f32.mrf.mxu0 }
 0x480   :  { %v7441_v21 = vmax.f32 %v7313_v63, %v7377_v41  ;;  %v4098_v2 = vadd.f32 %v4031_v9, %v12332_v56 }
 0x481   :  { %v7177_v31 = vpop.f32.mrf.mxu3  ;;  %v5888_v60 = vpop.f32.mrf.mxu2 }
 0x482   :  { %v7505_v32 = vpack.c.bf16 %v7441_v21, %v7441_v21  ;;  %v7246_v49 = vadd.f32 %v7177_v31, %v5952_v5  ;;  %v5392_v34 = vadd.f32 %v5325_v29, %v4098_v2 }
 0x484   :  { %7570 = vst.msk [vmem:[%s12263_s3 + $0xf0] sm:$0xf] %vm7509_vm5, %v7505_v32  ;;  %v7314_v36 = vadd.f32 %v12080_v47, %v7246_v49  ;;  %v5953_v51 = vadd.f32 %v5886_v18, %v5392_v34 }
 0x486   :  { %v7378_v8 = vmul.f32 0.01, %v7314_v36 }
 0x487   :  { %v4033_v30 = vpop.f32.mrf.mxu0 }
 0x488   :  { %v7442_v58 = vmax.f32 %v7314_v36, %v7378_v8  ;;  %v4099_v46 = vadd.f32 %v4033_v30, %v12333_v25 }
 0x489   :  { %v7180_v16 = vpop.f32.mrf.mxu3 }
 0x48a   :  { %v7506_v55 = vpack.c.bf16 %v7442_v58, %v7442_v58  ;;  %v7247_v35 = vadd.f32 %v7180_v16, %v5953_v51  ;;  %v5393_v48 = vadd.f32 %v5327_v27, %v4099_v46 }
 0x48c   :  { %7571 = vst.msk [vmem:[%s12263_s3 + $0xf4] sm:$0xf] %vm7509_vm5, %v7506_v55  ;;  %v7315_v7 = vadd.f32 %v12080_v47, %v7247_v35  ;;  %v5954_v24 = vadd.f32 %v5888_v60, %v5393_v48 }
 0x48e   :  { %v7379_v11 = vmul.f32 0.01, %v7315_v7 }
 0x490   :  { %v7443_v10 = vmax.f32 %v7315_v7, %v7379_v11 }
 0x491   :  { %v7182_v15 = vpop.f32.mrf.mxu3 }
 0x492   :  { %v7507_v3 = vpack.c.bf16 %v7443_v10, %v7443_v10  ;;  %v7248_v13 = vadd.f32 %v7182_v15, %v5954_v24 }
 0x494   :  { %7572 = vst.msk [vmem:[%s12263_s3 + $0xf8] sm:$0xf] %vm7509_vm5, %v7507_v3  ;;  %v7316_v4 = vadd.f32 %v12080_v47, %v7248_v13 }
 0x496   :  { %v7380_v0 = vmul.f32 0.01, %v7316_v4 }
 0x498   :  { %v7444_v20 = vmax.f32 %v7316_v4, %v7380_v0 }
 0x49a   :  { %v7508_v43 = vpack.c.bf16 %v7444_v20, %v7444_v20 }
 0x49c   :  { %7573 = vst.msk [vmem:[%s12263_s3 + $0xfc] sm:$0xf] %vm7509_vm5, %v7508_v43 }

</bundles_post_ra>
